<compile_context>
chip_gen: v7x
topology: tpu7x:2x2x1
jax: 0.10.0
libtpu: 0.0.40
codegen_flags: <defaults>
</compile_context>

<pallas_src>
import functools
import math

import jax
import jax.numpy as jnp
from jax.experimental import pallas as pl
from jax.experimental.pallas import tpu as pltpu

_HEAD_PAD = 128  # lane-dense padded output width for each prediction head


# ----------------------------- in-kernel helpers -----------------------------

def _dot(a, w):
    """bf16-operand matmul with f32 accumulation (weights already bf16)."""
    return jnp.dot(a.astype(jnp.bfloat16), w.astype(jnp.bfloat16),
                   preferred_element_type=jnp.float32)


def _layer_norm(x, g, b):
    """x: [S, D] f32, g/b: [1, D]. eps matches PyTorch (1e-5)."""
    mean = jnp.mean(x, axis=-1, keepdims=True)
    var = jnp.mean((x - mean) ** 2, axis=-1, keepdims=True)
    return (x - mean) * jax.lax.rsqrt(var + 1e-5) * g + b


def _mha(q, k, v, wo, bo, nheads):
    """Multi-head attention + output projection on VMEM values.

    Per-head scores / softmax / P@V, then ONE lane-concat and ONE K=D matmul
    against Wo (instead of nheads K=dh matmuls + running adds).
    q: [Sq, D], k/v: [Sk, D], wo: [D, D] bf16, bo: [1, D] f32.
    """
    Sq, D = q.shape
    dh = D // nheads
    scale = 1.0 / math.sqrt(dh)
    heads = []
    for h in range(nheads):
        sl = slice(h * dh, (h + 1) * dh)
        qh = q[:, sl].astype(jnp.bfloat16)
        kh = k[:, sl].astype(jnp.bfloat16)
        vh = v[:, sl].astype(jnp.bfloat16)
        # scores = qh @ kh^T  (contract on head dim, no explicit transpose)
        s = jax.lax.dot_general(qh, kh, (((1,), (1,)), ((), ())),
                                preferred_element_type=jnp.float32) * scale
        m = jnp.max(s, axis=-1, keepdims=True)
        p = jnp.exp(s - m)
        p = p * pl.reciprocal(jnp.sum(p, axis=-1, keepdims=True), approx=True)
        heads.append(_dot(p, vh))                    # [Sq, dh] f32
    o = jnp.concatenate(heads, axis=-1)              # [Sq, D], single lane concat
    return _dot(o, wo) + bo                          # single K=D output proj


# ----------------------------- fused DETR kernel -----------------------------

def _detr_kernel(x_ref, pos_ref, qemb_ref,
                 sw1_ref, sb1_ref, sw2_ref, sb2_ref,
                 e_wqkv_ref, e_bqkv_ref, e_wo_ref, e_bo_ref,
                 e_w1_ref, e_b1_ref, e_w2_ref, e_b2_ref, e_ln_ref,
                 sa_wqkv_ref, sa_bqkv_ref, sa_wo_ref, sa_bo_ref,
                 ca_wqkv_ref, ca_bqkv_ref, ca_wo_ref, ca_bo_ref,
                 d_w1_ref, d_b1_ref, d_w2_ref, d_b2_ref, d_ln_ref, d_fn_ref,
                 wc_ref, bc_ref, wb1_ref, bb1_ref, wb2_ref, bb2_ref,
                 wb3_ref, bb3_ref,
                 o_cls_ref, o_box_ref, *, nheads):
    """Stem + encoder stack + decoder stack + heads for one batch element."""
    # ---- stem: patchify-conv (as matmul) + ReLU + 1x1 input_proj ----
    xp = x_ref[0].astype(jnp.float32)                       # [S, C*P*P]
    h = jnp.maximum(_dot(xp, sw1_ref[...]) + sb1_ref[...], 0.0)
    x = _dot(h, sw2_ref[...]) + sb2_ref[...]                # [S, D] f32
    pos = pos_ref[...].astype(jnp.float32)                  # [S, D]
    D = x.shape[-1]

    # ---- encoder stack (post-norm DETR) ----
    for l in range(e_wqkv_ref.shape[0]):
        wqkv, bqkv, ln = e_wqkv_ref[l], e_bqkv_ref[l], e_ln_ref[l]
        # self-attention: q = k = x + pos, v = x
        qk_in = x + pos
        qk = _dot(qk_in, wqkv[:, :2 * D]) + bqkv[:, :2 * D]
        v = _dot(x, wqkv[:, 2 * D:]) + bqkv[:, 2 * D:]
        attn = _mha(qk[:, :D], qk[:, D:], v, e_wo_ref[l], e_bo_ref[l], nheads)
        x = _layer_norm(x + attn, ln[0:1], ln[1:2])
        # FFN
        ff = jnp.maximum(_dot(x, e_w1_ref[l]) + e_b1_ref[l], 0.0)
        ff = _dot(ff, e_w2_ref[l]) + e_b2_ref[l]
        x = _layer_norm(x + ff, ln[2:3], ln[3:4])
    mem = x                                                 # [S, D]

    # ---- decoder stack (+ final LayerNorm) ----
    qpos = qemb_ref[...].astype(jnp.float32)                # [Q, D]
    Qn = qpos.shape[0]
    tgt = jnp.zeros((Qn, D), jnp.float32)
    for l in range(sa_wqkv_ref.shape[0]):
        ln = d_ln_ref[l]
        # --- self-attention: q = k = tgt + qpos, v = tgt ---
        wqkv, bqkv = sa_wqkv_ref[l], sa_bqkv_ref[l]
        qk_in = tgt + qpos
        qk = _dot(qk_in, wqkv[:, :2 * D]) + bqkv[:, :2 * D]
        v = _dot(tgt, wqkv[:, 2 * D:]) + bqkv[:, 2 * D:]
        attn = _mha(qk[:, :D], qk[:, D:], v, sa_wo_ref[l], sa_bo_ref[l], nheads)
        tgt = _layer_norm(tgt + attn, ln[0:1], ln[1:2])
        # --- cross-attention: q = tgt + qpos, k = mem + pos, v = mem ---
        wqkv, bqkv = ca_wqkv_ref[l], ca_bqkv_ref[l]
        q = _dot(tgt + qpos, wqkv[:, :D]) + bqkv[:, :D]
        k = _dot(mem + pos, wqkv[:, D:2 * D]) + bqkv[:, D:2 * D]
        v = _dot(mem, wqkv[:, 2 * D:]) + bqkv[:, 2 * D:]
        attn = _mha(q, k, v, ca_wo_ref[l], ca_bo_ref[l], nheads)
        tgt = _layer_norm(tgt + attn, ln[2:3], ln[3:4])
        # --- FFN ---
        ff = jnp.maximum(_dot(tgt, d_w1_ref[l]) + d_b1_ref[l], 0.0)
        ff = _dot(ff, d_w2_ref[l]) + d_b2_ref[l]
        tgt = _layer_norm(tgt + ff, ln[4:5], ln[5:6])
    fn = d_fn_ref[...]
    hs = _layer_norm(tgt, fn[0:1], fn[1:2])                 # [Q, D]

    # ---- heads: two lane-dense [Q, 128] slabs (weights padded in wrapper) ----
    o_cls_ref[0] = (_dot(hs, wc_ref[...]) + bc_ref[...]).astype(o_cls_ref.dtype)
    b = jnp.maximum(_dot(hs, wb1_ref[...]) + bb1_ref[...], 0.0)
    b = jnp.maximum(_dot(b, wb2_ref[...]) + bb2_ref[...], 0.0)
    o_box_ref[0] = jax.nn.sigmoid(_dot(b, wb3_ref[...]) + bb3_ref[...]
                                  ).astype(o_box_ref.dtype)


# ----------------------------- pallas_call wrapper -----------------------------

def _shared_spec(a):
    """Whole array resident in VMEM, same block every grid step (weights)."""
    nd = a.ndim
    return pl.BlockSpec(tuple(a.shape), lambda b, _n=nd: (0,) * _n)


def detr_pallas_forward(params, x_patches, pos, cfg):
    """x_patches: [B, S, C*P*P] patchified images; pos: [S, D] sine embedding."""
    B, S, Cpp = x_patches.shape
    D, Q, NC = cfg["d_model"], cfg["num_queries"], cfg["num_classes"]
    p = params
    out_pad = p["heads"]["wc"].shape[1]

    weights = [
        p["stem"]["w1"], p["stem"]["b1"], p["stem"]["w2"], p["stem"]["b2"],
        p["enc"]["wqkv"], p["enc"]["bqkv"], p["enc"]["wo"], p["enc"]["bo"],
        p["enc"]["w1"], p["enc"]["b1"], p["enc"]["w2"], p["enc"]["b2"],
        p["enc"]["ln"],
        p["dec"]["sa_wqkv"], p["dec"]["sa_bqkv"], p["dec"]["sa_wo"], p["dec"]["sa_bo"],
        p["dec"]["ca_wqkv"], p["dec"]["ca_bqkv"], p["dec"]["ca_wo"], p["dec"]["ca_bo"],
        p["dec"]["w1"], p["dec"]["b1"], p["dec"]["w2"], p["dec"]["b2"],
        p["dec"]["ln"], p["dec_norm"],
        p["heads"]["wc"], p["heads"]["bc"],
        p["heads"]["wb1"], p["heads"]["bb1"],
        p["heads"]["wb2"], p["heads"]["bb2"],
        p["heads"]["wb3"], p["heads"]["bb3"],
    ]

    in_specs = ([pl.BlockSpec((1, S, Cpp), lambda b: (b, 0, 0)),
                 _shared_spec(pos), _shared_spec(p["query_embed"])]
                + [_shared_spec(w) for w in weights])

    out_cls, out_box = pl.pallas_call(
        functools.partial(_detr_kernel, nheads=cfg["nheads"]),
        out_shape=(jax.ShapeDtypeStruct((B, Q, out_pad), jnp.float32),
                   jax.ShapeDtypeStruct((B, Q, out_pad), jnp.float32)),
        grid=(B,),
        in_specs=in_specs,
        out_specs=(pl.BlockSpec((1, Q, out_pad), lambda b: (b, 0, 0)),
                   pl.BlockSpec((1, Q, out_pad), lambda b: (b, 0, 0))),
        compiler_params=pltpu.CompilerParams(
            dimension_semantics=("parallel",)),
    )(x_patches, pos, p["query_embed"], *weights)

    return out_cls[..., :NC], out_box[..., :4]


# ----------------------------- model glue (plain JAX, under jit) -----------------------------

def sine_pos_embed(H, W, D):
    """DETR PositionEmbeddingSine (normalize=True), returns [H*W, D]."""
    npf = D // 2
    temperature = 10000.0
    scale = 2.0 * math.pi
    eps = 1e-6
    y_embed = jnp.broadcast_to(jnp.arange(1, H + 1, dtype=jnp.float32)[:, None], (H, W))
    x_embed = jnp.broadcast_to(jnp.arange(1, W + 1, dtype=jnp.float32)[None, :], (H, W))
    y_embed = y_embed / (H + eps) * scale
    x_embed = x_embed / (W + eps) * scale
    dim_t = jnp.arange(npf, dtype=jnp.float32)
    dim_t = temperature ** (2.0 * jnp.floor(dim_t / 2.0) / npf)
    pos_x = x_embed[..., None] / dim_t
    pos_y = y_embed[..., None] / dim_t
    pos_x = jnp.stack([jnp.sin(pos_x[..., 0::2]), jnp.cos(pos_x[..., 1::2])],
                      axis=-1).reshape(H, W, npf)
    pos_y = jnp.stack([jnp.sin(pos_y[..., 0::2]), jnp.cos(pos_y[..., 1::2])],
                      axis=-1).reshape(H, W, npf)
    return jnp.concatenate([pos_y, pos_x], axis=-1).reshape(H * W, D)


def detr_forward(params, images, cfg):
    B, C, H, W = images.shape
    P = cfg["patch"]
    Hp, Wp = H // P, W // P
    S = Hp * Wp
    D, NC = cfg["d_model"], cfg["num_classes"]

    # TODO(synk): pretrained ResNet-50 backbone (torch.hub) has no compact Pallas
    # equivalent; replaced by a single 8x8/stride-8 patchify conv stem (im2col + matmul).
    x = images.reshape(B, C, Hp, P, Wp, P).transpose(0, 2, 4, 1, 3, 5)
    x = x.reshape(B, S, C * P * P)

    pos = sine_pos_embed(Hp, Wp, D)                           # [S, D]

    logits, boxes = detr_pallas_forward(params, x, pos, cfg)  # one kernel launch
    return {"pred_logits": logits, "pred_boxes": boxes}


# ----------------------------- parameters -----------------------------

def _w(key, shape, dtype=jnp.bfloat16):
    """Matmul weights stored in bf16 (cast once, not per use in the kernel)."""
    return (jax.random.normal(key, shape, jnp.float32) * 0.02).astype(dtype)


def init_params(key, cfg):
    D, Dff = cfg["d_model"], cfg["dim_ff"]
    Le, Ld = cfg["enc_layers"], cfg["dec_layers"]
    NC, Q = cfg["num_classes"], cfg["num_queries"]
    patch_dim = 3 * cfg["patch"] ** 2
    BC = cfg["backbone_ch"]
    ks = iter(jax.random.split(key, 32))
    zeros = lambda s: jnp.zeros(s, jnp.float32)

    def pad_cols(a, width):
        return jnp.pad(a, ((0, 0), (0, width - a.shape[-1])))

    enc_ln = jnp.tile(jnp.stack([jnp.ones(D), jnp.zeros(D)] * 2)[None], (Le, 1, 1))
    dec_ln = jnp.tile(jnp.stack([jnp.ones(D), jnp.zeros(D)] * 3)[None], (Ld, 1, 1))

    return {
        "stem": {"w1": _w(next(ks), (patch_dim, BC)), "b1": zeros((1, BC)),
                 "w2": _w(next(ks), (BC, D)), "b2": zeros((1, D))},
        "query_embed": _w(next(ks), (Q, D), jnp.float32),
        "enc": {
            "wqkv": _w(next(ks), (Le, D, 3 * D)), "bqkv": zeros((Le, 1, 3 * D)),
            "wo": _w(next(ks), (Le, D, D)), "bo": zeros((Le, 1, D)),
            "w1": _w(next(ks), (Le, D, Dff)), "b1": zeros((Le, 1, Dff)),
            "w2": _w(next(ks), (Le, Dff, D)), "b2": zeros((Le, 1, D)),
            "ln": enc_ln,
        },
        "dec": {
            "sa_wqkv": _w(next(ks), (Ld, D, 3 * D)), "sa_bqkv": zeros((Ld, 1, 3 * D)),
            "sa_wo": _w(next(ks), (Ld, D, D)), "sa_bo": zeros((Ld, 1, D)),
            "ca_wqkv": _w(next(ks), (Ld, D, 3 * D)), "ca_bqkv": zeros((Ld, 1, 3 * D)),
            "ca_wo": _w(next(ks), (Ld, D, D)), "ca_bo": zeros((Ld, 1, D)),
            "w1": _w(next(ks), (Ld, D, Dff)), "b1": zeros((Ld, 1, Dff)),
            "w2": _w(next(ks), (Ld, Dff, D)), "b2": zeros((Ld, 1, D)),
            "ln": dec_ln,
        },
        "dec_norm": jnp.stack([jnp.ones(D), jnp.zeros(D)]),
        # Head weights padded to 128 output lanes (lane-dense, unmasked stores);
        # the wrapper slices the first NC / 4 columns of the kernel outputs.
        "heads": {
            "wc": pad_cols(_w(next(ks), (D, NC), jnp.float32), _HEAD_PAD
                           ).astype(jnp.bfloat16),
            "bc": zeros((1, _HEAD_PAD)),
            "wb1": _w(next(ks), (D, D)), "bb1": zeros((1, D)),
            "wb2": _w(next(ks), (D, D)), "bb2": zeros((1, D)),
            "wb3": pad_cols(_w(next(ks), (D, 4), jnp.float32), _HEAD_PAD
                            ).astype(jnp.bfloat16),
            "bb3": zeros((1, _HEAD_PAD)),
        },
    }


# ----------------------------- main -----------------------------

if __name__ == "__main__":
    cfg = dict(
        num_classes=4,
        num_queries=8,
        d_model=32,
        nheads=4,
        dim_ff=64,
        enc_layers=2,
        dec_layers=2,
        patch=8,
        backbone_ch=64,
    )
    key = jax.random.PRNGKey(0)
    k_param, k_img = jax.random.split(key)
    params = init_params(k_param, cfg)
    images = jax.random.normal(k_img, (2, 3, 32, 32), jnp.float32)  # NCHW, like PyTorch

    forward = jax.jit(functools.partial(detr_forward, cfg=cfg))
    out = forward(params, images)
    jax.block_until_ready(out["pred_logits"])
    jax.block_until_ready(out["pred_boxes"])

    assert out["pred_logits"].shape == (2, cfg["num_queries"], cfg["num_classes"])
    assert out["pred_boxes"].shape == (2, cfg["num_queries"], 4)
    print("KERNEL_OK")
</pallas_src>

<mosaic_0001>
module attributes {stable_mosaic.version = 11 : i64} {
  func.func @_detr_kernel(%arg0: i32, %arg1: memref<1x16x192xf32, #tpu.memory_space<vmem>>, %arg2: memref<16x32xf32, #tpu.memory_space<vmem>>, %arg3: memref<8x32xf32, #tpu.memory_space<vmem>>, %arg4: memref<192x64xbf16, #tpu.memory_space<vmem>>, %arg5: memref<1x64xf32, #tpu.memory_space<vmem>>, %arg6: memref<64x32xbf16, #tpu.memory_space<vmem>>, %arg7: memref<1x32xf32, #tpu.memory_space<vmem>>, %arg8: memref<2x32x96xbf16, #tpu.memory_space<vmem>>, %arg9: memref<2x1x96xf32, #tpu.memory_space<vmem>>, %arg10: memref<2x32x32xbf16, #tpu.memory_space<vmem>>, %arg11: memref<2x1x32xf32, #tpu.memory_space<vmem>>, %arg12: memref<2x32x64xbf16, #tpu.memory_space<vmem>>, %arg13: memref<2x1x64xf32, #tpu.memory_space<vmem>>, %arg14: memref<2x64x32xbf16, #tpu.memory_space<vmem>>, %arg15: memref<2x1x32xf32, #tpu.memory_space<vmem>>, %arg16: memref<2x4x32xf32, #tpu.memory_space<vmem>>, %arg17: memref<2x32x96xbf16, #tpu.memory_space<vmem>>, %arg18: memref<2x1x96xf32, #tpu.memory_space<vmem>>, %arg19: memref<2x32x32xbf16, #tpu.memory_space<vmem>>, %arg20: memref<2x1x32xf32, #tpu.memory_space<vmem>>, %arg21: memref<2x32x96xbf16, #tpu.memory_space<vmem>>, %arg22: memref<2x1x96xf32, #tpu.memory_space<vmem>>, %arg23: memref<2x32x32xbf16, #tpu.memory_space<vmem>>, %arg24: memref<2x1x32xf32, #tpu.memory_space<vmem>>, %arg25: memref<2x32x64xbf16, #tpu.memory_space<vmem>>, %arg26: memref<2x1x64xf32, #tpu.memory_space<vmem>>, %arg27: memref<2x64x32xbf16, #tpu.memory_space<vmem>>, %arg28: memref<2x1x32xf32, #tpu.memory_space<vmem>>, %arg29: memref<2x6x32xf32, #tpu.memory_space<vmem>>, %arg30: memref<2x32xf32, #tpu.memory_space<vmem>>, %arg31: memref<32x128xbf16, #tpu.memory_space<vmem>>, %arg32: memref<1x128xf32, #tpu.memory_space<vmem>>, %arg33: memref<32x32xbf16, #tpu.memory_space<vmem>>, %arg34: memref<1x32xf32, #tpu.memory_space<vmem>>, %arg35: memref<32x32xbf16, #tpu.memory_space<vmem>>, %arg36: memref<1x32xf32, #tpu.memory_space<vmem>>, %arg37: memref<32x128xbf16, #tpu.memory_space<vmem>>, %arg38: memref<1x128xf32, #tpu.memory_space<vmem>>, %arg39: memref<1x8x128xf32, #tpu.memory_space<vmem>>, %arg40: memref<1x8x128xf32, #tpu.memory_space<vmem>>) attributes {dimension_semantics = [#tpu.dimension_semantics<parallel>], iteration_bounds = array<i64: 2>, scalar_prefetch = 0 : i64, scratch_operands = 0 : i64, tpu.core_type = #tpu.core_type<tc>, window_params = [{transform_indices = @transform_0, window_bounds = array<i64: 1, 16, 192>}, {pipeline_mode = #tpu.pipeline_mode<synchronous>, transform_indices = @transform_1, window_bounds = array<i64: 16, 32>}, {pipeline_mode = #tpu.pipeline_mode<synchronous>, transform_indices = @transform_2, window_bounds = array<i64: 8, 32>}, {pipeline_mode = #tpu.pipeline_mode<synchronous>, transform_indices = @transform_3, window_bounds = array<i64: 192, 64>}, {pipeline_mode = #tpu.pipeline_mode<synchronous>, transform_indices = @transform_4, window_bounds = array<i64: 1, 64>}, {pipeline_mode = #tpu.pipeline_mode<synchronous>, transform_indices = @transform_5, window_bounds = array<i64: 64, 32>}, {pipeline_mode = #tpu.pipeline_mode<synchronous>, transform_indices = @transform_6, window_bounds = array<i64: 1, 32>}, {pipeline_mode = #tpu.pipeline_mode<synchronous>, transform_indices = @transform_7, window_bounds = array<i64: 2, 32, 96>}, {pipeline_mode = #tpu.pipeline_mode<synchronous>, transform_indices = @transform_8, window_bounds = array<i64: 2, 1, 96>}, {pipeline_mode = #tpu.pipeline_mode<synchronous>, transform_indices = @transform_9, window_bounds = array<i64: 2, 32, 32>}, {pipeline_mode = #tpu.pipeline_mode<synchronous>, transform_indices = @transform_10, window_bounds = array<i64: 2, 1, 32>}, {pipeline_mode = #tpu.pipeline_mode<synchronous>, transform_indices = @transform_11, window_bounds = array<i64: 2, 32, 64>}, {pipeline_mode = #tpu.pipeline_mode<synchronous>, transform_indices = @transform_12, window_bounds = array<i64: 2, 1, 64>}, {pipeline_mode = #tpu.pipeline_mode<synchronous>, transform_indices = @transform_13, window_bounds = array<i64: 2, 64, 32>}, {pipeline_mode = #tpu.pipeline_mode<synchronous>, transform_indices = @transform_14, window_bounds = array<i64: 2, 1, 32>}, {pipeline_mode = #tpu.pipeline_mode<synchronous>, transform_indices = @transform_15, window_bounds = array<i64: 2, 4, 32>}, {pipeline_mode = #tpu.pipeline_mode<synchronous>, transform_indices = @transform_16, window_bounds = array<i64: 2, 32, 96>}, {pipeline_mode = #tpu.pipeline_mode<synchronous>, transform_indices = @transform_17, window_bounds = array<i64: 2, 1, 96>}, {pipeline_mode = #tpu.pipeline_mode<synchronous>, transform_indices = @transform_18, window_bounds = array<i64: 2, 32, 32>}, {pipeline_mode = #tpu.pipeline_mode<synchronous>, transform_indices = @transform_19, window_bounds = array<i64: 2, 1, 32>}, {pipeline_mode = #tpu.pipeline_mode<synchronous>, transform_indices = @transform_20, window_bounds = array<i64: 2, 32, 96>}, {pipeline_mode = #tpu.pipeline_mode<synchronous>, transform_indices = @transform_21, window_bounds = array<i64: 2, 1, 96>}, {pipeline_mode = #tpu.pipeline_mode<synchronous>, transform_indices = @transform_22, window_bounds = array<i64: 2, 32, 32>}, {pipeline_mode = #tpu.pipeline_mode<synchronous>, transform_indices = @transform_23, window_bounds = array<i64: 2, 1, 32>}, {pipeline_mode = #tpu.pipeline_mode<synchronous>, transform_indices = @transform_24, window_bounds = array<i64: 2, 32, 64>}, {pipeline_mode = #tpu.pipeline_mode<synchronous>, transform_indices = @transform_25, window_bounds = array<i64: 2, 1, 64>}, {pipeline_mode = #tpu.pipeline_mode<synchronous>, transform_indices = @transform_26, window_bounds = array<i64: 2, 64, 32>}, {pipeline_mode = #tpu.pipeline_mode<synchronous>, transform_indices = @transform_27, window_bounds = array<i64: 2, 1, 32>}, {pipeline_mode = #tpu.pipeline_mode<synchronous>, transform_indices = @transform_28, window_bounds = array<i64: 2, 6, 32>}, {pipeline_mode = #tpu.pipeline_mode<synchronous>, transform_indices = @transform_29, window_bounds = array<i64: 2, 32>}, {pipeline_mode = #tpu.pipeline_mode<synchronous>, transform_indices = @transform_30, window_bounds = array<i64: 32, 128>}, {pipeline_mode = #tpu.pipeline_mode<synchronous>, transform_indices = @transform_31, window_bounds = array<i64: 1, 128>}, {pipeline_mode = #tpu.pipeline_mode<synchronous>, transform_indices = @transform_32, window_bounds = array<i64: 32, 32>}, {pipeline_mode = #tpu.pipeline_mode<synchronous>, transform_indices = @transform_33, window_bounds = array<i64: 1, 32>}, {pipeline_mode = #tpu.pipeline_mode<synchronous>, transform_indices = @transform_34, window_bounds = array<i64: 32, 32>}, {pipeline_mode = #tpu.pipeline_mode<synchronous>, transform_indices = @transform_35, window_bounds = array<i64: 1, 32>}, {pipeline_mode = #tpu.pipeline_mode<synchronous>, transform_indices = @transform_36, window_bounds = array<i64: 32, 128>}, {pipeline_mode = #tpu.pipeline_mode<synchronous>, transform_indices = @transform_37, window_bounds = array<i64: 1, 128>}, {transform_indices = @transform_38, window_bounds = array<i64: 1, 8, 128>}, {transform_indices = @transform_39, window_bounds = array<i64: 1, 8, 128>}]} {
    %c0 = arith.constant 0 : index
    %c0_0 = arith.constant 0 : index
    %c0_1 = arith.constant 0 : index
    %0 = vector.load %arg1[%c0, %c0_0, %c0_1] : memref<1x16x192xf32, #tpu.memory_space<vmem>>, vector<1x16x192xf32>
    %1 = vector.shape_cast %0 : vector<1x16x192xf32> to vector<16x192xf32>
    %c0_2 = arith.constant 0 : index
    %c0_3 = arith.constant 0 : index
    %2 = vector.load %arg4[%c0_2, %c0_3] : memref<192x64xbf16, #tpu.memory_space<vmem>>, vector<192x64xbf16>
    %3 = arith.truncf %1 : vector<16x192xf32> to vector<16x192xbf16>
    %cst = arith.constant dense<0.000000e+00> : vector<16x64xf32>
    %4 = tpu.matmul %3, %2, %cst {dimension_numbers = #tpu.dot_dimension_numbers<[1], [0], [0], [1], [0, 0, 1, 1], [], []>} : vector<16x192xbf16>, vector<192x64xbf16>, vector<16x64xf32> -> vector<16x64xf32>
    %c0_4 = arith.constant 0 : index
    %c0_5 = arith.constant 0 : index
    %5 = vector.load %arg5[%c0_4, %c0_5] : memref<1x64xf32, #tpu.memory_space<vmem>>, vector<1x64xf32>
    %6 = vector.broadcast %5 : vector<1x64xf32> to vector<16x64xf32>
    %7 = arith.addf %4, %6 : vector<16x64xf32>
    %cst_6 = arith.constant 0.000000e+00 : f32
    %8 = vector.broadcast %cst_6 : f32 to vector<16x64xf32>
    %9 = arith.maximumf %7, %8 : vector<16x64xf32>
    %c0_7 = arith.constant 0 : index
    %c0_8 = arith.constant 0 : index
    %10 = vector.load %arg6[%c0_7, %c0_8] : memref<64x32xbf16, #tpu.memory_space<vmem>>, vector<64x32xbf16>
    %11 = arith.truncf %9 : vector<16x64xf32> to vector<16x64xbf16>
    %cst_9 = arith.constant dense<0.000000e+00> : vector<16x32xf32>
    %12 = tpu.matmul %11, %10, %cst_9 {dimension_numbers = #tpu.dot_dimension_numbers<[1], [0], [0], [1], [0, 0, 1, 1], [], []>} : vector<16x64xbf16>, vector<64x32xbf16>, vector<16x32xf32> -> vector<16x32xf32>
    %c0_10 = arith.constant 0 : index
    %c0_11 = arith.constant 0 : index
    %13 = vector.load %arg7[%c0_10, %c0_11] : memref<1x32xf32, #tpu.memory_space<vmem>>, vector<1x32xf32>
    %14 = vector.broadcast %13 : vector<1x32xf32> to vector<16x32xf32>
    %15 = arith.addf %12, %14 : vector<16x32xf32>
    %c0_12 = arith.constant 0 : index
    %c0_13 = arith.constant 0 : index
    %16 = vector.load %arg2[%c0_12, %c0_13] : memref<16x32xf32, #tpu.memory_space<vmem>>, vector<16x32xf32>
    %c0_14 = arith.constant 0 : index
    %c0_15 = arith.constant 0 : index
    %c0_16 = arith.constant 0 : index
    %17 = vector.load %arg8[%c0_14, %c0_15, %c0_16] : memref<2x32x96xbf16, #tpu.memory_space<vmem>>, vector<1x32x96xbf16>
    %18 = vector.shape_cast %17 : vector<1x32x96xbf16> to vector<32x96xbf16>
    %c0_17 = arith.constant 0 : index
    %c0_18 = arith.constant 0 : index
    %c0_19 = arith.constant 0 : index
    %19 = vector.load %arg9[%c0_17, %c0_18, %c0_19] : memref<2x1x96xf32, #tpu.memory_space<vmem>>, vector<1x1x96xf32>
    %20 = vector.shape_cast %19 : vector<1x1x96xf32> to vector<1x96xf32>
    %c0_20 = arith.constant 0 : index
    %c0_21 = arith.constant 0 : index
    %c0_22 = arith.constant 0 : index
    %21 = vector.load %arg16[%c0_20, %c0_21, %c0_22] : memref<2x4x32xf32, #tpu.memory_space<vmem>>, vector<1x4x32xf32>
    %22 = vector.shape_cast %21 : vector<1x4x32xf32> to vector<4x32xf32>
    %23 = arith.addf %15, %16 : vector<16x32xf32>
    %24 = vector.extract_strided_slice %18 {offsets = [0, 0], sizes = [32, 64], strides = [1, 1]} : vector<32x96xbf16> to vector<32x64xbf16>
    %25 = arith.truncf %23 : vector<16x32xf32> to vector<16x32xbf16>
    %cst_23 = arith.constant dense<0.000000e+00> : vector<16x64xf32>
    %26 = tpu.matmul %25, %24, %cst_23 {dimension_numbers = #tpu.dot_dimension_numbers<[1], [0], [0], [1], [0, 0, 1, 1], [], []>} : vector<16x32xbf16>, vector<32x64xbf16>, vector<16x64xf32> -> vector<16x64xf32>
    %27 = vector.extract_strided_slice %20 {offsets = [0, 0], sizes = [1, 64], strides = [1, 1]} : vector<1x96xf32> to vector<1x64xf32>
    %28 = vector.broadcast %27 : vector<1x64xf32> to vector<16x64xf32>
    %29 = arith.addf %26, %28 : vector<16x64xf32>
    %30 = vector.extract_strided_slice %18 {offsets = [0, 64], sizes = [32, 32], strides = [1, 1]} : vector<32x96xbf16> to vector<32x32xbf16>
    %31 = arith.truncf %15 : vector<16x32xf32> to vector<16x32xbf16>
    %cst_24 = arith.constant dense<0.000000e+00> : vector<16x32xf32>
    %32 = tpu.matmul %31, %30, %cst_24 {dimension_numbers = #tpu.dot_dimension_numbers<[1], [0], [0], [1], [0, 0, 1, 1], [], []>} : vector<16x32xbf16>, vector<32x32xbf16>, vector<16x32xf32> -> vector<16x32xf32>
    %33 = vector.extract_strided_slice %20 {offsets = [0, 64], sizes = [1, 32], strides = [1, 1]} : vector<1x96xf32> to vector<1x32xf32>
    %34 = vector.broadcast %33 : vector<1x32xf32> to vector<16x32xf32>
    %35 = arith.addf %32, %34 : vector<16x32xf32>
    %36 = vector.extract_strided_slice %29 {offsets = [0, 0], sizes = [16, 32], strides = [1, 1]} : vector<16x64xf32> to vector<16x32xf32>
    %37 = vector.extract_strided_slice %29 {offsets = [0, 32], sizes = [16, 32], strides = [1, 1]} : vector<16x64xf32> to vector<16x32xf32>
    %c0_25 = arith.constant 0 : index
    %c0_26 = arith.constant 0 : index
    %c0_27 = arith.constant 0 : index
    %38 = vector.load %arg10[%c0_25, %c0_26, %c0_27] : memref<2x32x32xbf16, #tpu.memory_space<vmem>>, vector<1x32x32xbf16>
    %39 = vector.shape_cast %38 : vector<1x32x32xbf16> to vector<32x32xbf16>
    %c0_28 = arith.constant 0 : index
    %c0_29 = arith.constant 0 : index
    %c0_30 = arith.constant 0 : index
    %40 = vector.load %arg11[%c0_28, %c0_29, %c0_30] : memref<2x1x32xf32, #tpu.memory_space<vmem>>, vector<1x1x32xf32>
    %41 = vector.shape_cast %40 : vector<1x1x32xf32> to vector<1x32xf32>
    %42 = vector.extract_strided_slice %36 {offsets = [0, 0], sizes = [16, 8], strides = [1, 1]} : vector<16x32xf32> to vector<16x8xf32>
    %43 = arith.truncf %42 : vector<16x8xf32> to vector<16x8xbf16>
    %44 = vector.extract_strided_slice %37 {offsets = [0, 0], sizes = [16, 8], strides = [1, 1]} : vector<16x32xf32> to vector<16x8xf32>
    %45 = arith.truncf %44 : vector<16x8xf32> to vector<16x8xbf16>
    %46 = vector.extract_strided_slice %35 {offsets = [0, 0], sizes = [16, 8], strides = [1, 1]} : vector<16x32xf32> to vector<16x8xf32>
    %47 = arith.truncf %46 : vector<16x8xf32> to vector<16x8xbf16>
    %cst_31 = arith.constant dense<0.000000e+00> : vector<16x16xf32>
    %48 = tpu.matmul %43, %45, %cst_31 {dimension_numbers = #tpu.dot_dimension_numbers<[1], [1], [0], [0], [0, 0, 1, 0], [], []>} : vector<16x8xbf16>, vector<16x8xbf16>, vector<16x16xf32> -> vector<16x16xf32>
    %cst_32 = arith.constant 0.353553385 : f32
    %49 = vector.broadcast %cst_32 : f32 to vector<16x16xf32>
    %50 = arith.mulf %48, %49 : vector<16x16xf32>
    %cst_33 = arith.constant dense<0xFF800000> : vector<16xf32>
    %51 = vector.multi_reduction <maximumf>, %50, %cst_33 [1] : vector<16x16xf32> to vector<16xf32>
    %52 = vector.shape_cast %51 : vector<16xf32> to vector<16x1xf32>
    %53 = vector.broadcast %52 : vector<16x1xf32> to vector<16x16xf32>
    %54 = arith.subf %50, %53 : vector<16x16xf32>
    %55 = math.exp %54 : vector<16x16xf32>
    %cst_34 = arith.constant dense<0.000000e+00> : vector<16xf32>
    %56 = vector.multi_reduction <add>, %55, %cst_34 [1] : vector<16x16xf32> to vector<16xf32>
    %57 = vector.shape_cast %56 : vector<16xf32> to vector<16x1xf32>
    %58 = tpu.reciprocal %57 {approx = true} : vector<16x1xf32> -> vector<16x1xf32>
    %59 = vector.broadcast %58 : vector<16x1xf32> to vector<16x16xf32>
    %60 = arith.mulf %55, %59 : vector<16x16xf32>
    %61 = arith.truncf %60 : vector<16x16xf32> to vector<16x16xbf16>
    %cst_35 = arith.constant dense<0.000000e+00> : vector<16x8xf32>
    %62 = tpu.matmul %61, %47, %cst_35 {dimension_numbers = #tpu.dot_dimension_numbers<[1], [0], [0], [1], [0, 0, 1, 1], [], []>} : vector<16x16xbf16>, vector<16x8xbf16>, vector<16x8xf32> -> vector<16x8xf32>
    %63 = vector.extract_strided_slice %36 {offsets = [0, 8], sizes = [16, 8], strides = [1, 1]} : vector<16x32xf32> to vector<16x8xf32>
    %64 = arith.truncf %63 : vector<16x8xf32> to vector<16x8xbf16>
    %65 = vector.extract_strided_slice %37 {offsets = [0, 8], sizes = [16, 8], strides = [1, 1]} : vector<16x32xf32> to vector<16x8xf32>
    %66 = arith.truncf %65 : vector<16x8xf32> to vector<16x8xbf16>
    %67 = vector.extract_strided_slice %35 {offsets = [0, 8], sizes = [16, 8], strides = [1, 1]} : vector<16x32xf32> to vector<16x8xf32>
    %68 = arith.truncf %67 : vector<16x8xf32> to vector<16x8xbf16>
    %cst_36 = arith.constant dense<0.000000e+00> : vector<16x16xf32>
    %69 = tpu.matmul %64, %66, %cst_36 {dimension_numbers = #tpu.dot_dimension_numbers<[1], [1], [0], [0], [0, 0, 1, 0], [], []>} : vector<16x8xbf16>, vector<16x8xbf16>, vector<16x16xf32> -> vector<16x16xf32>
    %cst_37 = arith.constant 0.353553385 : f32
    %70 = vector.broadcast %cst_37 : f32 to vector<16x16xf32>
    %71 = arith.mulf %69, %70 : vector<16x16xf32>
    %cst_38 = arith.constant dense<0xFF800000> : vector<16xf32>
    %72 = vector.multi_reduction <maximumf>, %71, %cst_38 [1] : vector<16x16xf32> to vector<16xf32>
    %73 = vector.shape_cast %72 : vector<16xf32> to vector<16x1xf32>
    %74 = vector.broadcast %73 : vector<16x1xf32> to vector<16x16xf32>
    %75 = arith.subf %71, %74 : vector<16x16xf32>
    %76 = math.exp %75 : vector<16x16xf32>
    %cst_39 = arith.constant dense<0.000000e+00> : vector<16xf32>
    %77 = vector.multi_reduction <add>, %76, %cst_39 [1] : vector<16x16xf32> to vector<16xf32>
    %78 = vector.shape_cast %77 : vector<16xf32> to vector<16x1xf32>
    %79 = tpu.reciprocal %78 {approx = true} : vector<16x1xf32> -> vector<16x1xf32>
    %80 = vector.broadcast %79 : vector<16x1xf32> to vector<16x16xf32>
    %81 = arith.mulf %76, %80 : vector<16x16xf32>
    %82 = arith.truncf %81 : vector<16x16xf32> to vector<16x16xbf16>
    %cst_40 = arith.constant dense<0.000000e+00> : vector<16x8xf32>
    %83 = tpu.matmul %82, %68, %cst_40 {dimension_numbers = #tpu.dot_dimension_numbers<[1], [0], [0], [1], [0, 0, 1, 1], [], []>} : vector<16x16xbf16>, vector<16x8xbf16>, vector<16x8xf32> -> vector<16x8xf32>
    %84 = vector.extract_strided_slice %36 {offsets = [0, 16], sizes = [16, 8], strides = [1, 1]} : vector<16x32xf32> to vector<16x8xf32>
    %85 = arith.truncf %84 : vector<16x8xf32> to vector<16x8xbf16>
    %86 = vector.extract_strided_slice %37 {offsets = [0, 16], sizes = [16, 8], strides = [1, 1]} : vector<16x32xf32> to vector<16x8xf32>
    %87 = arith.truncf %86 : vector<16x8xf32> to vector<16x8xbf16>
    %88 = vector.extract_strided_slice %35 {offsets = [0, 16], sizes = [16, 8], strides = [1, 1]} : vector<16x32xf32> to vector<16x8xf32>
    %89 = arith.truncf %88 : vector<16x8xf32> to vector<16x8xbf16>
    %cst_41 = arith.constant dense<0.000000e+00> : vector<16x16xf32>
    %90 = tpu.matmul %85, %87, %cst_41 {dimension_numbers = #tpu.dot_dimension_numbers<[1], [1], [0], [0], [0, 0, 1, 0], [], []>} : vector<16x8xbf16>, vector<16x8xbf16>, vector<16x16xf32> -> vector<16x16xf32>
    %cst_42 = arith.constant 0.353553385 : f32
    %91 = vector.broadcast %cst_42 : f32 to vector<16x16xf32>
    %92 = arith.mulf %90, %91 : vector<16x16xf32>
    %cst_43 = arith.constant dense<0xFF800000> : vector<16xf32>
    %93 = vector.multi_reduction <maximumf>, %92, %cst_43 [1] : vector<16x16xf32> to vector<16xf32>
    %94 = vector.shape_cast %93 : vector<16xf32> to vector<16x1xf32>
    %95 = vector.broadcast %94 : vector<16x1xf32> to vector<16x16xf32>
    %96 = arith.subf %92, %95 : vector<16x16xf32>
    %97 = math.exp %96 : vector<16x16xf32>
    %cst_44 = arith.constant dense<0.000000e+00> : vector<16xf32>
    %98 = vector.multi_reduction <add>, %97, %cst_44 [1] : vector<16x16xf32> to vector<16xf32>
    %99 = vector.shape_cast %98 : vector<16xf32> to vector<16x1xf32>
    %100 = tpu.reciprocal %99 {approx = true} : vector<16x1xf32> -> vector<16x1xf32>
    %101 = vector.broadcast %100 : vector<16x1xf32> to vector<16x16xf32>
    %102 = arith.mulf %97, %101 : vector<16x16xf32>
    %103 = arith.truncf %102 : vector<16x16xf32> to vector<16x16xbf16>
    %cst_45 = arith.constant dense<0.000000e+00> : vector<16x8xf32>
    %104 = tpu.matmul %103, %89, %cst_45 {dimension_numbers = #tpu.dot_dimension_numbers<[1], [0], [0], [1], [0, 0, 1, 1], [], []>} : vector<16x16xbf16>, vector<16x8xbf16>, vector<16x8xf32> -> vector<16x8xf32>
    %105 = vector.extract_strided_slice %36 {offsets = [0, 24], sizes = [16, 8], strides = [1, 1]} : vector<16x32xf32> to vector<16x8xf32>
    %106 = arith.truncf %105 : vector<16x8xf32> to vector<16x8xbf16>
    %107 = vector.extract_strided_slice %37 {offsets = [0, 24], sizes = [16, 8], strides = [1, 1]} : vector<16x32xf32> to vector<16x8xf32>
    %108 = arith.truncf %107 : vector<16x8xf32> to vector<16x8xbf16>
    %109 = vector.extract_strided_slice %35 {offsets = [0, 24], sizes = [16, 8], strides = [1, 1]} : vector<16x32xf32> to vector<16x8xf32>
    %110 = arith.truncf %109 : vector<16x8xf32> to vector<16x8xbf16>
    %cst_46 = arith.constant dense<0.000000e+00> : vector<16x16xf32>
    %111 = tpu.matmul %106, %108, %cst_46 {dimension_numbers = #tpu.dot_dimension_numbers<[1], [1], [0], [0], [0, 0, 1, 0], [], []>} : vector<16x8xbf16>, vector<16x8xbf16>, vector<16x16xf32> -> vector<16x16xf32>
    %cst_47 = arith.constant 0.353553385 : f32
    %112 = vector.broadcast %cst_47 : f32 to vector<16x16xf32>
    %113 = arith.mulf %111, %112 : vector<16x16xf32>
    %cst_48 = arith.constant dense<0xFF800000> : vector<16xf32>
    %114 = vector.multi_reduction <maximumf>, %113, %cst_48 [1] : vector<16x16xf32> to vector<16xf32>
    %115 = vector.shape_cast %114 : vector<16xf32> to vector<16x1xf32>
    %116 = vector.broadcast %115 : vector<16x1xf32> to vector<16x16xf32>
    %117 = arith.subf %113, %116 : vector<16x16xf32>
    %118 = math.exp %117 : vector<16x16xf32>
    %cst_49 = arith.constant dense<0.000000e+00> : vector<16xf32>
    %119 = vector.multi_reduction <add>, %118, %cst_49 [1] : vector<16x16xf32> to vector<16xf32>
    %120 = vector.shape_cast %119 : vector<16xf32> to vector<16x1xf32>
    %121 = tpu.reciprocal %120 {approx = true} : vector<16x1xf32> -> vector<16x1xf32>
    %122 = vector.broadcast %121 : vector<16x1xf32> to vector<16x16xf32>
    %123 = arith.mulf %118, %122 : vector<16x16xf32>
    %124 = arith.truncf %123 : vector<16x16xf32> to vector<16x16xbf16>
    %cst_50 = arith.constant dense<0.000000e+00> : vector<16x8xf32>
    %125 = tpu.matmul %124, %110, %cst_50 {dimension_numbers = #tpu.dot_dimension_numbers<[1], [0], [0], [1], [0, 0, 1, 1], [], []>} : vector<16x16xbf16>, vector<16x8xbf16>, vector<16x8xf32> -> vector<16x8xf32>
    %126 = tpu.concatenate %62, %83, %104, %125 in 1 : vector<16x8xf32>, vector<16x8xf32>, vector<16x8xf32>, vector<16x8xf32> -> vector<16x32xf32>
    %127 = arith.truncf %126 : vector<16x32xf32> to vector<16x32xbf16>
    %cst_51 = arith.constant dense<0.000000e+00> : vector<16x32xf32>
    %128 = tpu.matmul %127, %39, %cst_51 {dimension_numbers = #tpu.dot_dimension_numbers<[1], [0], [0], [1], [0, 0, 1, 1], [], []>} : vector<16x32xbf16>, vector<32x32xbf16>, vector<16x32xf32> -> vector<16x32xf32>
    %129 = vector.broadcast %41 : vector<1x32xf32> to vector<16x32xf32>
    %130 = arith.addf %128, %129 : vector<16x32xf32>
    %131 = arith.addf %15, %130 : vector<16x32xf32>
    %132 = vector.extract_strided_slice %22 {offsets = [0, 0], sizes = [1, 32], strides = [1, 1]} : vector<4x32xf32> to vector<1x32xf32>
    %133 = vector.extract_strided_slice %22 {offsets = [1, 0], sizes = [1, 32], strides = [1, 1]} : vector<4x32xf32> to vector<1x32xf32>
    %cst_52 = arith.constant dense<0.000000e+00> : vector<16xf32>
    %134 = vector.multi_reduction <add>, %131, %cst_52 [1] : vector<16x32xf32> to vector<16xf32>
    %135 = vector.shape_cast %134 : vector<16xf32> to vector<16x1xf32>
    %cst_53 = arith.constant 3.200000e+01 : f32
    %136 = vector.broadcast %cst_53 : f32 to vector<16x1xf32>
    %137 = arith.divf %135, %136 : vector<16x1xf32>
    %138 = vector.broadcast %137 : vector<16x1xf32> to vector<16x32xf32>
    %139 = arith.subf %131, %138 : vector<16x32xf32>
    %140 = arith.mulf %139, %139 : vector<16x32xf32>
    %cst_54 = arith.constant dense<0.000000e+00> : vector<16xf32>
    %141 = vector.multi_reduction <add>, %140, %cst_54 [1] : vector<16x32xf32> to vector<16xf32>
    %142 = vector.shape_cast %141 : vector<16xf32> to vector<16x1xf32>
    %cst_55 = arith.constant 3.200000e+01 : f32
    %143 = vector.broadcast %cst_55 : f32 to vector<16x1xf32>
    %144 = arith.divf %142, %143 : vector<16x1xf32>
    %145 = vector.broadcast %137 : vector<16x1xf32> to vector<16x32xf32>
    %146 = arith.subf %131, %145 : vector<16x32xf32>
    %cst_56 = arith.constant 9.99999974E-6 : f32
    %147 = vector.broadcast %cst_56 : f32 to vector<16x1xf32>
    %148 = arith.addf %144, %147 : vector<16x1xf32>
    %149 = math.rsqrt %148 : vector<16x1xf32>
    %150 = vector.broadcast %149 : vector<16x1xf32> to vector<16x32xf32>
    %151 = arith.mulf %146, %150 : vector<16x32xf32>
    %152 = vector.broadcast %132 : vector<1x32xf32> to vector<16x32xf32>
    %153 = arith.mulf %151, %152 : vector<16x32xf32>
    %154 = vector.broadcast %133 : vector<1x32xf32> to vector<16x32xf32>
    %155 = arith.addf %153, %154 : vector<16x32xf32>
    %c0_57 = arith.constant 0 : index
    %c0_58 = arith.constant 0 : index
    %c0_59 = arith.constant 0 : index
    %156 = vector.load %arg12[%c0_57, %c0_58, %c0_59] : memref<2x32x64xbf16, #tpu.memory_space<vmem>>, vector<1x32x64xbf16>
    %157 = vector.shape_cast %156 : vector<1x32x64xbf16> to vector<32x64xbf16>
    %158 = arith.truncf %155 : vector<16x32xf32> to vector<16x32xbf16>
    %cst_60 = arith.constant dense<0.000000e+00> : vector<16x64xf32>
    %159 = tpu.matmul %158, %157, %cst_60 {dimension_numbers = #tpu.dot_dimension_numbers<[1], [0], [0], [1], [0, 0, 1, 1], [], []>} : vector<16x32xbf16>, vector<32x64xbf16>, vector<16x64xf32> -> vector<16x64xf32>
    %c0_61 = arith.constant 0 : index
    %c0_62 = arith.constant 0 : index
    %c0_63 = arith.constant 0 : index
    %160 = vector.load %arg13[%c0_61, %c0_62, %c0_63] : memref<2x1x64xf32, #tpu.memory_space<vmem>>, vector<1x1x64xf32>
    %161 = vector.shape_cast %160 : vector<1x1x64xf32> to vector<1x64xf32>
    %162 = vector.broadcast %161 : vector<1x64xf32> to vector<16x64xf32>
    %163 = arith.addf %159, %162 : vector<16x64xf32>
    %cst_64 = arith.constant 0.000000e+00 : f32
    %164 = vector.broadcast %cst_64 : f32 to vector<16x64xf32>
    %165 = arith.maximumf %163, %164 : vector<16x64xf32>
    %c0_65 = arith.constant 0 : index
    %c0_66 = arith.constant 0 : index
    %c0_67 = arith.constant 0 : index
    %166 = vector.load %arg14[%c0_65, %c0_66, %c0_67] : memref<2x64x32xbf16, #tpu.memory_space<vmem>>, vector<1x64x32xbf16>
    %167 = vector.shape_cast %166 : vector<1x64x32xbf16> to vector<64x32xbf16>
    %168 = arith.truncf %165 : vector<16x64xf32> to vector<16x64xbf16>
    %cst_68 = arith.constant dense<0.000000e+00> : vector<16x32xf32>
    %169 = tpu.matmul %168, %167, %cst_68 {dimension_numbers = #tpu.dot_dimension_numbers<[1], [0], [0], [1], [0, 0, 1, 1], [], []>} : vector<16x64xbf16>, vector<64x32xbf16>, vector<16x32xf32> -> vector<16x32xf32>
    %c0_69 = arith.constant 0 : index
    %c0_70 = arith.constant 0 : index
    %c0_71 = arith.constant 0 : index
    %170 = vector.load %arg15[%c0_69, %c0_70, %c0_71] : memref<2x1x32xf32, #tpu.memory_space<vmem>>, vector<1x1x32xf32>
    %171 = vector.shape_cast %170 : vector<1x1x32xf32> to vector<1x32xf32>
    %172 = vector.broadcast %171 : vector<1x32xf32> to vector<16x32xf32>
    %173 = arith.addf %169, %172 : vector<16x32xf32>
    %174 = arith.addf %155, %173 : vector<16x32xf32>
    %175 = vector.extract_strided_slice %22 {offsets = [2, 0], sizes = [1, 32], strides = [1, 1]} : vector<4x32xf32> to vector<1x32xf32>
    %176 = vector.extract_strided_slice %22 {offsets = [3, 0], sizes = [1, 32], strides = [1, 1]} : vector<4x32xf32> to vector<1x32xf32>
    %cst_72 = arith.constant dense<0.000000e+00> : vector<16xf32>
    %177 = vector.multi_reduction <add>, %174, %cst_72 [1] : vector<16x32xf32> to vector<16xf32>
    %178 = vector.shape_cast %177 : vector<16xf32> to vector<16x1xf32>
    %cst_73 = arith.constant 3.200000e+01 : f32
    %179 = vector.broadcast %cst_73 : f32 to vector<16x1xf32>
    %180 = arith.divf %178, %179 : vector<16x1xf32>
    %181 = vector.broadcast %180 : vector<16x1xf32> to vector<16x32xf32>
    %182 = arith.subf %174, %181 : vector<16x32xf32>
    %183 = arith.mulf %182, %182 : vector<16x32xf32>
    %cst_74 = arith.constant dense<0.000000e+00> : vector<16xf32>
    %184 = vector.multi_reduction <add>, %183, %cst_74 [1] : vector<16x32xf32> to vector<16xf32>
    %185 = vector.shape_cast %184 : vector<16xf32> to vector<16x1xf32>
    %cst_75 = arith.constant 3.200000e+01 : f32
    %186 = vector.broadcast %cst_75 : f32 to vector<16x1xf32>
    %187 = arith.divf %185, %186 : vector<16x1xf32>
    %188 = vector.broadcast %180 : vector<16x1xf32> to vector<16x32xf32>
    %189 = arith.subf %174, %188 : vector<16x32xf32>
    %cst_76 = arith.constant 9.99999974E-6 : f32
    %190 = vector.broadcast %cst_76 : f32 to vector<16x1xf32>
    %191 = arith.addf %187, %190 : vector<16x1xf32>
    %192 = math.rsqrt %191 : vector<16x1xf32>
    %193 = vector.broadcast %192 : vector<16x1xf32> to vector<16x32xf32>
    %194 = arith.mulf %189, %193 : vector<16x32xf32>
    %195 = vector.broadcast %175 : vector<1x32xf32> to vector<16x32xf32>
    %196 = arith.mulf %194, %195 : vector<16x32xf32>
    %197 = vector.broadcast %176 : vector<1x32xf32> to vector<16x32xf32>
    %198 = arith.addf %196, %197 : vector<16x32xf32>
    %c1 = arith.constant 1 : index
    %c0_77 = arith.constant 0 : index
    %c0_78 = arith.constant 0 : index
    %199 = vector.load %arg8[%c1, %c0_77, %c0_78] : memref<2x32x96xbf16, #tpu.memory_space<vmem>>, vector<1x32x96xbf16>
    %200 = vector.shape_cast %199 : vector<1x32x96xbf16> to vector<32x96xbf16>
    %c1_79 = arith.constant 1 : index
    %c0_80 = arith.constant 0 : index
    %c0_81 = arith.constant 0 : index
    %201 = vector.load %arg9[%c1_79, %c0_80, %c0_81] : memref<2x1x96xf32, #tpu.memory_space<vmem>>, vector<1x1x96xf32>
    %202 = vector.shape_cast %201 : vector<1x1x96xf32> to vector<1x96xf32>
    %c1_82 = arith.constant 1 : index
    %c0_83 = arith.constant 0 : index
    %c0_84 = arith.constant 0 : index
    %203 = vector.load %arg16[%c1_82, %c0_83, %c0_84] : memref<2x4x32xf32, #tpu.memory_space<vmem>>, vector<1x4x32xf32>
    %204 = vector.shape_cast %203 : vector<1x4x32xf32> to vector<4x32xf32>
    %205 = arith.addf %198, %16 : vector<16x32xf32>
    %206 = vector.extract_strided_slice %200 {offsets = [0, 0], sizes = [32, 64], strides = [1, 1]} : vector<32x96xbf16> to vector<32x64xbf16>
    %207 = arith.truncf %205 : vector<16x32xf32> to vector<16x32xbf16>
    %cst_85 = arith.constant dense<0.000000e+00> : vector<16x64xf32>
    %208 = tpu.matmul %207, %206, %cst_85 {dimension_numbers = #tpu.dot_dimension_numbers<[1], [0], [0], [1], [0, 0, 1, 1], [], []>} : vector<16x32xbf16>, vector<32x64xbf16>, vector<16x64xf32> -> vector<16x64xf32>
    %209 = vector.extract_strided_slice %202 {offsets = [0, 0], sizes = [1, 64], strides = [1, 1]} : vector<1x96xf32> to vector<1x64xf32>
    %210 = vector.broadcast %209 : vector<1x64xf32> to vector<16x64xf32>
    %211 = arith.addf %208, %210 : vector<16x64xf32>
    %212 = vector.extract_strided_slice %200 {offsets = [0, 64], sizes = [32, 32], strides = [1, 1]} : vector<32x96xbf16> to vector<32x32xbf16>
    %213 = arith.truncf %198 : vector<16x32xf32> to vector<16x32xbf16>
    %cst_86 = arith.constant dense<0.000000e+00> : vector<16x32xf32>
    %214 = tpu.matmul %213, %212, %cst_86 {dimension_numbers = #tpu.dot_dimension_numbers<[1], [0], [0], [1], [0, 0, 1, 1], [], []>} : vector<16x32xbf16>, vector<32x32xbf16>, vector<16x32xf32> -> vector<16x32xf32>
    %215 = vector.extract_strided_slice %202 {offsets = [0, 64], sizes = [1, 32], strides = [1, 1]} : vector<1x96xf32> to vector<1x32xf32>
    %216 = vector.broadcast %215 : vector<1x32xf32> to vector<16x32xf32>
    %217 = arith.addf %214, %216 : vector<16x32xf32>
    %218 = vector.extract_strided_slice %211 {offsets = [0, 0], sizes = [16, 32], strides = [1, 1]} : vector<16x64xf32> to vector<16x32xf32>
    %219 = vector.extract_strided_slice %211 {offsets = [0, 32], sizes = [16, 32], strides = [1, 1]} : vector<16x64xf32> to vector<16x32xf32>
    %c1_87 = arith.constant 1 : index
    %c0_88 = arith.constant 0 : index
    %c0_89 = arith.constant 0 : index
    %220 = vector.load %arg10[%c1_87, %c0_88, %c0_89] : memref<2x32x32xbf16, #tpu.memory_space<vmem>>, vector<1x32x32xbf16>
    %221 = vector.shape_cast %220 : vector<1x32x32xbf16> to vector<32x32xbf16>
    %c1_90 = arith.constant 1 : index
    %c0_91 = arith.constant 0 : index
    %c0_92 = arith.constant 0 : index
    %222 = vector.load %arg11[%c1_90, %c0_91, %c0_92] : memref<2x1x32xf32, #tpu.memory_space<vmem>>, vector<1x1x32xf32>
    %223 = vector.shape_cast %222 : vector<1x1x32xf32> to vector<1x32xf32>
    %224 = vector.extract_strided_slice %218 {offsets = [0, 0], sizes = [16, 8], strides = [1, 1]} : vector<16x32xf32> to vector<16x8xf32>
    %225 = arith.truncf %224 : vector<16x8xf32> to vector<16x8xbf16>
    %226 = vector.extract_strided_slice %219 {offsets = [0, 0], sizes = [16, 8], strides = [1, 1]} : vector<16x32xf32> to vector<16x8xf32>
    %227 = arith.truncf %226 : vector<16x8xf32> to vector<16x8xbf16>
    %228 = vector.extract_strided_slice %217 {offsets = [0, 0], sizes = [16, 8], strides = [1, 1]} : vector<16x32xf32> to vector<16x8xf32>
    %229 = arith.truncf %228 : vector<16x8xf32> to vector<16x8xbf16>
    %cst_93 = arith.constant dense<0.000000e+00> : vector<16x16xf32>
    %230 = tpu.matmul %225, %227, %cst_93 {dimension_numbers = #tpu.dot_dimension_numbers<[1], [1], [0], [0], [0, 0, 1, 0], [], []>} : vector<16x8xbf16>, vector<16x8xbf16>, vector<16x16xf32> -> vector<16x16xf32>
    %cst_94 = arith.constant 0.353553385 : f32
    %231 = vector.broadcast %cst_94 : f32 to vector<16x16xf32>
    %232 = arith.mulf %230, %231 : vector<16x16xf32>
    %cst_95 = arith.constant dense<0xFF800000> : vector<16xf32>
    %233 = vector.multi_reduction <maximumf>, %232, %cst_95 [1] : vector<16x16xf32> to vector<16xf32>
    %234 = vector.shape_cast %233 : vector<16xf32> to vector<16x1xf32>
    %235 = vector.broadcast %234 : vector<16x1xf32> to vector<16x16xf32>
    %236 = arith.subf %232, %235 : vector<16x16xf32>
    %237 = math.exp %236 : vector<16x16xf32>
    %cst_96 = arith.constant dense<0.000000e+00> : vector<16xf32>
    %238 = vector.multi_reduction <add>, %237, %cst_96 [1] : vector<16x16xf32> to vector<16xf32>
    %239 = vector.shape_cast %238 : vector<16xf32> to vector<16x1xf32>
    %240 = tpu.reciprocal %239 {approx = true} : vector<16x1xf32> -> vector<16x1xf32>
    %241 = vector.broadcast %240 : vector<16x1xf32> to vector<16x16xf32>
    %242 = arith.mulf %237, %241 : vector<16x16xf32>
    %243 = arith.truncf %242 : vector<16x16xf32> to vector<16x16xbf16>
    %cst_97 = arith.constant dense<0.000000e+00> : vector<16x8xf32>
    %244 = tpu.matmul %243, %229, %cst_97 {dimension_numbers = #tpu.dot_dimension_numbers<[1], [0], [0], [1], [0, 0, 1, 1], [], []>} : vector<16x16xbf16>, vector<16x8xbf16>, vector<16x8xf32> -> vector<16x8xf32>
    %245 = vector.extract_strided_slice %218 {offsets = [0, 8], sizes = [16, 8], strides = [1, 1]} : vector<16x32xf32> to vector<16x8xf32>
    %246 = arith.truncf %245 : vector<16x8xf32> to vector<16x8xbf16>
    %247 = vector.extract_strided_slice %219 {offsets = [0, 8], sizes = [16, 8], strides = [1, 1]} : vector<16x32xf32> to vector<16x8xf32>
    %248 = arith.truncf %247 : vector<16x8xf32> to vector<16x8xbf16>
    %249 = vector.extract_strided_slice %217 {offsets = [0, 8], sizes = [16, 8], strides = [1, 1]} : vector<16x32xf32> to vector<16x8xf32>
    %250 = arith.truncf %249 : vector<16x8xf32> to vector<16x8xbf16>
    %cst_98 = arith.constant dense<0.000000e+00> : vector<16x16xf32>
    %251 = tpu.matmul %246, %248, %cst_98 {dimension_numbers = #tpu.dot_dimension_numbers<[1], [1], [0], [0], [0, 0, 1, 0], [], []>} : vector<16x8xbf16>, vector<16x8xbf16>, vector<16x16xf32> -> vector<16x16xf32>
    %cst_99 = arith.constant 0.353553385 : f32
    %252 = vector.broadcast %cst_99 : f32 to vector<16x16xf32>
    %253 = arith.mulf %251, %252 : vector<16x16xf32>
    %cst_100 = arith.constant dense<0xFF800000> : vector<16xf32>
    %254 = vector.multi_reduction <maximumf>, %253, %cst_100 [1] : vector<16x16xf32> to vector<16xf32>
    %255 = vector.shape_cast %254 : vector<16xf32> to vector<16x1xf32>
    %256 = vector.broadcast %255 : vector<16x1xf32> to vector<16x16xf32>
    %257 = arith.subf %253, %256 : vector<16x16xf32>
    %258 = math.exp %257 : vector<16x16xf32>
    %cst_101 = arith.constant dense<0.000000e+00> : vector<16xf32>
    %259 = vector.multi_reduction <add>, %258, %cst_101 [1] : vector<16x16xf32> to vector<16xf32>
    %260 = vector.shape_cast %259 : vector<16xf32> to vector<16x1xf32>
    %261 = tpu.reciprocal %260 {approx = true} : vector<16x1xf32> -> vector<16x1xf32>
    %262 = vector.broadcast %261 : vector<16x1xf32> to vector<16x16xf32>
    %263 = arith.mulf %258, %262 : vector<16x16xf32>
    %264 = arith.truncf %263 : vector<16x16xf32> to vector<16x16xbf16>
    %cst_102 = arith.constant dense<0.000000e+00> : vector<16x8xf32>
    %265 = tpu.matmul %264, %250, %cst_102 {dimension_numbers = #tpu.dot_dimension_numbers<[1], [0], [0], [1], [0, 0, 1, 1], [], []>} : vector<16x16xbf16>, vector<16x8xbf16>, vector<16x8xf32> -> vector<16x8xf32>
    %266 = vector.extract_strided_slice %218 {offsets = [0, 16], sizes = [16, 8], strides = [1, 1]} : vector<16x32xf32> to vector<16x8xf32>
    %267 = arith.truncf %266 : vector<16x8xf32> to vector<16x8xbf16>
    %268 = vector.extract_strided_slice %219 {offsets = [0, 16], sizes = [16, 8], strides = [1, 1]} : vector<16x32xf32> to vector<16x8xf32>
    %269 = arith.truncf %268 : vector<16x8xf32> to vector<16x8xbf16>
    %270 = vector.extract_strided_slice %217 {offsets = [0, 16], sizes = [16, 8], strides = [1, 1]} : vector<16x32xf32> to vector<16x8xf32>
    %271 = arith.truncf %270 : vector<16x8xf32> to vector<16x8xbf16>
    %cst_103 = arith.constant dense<0.000000e+00> : vector<16x16xf32>
    %272 = tpu.matmul %267, %269, %cst_103 {dimension_numbers = #tpu.dot_dimension_numbers<[1], [1], [0], [0], [0, 0, 1, 0], [], []>} : vector<16x8xbf16>, vector<16x8xbf16>, vector<16x16xf32> -> vector<16x16xf32>
    %cst_104 = arith.constant 0.353553385 : f32
    %273 = vector.broadcast %cst_104 : f32 to vector<16x16xf32>
    %274 = arith.mulf %272, %273 : vector<16x16xf32>
    %cst_105 = arith.constant dense<0xFF800000> : vector<16xf32>
    %275 = vector.multi_reduction <maximumf>, %274, %cst_105 [1] : vector<16x16xf32> to vector<16xf32>
    %276 = vector.shape_cast %275 : vector<16xf32> to vector<16x1xf32>
    %277 = vector.broadcast %276 : vector<16x1xf32> to vector<16x16xf32>
    %278 = arith.subf %274, %277 : vector<16x16xf32>
    %279 = math.exp %278 : vector<16x16xf32>
    %cst_106 = arith.constant dense<0.000000e+00> : vector<16xf32>
    %280 = vector.multi_reduction <add>, %279, %cst_106 [1] : vector<16x16xf32> to vector<16xf32>
    %281 = vector.shape_cast %280 : vector<16xf32> to vector<16x1xf32>
    %282 = tpu.reciprocal %281 {approx = true} : vector<16x1xf32> -> vector<16x1xf32>
    %283 = vector.broadcast %282 : vector<16x1xf32> to vector<16x16xf32>
    %284 = arith.mulf %279, %283 : vector<16x16xf32>
    %285 = arith.truncf %284 : vector<16x16xf32> to vector<16x16xbf16>
    %cst_107 = arith.constant dense<0.000000e+00> : vector<16x8xf32>
    %286 = tpu.matmul %285, %271, %cst_107 {dimension_numbers = #tpu.dot_dimension_numbers<[1], [0], [0], [1], [0, 0, 1, 1], [], []>} : vector<16x16xbf16>, vector<16x8xbf16>, vector<16x8xf32> -> vector<16x8xf32>
    %287 = vector.extract_strided_slice %218 {offsets = [0, 24], sizes = [16, 8], strides = [1, 1]} : vector<16x32xf32> to vector<16x8xf32>
    %288 = arith.truncf %287 : vector<16x8xf32> to vector<16x8xbf16>
    %289 = vector.extract_strided_slice %219 {offsets = [0, 24], sizes = [16, 8], strides = [1, 1]} : vector<16x32xf32> to vector<16x8xf32>
    %290 = arith.truncf %289 : vector<16x8xf32> to vector<16x8xbf16>
    %291 = vector.extract_strided_slice %217 {offsets = [0, 24], sizes = [16, 8], strides = [1, 1]} : vector<16x32xf32> to vector<16x8xf32>
    %292 = arith.truncf %291 : vector<16x8xf32> to vector<16x8xbf16>
    %cst_108 = arith.constant dense<0.000000e+00> : vector<16x16xf32>
    %293 = tpu.matmul %288, %290, %cst_108 {dimension_numbers = #tpu.dot_dimension_numbers<[1], [1], [0], [0], [0, 0, 1, 0], [], []>} : vector<16x8xbf16>, vector<16x8xbf16>, vector<16x16xf32> -> vector<16x16xf32>
    %cst_109 = arith.constant 0.353553385 : f32
    %294 = vector.broadcast %cst_109 : f32 to vector<16x16xf32>
    %295 = arith.mulf %293, %294 : vector<16x16xf32>
    %cst_110 = arith.constant dense<0xFF800000> : vector<16xf32>
    %296 = vector.multi_reduction <maximumf>, %295, %cst_110 [1] : vector<16x16xf32> to vector<16xf32>
    %297 = vector.shape_cast %296 : vector<16xf32> to vector<16x1xf32>
    %298 = vector.broadcast %297 : vector<16x1xf32> to vector<16x16xf32>
    %299 = arith.subf %295, %298 : vector<16x16xf32>
    %300 = math.exp %299 : vector<16x16xf32>
    %cst_111 = arith.constant dense<0.000000e+00> : vector<16xf32>
    %301 = vector.multi_reduction <add>, %300, %cst_111 [1] : vector<16x16xf32> to vector<16xf32>
    %302 = vector.shape_cast %301 : vector<16xf32> to vector<16x1xf32>
    %303 = tpu.reciprocal %302 {approx = true} : vector<16x1xf32> -> vector<16x1xf32>
    %304 = vector.broadcast %303 : vector<16x1xf32> to vector<16x16xf32>
    %305 = arith.mulf %300, %304 : vector<16x16xf32>
    %306 = arith.truncf %305 : vector<16x16xf32> to vector<16x16xbf16>
    %cst_112 = arith.constant dense<0.000000e+00> : vector<16x8xf32>
    %307 = tpu.matmul %306, %292, %cst_112 {dimension_numbers = #tpu.dot_dimension_numbers<[1], [0], [0], [1], [0, 0, 1, 1], [], []>} : vector<16x16xbf16>, vector<16x8xbf16>, vector<16x8xf32> -> vector<16x8xf32>
    %308 = tpu.concatenate %244, %265, %286, %307 in 1 : vector<16x8xf32>, vector<16x8xf32>, vector<16x8xf32>, vector<16x8xf32> -> vector<16x32xf32>
    %309 = arith.truncf %308 : vector<16x32xf32> to vector<16x32xbf16>
    %cst_113 = arith.constant dense<0.000000e+00> : vector<16x32xf32>
    %310 = tpu.matmul %309, %221, %cst_113 {dimension_numbers = #tpu.dot_dimension_numbers<[1], [0], [0], [1], [0, 0, 1, 1], [], []>} : vector<16x32xbf16>, vector<32x32xbf16>, vector<16x32xf32> -> vector<16x32xf32>
    %311 = vector.broadcast %223 : vector<1x32xf32> to vector<16x32xf32>
    %312 = arith.addf %310, %311 : vector<16x32xf32>
    %313 = arith.addf %198, %312 : vector<16x32xf32>
    %314 = vector.extract_strided_slice %204 {offsets = [0, 0], sizes = [1, 32], strides = [1, 1]} : vector<4x32xf32> to vector<1x32xf32>
    %315 = vector.extract_strided_slice %204 {offsets = [1, 0], sizes = [1, 32], strides = [1, 1]} : vector<4x32xf32> to vector<1x32xf32>
    %cst_114 = arith.constant dense<0.000000e+00> : vector<16xf32>
    %316 = vector.multi_reduction <add>, %313, %cst_114 [1] : vector<16x32xf32> to vector<16xf32>
    %317 = vector.shape_cast %316 : vector<16xf32> to vector<16x1xf32>
    %cst_115 = arith.constant 3.200000e+01 : f32
    %318 = vector.broadcast %cst_115 : f32 to vector<16x1xf32>
    %319 = arith.divf %317, %318 : vector<16x1xf32>
    %320 = vector.broadcast %319 : vector<16x1xf32> to vector<16x32xf32>
    %321 = arith.subf %313, %320 : vector<16x32xf32>
    %322 = arith.mulf %321, %321 : vector<16x32xf32>
    %cst_116 = arith.constant dense<0.000000e+00> : vector<16xf32>
    %323 = vector.multi_reduction <add>, %322, %cst_116 [1] : vector<16x32xf32> to vector<16xf32>
    %324 = vector.shape_cast %323 : vector<16xf32> to vector<16x1xf32>
    %cst_117 = arith.constant 3.200000e+01 : f32
    %325 = vector.broadcast %cst_117 : f32 to vector<16x1xf32>
    %326 = arith.divf %324, %325 : vector<16x1xf32>
    %327 = vector.broadcast %319 : vector<16x1xf32> to vector<16x32xf32>
    %328 = arith.subf %313, %327 : vector<16x32xf32>
    %cst_118 = arith.constant 9.99999974E-6 : f32
    %329 = vector.broadcast %cst_118 : f32 to vector<16x1xf32>
    %330 = arith.addf %326, %329 : vector<16x1xf32>
    %331 = math.rsqrt %330 : vector<16x1xf32>
    %332 = vector.broadcast %331 : vector<16x1xf32> to vector<16x32xf32>
    %333 = arith.mulf %328, %332 : vector<16x32xf32>
    %334 = vector.broadcast %314 : vector<1x32xf32> to vector<16x32xf32>
    %335 = arith.mulf %333, %334 : vector<16x32xf32>
    %336 = vector.broadcast %315 : vector<1x32xf32> to vector<16x32xf32>
    %337 = arith.addf %335, %336 : vector<16x32xf32>
    %c1_119 = arith.constant 1 : index
    %c0_120 = arith.constant 0 : index
    %c0_121 = arith.constant 0 : index
    %338 = vector.load %arg12[%c1_119, %c0_120, %c0_121] : memref<2x32x64xbf16, #tpu.memory_space<vmem>>, vector<1x32x64xbf16>
    %339 = vector.shape_cast %338 : vector<1x32x64xbf16> to vector<32x64xbf16>
    %340 = arith.truncf %337 : vector<16x32xf32> to vector<16x32xbf16>
    %cst_122 = arith.constant dense<0.000000e+00> : vector<16x64xf32>
    %341 = tpu.matmul %340, %339, %cst_122 {dimension_numbers = #tpu.dot_dimension_numbers<[1], [0], [0], [1], [0, 0, 1, 1], [], []>} : vector<16x32xbf16>, vector<32x64xbf16>, vector<16x64xf32> -> vector<16x64xf32>
    %c1_123 = arith.constant 1 : index
    %c0_124 = arith.constant 0 : index
    %c0_125 = arith.constant 0 : index
    %342 = vector.load %arg13[%c1_123, %c0_124, %c0_125] : memref<2x1x64xf32, #tpu.memory_space<vmem>>, vector<1x1x64xf32>
    %343 = vector.shape_cast %342 : vector<1x1x64xf32> to vector<1x64xf32>
    %344 = vector.broadcast %343 : vector<1x64xf32> to vector<16x64xf32>
    %345 = arith.addf %341, %344 : vector<16x64xf32>
    %cst_126 = arith.constant 0.000000e+00 : f32
    %346 = vector.broadcast %cst_126 : f32 to vector<16x64xf32>
    %347 = arith.maximumf %345, %346 : vector<16x64xf32>
    %c1_127 = arith.constant 1 : index
    %c0_128 = arith.constant 0 : index
    %c0_129 = arith.constant 0 : index
    %348 = vector.load %arg14[%c1_127, %c0_128, %c0_129] : memref<2x64x32xbf16, #tpu.memory_space<vmem>>, vector<1x64x32xbf16>
    %349 = vector.shape_cast %348 : vector<1x64x32xbf16> to vector<64x32xbf16>
    %350 = arith.truncf %347 : vector<16x64xf32> to vector<16x64xbf16>
    %cst_130 = arith.constant dense<0.000000e+00> : vector<16x32xf32>
    %351 = tpu.matmul %350, %349, %cst_130 {dimension_numbers = #tpu.dot_dimension_numbers<[1], [0], [0], [1], [0, 0, 1, 1], [], []>} : vector<16x64xbf16>, vector<64x32xbf16>, vector<16x32xf32> -> vector<16x32xf32>
    %c1_131 = arith.constant 1 : index
    %c0_132 = arith.constant 0 : index
    %c0_133 = arith.constant 0 : index
    %352 = vector.load %arg15[%c1_131, %c0_132, %c0_133] : memref<2x1x32xf32, #tpu.memory_space<vmem>>, vector<1x1x32xf32>
    %353 = vector.shape_cast %352 : vector<1x1x32xf32> to vector<1x32xf32>
    %354 = vector.broadcast %353 : vector<1x32xf32> to vector<16x32xf32>
    %355 = arith.addf %351, %354 : vector<16x32xf32>
    %356 = arith.addf %337, %355 : vector<16x32xf32>
    %357 = vector.extract_strided_slice %204 {offsets = [2, 0], sizes = [1, 32], strides = [1, 1]} : vector<4x32xf32> to vector<1x32xf32>
    %358 = vector.extract_strided_slice %204 {offsets = [3, 0], sizes = [1, 32], strides = [1, 1]} : vector<4x32xf32> to vector<1x32xf32>
    %cst_134 = arith.constant dense<0.000000e+00> : vector<16xf32>
    %359 = vector.multi_reduction <add>, %356, %cst_134 [1] : vector<16x32xf32> to vector<16xf32>
    %360 = vector.shape_cast %359 : vector<16xf32> to vector<16x1xf32>
    %cst_135 = arith.constant 3.200000e+01 : f32
    %361 = vector.broadcast %cst_135 : f32 to vector<16x1xf32>
    %362 = arith.divf %360, %361 : vector<16x1xf32>
    %363 = vector.broadcast %362 : vector<16x1xf32> to vector<16x32xf32>
    %364 = arith.subf %356, %363 : vector<16x32xf32>
    %365 = arith.mulf %364, %364 : vector<16x32xf32>
    %cst_136 = arith.constant dense<0.000000e+00> : vector<16xf32>
    %366 = vector.multi_reduction <add>, %365, %cst_136 [1] : vector<16x32xf32> to vector<16xf32>
    %367 = vector.shape_cast %366 : vector<16xf32> to vector<16x1xf32>
    %cst_137 = arith.constant 3.200000e+01 : f32
    %368 = vector.broadcast %cst_137 : f32 to vector<16x1xf32>
    %369 = arith.divf %367, %368 : vector<16x1xf32>
    %370 = vector.broadcast %362 : vector<16x1xf32> to vector<16x32xf32>
    %371 = arith.subf %356, %370 : vector<16x32xf32>
    %cst_138 = arith.constant 9.99999974E-6 : f32
    %372 = vector.broadcast %cst_138 : f32 to vector<16x1xf32>
    %373 = arith.addf %369, %372 : vector<16x1xf32>
    %374 = math.rsqrt %373 : vector<16x1xf32>
    %375 = vector.broadcast %374 : vector<16x1xf32> to vector<16x32xf32>
    %376 = arith.mulf %371, %375 : vector<16x32xf32>
    %377 = vector.broadcast %357 : vector<1x32xf32> to vector<16x32xf32>
    %378 = arith.mulf %376, %377 : vector<16x32xf32>
    %379 = vector.broadcast %358 : vector<1x32xf32> to vector<16x32xf32>
    %380 = arith.addf %378, %379 : vector<16x32xf32>
    %c0_139 = arith.constant 0 : index
    %c0_140 = arith.constant 0 : index
    %381 = vector.load %arg3[%c0_139, %c0_140] : memref<8x32xf32, #tpu.memory_space<vmem>>, vector<8x32xf32>
    %cst_141 = arith.constant 0.000000e+00 : f32
    %382 = vector.broadcast %cst_141 : f32 to vector<8x32xf32>
    %c0_142 = arith.constant 0 : index
    %c0_143 = arith.constant 0 : index
    %c0_144 = arith.constant 0 : index
    %383 = vector.load %arg29[%c0_142, %c0_143, %c0_144] : memref<2x6x32xf32, #tpu.memory_space<vmem>>, vector<1x6x32xf32>
    %384 = vector.shape_cast %383 : vector<1x6x32xf32> to vector<6x32xf32>
    %c0_145 = arith.constant 0 : index
    %c0_146 = arith.constant 0 : index
    %c0_147 = arith.constant 0 : index
    %385 = vector.load %arg17[%c0_145, %c0_146, %c0_147] : memref<2x32x96xbf16, #tpu.memory_space<vmem>>, vector<1x32x96xbf16>
    %386 = vector.shape_cast %385 : vector<1x32x96xbf16> to vector<32x96xbf16>
    %c0_148 = arith.constant 0 : index
    %c0_149 = arith.constant 0 : index
    %c0_150 = arith.constant 0 : index
    %387 = vector.load %arg18[%c0_148, %c0_149, %c0_150] : memref<2x1x96xf32, #tpu.memory_space<vmem>>, vector<1x1x96xf32>
    %388 = vector.shape_cast %387 : vector<1x1x96xf32> to vector<1x96xf32>
    %389 = arith.addf %382, %381 : vector<8x32xf32>
    %390 = vector.extract_strided_slice %386 {offsets = [0, 0], sizes = [32, 64], strides = [1, 1]} : vector<32x96xbf16> to vector<32x64xbf16>
    %391 = arith.truncf %389 : vector<8x32xf32> to vector<8x32xbf16>
    %cst_151 = arith.constant dense<0.000000e+00> : vector<8x64xf32>
    %392 = tpu.matmul %391, %390, %cst_151 {dimension_numbers = #tpu.dot_dimension_numbers<[1], [0], [0], [1], [0, 0, 1, 1], [], []>} : vector<8x32xbf16>, vector<32x64xbf16>, vector<8x64xf32> -> vector<8x64xf32>
    %393 = vector.extract_strided_slice %388 {offsets = [0, 0], sizes = [1, 64], strides = [1, 1]} : vector<1x96xf32> to vector<1x64xf32>
    %394 = vector.broadcast %393 : vector<1x64xf32> to vector<8x64xf32>
    %395 = arith.addf %392, %394 : vector<8x64xf32>
    %396 = vector.extract_strided_slice %386 {offsets = [0, 64], sizes = [32, 32], strides = [1, 1]} : vector<32x96xbf16> to vector<32x32xbf16>
    %397 = arith.truncf %382 : vector<8x32xf32> to vector<8x32xbf16>
    %cst_152 = arith.constant dense<0.000000e+00> : vector<8x32xf32>
    %398 = tpu.matmul %397, %396, %cst_152 {dimension_numbers = #tpu.dot_dimension_numbers<[1], [0], [0], [1], [0, 0, 1, 1], [], []>} : vector<8x32xbf16>, vector<32x32xbf16>, vector<8x32xf32> -> vector<8x32xf32>
    %399 = vector.extract_strided_slice %388 {offsets = [0, 64], sizes = [1, 32], strides = [1, 1]} : vector<1x96xf32> to vector<1x32xf32>
    %400 = vector.broadcast %399 : vector<1x32xf32> to vector<8x32xf32>
    %401 = arith.addf %398, %400 : vector<8x32xf32>
    %402 = vector.extract_strided_slice %395 {offsets = [0, 0], sizes = [8, 32], strides = [1, 1]} : vector<8x64xf32> to vector<8x32xf32>
    %403 = vector.extract_strided_slice %395 {offsets = [0, 32], sizes = [8, 32], strides = [1, 1]} : vector<8x64xf32> to vector<8x32xf32>
    %c0_153 = arith.constant 0 : index
    %c0_154 = arith.constant 0 : index
    %c0_155 = arith.constant 0 : index
    %404 = vector.load %arg19[%c0_153, %c0_154, %c0_155] : memref<2x32x32xbf16, #tpu.memory_space<vmem>>, vector<1x32x32xbf16>
    %405 = vector.shape_cast %404 : vector<1x32x32xbf16> to vector<32x32xbf16>
    %c0_156 = arith.constant 0 : index
    %c0_157 = arith.constant 0 : index
    %c0_158 = arith.constant 0 : index
    %406 = vector.load %arg20[%c0_156, %c0_157, %c0_158] : memref<2x1x32xf32, #tpu.memory_space<vmem>>, vector<1x1x32xf32>
    %407 = vector.shape_cast %406 : vector<1x1x32xf32> to vector<1x32xf32>
    %408 = vector.extract_strided_slice %402 {offsets = [0, 0], sizes = [8, 8], strides = [1, 1]} : vector<8x32xf32> to vector<8x8xf32>
    %409 = arith.truncf %408 : vector<8x8xf32> to vector<8x8xbf16>
    %410 = vector.extract_strided_slice %403 {offsets = [0, 0], sizes = [8, 8], strides = [1, 1]} : vector<8x32xf32> to vector<8x8xf32>
    %411 = arith.truncf %410 : vector<8x8xf32> to vector<8x8xbf16>
    %412 = vector.extract_strided_slice %401 {offsets = [0, 0], sizes = [8, 8], strides = [1, 1]} : vector<8x32xf32> to vector<8x8xf32>
    %413 = arith.truncf %412 : vector<8x8xf32> to vector<8x8xbf16>
    %cst_159 = arith.constant dense<0.000000e+00> : vector<8x8xf32>
    %414 = tpu.matmul %409, %411, %cst_159 {dimension_numbers = #tpu.dot_dimension_numbers<[1], [1], [0], [0], [0, 0, 1, 0], [], []>} : vector<8x8xbf16>, vector<8x8xbf16>, vector<8x8xf32> -> vector<8x8xf32>
    %cst_160 = arith.constant 0.353553385 : f32
    %415 = vector.broadcast %cst_160 : f32 to vector<8x8xf32>
    %416 = arith.mulf %414, %415 : vector<8x8xf32>
    %cst_161 = arith.constant dense<0xFF800000> : vector<8xf32>
    %417 = vector.multi_reduction <maximumf>, %416, %cst_161 [1] : vector<8x8xf32> to vector<8xf32>
    %418 = vector.shape_cast %417 : vector<8xf32> to vector<8x1xf32>
    %419 = vector.broadcast %418 : vector<8x1xf32> to vector<8x8xf32>
    %420 = arith.subf %416, %419 : vector<8x8xf32>
    %421 = math.exp %420 : vector<8x8xf32>
    %cst_162 = arith.constant dense<0.000000e+00> : vector<8xf32>
    %422 = vector.multi_reduction <add>, %421, %cst_162 [1] : vector<8x8xf32> to vector<8xf32>
    %423 = vector.shape_cast %422 : vector<8xf32> to vector<8x1xf32>
    %424 = tpu.reciprocal %423 {approx = true} : vector<8x1xf32> -> vector<8x1xf32>
    %425 = vector.broadcast %424 : vector<8x1xf32> to vector<8x8xf32>
    %426 = arith.mulf %421, %425 : vector<8x8xf32>
    %427 = arith.truncf %426 : vector<8x8xf32> to vector<8x8xbf16>
    %cst_163 = arith.constant dense<0.000000e+00> : vector<8x8xf32>
    %428 = tpu.matmul %427, %413, %cst_163 {dimension_numbers = #tpu.dot_dimension_numbers<[1], [0], [0], [1], [0, 0, 1, 1], [], []>} : vector<8x8xbf16>, vector<8x8xbf16>, vector<8x8xf32> -> vector<8x8xf32>
    %429 = vector.extract_strided_slice %402 {offsets = [0, 8], sizes = [8, 8], strides = [1, 1]} : vector<8x32xf32> to vector<8x8xf32>
    %430 = arith.truncf %429 : vector<8x8xf32> to vector<8x8xbf16>
    %431 = vector.extract_strided_slice %403 {offsets = [0, 8], sizes = [8, 8], strides = [1, 1]} : vector<8x32xf32> to vector<8x8xf32>
    %432 = arith.truncf %431 : vector<8x8xf32> to vector<8x8xbf16>
    %433 = vector.extract_strided_slice %401 {offsets = [0, 8], sizes = [8, 8], strides = [1, 1]} : vector<8x32xf32> to vector<8x8xf32>
    %434 = arith.truncf %433 : vector<8x8xf32> to vector<8x8xbf16>
    %cst_164 = arith.constant dense<0.000000e+00> : vector<8x8xf32>
    %435 = tpu.matmul %430, %432, %cst_164 {dimension_numbers = #tpu.dot_dimension_numbers<[1], [1], [0], [0], [0, 0, 1, 0], [], []>} : vector<8x8xbf16>, vector<8x8xbf16>, vector<8x8xf32> -> vector<8x8xf32>
    %cst_165 = arith.constant 0.353553385 : f32
    %436 = vector.broadcast %cst_165 : f32 to vector<8x8xf32>
    %437 = arith.mulf %435, %436 : vector<8x8xf32>
    %cst_166 = arith.constant dense<0xFF800000> : vector<8xf32>
    %438 = vector.multi_reduction <maximumf>, %437, %cst_166 [1] : vector<8x8xf32> to vector<8xf32>
    %439 = vector.shape_cast %438 : vector<8xf32> to vector<8x1xf32>
    %440 = vector.broadcast %439 : vector<8x1xf32> to vector<8x8xf32>
    %441 = arith.subf %437, %440 : vector<8x8xf32>
    %442 = math.exp %441 : vector<8x8xf32>
    %cst_167 = arith.constant dense<0.000000e+00> : vector<8xf32>
    %443 = vector.multi_reduction <add>, %442, %cst_167 [1] : vector<8x8xf32> to vector<8xf32>
    %444 = vector.shape_cast %443 : vector<8xf32> to vector<8x1xf32>
    %445 = tpu.reciprocal %444 {approx = true} : vector<8x1xf32> -> vector<8x1xf32>
    %446 = vector.broadcast %445 : vector<8x1xf32> to vector<8x8xf32>
    %447 = arith.mulf %442, %446 : vector<8x8xf32>
    %448 = arith.truncf %447 : vector<8x8xf32> to vector<8x8xbf16>
    %cst_168 = arith.constant dense<0.000000e+00> : vector<8x8xf32>
    %449 = tpu.matmul %448, %434, %cst_168 {dimension_numbers = #tpu.dot_dimension_numbers<[1], [0], [0], [1], [0, 0, 1, 1], [], []>} : vector<8x8xbf16>, vector<8x8xbf16>, vector<8x8xf32> -> vector<8x8xf32>
    %450 = vector.extract_strided_slice %402 {offsets = [0, 16], sizes = [8, 8], strides = [1, 1]} : vector<8x32xf32> to vector<8x8xf32>
    %451 = arith.truncf %450 : vector<8x8xf32> to vector<8x8xbf16>
    %452 = vector.extract_strided_slice %403 {offsets = [0, 16], sizes = [8, 8], strides = [1, 1]} : vector<8x32xf32> to vector<8x8xf32>
    %453 = arith.truncf %452 : vector<8x8xf32> to vector<8x8xbf16>
    %454 = vector.extract_strided_slice %401 {offsets = [0, 16], sizes = [8, 8], strides = [1, 1]} : vector<8x32xf32> to vector<8x8xf32>
    %455 = arith.truncf %454 : vector<8x8xf32> to vector<8x8xbf16>
    %cst_169 = arith.constant dense<0.000000e+00> : vector<8x8xf32>
    %456 = tpu.matmul %451, %453, %cst_169 {dimension_numbers = #tpu.dot_dimension_numbers<[1], [1], [0], [0], [0, 0, 1, 0], [], []>} : vector<8x8xbf16>, vector<8x8xbf16>, vector<8x8xf32> -> vector<8x8xf32>
    %cst_170 = arith.constant 0.353553385 : f32
    %457 = vector.broadcast %cst_170 : f32 to vector<8x8xf32>
    %458 = arith.mulf %456, %457 : vector<8x8xf32>
    %cst_171 = arith.constant dense<0xFF800000> : vector<8xf32>
    %459 = vector.multi_reduction <maximumf>, %458, %cst_171 [1] : vector<8x8xf32> to vector<8xf32>
    %460 = vector.shape_cast %459 : vector<8xf32> to vector<8x1xf32>
    %461 = vector.broadcast %460 : vector<8x1xf32> to vector<8x8xf32>
    %462 = arith.subf %458, %461 : vector<8x8xf32>
    %463 = math.exp %462 : vector<8x8xf32>
    %cst_172 = arith.constant dense<0.000000e+00> : vector<8xf32>
    %464 = vector.multi_reduction <add>, %463, %cst_172 [1] : vector<8x8xf32> to vector<8xf32>
    %465 = vector.shape_cast %464 : vector<8xf32> to vector<8x1xf32>
    %466 = tpu.reciprocal %465 {approx = true} : vector<8x1xf32> -> vector<8x1xf32>
    %467 = vector.broadcast %466 : vector<8x1xf32> to vector<8x8xf32>
    %468 = arith.mulf %463, %467 : vector<8x8xf32>
    %469 = arith.truncf %468 : vector<8x8xf32> to vector<8x8xbf16>
    %cst_173 = arith.constant dense<0.000000e+00> : vector<8x8xf32>
    %470 = tpu.matmul %469, %455, %cst_173 {dimension_numbers = #tpu.dot_dimension_numbers<[1], [0], [0], [1], [0, 0, 1, 1], [], []>} : vector<8x8xbf16>, vector<8x8xbf16>, vector<8x8xf32> -> vector<8x8xf32>
    %471 = vector.extract_strided_slice %402 {offsets = [0, 24], sizes = [8, 8], strides = [1, 1]} : vector<8x32xf32> to vector<8x8xf32>
    %472 = arith.truncf %471 : vector<8x8xf32> to vector<8x8xbf16>
    %473 = vector.extract_strided_slice %403 {offsets = [0, 24], sizes = [8, 8], strides = [1, 1]} : vector<8x32xf32> to vector<8x8xf32>
    %474 = arith.truncf %473 : vector<8x8xf32> to vector<8x8xbf16>
    %475 = vector.extract_strided_slice %401 {offsets = [0, 24], sizes = [8, 8], strides = [1, 1]} : vector<8x32xf32> to vector<8x8xf32>
    %476 = arith.truncf %475 : vector<8x8xf32> to vector<8x8xbf16>
    %cst_174 = arith.constant dense<0.000000e+00> : vector<8x8xf32>
    %477 = tpu.matmul %472, %474, %cst_174 {dimension_numbers = #tpu.dot_dimension_numbers<[1], [1], [0], [0], [0, 0, 1, 0], [], []>} : vector<8x8xbf16>, vector<8x8xbf16>, vector<8x8xf32> -> vector<8x8xf32>
    %cst_175 = arith.constant 0.353553385 : f32
    %478 = vector.broadcast %cst_175 : f32 to vector<8x8xf32>
    %479 = arith.mulf %477, %478 : vector<8x8xf32>
    %cst_176 = arith.constant dense<0xFF800000> : vector<8xf32>
    %480 = vector.multi_reduction <maximumf>, %479, %cst_176 [1] : vector<8x8xf32> to vector<8xf32>
    %481 = vector.shape_cast %480 : vector<8xf32> to vector<8x1xf32>
    %482 = vector.broadcast %481 : vector<8x1xf32> to vector<8x8xf32>
    %483 = arith.subf %479, %482 : vector<8x8xf32>
    %484 = math.exp %483 : vector<8x8xf32>
    %cst_177 = arith.constant dense<0.000000e+00> : vector<8xf32>
    %485 = vector.multi_reduction <add>, %484, %cst_177 [1] : vector<8x8xf32> to vector<8xf32>
    %486 = vector.shape_cast %485 : vector<8xf32> to vector<8x1xf32>
    %487 = tpu.reciprocal %486 {approx = true} : vector<8x1xf32> -> vector<8x1xf32>
    %488 = vector.broadcast %487 : vector<8x1xf32> to vector<8x8xf32>
    %489 = arith.mulf %484, %488 : vector<8x8xf32>
    %490 = arith.truncf %489 : vector<8x8xf32> to vector<8x8xbf16>
    %cst_178 = arith.constant dense<0.000000e+00> : vector<8x8xf32>
    %491 = tpu.matmul %490, %476, %cst_178 {dimension_numbers = #tpu.dot_dimension_numbers<[1], [0], [0], [1], [0, 0, 1, 1], [], []>} : vector<8x8xbf16>, vector<8x8xbf16>, vector<8x8xf32> -> vector<8x8xf32>
    %492 = tpu.concatenate %428, %449, %470, %491 in 1 : vector<8x8xf32>, vector<8x8xf32>, vector<8x8xf32>, vector<8x8xf32> -> vector<8x32xf32>
    %493 = arith.truncf %492 : vector<8x32xf32> to vector<8x32xbf16>
    %cst_179 = arith.constant dense<0.000000e+00> : vector<8x32xf32>
    %494 = tpu.matmul %493, %405, %cst_179 {dimension_numbers = #tpu.dot_dimension_numbers<[1], [0], [0], [1], [0, 0, 1, 1], [], []>} : vector<8x32xbf16>, vector<32x32xbf16>, vector<8x32xf32> -> vector<8x32xf32>
    %495 = vector.broadcast %407 : vector<1x32xf32> to vector<8x32xf32>
    %496 = arith.addf %494, %495 : vector<8x32xf32>
    %497 = arith.addf %382, %496 : vector<8x32xf32>
    %498 = vector.extract_strided_slice %384 {offsets = [0, 0], sizes = [1, 32], strides = [1, 1]} : vector<6x32xf32> to vector<1x32xf32>
    %499 = vector.extract_strided_slice %384 {offsets = [1, 0], sizes = [1, 32], strides = [1, 1]} : vector<6x32xf32> to vector<1x32xf32>
    %cst_180 = arith.constant dense<0.000000e+00> : vector<8xf32>
    %500 = vector.multi_reduction <add>, %497, %cst_180 [1] : vector<8x32xf32> to vector<8xf32>
    %501 = vector.shape_cast %500 : vector<8xf32> to vector<8x1xf32>
    %cst_181 = arith.constant 3.200000e+01 : f32
    %502 = vector.broadcast %cst_181 : f32 to vector<8x1xf32>
    %503 = arith.divf %501, %502 : vector<8x1xf32>
    %504 = vector.broadcast %503 : vector<8x1xf32> to vector<8x32xf32>
    %505 = arith.subf %497, %504 : vector<8x32xf32>
    %506 = arith.mulf %505, %505 : vector<8x32xf32>
    %cst_182 = arith.constant dense<0.000000e+00> : vector<8xf32>
    %507 = vector.multi_reduction <add>, %506, %cst_182 [1] : vector<8x32xf32> to vector<8xf32>
    %508 = vector.shape_cast %507 : vector<8xf32> to vector<8x1xf32>
    %cst_183 = arith.constant 3.200000e+01 : f32
    %509 = vector.broadcast %cst_183 : f32 to vector<8x1xf32>
    %510 = arith.divf %508, %509 : vector<8x1xf32>
    %511 = vector.broadcast %503 : vector<8x1xf32> to vector<8x32xf32>
    %512 = arith.subf %497, %511 : vector<8x32xf32>
    %cst_184 = arith.constant 9.99999974E-6 : f32
    %513 = vector.broadcast %cst_184 : f32 to vector<8x1xf32>
    %514 = arith.addf %510, %513 : vector<8x1xf32>
    %515 = math.rsqrt %514 : vector<8x1xf32>
    %516 = vector.broadcast %515 : vector<8x1xf32> to vector<8x32xf32>
    %517 = arith.mulf %512, %516 : vector<8x32xf32>
    %518 = vector.broadcast %498 : vector<1x32xf32> to vector<8x32xf32>
    %519 = arith.mulf %517, %518 : vector<8x32xf32>
    %520 = vector.broadcast %499 : vector<1x32xf32> to vector<8x32xf32>
    %521 = arith.addf %519, %520 : vector<8x32xf32>
    %c0_185 = arith.constant 0 : index
    %c0_186 = arith.constant 0 : index
    %c0_187 = arith.constant 0 : index
    %522 = vector.load %arg21[%c0_185, %c0_186, %c0_187] : memref<2x32x96xbf16, #tpu.memory_space<vmem>>, vector<1x32x96xbf16>
    %523 = vector.shape_cast %522 : vector<1x32x96xbf16> to vector<32x96xbf16>
    %c0_188 = arith.constant 0 : index
    %c0_189 = arith.constant 0 : index
    %c0_190 = arith.constant 0 : index
    %524 = vector.load %arg22[%c0_188, %c0_189, %c0_190] : memref<2x1x96xf32, #tpu.memory_space<vmem>>, vector<1x1x96xf32>
    %525 = vector.shape_cast %524 : vector<1x1x96xf32> to vector<1x96xf32>
    %526 = arith.addf %521, %381 : vector<8x32xf32>
    %527 = vector.extract_strided_slice %523 {offsets = [0, 0], sizes = [32, 32], strides = [1, 1]} : vector<32x96xbf16> to vector<32x32xbf16>
    %528 = arith.truncf %526 : vector<8x32xf32> to vector<8x32xbf16>
    %cst_191 = arith.constant dense<0.000000e+00> : vector<8x32xf32>
    %529 = tpu.matmul %528, %527, %cst_191 {dimension_numbers = #tpu.dot_dimension_numbers<[1], [0], [0], [1], [0, 0, 1, 1], [], []>} : vector<8x32xbf16>, vector<32x32xbf16>, vector<8x32xf32> -> vector<8x32xf32>
    %530 = vector.extract_strided_slice %525 {offsets = [0, 0], sizes = [1, 32], strides = [1, 1]} : vector<1x96xf32> to vector<1x32xf32>
    %531 = vector.broadcast %530 : vector<1x32xf32> to vector<8x32xf32>
    %532 = arith.addf %529, %531 : vector<8x32xf32>
    %533 = arith.addf %380, %16 : vector<16x32xf32>
    %534 = vector.extract_strided_slice %523 {offsets = [0, 32], sizes = [32, 32], strides = [1, 1]} : vector<32x96xbf16> to vector<32x32xbf16>
    %535 = arith.truncf %533 : vector<16x32xf32> to vector<16x32xbf16>
    %cst_192 = arith.constant dense<0.000000e+00> : vector<16x32xf32>
    %536 = tpu.matmul %535, %534, %cst_192 {dimension_numbers = #tpu.dot_dimension_numbers<[1], [0], [0], [1], [0, 0, 1, 1], [], []>} : vector<16x32xbf16>, vector<32x32xbf16>, vector<16x32xf32> -> vector<16x32xf32>
    %537 = vector.extract_strided_slice %525 {offsets = [0, 32], sizes = [1, 32], strides = [1, 1]} : vector<1x96xf32> to vector<1x32xf32>
    %538 = vector.broadcast %537 : vector<1x32xf32> to vector<16x32xf32>
    %539 = arith.addf %536, %538 : vector<16x32xf32>
    %540 = vector.extract_strided_slice %523 {offsets = [0, 64], sizes = [32, 32], strides = [1, 1]} : vector<32x96xbf16> to vector<32x32xbf16>
    %541 = arith.truncf %380 : vector<16x32xf32> to vector<16x32xbf16>
    %cst_193 = arith.constant dense<0.000000e+00> : vector<16x32xf32>
    %542 = tpu.matmul %541, %540, %cst_193 {dimension_numbers = #tpu.dot_dimension_numbers<[1], [0], [0], [1], [0, 0, 1, 1], [], []>} : vector<16x32xbf16>, vector<32x32xbf16>, vector<16x32xf32> -> vector<16x32xf32>
    %543 = vector.extract_strided_slice %525 {offsets = [0, 64], sizes = [1, 32], strides = [1, 1]} : vector<1x96xf32> to vector<1x32xf32>
    %544 = vector.broadcast %543 : vector<1x32xf32> to vector<16x32xf32>
    %545 = arith.addf %542, %544 : vector<16x32xf32>
    %c0_194 = arith.constant 0 : index
    %c0_195 = arith.constant 0 : index
    %c0_196 = arith.constant 0 : index
    %546 = vector.load %arg23[%c0_194, %c0_195, %c0_196] : memref<2x32x32xbf16, #tpu.memory_space<vmem>>, vector<1x32x32xbf16>
    %547 = vector.shape_cast %546 : vector<1x32x32xbf16> to vector<32x32xbf16>
    %c0_197 = arith.constant 0 : index
    %c0_198 = arith.constant 0 : index
    %c0_199 = arith.constant 0 : index
    %548 = vector.load %arg24[%c0_197, %c0_198, %c0_199] : memref<2x1x32xf32, #tpu.memory_space<vmem>>, vector<1x1x32xf32>
    %549 = vector.shape_cast %548 : vector<1x1x32xf32> to vector<1x32xf32>
    %550 = vector.extract_strided_slice %532 {offsets = [0, 0], sizes = [8, 8], strides = [1, 1]} : vector<8x32xf32> to vector<8x8xf32>
    %551 = arith.truncf %550 : vector<8x8xf32> to vector<8x8xbf16>
    %552 = vector.extract_strided_slice %539 {offsets = [0, 0], sizes = [16, 8], strides = [1, 1]} : vector<16x32xf32> to vector<16x8xf32>
    %553 = arith.truncf %552 : vector<16x8xf32> to vector<16x8xbf16>
    %554 = vector.extract_strided_slice %545 {offsets = [0, 0], sizes = [16, 8], strides = [1, 1]} : vector<16x32xf32> to vector<16x8xf32>
    %555 = arith.truncf %554 : vector<16x8xf32> to vector<16x8xbf16>
    %cst_200 = arith.constant dense<0.000000e+00> : vector<8x16xf32>
    %556 = tpu.matmul %551, %553, %cst_200 {dimension_numbers = #tpu.dot_dimension_numbers<[1], [1], [0], [0], [0, 0, 1, 0], [], []>} : vector<8x8xbf16>, vector<16x8xbf16>, vector<8x16xf32> -> vector<8x16xf32>
    %cst_201 = arith.constant 0.353553385 : f32
    %557 = vector.broadcast %cst_201 : f32 to vector<8x16xf32>
    %558 = arith.mulf %556, %557 : vector<8x16xf32>
    %cst_202 = arith.constant dense<0xFF800000> : vector<8xf32>
    %559 = vector.multi_reduction <maximumf>, %558, %cst_202 [1] : vector<8x16xf32> to vector<8xf32>
    %560 = vector.shape_cast %559 : vector<8xf32> to vector<8x1xf32>
    %561 = vector.broadcast %560 : vector<8x1xf32> to vector<8x16xf32>
    %562 = arith.subf %558, %561 : vector<8x16xf32>
    %563 = math.exp %562 : vector<8x16xf32>
    %cst_203 = arith.constant dense<0.000000e+00> : vector<8xf32>
    %564 = vector.multi_reduction <add>, %563, %cst_203 [1] : vector<8x16xf32> to vector<8xf32>
    %565 = vector.shape_cast %564 : vector<8xf32> to vector<8x1xf32>
    %566 = tpu.reciprocal %565 {approx = true} : vector<8x1xf32> -> vector<8x1xf32>
    %567 = vector.broadcast %566 : vector<8x1xf32> to vector<8x16xf32>
    %568 = arith.mulf %563, %567 : vector<8x16xf32>
    %569 = arith.truncf %568 : vector<8x16xf32> to vector<8x16xbf16>
    %cst_204 = arith.constant dense<0.000000e+00> : vector<8x8xf32>
    %570 = tpu.matmul %569, %555, %cst_204 {dimension_numbers = #tpu.dot_dimension_numbers<[1], [0], [0], [1], [0, 0, 1, 1], [], []>} : vector<8x16xbf16>, vector<16x8xbf16>, vector<8x8xf32> -> vector<8x8xf32>
    %571 = vector.extract_strided_slice %532 {offsets = [0, 8], sizes = [8, 8], strides = [1, 1]} : vector<8x32xf32> to vector<8x8xf32>
    %572 = arith.truncf %571 : vector<8x8xf32> to vector<8x8xbf16>
    %573 = vector.extract_strided_slice %539 {offsets = [0, 8], sizes = [16, 8], strides = [1, 1]} : vector<16x32xf32> to vector<16x8xf32>
    %574 = arith.truncf %573 : vector<16x8xf32> to vector<16x8xbf16>
    %575 = vector.extract_strided_slice %545 {offsets = [0, 8], sizes = [16, 8], strides = [1, 1]} : vector<16x32xf32> to vector<16x8xf32>
    %576 = arith.truncf %575 : vector<16x8xf32> to vector<16x8xbf16>
    %cst_205 = arith.constant dense<0.000000e+00> : vector<8x16xf32>
    %577 = tpu.matmul %572, %574, %cst_205 {dimension_numbers = #tpu.dot_dimension_numbers<[1], [1], [0], [0], [0, 0, 1, 0], [], []>} : vector<8x8xbf16>, vector<16x8xbf16>, vector<8x16xf32> -> vector<8x16xf32>
    %cst_206 = arith.constant 0.353553385 : f32
    %578 = vector.broadcast %cst_206 : f32 to vector<8x16xf32>
    %579 = arith.mulf %577, %578 : vector<8x16xf32>
    %cst_207 = arith.constant dense<0xFF800000> : vector<8xf32>
    %580 = vector.multi_reduction <maximumf>, %579, %cst_207 [1] : vector<8x16xf32> to vector<8xf32>
    %581 = vector.shape_cast %580 : vector<8xf32> to vector<8x1xf32>
    %582 = vector.broadcast %581 : vector<8x1xf32> to vector<8x16xf32>
    %583 = arith.subf %579, %582 : vector<8x16xf32>
    %584 = math.exp %583 : vector<8x16xf32>
    %cst_208 = arith.constant dense<0.000000e+00> : vector<8xf32>
    %585 = vector.multi_reduction <add>, %584, %cst_208 [1] : vector<8x16xf32> to vector<8xf32>
    %586 = vector.shape_cast %585 : vector<8xf32> to vector<8x1xf32>
    %587 = tpu.reciprocal %586 {approx = true} : vector<8x1xf32> -> vector<8x1xf32>
    %588 = vector.broadcast %587 : vector<8x1xf32> to vector<8x16xf32>
    %589 = arith.mulf %584, %588 : vector<8x16xf32>
    %590 = arith.truncf %589 : vector<8x16xf32> to vector<8x16xbf16>
    %cst_209 = arith.constant dense<0.000000e+00> : vector<8x8xf32>
    %591 = tpu.matmul %590, %576, %cst_209 {dimension_numbers = #tpu.dot_dimension_numbers<[1], [0], [0], [1], [0, 0, 1, 1], [], []>} : vector<8x16xbf16>, vector<16x8xbf16>, vector<8x8xf32> -> vector<8x8xf32>
    %592 = vector.extract_strided_slice %532 {offsets = [0, 16], sizes = [8, 8], strides = [1, 1]} : vector<8x32xf32> to vector<8x8xf32>
    %593 = arith.truncf %592 : vector<8x8xf32> to vector<8x8xbf16>
    %594 = vector.extract_strided_slice %539 {offsets = [0, 16], sizes = [16, 8], strides = [1, 1]} : vector<16x32xf32> to vector<16x8xf32>
    %595 = arith.truncf %594 : vector<16x8xf32> to vector<16x8xbf16>
    %596 = vector.extract_strided_slice %545 {offsets = [0, 16], sizes = [16, 8], strides = [1, 1]} : vector<16x32xf32> to vector<16x8xf32>
    %597 = arith.truncf %596 : vector<16x8xf32> to vector<16x8xbf16>
    %cst_210 = arith.constant dense<0.000000e+00> : vector<8x16xf32>
    %598 = tpu.matmul %593, %595, %cst_210 {dimension_numbers = #tpu.dot_dimension_numbers<[1], [1], [0], [0], [0, 0, 1, 0], [], []>} : vector<8x8xbf16>, vector<16x8xbf16>, vector<8x16xf32> -> vector<8x16xf32>
    %cst_211 = arith.constant 0.353553385 : f32
    %599 = vector.broadcast %cst_211 : f32 to vector<8x16xf32>
    %600 = arith.mulf %598, %599 : vector<8x16xf32>
    %cst_212 = arith.constant dense<0xFF800000> : vector<8xf32>
    %601 = vector.multi_reduction <maximumf>, %600, %cst_212 [1] : vector<8x16xf32> to vector<8xf32>
    %602 = vector.shape_cast %601 : vector<8xf32> to vector<8x1xf32>
    %603 = vector.broadcast %602 : vector<8x1xf32> to vector<8x16xf32>
    %604 = arith.subf %600, %603 : vector<8x16xf32>
    %605 = math.exp %604 : vector<8x16xf32>
    %cst_213 = arith.constant dense<0.000000e+00> : vector<8xf32>
    %606 = vector.multi_reduction <add>, %605, %cst_213 [1] : vector<8x16xf32> to vector<8xf32>
    %607 = vector.shape_cast %606 : vector<8xf32> to vector<8x1xf32>
    %608 = tpu.reciprocal %607 {approx = true} : vector<8x1xf32> -> vector<8x1xf32>
    %609 = vector.broadcast %608 : vector<8x1xf32> to vector<8x16xf32>
    %610 = arith.mulf %605, %609 : vector<8x16xf32>
    %611 = arith.truncf %610 : vector<8x16xf32> to vector<8x16xbf16>
    %cst_214 = arith.constant dense<0.000000e+00> : vector<8x8xf32>
    %612 = tpu.matmul %611, %597, %cst_214 {dimension_numbers = #tpu.dot_dimension_numbers<[1], [0], [0], [1], [0, 0, 1, 1], [], []>} : vector<8x16xbf16>, vector<16x8xbf16>, vector<8x8xf32> -> vector<8x8xf32>
    %613 = vector.extract_strided_slice %532 {offsets = [0, 24], sizes = [8, 8], strides = [1, 1]} : vector<8x32xf32> to vector<8x8xf32>
    %614 = arith.truncf %613 : vector<8x8xf32> to vector<8x8xbf16>
    %615 = vector.extract_strided_slice %539 {offsets = [0, 24], sizes = [16, 8], strides = [1, 1]} : vector<16x32xf32> to vector<16x8xf32>
    %616 = arith.truncf %615 : vector<16x8xf32> to vector<16x8xbf16>
    %617 = vector.extract_strided_slice %545 {offsets = [0, 24], sizes = [16, 8], strides = [1, 1]} : vector<16x32xf32> to vector<16x8xf32>
    %618 = arith.truncf %617 : vector<16x8xf32> to vector<16x8xbf16>
    %cst_215 = arith.constant dense<0.000000e+00> : vector<8x16xf32>
    %619 = tpu.matmul %614, %616, %cst_215 {dimension_numbers = #tpu.dot_dimension_numbers<[1], [1], [0], [0], [0, 0, 1, 0], [], []>} : vector<8x8xbf16>, vector<16x8xbf16>, vector<8x16xf32> -> vector<8x16xf32>
    %cst_216 = arith.constant 0.353553385 : f32
    %620 = vector.broadcast %cst_216 : f32 to vector<8x16xf32>
    %621 = arith.mulf %619, %620 : vector<8x16xf32>
    %cst_217 = arith.constant dense<0xFF800000> : vector<8xf32>
    %622 = vector.multi_reduction <maximumf>, %621, %cst_217 [1] : vector<8x16xf32> to vector<8xf32>
    %623 = vector.shape_cast %622 : vector<8xf32> to vector<8x1xf32>
    %624 = vector.broadcast %623 : vector<8x1xf32> to vector<8x16xf32>
    %625 = arith.subf %621, %624 : vector<8x16xf32>
    %626 = math.exp %625 : vector<8x16xf32>
    %cst_218 = arith.constant dense<0.000000e+00> : vector<8xf32>
    %627 = vector.multi_reduction <add>, %626, %cst_218 [1] : vector<8x16xf32> to vector<8xf32>
    %628 = vector.shape_cast %627 : vector<8xf32> to vector<8x1xf32>
    %629 = tpu.reciprocal %628 {approx = true} : vector<8x1xf32> -> vector<8x1xf32>
    %630 = vector.broadcast %629 : vector<8x1xf32> to vector<8x16xf32>
    %631 = arith.mulf %626, %630 : vector<8x16xf32>
    %632 = arith.truncf %631 : vector<8x16xf32> to vector<8x16xbf16>
    %cst_219 = arith.constant dense<0.000000e+00> : vector<8x8xf32>
    %633 = tpu.matmul %632, %618, %cst_219 {dimension_numbers = #tpu.dot_dimension_numbers<[1], [0], [0], [1], [0, 0, 1, 1], [], []>} : vector<8x16xbf16>, vector<16x8xbf16>, vector<8x8xf32> -> vector<8x8xf32>
    %634 = tpu.concatenate %570, %591, %612, %633 in 1 : vector<8x8xf32>, vector<8x8xf32>, vector<8x8xf32>, vector<8x8xf32> -> vector<8x32xf32>
    %635 = arith.truncf %634 : vector<8x32xf32> to vector<8x32xbf16>
    %cst_220 = arith.constant dense<0.000000e+00> : vector<8x32xf32>
    %636 = tpu.matmul %635, %547, %cst_220 {dimension_numbers = #tpu.dot_dimension_numbers<[1], [0], [0], [1], [0, 0, 1, 1], [], []>} : vector<8x32xbf16>, vector<32x32xbf16>, vector<8x32xf32> -> vector<8x32xf32>
    %637 = vector.broadcast %549 : vector<1x32xf32> to vector<8x32xf32>
    %638 = arith.addf %636, %637 : vector<8x32xf32>
    %639 = arith.addf %521, %638 : vector<8x32xf32>
    %640 = vector.extract_strided_slice %384 {offsets = [2, 0], sizes = [1, 32], strides = [1, 1]} : vector<6x32xf32> to vector<1x32xf32>
    %641 = vector.extract_strided_slice %384 {offsets = [3, 0], sizes = [1, 32], strides = [1, 1]} : vector<6x32xf32> to vector<1x32xf32>
    %cst_221 = arith.constant dense<0.000000e+00> : vector<8xf32>
    %642 = vector.multi_reduction <add>, %639, %cst_221 [1] : vector<8x32xf32> to vector<8xf32>
    %643 = vector.shape_cast %642 : vector<8xf32> to vector<8x1xf32>
    %cst_222 = arith.constant 3.200000e+01 : f32
    %644 = vector.broadcast %cst_222 : f32 to vector<8x1xf32>
    %645 = arith.divf %643, %644 : vector<8x1xf32>
    %646 = vector.broadcast %645 : vector<8x1xf32> to vector<8x32xf32>
    %647 = arith.subf %639, %646 : vector<8x32xf32>
    %648 = arith.mulf %647, %647 : vector<8x32xf32>
    %cst_223 = arith.constant dense<0.000000e+00> : vector<8xf32>
    %649 = vector.multi_reduction <add>, %648, %cst_223 [1] : vector<8x32xf32> to vector<8xf32>
    %650 = vector.shape_cast %649 : vector<8xf32> to vector<8x1xf32>
    %cst_224 = arith.constant 3.200000e+01 : f32
    %651 = vector.broadcast %cst_224 : f32 to vector<8x1xf32>
    %652 = arith.divf %650, %651 : vector<8x1xf32>
    %653 = vector.broadcast %645 : vector<8x1xf32> to vector<8x32xf32>
    %654 = arith.subf %639, %653 : vector<8x32xf32>
    %cst_225 = arith.constant 9.99999974E-6 : f32
    %655 = vector.broadcast %cst_225 : f32 to vector<8x1xf32>
    %656 = arith.addf %652, %655 : vector<8x1xf32>
    %657 = math.rsqrt %656 : vector<8x1xf32>
    %658 = vector.broadcast %657 : vector<8x1xf32> to vector<8x32xf32>
    %659 = arith.mulf %654, %658 : vector<8x32xf32>
    %660 = vector.broadcast %640 : vector<1x32xf32> to vector<8x32xf32>
    %661 = arith.mulf %659, %660 : vector<8x32xf32>
    %662 = vector.broadcast %641 : vector<1x32xf32> to vector<8x32xf32>
    %663 = arith.addf %661, %662 : vector<8x32xf32>
    %c0_226 = arith.constant 0 : index
    %c0_227 = arith.constant 0 : index
    %c0_228 = arith.constant 0 : index
    %664 = vector.load %arg25[%c0_226, %c0_227, %c0_228] : memref<2x32x64xbf16, #tpu.memory_space<vmem>>, vector<1x32x64xbf16>
    %665 = vector.shape_cast %664 : vector<1x32x64xbf16> to vector<32x64xbf16>
    %666 = arith.truncf %663 : vector<8x32xf32> to vector<8x32xbf16>
    %cst_229 = arith.constant dense<0.000000e+00> : vector<8x64xf32>
    %667 = tpu.matmul %666, %665, %cst_229 {dimension_numbers = #tpu.dot_dimension_numbers<[1], [0], [0], [1], [0, 0, 1, 1], [], []>} : vector<8x32xbf16>, vector<32x64xbf16>, vector<8x64xf32> -> vector<8x64xf32>
    %c0_230 = arith.constant 0 : index
    %c0_231 = arith.constant 0 : index
    %c0_232 = arith.constant 0 : index
    %668 = vector.load %arg26[%c0_230, %c0_231, %c0_232] : memref<2x1x64xf32, #tpu.memory_space<vmem>>, vector<1x1x64xf32>
    %669 = vector.shape_cast %668 : vector<1x1x64xf32> to vector<1x64xf32>
    %670 = vector.broadcast %669 : vector<1x64xf32> to vector<8x64xf32>
    %671 = arith.addf %667, %670 : vector<8x64xf32>
    %cst_233 = arith.constant 0.000000e+00 : f32
    %672 = vector.broadcast %cst_233 : f32 to vector<8x64xf32>
    %673 = arith.maximumf %671, %672 : vector<8x64xf32>
    %c0_234 = arith.constant 0 : index
    %c0_235 = arith.constant 0 : index
    %c0_236 = arith.constant 0 : index
    %674 = vector.load %arg27[%c0_234, %c0_235, %c0_236] : memref<2x64x32xbf16, #tpu.memory_space<vmem>>, vector<1x64x32xbf16>
    %675 = vector.shape_cast %674 : vector<1x64x32xbf16> to vector<64x32xbf16>
    %676 = arith.truncf %673 : vector<8x64xf32> to vector<8x64xbf16>
    %cst_237 = arith.constant dense<0.000000e+00> : vector<8x32xf32>
    %677 = tpu.matmul %676, %675, %cst_237 {dimension_numbers = #tpu.dot_dimension_numbers<[1], [0], [0], [1], [0, 0, 1, 1], [], []>} : vector<8x64xbf16>, vector<64x32xbf16>, vector<8x32xf32> -> vector<8x32xf32>
    %c0_238 = arith.constant 0 : index
    %c0_239 = arith.constant 0 : index
    %c0_240 = arith.constant 0 : index
    %678 = vector.load %arg28[%c0_238, %c0_239, %c0_240] : memref<2x1x32xf32, #tpu.memory_space<vmem>>, vector<1x1x32xf32>
    %679 = vector.shape_cast %678 : vector<1x1x32xf32> to vector<1x32xf32>
    %680 = vector.broadcast %679 : vector<1x32xf32> to vector<8x32xf32>
    %681 = arith.addf %677, %680 : vector<8x32xf32>
    %682 = arith.addf %663, %681 : vector<8x32xf32>
    %683 = vector.extract_strided_slice %384 {offsets = [4, 0], sizes = [1, 32], strides = [1, 1]} : vector<6x32xf32> to vector<1x32xf32>
    %684 = vector.extract_strided_slice %384 {offsets = [5, 0], sizes = [1, 32], strides = [1, 1]} : vector<6x32xf32> to vector<1x32xf32>
    %cst_241 = arith.constant dense<0.000000e+00> : vector<8xf32>
    %685 = vector.multi_reduction <add>, %682, %cst_241 [1] : vector<8x32xf32> to vector<8xf32>
    %686 = vector.shape_cast %685 : vector<8xf32> to vector<8x1xf32>
    %cst_242 = arith.constant 3.200000e+01 : f32
    %687 = vector.broadcast %cst_242 : f32 to vector<8x1xf32>
    %688 = arith.divf %686, %687 : vector<8x1xf32>
    %689 = vector.broadcast %688 : vector<8x1xf32> to vector<8x32xf32>
    %690 = arith.subf %682, %689 : vector<8x32xf32>
    %691 = arith.mulf %690, %690 : vector<8x32xf32>
    %cst_243 = arith.constant dense<0.000000e+00> : vector<8xf32>
    %692 = vector.multi_reduction <add>, %691, %cst_243 [1] : vector<8x32xf32> to vector<8xf32>
    %693 = vector.shape_cast %692 : vector<8xf32> to vector<8x1xf32>
    %cst_244 = arith.constant 3.200000e+01 : f32
    %694 = vector.broadcast %cst_244 : f32 to vector<8x1xf32>
    %695 = arith.divf %693, %694 : vector<8x1xf32>
    %696 = vector.broadcast %688 : vector<8x1xf32> to vector<8x32xf32>
    %697 = arith.subf %682, %696 : vector<8x32xf32>
    %cst_245 = arith.constant 9.99999974E-6 : f32
    %698 = vector.broadcast %cst_245 : f32 to vector<8x1xf32>
    %699 = arith.addf %695, %698 : vector<8x1xf32>
    %700 = math.rsqrt %699 : vector<8x1xf32>
    %701 = vector.broadcast %700 : vector<8x1xf32> to vector<8x32xf32>
    %702 = arith.mulf %697, %701 : vector<8x32xf32>
    %703 = vector.broadcast %683 : vector<1x32xf32> to vector<8x32xf32>
    %704 = arith.mulf %702, %703 : vector<8x32xf32>
    %705 = vector.broadcast %684 : vector<1x32xf32> to vector<8x32xf32>
    %706 = arith.addf %704, %705 : vector<8x32xf32>
    %c1_246 = arith.constant 1 : index
    %c0_247 = arith.constant 0 : index
    %c0_248 = arith.constant 0 : index
    %707 = vector.load %arg29[%c1_246, %c0_247, %c0_248] : memref<2x6x32xf32, #tpu.memory_space<vmem>>, vector<1x6x32xf32>
    %708 = vector.shape_cast %707 : vector<1x6x32xf32> to vector<6x32xf32>
    %c1_249 = arith.constant 1 : index
    %c0_250 = arith.constant 0 : index
    %c0_251 = arith.constant 0 : index
    %709 = vector.load %arg17[%c1_249, %c0_250, %c0_251] : memref<2x32x96xbf16, #tpu.memory_space<vmem>>, vector<1x32x96xbf16>
    %710 = vector.shape_cast %709 : vector<1x32x96xbf16> to vector<32x96xbf16>
    %c1_252 = arith.constant 1 : index
    %c0_253 = arith.constant 0 : index
    %c0_254 = arith.constant 0 : index
    %711 = vector.load %arg18[%c1_252, %c0_253, %c0_254] : memref<2x1x96xf32, #tpu.memory_space<vmem>>, vector<1x1x96xf32>
    %712 = vector.shape_cast %711 : vector<1x1x96xf32> to vector<1x96xf32>
    %713 = arith.addf %706, %381 : vector<8x32xf32>
    %714 = vector.extract_strided_slice %710 {offsets = [0, 0], sizes = [32, 64], strides = [1, 1]} : vector<32x96xbf16> to vector<32x64xbf16>
    %715 = arith.truncf %713 : vector<8x32xf32> to vector<8x32xbf16>
    %cst_255 = arith.constant dense<0.000000e+00> : vector<8x64xf32>
    %716 = tpu.matmul %715, %714, %cst_255 {dimension_numbers = #tpu.dot_dimension_numbers<[1], [0], [0], [1], [0, 0, 1, 1], [], []>} : vector<8x32xbf16>, vector<32x64xbf16>, vector<8x64xf32> -> vector<8x64xf32>
    %717 = vector.extract_strided_slice %712 {offsets = [0, 0], sizes = [1, 64], strides = [1, 1]} : vector<1x96xf32> to vector<1x64xf32>
    %718 = vector.broadcast %717 : vector<1x64xf32> to vector<8x64xf32>
    %719 = arith.addf %716, %718 : vector<8x64xf32>
    %720 = vector.extract_strided_slice %710 {offsets = [0, 64], sizes = [32, 32], strides = [1, 1]} : vector<32x96xbf16> to vector<32x32xbf16>
    %721 = arith.truncf %706 : vector<8x32xf32> to vector<8x32xbf16>
    %cst_256 = arith.constant dense<0.000000e+00> : vector<8x32xf32>
    %722 = tpu.matmul %721, %720, %cst_256 {dimension_numbers = #tpu.dot_dimension_numbers<[1], [0], [0], [1], [0, 0, 1, 1], [], []>} : vector<8x32xbf16>, vector<32x32xbf16>, vector<8x32xf32> -> vector<8x32xf32>
    %723 = vector.extract_strided_slice %712 {offsets = [0, 64], sizes = [1, 32], strides = [1, 1]} : vector<1x96xf32> to vector<1x32xf32>
    %724 = vector.broadcast %723 : vector<1x32xf32> to vector<8x32xf32>
    %725 = arith.addf %722, %724 : vector<8x32xf32>
    %726 = vector.extract_strided_slice %719 {offsets = [0, 0], sizes = [8, 32], strides = [1, 1]} : vector<8x64xf32> to vector<8x32xf32>
    %727 = vector.extract_strided_slice %719 {offsets = [0, 32], sizes = [8, 32], strides = [1, 1]} : vector<8x64xf32> to vector<8x32xf32>
    %c1_257 = arith.constant 1 : index
    %c0_258 = arith.constant 0 : index
    %c0_259 = arith.constant 0 : index
    %728 = vector.load %arg19[%c1_257, %c0_258, %c0_259] : memref<2x32x32xbf16, #tpu.memory_space<vmem>>, vector<1x32x32xbf16>
    %729 = vector.shape_cast %728 : vector<1x32x32xbf16> to vector<32x32xbf16>
    %c1_260 = arith.constant 1 : index
    %c0_261 = arith.constant 0 : index
    %c0_262 = arith.constant 0 : index
    %730 = vector.load %arg20[%c1_260, %c0_261, %c0_262] : memref<2x1x32xf32, #tpu.memory_space<vmem>>, vector<1x1x32xf32>
    %731 = vector.shape_cast %730 : vector<1x1x32xf32> to vector<1x32xf32>
    %732 = vector.extract_strided_slice %726 {offsets = [0, 0], sizes = [8, 8], strides = [1, 1]} : vector<8x32xf32> to vector<8x8xf32>
    %733 = arith.truncf %732 : vector<8x8xf32> to vector<8x8xbf16>
    %734 = vector.extract_strided_slice %727 {offsets = [0, 0], sizes = [8, 8], strides = [1, 1]} : vector<8x32xf32> to vector<8x8xf32>
    %735 = arith.truncf %734 : vector<8x8xf32> to vector<8x8xbf16>
    %736 = vector.extract_strided_slice %725 {offsets = [0, 0], sizes = [8, 8], strides = [1, 1]} : vector<8x32xf32> to vector<8x8xf32>
    %737 = arith.truncf %736 : vector<8x8xf32> to vector<8x8xbf16>
    %cst_263 = arith.constant dense<0.000000e+00> : vector<8x8xf32>
    %738 = tpu.matmul %733, %735, %cst_263 {dimension_numbers = #tpu.dot_dimension_numbers<[1], [1], [0], [0], [0, 0, 1, 0], [], []>} : vector<8x8xbf16>, vector<8x8xbf16>, vector<8x8xf32> -> vector<8x8xf32>
    %cst_264 = arith.constant 0.353553385 : f32
    %739 = vector.broadcast %cst_264 : f32 to vector<8x8xf32>
    %740 = arith.mulf %738, %739 : vector<8x8xf32>
    %cst_265 = arith.constant dense<0xFF800000> : vector<8xf32>
    %741 = vector.multi_reduction <maximumf>, %740, %cst_265 [1] : vector<8x8xf32> to vector<8xf32>
    %742 = vector.shape_cast %741 : vector<8xf32> to vector<8x1xf32>
    %743 = vector.broadcast %742 : vector<8x1xf32> to vector<8x8xf32>
    %744 = arith.subf %740, %743 : vector<8x8xf32>
    %745 = math.exp %744 : vector<8x8xf32>
    %cst_266 = arith.constant dense<0.000000e+00> : vector<8xf32>
    %746 = vector.multi_reduction <add>, %745, %cst_266 [1] : vector<8x8xf32> to vector<8xf32>
    %747 = vector.shape_cast %746 : vector<8xf32> to vector<8x1xf32>
    %748 = tpu.reciprocal %747 {approx = true} : vector<8x1xf32> -> vector<8x1xf32>
    %749 = vector.broadcast %748 : vector<8x1xf32> to vector<8x8xf32>
    %750 = arith.mulf %745, %749 : vector<8x8xf32>
    %751 = arith.truncf %750 : vector<8x8xf32> to vector<8x8xbf16>
    %cst_267 = arith.constant dense<0.000000e+00> : vector<8x8xf32>
    %752 = tpu.matmul %751, %737, %cst_267 {dimension_numbers = #tpu.dot_dimension_numbers<[1], [0], [0], [1], [0, 0, 1, 1], [], []>} : vector<8x8xbf16>, vector<8x8xbf16>, vector<8x8xf32> -> vector<8x8xf32>
    %753 = vector.extract_strided_slice %726 {offsets = [0, 8], sizes = [8, 8], strides = [1, 1]} : vector<8x32xf32> to vector<8x8xf32>
    %754 = arith.truncf %753 : vector<8x8xf32> to vector<8x8xbf16>
    %755 = vector.extract_strided_slice %727 {offsets = [0, 8], sizes = [8, 8], strides = [1, 1]} : vector<8x32xf32> to vector<8x8xf32>
    %756 = arith.truncf %755 : vector<8x8xf32> to vector<8x8xbf16>
    %757 = vector.extract_strided_slice %725 {offsets = [0, 8], sizes = [8, 8], strides = [1, 1]} : vector<8x32xf32> to vector<8x8xf32>
    %758 = arith.truncf %757 : vector<8x8xf32> to vector<8x8xbf16>
    %cst_268 = arith.constant dense<0.000000e+00> : vector<8x8xf32>
    %759 = tpu.matmul %754, %756, %cst_268 {dimension_numbers = #tpu.dot_dimension_numbers<[1], [1], [0], [0], [0, 0, 1, 0], [], []>} : vector<8x8xbf16>, vector<8x8xbf16>, vector<8x8xf32> -> vector<8x8xf32>
    %cst_269 = arith.constant 0.353553385 : f32
    %760 = vector.broadcast %cst_269 : f32 to vector<8x8xf32>
    %761 = arith.mulf %759, %760 : vector<8x8xf32>
    %cst_270 = arith.constant dense<0xFF800000> : vector<8xf32>
    %762 = vector.multi_reduction <maximumf>, %761, %cst_270 [1] : vector<8x8xf32> to vector<8xf32>
    %763 = vector.shape_cast %762 : vector<8xf32> to vector<8x1xf32>
    %764 = vector.broadcast %763 : vector<8x1xf32> to vector<8x8xf32>
    %765 = arith.subf %761, %764 : vector<8x8xf32>
    %766 = math.exp %765 : vector<8x8xf32>
    %cst_271 = arith.constant dense<0.000000e+00> : vector<8xf32>
    %767 = vector.multi_reduction <add>, %766, %cst_271 [1] : vector<8x8xf32> to vector<8xf32>
    %768 = vector.shape_cast %767 : vector<8xf32> to vector<8x1xf32>
    %769 = tpu.reciprocal %768 {approx = true} : vector<8x1xf32> -> vector<8x1xf32>
    %770 = vector.broadcast %769 : vector<8x1xf32> to vector<8x8xf32>
    %771 = arith.mulf %766, %770 : vector<8x8xf32>
    %772 = arith.truncf %771 : vector<8x8xf32> to vector<8x8xbf16>
    %cst_272 = arith.constant dense<0.000000e+00> : vector<8x8xf32>
    %773 = tpu.matmul %772, %758, %cst_272 {dimension_numbers = #tpu.dot_dimension_numbers<[1], [0], [0], [1], [0, 0, 1, 1], [], []>} : vector<8x8xbf16>, vector<8x8xbf16>, vector<8x8xf32> -> vector<8x8xf32>
    %774 = vector.extract_strided_slice %726 {offsets = [0, 16], sizes = [8, 8], strides = [1, 1]} : vector<8x32xf32> to vector<8x8xf32>
    %775 = arith.truncf %774 : vector<8x8xf32> to vector<8x8xbf16>
    %776 = vector.extract_strided_slice %727 {offsets = [0, 16], sizes = [8, 8], strides = [1, 1]} : vector<8x32xf32> to vector<8x8xf32>
    %777 = arith.truncf %776 : vector<8x8xf32> to vector<8x8xbf16>
    %778 = vector.extract_strided_slice %725 {offsets = [0, 16], sizes = [8, 8], strides = [1, 1]} : vector<8x32xf32> to vector<8x8xf32>
    %779 = arith.truncf %778 : vector<8x8xf32> to vector<8x8xbf16>
    %cst_273 = arith.constant dense<0.000000e+00> : vector<8x8xf32>
    %780 = tpu.matmul %775, %777, %cst_273 {dimension_numbers = #tpu.dot_dimension_numbers<[1], [1], [0], [0], [0, 0, 1, 0], [], []>} : vector<8x8xbf16>, vector<8x8xbf16>, vector<8x8xf32> -> vector<8x8xf32>
    %cst_274 = arith.constant 0.353553385 : f32
    %781 = vector.broadcast %cst_274 : f32 to vector<8x8xf32>
    %782 = arith.mulf %780, %781 : vector<8x8xf32>
    %cst_275 = arith.constant dense<0xFF800000> : vector<8xf32>
    %783 = vector.multi_reduction <maximumf>, %782, %cst_275 [1] : vector<8x8xf32> to vector<8xf32>
    %784 = vector.shape_cast %783 : vector<8xf32> to vector<8x1xf32>
    %785 = vector.broadcast %784 : vector<8x1xf32> to vector<8x8xf32>
    %786 = arith.subf %782, %785 : vector<8x8xf32>
    %787 = math.exp %786 : vector<8x8xf32>
    %cst_276 = arith.constant dense<0.000000e+00> : vector<8xf32>
    %788 = vector.multi_reduction <add>, %787, %cst_276 [1] : vector<8x8xf32> to vector<8xf32>
    %789 = vector.shape_cast %788 : vector<8xf32> to vector<8x1xf32>
    %790 = tpu.reciprocal %789 {approx = true} : vector<8x1xf32> -> vector<8x1xf32>
    %791 = vector.broadcast %790 : vector<8x1xf32> to vector<8x8xf32>
    %792 = arith.mulf %787, %791 : vector<8x8xf32>
    %793 = arith.truncf %792 : vector<8x8xf32> to vector<8x8xbf16>
    %cst_277 = arith.constant dense<0.000000e+00> : vector<8x8xf32>
    %794 = tpu.matmul %793, %779, %cst_277 {dimension_numbers = #tpu.dot_dimension_numbers<[1], [0], [0], [1], [0, 0, 1, 1], [], []>} : vector<8x8xbf16>, vector<8x8xbf16>, vector<8x8xf32> -> vector<8x8xf32>
    %795 = vector.extract_strided_slice %726 {offsets = [0, 24], sizes = [8, 8], strides = [1, 1]} : vector<8x32xf32> to vector<8x8xf32>
    %796 = arith.truncf %795 : vector<8x8xf32> to vector<8x8xbf16>
    %797 = vector.extract_strided_slice %727 {offsets = [0, 24], sizes = [8, 8], strides = [1, 1]} : vector<8x32xf32> to vector<8x8xf32>
    %798 = arith.truncf %797 : vector<8x8xf32> to vector<8x8xbf16>
    %799 = vector.extract_strided_slice %725 {offsets = [0, 24], sizes = [8, 8], strides = [1, 1]} : vector<8x32xf32> to vector<8x8xf32>
    %800 = arith.truncf %799 : vector<8x8xf32> to vector<8x8xbf16>
    %cst_278 = arith.constant dense<0.000000e+00> : vector<8x8xf32>
    %801 = tpu.matmul %796, %798, %cst_278 {dimension_numbers = #tpu.dot_dimension_numbers<[1], [1], [0], [0], [0, 0, 1, 0], [], []>} : vector<8x8xbf16>, vector<8x8xbf16>, vector<8x8xf32> -> vector<8x8xf32>
    %cst_279 = arith.constant 0.353553385 : f32
    %802 = vector.broadcast %cst_279 : f32 to vector<8x8xf32>
    %803 = arith.mulf %801, %802 : vector<8x8xf32>
    %cst_280 = arith.constant dense<0xFF800000> : vector<8xf32>
    %804 = vector.multi_reduction <maximumf>, %803, %cst_280 [1] : vector<8x8xf32> to vector<8xf32>
    %805 = vector.shape_cast %804 : vector<8xf32> to vector<8x1xf32>
    %806 = vector.broadcast %805 : vector<8x1xf32> to vector<8x8xf32>
    %807 = arith.subf %803, %806 : vector<8x8xf32>
    %808 = math.exp %807 : vector<8x8xf32>
    %cst_281 = arith.constant dense<0.000000e+00> : vector<8xf32>
    %809 = vector.multi_reduction <add>, %808, %cst_281 [1] : vector<8x8xf32> to vector<8xf32>
    %810 = vector.shape_cast %809 : vector<8xf32> to vector<8x1xf32>
    %811 = tpu.reciprocal %810 {approx = true} : vector<8x1xf32> -> vector<8x1xf32>
    %812 = vector.broadcast %811 : vector<8x1xf32> to vector<8x8xf32>
    %813 = arith.mulf %808, %812 : vector<8x8xf32>
    %814 = arith.truncf %813 : vector<8x8xf32> to vector<8x8xbf16>
    %cst_282 = arith.constant dense<0.000000e+00> : vector<8x8xf32>
    %815 = tpu.matmul %814, %800, %cst_282 {dimension_numbers = #tpu.dot_dimension_numbers<[1], [0], [0], [1], [0, 0, 1, 1], [], []>} : vector<8x8xbf16>, vector<8x8xbf16>, vector<8x8xf32> -> vector<8x8xf32>
    %816 = tpu.concatenate %752, %773, %794, %815 in 1 : vector<8x8xf32>, vector<8x8xf32>, vector<8x8xf32>, vector<8x8xf32> -> vector<8x32xf32>
    %817 = arith.truncf %816 : vector<8x32xf32> to vector<8x32xbf16>
    %cst_283 = arith.constant dense<0.000000e+00> : vector<8x32xf32>
    %818 = tpu.matmul %817, %729, %cst_283 {dimension_numbers = #tpu.dot_dimension_numbers<[1], [0], [0], [1], [0, 0, 1, 1], [], []>} : vector<8x32xbf16>, vector<32x32xbf16>, vector<8x32xf32> -> vector<8x32xf32>
    %819 = vector.broadcast %731 : vector<1x32xf32> to vector<8x32xf32>
    %820 = arith.addf %818, %819 : vector<8x32xf32>
    %821 = arith.addf %706, %820 : vector<8x32xf32>
    %822 = vector.extract_strided_slice %708 {offsets = [0, 0], sizes = [1, 32], strides = [1, 1]} : vector<6x32xf32> to vector<1x32xf32>
    %823 = vector.extract_strided_slice %708 {offsets = [1, 0], sizes = [1, 32], strides = [1, 1]} : vector<6x32xf32> to vector<1x32xf32>
    %cst_284 = arith.constant dense<0.000000e+00> : vector<8xf32>
    %824 = vector.multi_reduction <add>, %821, %cst_284 [1] : vector<8x32xf32> to vector<8xf32>
    %825 = vector.shape_cast %824 : vector<8xf32> to vector<8x1xf32>
    %cst_285 = arith.constant 3.200000e+01 : f32
    %826 = vector.broadcast %cst_285 : f32 to vector<8x1xf32>
    %827 = arith.divf %825, %826 : vector<8x1xf32>
    %828 = vector.broadcast %827 : vector<8x1xf32> to vector<8x32xf32>
    %829 = arith.subf %821, %828 : vector<8x32xf32>
    %830 = arith.mulf %829, %829 : vector<8x32xf32>
    %cst_286 = arith.constant dense<0.000000e+00> : vector<8xf32>
    %831 = vector.multi_reduction <add>, %830, %cst_286 [1] : vector<8x32xf32> to vector<8xf32>
    %832 = vector.shape_cast %831 : vector<8xf32> to vector<8x1xf32>
    %cst_287 = arith.constant 3.200000e+01 : f32
    %833 = vector.broadcast %cst_287 : f32 to vector<8x1xf32>
    %834 = arith.divf %832, %833 : vector<8x1xf32>
    %835 = vector.broadcast %827 : vector<8x1xf32> to vector<8x32xf32>
    %836 = arith.subf %821, %835 : vector<8x32xf32>
    %cst_288 = arith.constant 9.99999974E-6 : f32
    %837 = vector.broadcast %cst_288 : f32 to vector<8x1xf32>
    %838 = arith.addf %834, %837 : vector<8x1xf32>
    %839 = math.rsqrt %838 : vector<8x1xf32>
    %840 = vector.broadcast %839 : vector<8x1xf32> to vector<8x32xf32>
    %841 = arith.mulf %836, %840 : vector<8x32xf32>
    %842 = vector.broadcast %822 : vector<1x32xf32> to vector<8x32xf32>
    %843 = arith.mulf %841, %842 : vector<8x32xf32>
    %844 = vector.broadcast %823 : vector<1x32xf32> to vector<8x32xf32>
    %845 = arith.addf %843, %844 : vector<8x32xf32>
    %c1_289 = arith.constant 1 : index
    %c0_290 = arith.constant 0 : index
    %c0_291 = arith.constant 0 : index
    %846 = vector.load %arg21[%c1_289, %c0_290, %c0_291] : memref<2x32x96xbf16, #tpu.memory_space<vmem>>, vector<1x32x96xbf16>
    %847 = vector.shape_cast %846 : vector<1x32x96xbf16> to vector<32x96xbf16>
    %c1_292 = arith.constant 1 : index
    %c0_293 = arith.constant 0 : index
    %c0_294 = arith.constant 0 : index
    %848 = vector.load %arg22[%c1_292, %c0_293, %c0_294] : memref<2x1x96xf32, #tpu.memory_space<vmem>>, vector<1x1x96xf32>
    %849 = vector.shape_cast %848 : vector<1x1x96xf32> to vector<1x96xf32>
    %850 = arith.addf %845, %381 : vector<8x32xf32>
    %851 = vector.extract_strided_slice %847 {offsets = [0, 0], sizes = [32, 32], strides = [1, 1]} : vector<32x96xbf16> to vector<32x32xbf16>
    %852 = arith.truncf %850 : vector<8x32xf32> to vector<8x32xbf16>
    %cst_295 = arith.constant dense<0.000000e+00> : vector<8x32xf32>
    %853 = tpu.matmul %852, %851, %cst_295 {dimension_numbers = #tpu.dot_dimension_numbers<[1], [0], [0], [1], [0, 0, 1, 1], [], []>} : vector<8x32xbf16>, vector<32x32xbf16>, vector<8x32xf32> -> vector<8x32xf32>
    %854 = vector.extract_strided_slice %849 {offsets = [0, 0], sizes = [1, 32], strides = [1, 1]} : vector<1x96xf32> to vector<1x32xf32>
    %855 = vector.broadcast %854 : vector<1x32xf32> to vector<8x32xf32>
    %856 = arith.addf %853, %855 : vector<8x32xf32>
    %857 = arith.addf %380, %16 : vector<16x32xf32>
    %858 = vector.extract_strided_slice %847 {offsets = [0, 32], sizes = [32, 32], strides = [1, 1]} : vector<32x96xbf16> to vector<32x32xbf16>
    %859 = arith.truncf %857 : vector<16x32xf32> to vector<16x32xbf16>
    %cst_296 = arith.constant dense<0.000000e+00> : vector<16x32xf32>
    %860 = tpu.matmul %859, %858, %cst_296 {dimension_numbers = #tpu.dot_dimension_numbers<[1], [0], [0], [1], [0, 0, 1, 1], [], []>} : vector<16x32xbf16>, vector<32x32xbf16>, vector<16x32xf32> -> vector<16x32xf32>
    %861 = vector.extract_strided_slice %849 {offsets = [0, 32], sizes = [1, 32], strides = [1, 1]} : vector<1x96xf32> to vector<1x32xf32>
    %862 = vector.broadcast %861 : vector<1x32xf32> to vector<16x32xf32>
    %863 = arith.addf %860, %862 : vector<16x32xf32>
    %864 = vector.extract_strided_slice %847 {offsets = [0, 64], sizes = [32, 32], strides = [1, 1]} : vector<32x96xbf16> to vector<32x32xbf16>
    %865 = arith.truncf %380 : vector<16x32xf32> to vector<16x32xbf16>
    %cst_297 = arith.constant dense<0.000000e+00> : vector<16x32xf32>
    %866 = tpu.matmul %865, %864, %cst_297 {dimension_numbers = #tpu.dot_dimension_numbers<[1], [0], [0], [1], [0, 0, 1, 1], [], []>} : vector<16x32xbf16>, vector<32x32xbf16>, vector<16x32xf32> -> vector<16x32xf32>
    %867 = vector.extract_strided_slice %849 {offsets = [0, 64], sizes = [1, 32], strides = [1, 1]} : vector<1x96xf32> to vector<1x32xf32>
    %868 = vector.broadcast %867 : vector<1x32xf32> to vector<16x32xf32>
    %869 = arith.addf %866, %868 : vector<16x32xf32>
    %c1_298 = arith.constant 1 : index
    %c0_299 = arith.constant 0 : index
    %c0_300 = arith.constant 0 : index
    %870 = vector.load %arg23[%c1_298, %c0_299, %c0_300] : memref<2x32x32xbf16, #tpu.memory_space<vmem>>, vector<1x32x32xbf16>
    %871 = vector.shape_cast %870 : vector<1x32x32xbf16> to vector<32x32xbf16>
    %c1_301 = arith.constant 1 : index
    %c0_302 = arith.constant 0 : index
    %c0_303 = arith.constant 0 : index
    %872 = vector.load %arg24[%c1_301, %c0_302, %c0_303] : memref<2x1x32xf32, #tpu.memory_space<vmem>>, vector<1x1x32xf32>
    %873 = vector.shape_cast %872 : vector<1x1x32xf32> to vector<1x32xf32>
    %874 = vector.extract_strided_slice %856 {offsets = [0, 0], sizes = [8, 8], strides = [1, 1]} : vector<8x32xf32> to vector<8x8xf32>
    %875 = arith.truncf %874 : vector<8x8xf32> to vector<8x8xbf16>
    %876 = vector.extract_strided_slice %863 {offsets = [0, 0], sizes = [16, 8], strides = [1, 1]} : vector<16x32xf32> to vector<16x8xf32>
    %877 = arith.truncf %876 : vector<16x8xf32> to vector<16x8xbf16>
    %878 = vector.extract_strided_slice %869 {offsets = [0, 0], sizes = [16, 8], strides = [1, 1]} : vector<16x32xf32> to vector<16x8xf32>
    %879 = arith.truncf %878 : vector<16x8xf32> to vector<16x8xbf16>
    %cst_304 = arith.constant dense<0.000000e+00> : vector<8x16xf32>
    %880 = tpu.matmul %875, %877, %cst_304 {dimension_numbers = #tpu.dot_dimension_numbers<[1], [1], [0], [0], [0, 0, 1, 0], [], []>} : vector<8x8xbf16>, vector<16x8xbf16>, vector<8x16xf32> -> vector<8x16xf32>
    %cst_305 = arith.constant 0.353553385 : f32
    %881 = vector.broadcast %cst_305 : f32 to vector<8x16xf32>
    %882 = arith.mulf %880, %881 : vector<8x16xf32>
    %cst_306 = arith.constant dense<0xFF800000> : vector<8xf32>
    %883 = vector.multi_reduction <maximumf>, %882, %cst_306 [1] : vector<8x16xf32> to vector<8xf32>
    %884 = vector.shape_cast %883 : vector<8xf32> to vector<8x1xf32>
    %885 = vector.broadcast %884 : vector<8x1xf32> to vector<8x16xf32>
    %886 = arith.subf %882, %885 : vector<8x16xf32>
    %887 = math.exp %886 : vector<8x16xf32>
    %cst_307 = arith.constant dense<0.000000e+00> : vector<8xf32>
    %888 = vector.multi_reduction <add>, %887, %cst_307 [1] : vector<8x16xf32> to vector<8xf32>
    %889 = vector.shape_cast %888 : vector<8xf32> to vector<8x1xf32>
    %890 = tpu.reciprocal %889 {approx = true} : vector<8x1xf32> -> vector<8x1xf32>
    %891 = vector.broadcast %890 : vector<8x1xf32> to vector<8x16xf32>
    %892 = arith.mulf %887, %891 : vector<8x16xf32>
    %893 = arith.truncf %892 : vector<8x16xf32> to vector<8x16xbf16>
    %cst_308 = arith.constant dense<0.000000e+00> : vector<8x8xf32>
    %894 = tpu.matmul %893, %879, %cst_308 {dimension_numbers = #tpu.dot_dimension_numbers<[1], [0], [0], [1], [0, 0, 1, 1], [], []>} : vector<8x16xbf16>, vector<16x8xbf16>, vector<8x8xf32> -> vector<8x8xf32>
    %895 = vector.extract_strided_slice %856 {offsets = [0, 8], sizes = [8, 8], strides = [1, 1]} : vector<8x32xf32> to vector<8x8xf32>
    %896 = arith.truncf %895 : vector<8x8xf32> to vector<8x8xbf16>
    %897 = vector.extract_strided_slice %863 {offsets = [0, 8], sizes = [16, 8], strides = [1, 1]} : vector<16x32xf32> to vector<16x8xf32>
    %898 = arith.truncf %897 : vector<16x8xf32> to vector<16x8xbf16>
    %899 = vector.extract_strided_slice %869 {offsets = [0, 8], sizes = [16, 8], strides = [1, 1]} : vector<16x32xf32> to vector<16x8xf32>
    %900 = arith.truncf %899 : vector<16x8xf32> to vector<16x8xbf16>
    %cst_309 = arith.constant dense<0.000000e+00> : vector<8x16xf32>
    %901 = tpu.matmul %896, %898, %cst_309 {dimension_numbers = #tpu.dot_dimension_numbers<[1], [1], [0], [0], [0, 0, 1, 0], [], []>} : vector<8x8xbf16>, vector<16x8xbf16>, vector<8x16xf32> -> vector<8x16xf32>
    %cst_310 = arith.constant 0.353553385 : f32
    %902 = vector.broadcast %cst_310 : f32 to vector<8x16xf32>
    %903 = arith.mulf %901, %902 : vector<8x16xf32>
    %cst_311 = arith.constant dense<0xFF800000> : vector<8xf32>
    %904 = vector.multi_reduction <maximumf>, %903, %cst_311 [1] : vector<8x16xf32> to vector<8xf32>
    %905 = vector.shape_cast %904 : vector<8xf32> to vector<8x1xf32>
    %906 = vector.broadcast %905 : vector<8x1xf32> to vector<8x16xf32>
    %907 = arith.subf %903, %906 : vector<8x16xf32>
    %908 = math.exp %907 : vector<8x16xf32>
    %cst_312 = arith.constant dense<0.000000e+00> : vector<8xf32>
    %909 = vector.multi_reduction <add>, %908, %cst_312 [1] : vector<8x16xf32> to vector<8xf32>
    %910 = vector.shape_cast %909 : vector<8xf32> to vector<8x1xf32>
    %911 = tpu.reciprocal %910 {approx = true} : vector<8x1xf32> -> vector<8x1xf32>
    %912 = vector.broadcast %911 : vector<8x1xf32> to vector<8x16xf32>
    %913 = arith.mulf %908, %912 : vector<8x16xf32>
    %914 = arith.truncf %913 : vector<8x16xf32> to vector<8x16xbf16>
    %cst_313 = arith.constant dense<0.000000e+00> : vector<8x8xf32>
    %915 = tpu.matmul %914, %900, %cst_313 {dimension_numbers = #tpu.dot_dimension_numbers<[1], [0], [0], [1], [0, 0, 1, 1], [], []>} : vector<8x16xbf16>, vector<16x8xbf16>, vector<8x8xf32> -> vector<8x8xf32>
    %916 = vector.extract_strided_slice %856 {offsets = [0, 16], sizes = [8, 8], strides = [1, 1]} : vector<8x32xf32> to vector<8x8xf32>
    %917 = arith.truncf %916 : vector<8x8xf32> to vector<8x8xbf16>
    %918 = vector.extract_strided_slice %863 {offsets = [0, 16], sizes = [16, 8], strides = [1, 1]} : vector<16x32xf32> to vector<16x8xf32>
    %919 = arith.truncf %918 : vector<16x8xf32> to vector<16x8xbf16>
    %920 = vector.extract_strided_slice %869 {offsets = [0, 16], sizes = [16, 8], strides = [1, 1]} : vector<16x32xf32> to vector<16x8xf32>
    %921 = arith.truncf %920 : vector<16x8xf32> to vector<16x8xbf16>
    %cst_314 = arith.constant dense<0.000000e+00> : vector<8x16xf32>
    %922 = tpu.matmul %917, %919, %cst_314 {dimension_numbers = #tpu.dot_dimension_numbers<[1], [1], [0], [0], [0, 0, 1, 0], [], []>} : vector<8x8xbf16>, vector<16x8xbf16>, vector<8x16xf32> -> vector<8x16xf32>
    %cst_315 = arith.constant 0.353553385 : f32
    %923 = vector.broadcast %cst_315 : f32 to vector<8x16xf32>
    %924 = arith.mulf %922, %923 : vector<8x16xf32>
    %cst_316 = arith.constant dense<0xFF800000> : vector<8xf32>
    %925 = vector.multi_reduction <maximumf>, %924, %cst_316 [1] : vector<8x16xf32> to vector<8xf32>
    %926 = vector.shape_cast %925 : vector<8xf32> to vector<8x1xf32>
    %927 = vector.broadcast %926 : vector<8x1xf32> to vector<8x16xf32>
    %928 = arith.subf %924, %927 : vector<8x16xf32>
    %929 = math.exp %928 : vector<8x16xf32>
    %cst_317 = arith.constant dense<0.000000e+00> : vector<8xf32>
    %930 = vector.multi_reduction <add>, %929, %cst_317 [1] : vector<8x16xf32> to vector<8xf32>
    %931 = vector.shape_cast %930 : vector<8xf32> to vector<8x1xf32>
    %932 = tpu.reciprocal %931 {approx = true} : vector<8x1xf32> -> vector<8x1xf32>
    %933 = vector.broadcast %932 : vector<8x1xf32> to vector<8x16xf32>
    %934 = arith.mulf %929, %933 : vector<8x16xf32>
    %935 = arith.truncf %934 : vector<8x16xf32> to vector<8x16xbf16>
    %cst_318 = arith.constant dense<0.000000e+00> : vector<8x8xf32>
    %936 = tpu.matmul %935, %921, %cst_318 {dimension_numbers = #tpu.dot_dimension_numbers<[1], [0], [0], [1], [0, 0, 1, 1], [], []>} : vector<8x16xbf16>, vector<16x8xbf16>, vector<8x8xf32> -> vector<8x8xf32>
    %937 = vector.extract_strided_slice %856 {offsets = [0, 24], sizes = [8, 8], strides = [1, 1]} : vector<8x32xf32> to vector<8x8xf32>
    %938 = arith.truncf %937 : vector<8x8xf32> to vector<8x8xbf16>
    %939 = vector.extract_strided_slice %863 {offsets = [0, 24], sizes = [16, 8], strides = [1, 1]} : vector<16x32xf32> to vector<16x8xf32>
    %940 = arith.truncf %939 : vector<16x8xf32> to vector<16x8xbf16>
    %941 = vector.extract_strided_slice %869 {offsets = [0, 24], sizes = [16, 8], strides = [1, 1]} : vector<16x32xf32> to vector<16x8xf32>
    %942 = arith.truncf %941 : vector<16x8xf32> to vector<16x8xbf16>
    %cst_319 = arith.constant dense<0.000000e+00> : vector<8x16xf32>
    %943 = tpu.matmul %938, %940, %cst_319 {dimension_numbers = #tpu.dot_dimension_numbers<[1], [1], [0], [0], [0, 0, 1, 0], [], []>} : vector<8x8xbf16>, vector<16x8xbf16>, vector<8x16xf32> -> vector<8x16xf32>
    %cst_320 = arith.constant 0.353553385 : f32
    %944 = vector.broadcast %cst_320 : f32 to vector<8x16xf32>
    %945 = arith.mulf %943, %944 : vector<8x16xf32>
    %cst_321 = arith.constant dense<0xFF800000> : vector<8xf32>
    %946 = vector.multi_reduction <maximumf>, %945, %cst_321 [1] : vector<8x16xf32> to vector<8xf32>
    %947 = vector.shape_cast %946 : vector<8xf32> to vector<8x1xf32>
    %948 = vector.broadcast %947 : vector<8x1xf32> to vector<8x16xf32>
    %949 = arith.subf %945, %948 : vector<8x16xf32>
    %950 = math.exp %949 : vector<8x16xf32>
    %cst_322 = arith.constant dense<0.000000e+00> : vector<8xf32>
    %951 = vector.multi_reduction <add>, %950, %cst_322 [1] : vector<8x16xf32> to vector<8xf32>
    %952 = vector.shape_cast %951 : vector<8xf32> to vector<8x1xf32>
    %953 = tpu.reciprocal %952 {approx = true} : vector<8x1xf32> -> vector<8x1xf32>
    %954 = vector.broadcast %953 : vector<8x1xf32> to vector<8x16xf32>
    %955 = arith.mulf %950, %954 : vector<8x16xf32>
    %956 = arith.truncf %955 : vector<8x16xf32> to vector<8x16xbf16>
    %cst_323 = arith.constant dense<0.000000e+00> : vector<8x8xf32>
    %957 = tpu.matmul %956, %942, %cst_323 {dimension_numbers = #tpu.dot_dimension_numbers<[1], [0], [0], [1], [0, 0, 1, 1], [], []>} : vector<8x16xbf16>, vector<16x8xbf16>, vector<8x8xf32> -> vector<8x8xf32>
    %958 = tpu.concatenate %894, %915, %936, %957 in 1 : vector<8x8xf32>, vector<8x8xf32>, vector<8x8xf32>, vector<8x8xf32> -> vector<8x32xf32>
    %959 = arith.truncf %958 : vector<8x32xf32> to vector<8x32xbf16>
    %cst_324 = arith.constant dense<0.000000e+00> : vector<8x32xf32>
    %960 = tpu.matmul %959, %871, %cst_324 {dimension_numbers = #tpu.dot_dimension_numbers<[1], [0], [0], [1], [0, 0, 1, 1], [], []>} : vector<8x32xbf16>, vector<32x32xbf16>, vector<8x32xf32> -> vector<8x32xf32>
    %961 = vector.broadcast %873 : vector<1x32xf32> to vector<8x32xf32>
    %962 = arith.addf %960, %961 : vector<8x32xf32>
    %963 = arith.addf %845, %962 : vector<8x32xf32>
    %964 = vector.extract_strided_slice %708 {offsets = [2, 0], sizes = [1, 32], strides = [1, 1]} : vector<6x32xf32> to vector<1x32xf32>
    %965 = vector.extract_strided_slice %708 {offsets = [3, 0], sizes = [1, 32], strides = [1, 1]} : vector<6x32xf32> to vector<1x32xf32>
    %cst_325 = arith.constant dense<0.000000e+00> : vector<8xf32>
    %966 = vector.multi_reduction <add>, %963, %cst_325 [1] : vector<8x32xf32> to vector<8xf32>
    %967 = vector.shape_cast %966 : vector<8xf32> to vector<8x1xf32>
    %cst_326 = arith.constant 3.200000e+01 : f32
    %968 = vector.broadcast %cst_326 : f32 to vector<8x1xf32>
    %969 = arith.divf %967, %968 : vector<8x1xf32>
    %970 = vector.broadcast %969 : vector<8x1xf32> to vector<8x32xf32>
    %971 = arith.subf %963, %970 : vector<8x32xf32>
    %972 = arith.mulf %971, %971 : vector<8x32xf32>
    %cst_327 = arith.constant dense<0.000000e+00> : vector<8xf32>
    %973 = vector.multi_reduction <add>, %972, %cst_327 [1] : vector<8x32xf32> to vector<8xf32>
    %974 = vector.shape_cast %973 : vector<8xf32> to vector<8x1xf32>
    %cst_328 = arith.constant 3.200000e+01 : f32
    %975 = vector.broadcast %cst_328 : f32 to vector<8x1xf32>
    %976 = arith.divf %974, %975 : vector<8x1xf32>
    %977 = vector.broadcast %969 : vector<8x1xf32> to vector<8x32xf32>
    %978 = arith.subf %963, %977 : vector<8x32xf32>
    %cst_329 = arith.constant 9.99999974E-6 : f32
    %979 = vector.broadcast %cst_329 : f32 to vector<8x1xf32>
    %980 = arith.addf %976, %979 : vector<8x1xf32>
    %981 = math.rsqrt %980 : vector<8x1xf32>
    %982 = vector.broadcast %981 : vector<8x1xf32> to vector<8x32xf32>
    %983 = arith.mulf %978, %982 : vector<8x32xf32>
    %984 = vector.broadcast %964 : vector<1x32xf32> to vector<8x32xf32>
    %985 = arith.mulf %983, %984 : vector<8x32xf32>
    %986 = vector.broadcast %965 : vector<1x32xf32> to vector<8x32xf32>
    %987 = arith.addf %985, %986 : vector<8x32xf32>
    %c1_330 = arith.constant 1 : index
    %c0_331 = arith.constant 0 : index
    %c0_332 = arith.constant 0 : index
    %988 = vector.load %arg25[%c1_330, %c0_331, %c0_332] : memref<2x32x64xbf16, #tpu.memory_space<vmem>>, vector<1x32x64xbf16>
    %989 = vector.shape_cast %988 : vector<1x32x64xbf16> to vector<32x64xbf16>
    %990 = arith.truncf %987 : vector<8x32xf32> to vector<8x32xbf16>
    %cst_333 = arith.constant dense<0.000000e+00> : vector<8x64xf32>
    %991 = tpu.matmul %990, %989, %cst_333 {dimension_numbers = #tpu.dot_dimension_numbers<[1], [0], [0], [1], [0, 0, 1, 1], [], []>} : vector<8x32xbf16>, vector<32x64xbf16>, vector<8x64xf32> -> vector<8x64xf32>
    %c1_334 = arith.constant 1 : index
    %c0_335 = arith.constant 0 : index
    %c0_336 = arith.constant 0 : index
    %992 = vector.load %arg26[%c1_334, %c0_335, %c0_336] : memref<2x1x64xf32, #tpu.memory_space<vmem>>, vector<1x1x64xf32>
    %993 = vector.shape_cast %992 : vector<1x1x64xf32> to vector<1x64xf32>
    %994 = vector.broadcast %993 : vector<1x64xf32> to vector<8x64xf32>
    %995 = arith.addf %991, %994 : vector<8x64xf32>
    %cst_337 = arith.constant 0.000000e+00 : f32
    %996 = vector.broadcast %cst_337 : f32 to vector<8x64xf32>
    %997 = arith.maximumf %995, %996 : vector<8x64xf32>
    %c1_338 = arith.constant 1 : index
    %c0_339 = arith.constant 0 : index
    %c0_340 = arith.constant 0 : index
    %998 = vector.load %arg27[%c1_338, %c0_339, %c0_340] : memref<2x64x32xbf16, #tpu.memory_space<vmem>>, vector<1x64x32xbf16>
    %999 = vector.shape_cast %998 : vector<1x64x32xbf16> to vector<64x32xbf16>
    %1000 = arith.truncf %997 : vector<8x64xf32> to vector<8x64xbf16>
    %cst_341 = arith.constant dense<0.000000e+00> : vector<8x32xf32>
    %1001 = tpu.matmul %1000, %999, %cst_341 {dimension_numbers = #tpu.dot_dimension_numbers<[1], [0], [0], [1], [0, 0, 1, 1], [], []>} : vector<8x64xbf16>, vector<64x32xbf16>, vector<8x32xf32> -> vector<8x32xf32>
    %c1_342 = arith.constant 1 : index
    %c0_343 = arith.constant 0 : index
    %c0_344 = arith.constant 0 : index
    %1002 = vector.load %arg28[%c1_342, %c0_343, %c0_344] : memref<2x1x32xf32, #tpu.memory_space<vmem>>, vector<1x1x32xf32>
    %1003 = vector.shape_cast %1002 : vector<1x1x32xf32> to vector<1x32xf32>
    %1004 = vector.broadcast %1003 : vector<1x32xf32> to vector<8x32xf32>
    %1005 = arith.addf %1001, %1004 : vector<8x32xf32>
    %1006 = arith.addf %987, %1005 : vector<8x32xf32>
    %1007 = vector.extract_strided_slice %708 {offsets = [4, 0], sizes = [1, 32], strides = [1, 1]} : vector<6x32xf32> to vector<1x32xf32>
    %1008 = vector.extract_strided_slice %708 {offsets = [5, 0], sizes = [1, 32], strides = [1, 1]} : vector<6x32xf32> to vector<1x32xf32>
    %cst_345 = arith.constant dense<0.000000e+00> : vector<8xf32>
    %1009 = vector.multi_reduction <add>, %1006, %cst_345 [1] : vector<8x32xf32> to vector<8xf32>
    %1010 = vector.shape_cast %1009 : vector<8xf32> to vector<8x1xf32>
    %cst_346 = arith.constant 3.200000e+01 : f32
    %1011 = vector.broadcast %cst_346 : f32 to vector<8x1xf32>
    %1012 = arith.divf %1010, %1011 : vector<8x1xf32>
    %1013 = vector.broadcast %1012 : vector<8x1xf32> to vector<8x32xf32>
    %1014 = arith.subf %1006, %1013 : vector<8x32xf32>
    %1015 = arith.mulf %1014, %1014 : vector<8x32xf32>
    %cst_347 = arith.constant dense<0.000000e+00> : vector<8xf32>
    %1016 = vector.multi_reduction <add>, %1015, %cst_347 [1] : vector<8x32xf32> to vector<8xf32>
    %1017 = vector.shape_cast %1016 : vector<8xf32> to vector<8x1xf32>
    %cst_348 = arith.constant 3.200000e+01 : f32
    %1018 = vector.broadcast %cst_348 : f32 to vector<8x1xf32>
    %1019 = arith.divf %1017, %1018 : vector<8x1xf32>
    %1020 = vector.broadcast %1012 : vector<8x1xf32> to vector<8x32xf32>
    %1021 = arith.subf %1006, %1020 : vector<8x32xf32>
    %cst_349 = arith.constant 9.99999974E-6 : f32
    %1022 = vector.broadcast %cst_349 : f32 to vector<8x1xf32>
    %1023 = arith.addf %1019, %1022 : vector<8x1xf32>
    %1024 = math.rsqrt %1023 : vector<8x1xf32>
    %1025 = vector.broadcast %1024 : vector<8x1xf32> to vector<8x32xf32>
    %1026 = arith.mulf %1021, %1025 : vector<8x32xf32>
    %1027 = vector.broadcast %1007 : vector<1x32xf32> to vector<8x32xf32>
    %1028 = arith.mulf %1026, %1027 : vector<8x32xf32>
    %1029 = vector.broadcast %1008 : vector<1x32xf32> to vector<8x32xf32>
    %1030 = arith.addf %1028, %1029 : vector<8x32xf32>
    %c0_350 = arith.constant 0 : index
    %c0_351 = arith.constant 0 : index
    %1031 = vector.load %arg30[%c0_350, %c0_351] : memref<2x32xf32, #tpu.memory_space<vmem>>, vector<2x32xf32>
    %1032 = vector.extract_strided_slice %1031 {offsets = [0, 0], sizes = [1, 32], strides = [1, 1]} : vector<2x32xf32> to vector<1x32xf32>
    %1033 = vector.extract_strided_slice %1031 {offsets = [1, 0], sizes = [1, 32], strides = [1, 1]} : vector<2x32xf32> to vector<1x32xf32>
    %cst_352 = arith.constant dense<0.000000e+00> : vector<8xf32>
    %1034 = vector.multi_reduction <add>, %1030, %cst_352 [1] : vector<8x32xf32> to vector<8xf32>
    %1035 = vector.shape_cast %1034 : vector<8xf32> to vector<8x1xf32>
    %cst_353 = arith.constant 3.200000e+01 : f32
    %1036 = vector.broadcast %cst_353 : f32 to vector<8x1xf32>
    %1037 = arith.divf %1035, %1036 : vector<8x1xf32>
    %1038 = vector.broadcast %1037 : vector<8x1xf32> to vector<8x32xf32>
    %1039 = arith.subf %1030, %1038 : vector<8x32xf32>
    %1040 = arith.mulf %1039, %1039 : vector<8x32xf32>
    %cst_354 = arith.constant dense<0.000000e+00> : vector<8xf32>
    %1041 = vector.multi_reduction <add>, %1040, %cst_354 [1] : vector<8x32xf32> to vector<8xf32>
    %1042 = vector.shape_cast %1041 : vector<8xf32> to vector<8x1xf32>
    %cst_355 = arith.constant 3.200000e+01 : f32
    %1043 = vector.broadcast %cst_355 : f32 to vector<8x1xf32>
    %1044 = arith.divf %1042, %1043 : vector<8x1xf32>
    %1045 = vector.broadcast %1037 : vector<8x1xf32> to vector<8x32xf32>
    %1046 = arith.subf %1030, %1045 : vector<8x32xf32>
    %cst_356 = arith.constant 9.99999974E-6 : f32
    %1047 = vector.broadcast %cst_356 : f32 to vector<8x1xf32>
    %1048 = arith.addf %1044, %1047 : vector<8x1xf32>
    %1049 = math.rsqrt %1048 : vector<8x1xf32>
    %1050 = vector.broadcast %1049 : vector<8x1xf32> to vector<8x32xf32>
    %1051 = arith.mulf %1046, %1050 : vector<8x32xf32>
    %1052 = vector.broadcast %1032 : vector<1x32xf32> to vector<8x32xf32>
    %1053 = arith.mulf %1051, %1052 : vector<8x32xf32>
    %1054 = vector.broadcast %1033 : vector<1x32xf32> to vector<8x32xf32>
    %1055 = arith.addf %1053, %1054 : vector<8x32xf32>
    %c0_357 = arith.constant 0 : index
    %c0_358 = arith.constant 0 : index
    %1056 = vector.load %arg31[%c0_357, %c0_358] : memref<32x128xbf16, #tpu.memory_space<vmem>>, vector<32x128xbf16>
    %1057 = arith.truncf %1055 : vector<8x32xf32> to vector<8x32xbf16>
    %cst_359 = arith.constant dense<0.000000e+00> : vector<8x128xf32>
    %1058 = tpu.matmul %1057, %1056, %cst_359 {dimension_numbers = #tpu.dot_dimension_numbers<[1], [0], [0], [1], [0, 0, 1, 1], [], []>} : vector<8x32xbf16>, vector<32x128xbf16>, vector<8x128xf32> -> vector<8x128xf32>
    %c0_360 = arith.constant 0 : index
    %c0_361 = arith.constant 0 : index
    %1059 = vector.load %arg32[%c0_360, %c0_361] : memref<1x128xf32, #tpu.memory_space<vmem>>, vector<1x128xf32>
    %1060 = vector.broadcast %1059 : vector<1x128xf32> to vector<8x128xf32>
    %1061 = arith.addf %1058, %1060 : vector<8x128xf32>
    %c0_362 = arith.constant 0 : index
    %c0_363 = arith.constant 0 : index
    %c0_364 = arith.constant 0 : index
    %1062 = vector.load %arg39[%c0_362, %c0_363, %c0_364] : memref<1x8x128xf32, #tpu.memory_space<vmem>>, vector<1x8x128xf32>
    %1063 = vector.shape_cast %1062 : vector<1x8x128xf32> to vector<8x128xf32>
    %1064 = vector.shape_cast %1061 : vector<8x128xf32> to vector<1x8x128xf32>
    tpu.vector_store %arg39[%c0_362, %c0_363, %c0_364], %1064 {strides = array<i32>} : memref<1x8x128xf32, #tpu.memory_space<vmem>>, vector<1x8x128xf32>,
    %c0_365 = arith.constant 0 : index
    %c0_366 = arith.constant 0 : index
    %1065 = vector.load %arg33[%c0_365, %c0_366] : memref<32x32xbf16, #tpu.memory_space<vmem>>, vector<32x32xbf16>
    %1066 = arith.truncf %1055 : vector<8x32xf32> to vector<8x32xbf16>
    %cst_367 = arith.constant dense<0.000000e+00> : vector<8x32xf32>
    %1067 = tpu.matmul %1066, %1065, %cst_367 {dimension_numbers = #tpu.dot_dimension_numbers<[1], [0], [0], [1], [0, 0, 1, 1], [], []>} : vector<8x32xbf16>, vector<32x32xbf16>, vector<8x32xf32> -> vector<8x32xf32>
    %c0_368 = arith.constant 0 : index
    %c0_369 = arith.constant 0 : index
    %1068 = vector.load %arg34[%c0_368, %c0_369] : memref<1x32xf32, #tpu.memory_space<vmem>>, vector<1x32xf32>
    %1069 = vector.broadcast %1068 : vector<1x32xf32> to vector<8x32xf32>
    %1070 = arith.addf %1067, %1069 : vector<8x32xf32>
    %cst_370 = arith.constant 0.000000e+00 : f32
    %1071 = vector.broadcast %cst_370 : f32 to vector<8x32xf32>
    %1072 = arith.maximumf %1070, %1071 : vector<8x32xf32>
    %c0_371 = arith.constant 0 : index
    %c0_372 = arith.constant 0 : index
    %1073 = vector.load %arg35[%c0_371, %c0_372] : memref<32x32xbf16, #tpu.memory_space<vmem>>, vector<32x32xbf16>
    %1074 = arith.truncf %1072 : vector<8x32xf32> to vector<8x32xbf16>
    %cst_373 = arith.constant dense<0.000000e+00> : vector<8x32xf32>
    %1075 = tpu.matmul %1074, %1073, %cst_373 {dimension_numbers = #tpu.dot_dimension_numbers<[1], [0], [0], [1], [0, 0, 1, 1], [], []>} : vector<8x32xbf16>, vector<32x32xbf16>, vector<8x32xf32> -> vector<8x32xf32>
    %c0_374 = arith.constant 0 : index
    %c0_375 = arith.constant 0 : index
    %1076 = vector.load %arg36[%c0_374, %c0_375] : memref<1x32xf32, #tpu.memory_space<vmem>>, vector<1x32xf32>
    %1077 = vector.broadcast %1076 : vector<1x32xf32> to vector<8x32xf32>
    %1078 = arith.addf %1075, %1077 : vector<8x32xf32>
    %cst_376 = arith.constant 0.000000e+00 : f32
    %1079 = vector.broadcast %cst_376 : f32 to vector<8x32xf32>
    %1080 = arith.maximumf %1078, %1079 : vector<8x32xf32>
    %c0_377 = arith.constant 0 : index
    %c0_378 = arith.constant 0 : index
    %1081 = vector.load %arg37[%c0_377, %c0_378] : memref<32x128xbf16, #tpu.memory_space<vmem>>, vector<32x128xbf16>
    %1082 = arith.truncf %1080 : vector<8x32xf32> to vector<8x32xbf16>
    %cst_379 = arith.constant dense<0.000000e+00> : vector<8x128xf32>
    %1083 = tpu.matmul %1082, %1081, %cst_379 {dimension_numbers = #tpu.dot_dimension_numbers<[1], [0], [0], [1], [0, 0, 1, 1], [], []>} : vector<8x32xbf16>, vector<32x128xbf16>, vector<8x128xf32> -> vector<8x128xf32>
    %c0_380 = arith.constant 0 : index
    %c0_381 = arith.constant 0 : index
    %1084 = vector.load %arg38[%c0_380, %c0_381] : memref<1x128xf32, #tpu.memory_space<vmem>>, vector<1x128xf32>
    %1085 = vector.broadcast %1084 : vector<1x128xf32> to vector<8x128xf32>
    %1086 = arith.addf %1083, %1085 : vector<8x128xf32>
    %1087 = arith.negf %1086 : vector<8x128xf32>
    %1088 = math.exp %1087 : vector<8x128xf32>
    %cst_382 = arith.constant 1.000000e+00 : f32
    %1089 = vector.broadcast %cst_382 : f32 to vector<8x128xf32>
    %1090 = arith.addf %1089, %1088 : vector<8x128xf32>
    %1091 = arith.divf %1089, %1090 : vector<8x128xf32>
    %c0_383 = arith.constant 0 : index
    %c0_384 = arith.constant 0 : index
    %c0_385 = arith.constant 0 : index
    %1092 = vector.load %arg40[%c0_383, %c0_384, %c0_385] : memref<1x8x128xf32, #tpu.memory_space<vmem>>, vector<1x8x128xf32>
    %1093 = vector.shape_cast %1092 : vector<1x8x128xf32> to vector<8x128xf32>
    %1094 = vector.shape_cast %1091 : vector<8x128xf32> to vector<1x8x128xf32>
    tpu.vector_store %arg40[%c0_383, %c0_384, %c0_385], %1094 {strides = array<i32>} : memref<1x8x128xf32, #tpu.memory_space<vmem>>, vector<1x8x128xf32>,
    return
  }
  func.func @transform_0(%arg0: i32) -> (i32, i32, i32) {
    %c0_i32 = arith.constant 0 : i32
    %c0_i32_0 = arith.constant 0 : i32
    %c0_i32_1 = arith.constant 0 : i32
    return %arg0, %c0_i32, %c0_i32_0 : i32, i32, i32
  }
  func.func @transform_1(%arg0: i32) -> (i32, i32) {
    %c0_i32 = arith.constant 0 : i32
    %c0_i32_0 = arith.constant 0 : i32
    %c0_i32_1 = arith.constant 0 : i32
    return %c0_i32, %c0_i32_0 : i32, i32
  }
  func.func @transform_2(%arg0: i32) -> (i32, i32) {
    %c0_i32 = arith.constant 0 : i32
    %c0_i32_0 = arith.constant 0 : i32
    %c0_i32_1 = arith.constant 0 : i32
    return %c0_i32, %c0_i32_0 : i32, i32
  }
  func.func @transform_3(%arg0: i32) -> (i32, i32) {
    %c0_i32 = arith.constant 0 : i32
    %c0_i32_0 = arith.constant 0 : i32
    %c0_i32_1 = arith.constant 0 : i32
    return %c0_i32, %c0_i32_0 : i32, i32
  }
  func.func @transform_4(%arg0: i32) -> (i32, i32) {
    %c0_i32 = arith.constant 0 : i32
    %c0_i32_0 = arith.constant 0 : i32
    %c0_i32_1 = arith.constant 0 : i32
    return %c0_i32, %c0_i32_0 : i32, i32
  }
  func.func @transform_5(%arg0: i32) -> (i32, i32) {
    %c0_i32 = arith.constant 0 : i32
    %c0_i32_0 = arith.constant 0 : i32
    %c0_i32_1 = arith.constant 0 : i32
    return %c0_i32, %c0_i32_0 : i32, i32
  }
  func.func @transform_6(%arg0: i32) -> (i32, i32) {
    %c0_i32 = arith.constant 0 : i32
    %c0_i32_0 = arith.constant 0 : i32
    %c0_i32_1 = arith.constant 0 : i32
    return %c0_i32, %c0_i32_0 : i32, i32
  }
  func.func @transform_7(%arg0: i32) -> (i32, i32, i32) {
    %c0_i32 = arith.constant 0 : i32
    %c0_i32_0 = arith.constant 0 : i32
    %c0_i32_1 = arith.constant 0 : i32
    %c0_i32_2 = arith.constant 0 : i32
    return %c0_i32, %c0_i32_0, %c0_i32_1 : i32, i32, i32
  }
  func.func @transform_8(%arg0: i32) -> (i32, i32, i32) {
    %c0_i32 = arith.constant 0 : i32
    %c0_i32_0 = arith.constant 0 : i32
    %c0_i32_1 = arith.constant 0 : i32
    %c0_i32_2 = arith.constant 0 : i32
    return %c0_i32, %c0_i32_0, %c0_i32_1 : i32, i32, i32
  }
  func.func @transform_9(%arg0: i32) -> (i32, i32, i32) {
    %c0_i32 = arith.constant 0 : i32
    %c0_i32_0 = arith.constant 0 : i32
    %c0_i32_1 = arith.constant 0 : i32
    %c0_i32_2 = arith.constant 0 : i32
    return %c0_i32, %c0_i32_0, %c0_i32_1 : i32, i32, i32
  }
  func.func @transform_10(%arg0: i32) -> (i32, i32, i32) {
    %c0_i32 = arith.constant 0 : i32
    %c0_i32_0 = arith.constant 0 : i32
    %c0_i32_1 = arith.constant 0 : i32
    %c0_i32_2 = arith.constant 0 : i32
    return %c0_i32, %c0_i32_0, %c0_i32_1 : i32, i32, i32
  }
  func.func @transform_11(%arg0: i32) -> (i32, i32, i32) {
    %c0_i32 = arith.constant 0 : i32
    %c0_i32_0 = arith.constant 0 : i32
    %c0_i32_1 = arith.constant 0 : i32
    %c0_i32_2 = arith.constant 0 : i32
    return %c0_i32, %c0_i32_0, %c0_i32_1 : i32, i32, i32
  }
  func.func @transform_12(%arg0: i32) -> (i32, i32, i32) {
    %c0_i32 = arith.constant 0 : i32
    %c0_i32_0 = arith.constant 0 : i32
    %c0_i32_1 = arith.constant 0 : i32
    %c0_i32_2 = arith.constant 0 : i32
    return %c0_i32, %c0_i32_0, %c0_i32_1 : i32, i32, i32
  }
  func.func @transform_13(%arg0: i32) -> (i32, i32, i32) {
    %c0_i32 = arith.constant 0 : i32
    %c0_i32_0 = arith.constant 0 : i32
    %c0_i32_1 = arith.constant 0 : i32
    %c0_i32_2 = arith.constant 0 : i32
    return %c0_i32, %c0_i32_0, %c0_i32_1 : i32, i32, i32
  }
  func.func @transform_14(%arg0: i32) -> (i32, i32, i32) {
    %c0_i32 = arith.constant 0 : i32
    %c0_i32_0 = arith.constant 0 : i32
    %c0_i32_1 = arith.constant 0 : i32
    %c0_i32_2 = arith.constant 0 : i32
    return %c0_i32, %c0_i32_0, %c0_i32_1 : i32, i32, i32
  }
  func.func @transform_15(%arg0: i32) -> (i32, i32, i32) {
    %c0_i32 = arith.constant 0 : i32
    %c0_i32_0 = arith.constant 0 : i32
    %c0_i32_1 = arith.constant 0 : i32
    %c0_i32_2 = arith.constant 0 : i32
    return %c0_i32, %c0_i32_0, %c0_i32_1 : i32, i32, i32
  }
  func.func @transform_16(%arg0: i32) -> (i32, i32, i32) {
    %c0_i32 = arith.constant 0 : i32
    %c0_i32_0 = arith.constant 0 : i32
    %c0_i32_1 = arith.constant 0 : i32
    %c0_i32_2 = arith.constant 0 : i32
    return %c0_i32, %c0_i32_0, %c0_i32_1 : i32, i32, i32
  }
  func.func @transform_17(%arg0: i32) -> (i32, i32, i32) {
    %c0_i32 = arith.constant 0 : i32
    %c0_i32_0 = arith.constant 0 : i32
    %c0_i32_1 = arith.constant 0 : i32
    %c0_i32_2 = arith.constant 0 : i32
    return %c0_i32, %c0_i32_0, %c0_i32_1 : i32, i32, i32
  }
  func.func @transform_18(%arg0: i32) -> (i32, i32, i32) {
    %c0_i32 = arith.constant 0 : i32
    %c0_i32_0 = arith.constant 0 : i32
    %c0_i32_1 = arith.constant 0 : i32
    %c0_i32_2 = arith.constant 0 : i32
    return %c0_i32, %c0_i32_0, %c0_i32_1 : i32, i32, i32
  }
  func.func @transform_19(%arg0: i32) -> (i32, i32, i32) {
    %c0_i32 = arith.constant 0 : i32
    %c0_i32_0 = arith.constant 0 : i32
    %c0_i32_1 = arith.constant 0 : i32
    %c0_i32_2 = arith.constant 0 : i32
    return %c0_i32, %c0_i32_0, %c0_i32_1 : i32, i32, i32
  }
  func.func @transform_20(%arg0: i32) -> (i32, i32, i32) {
    %c0_i32 = arith.constant 0 : i32
    %c0_i32_0 = arith.constant 0 : i32
    %c0_i32_1 = arith.constant 0 : i32
    %c0_i32_2 = arith.constant 0 : i32
    return %c0_i32, %c0_i32_0, %c0_i32_1 : i32, i32, i32
  }
  func.func @transform_21(%arg0: i32) -> (i32, i32, i32) {
    %c0_i32 = arith.constant 0 : i32
    %c0_i32_0 = arith.constant 0 : i32
    %c0_i32_1 = arith.constant 0 : i32
    %c0_i32_2 = arith.constant 0 : i32
    return %c0_i32, %c0_i32_0, %c0_i32_1 : i32, i32, i32
  }
  func.func @transform_22(%arg0: i32) -> (i32, i32, i32) {
    %c0_i32 = arith.constant 0 : i32
    %c0_i32_0 = arith.constant 0 : i32
    %c0_i32_1 = arith.constant 0 : i32
    %c0_i32_2 = arith.constant 0 : i32
    return %c0_i32, %c0_i32_0, %c0_i32_1 : i32, i32, i32
  }
  func.func @transform_23(%arg0: i32) -> (i32, i32, i32) {
    %c0_i32 = arith.constant 0 : i32
    %c0_i32_0 = arith.constant 0 : i32
    %c0_i32_1 = arith.constant 0 : i32
    %c0_i32_2 = arith.constant 0 : i32
    return %c0_i32, %c0_i32_0, %c0_i32_1 : i32, i32, i32
  }
  func.func @transform_24(%arg0: i32) -> (i32, i32, i32) {
    %c0_i32 = arith.constant 0 : i32
    %c0_i32_0 = arith.constant 0 : i32
    %c0_i32_1 = arith.constant 0 : i32
    %c0_i32_2 = arith.constant 0 : i32
    return %c0_i32, %c0_i32_0, %c0_i32_1 : i32, i32, i32
  }
  func.func @transform_25(%arg0: i32) -> (i32, i32, i32) {
    %c0_i32 = arith.constant 0 : i32
    %c0_i32_0 = arith.constant 0 : i32
    %c0_i32_1 = arith.constant 0 : i32
    %c0_i32_2 = arith.constant 0 : i32
    return %c0_i32, %c0_i32_0, %c0_i32_1 : i32, i32, i32
  }
  func.func @transform_26(%arg0: i32) -> (i32, i32, i32) {
    %c0_i32 = arith.constant 0 : i32
    %c0_i32_0 = arith.constant 0 : i32
    %c0_i32_1 = arith.constant 0 : i32
    %c0_i32_2 = arith.constant 0 : i32
    return %c0_i32, %c0_i32_0, %c0_i32_1 : i32, i32, i32
  }
  func.func @transform_27(%arg0: i32) -> (i32, i32, i32) {
    %c0_i32 = arith.constant 0 : i32
    %c0_i32_0 = arith.constant 0 : i32
    %c0_i32_1 = arith.constant 0 : i32
    %c0_i32_2 = arith.constant 0 : i32
    return %c0_i32, %c0_i32_0, %c0_i32_1 : i32, i32, i32
  }
  func.func @transform_28(%arg0: i32) -> (i32, i32, i32) {
    %c0_i32 = arith.constant 0 : i32
    %c0_i32_0 = arith.constant 0 : i32
    %c0_i32_1 = arith.constant 0 : i32
    %c0_i32_2 = arith.constant 0 : i32
    return %c0_i32, %c0_i32_0, %c0_i32_1 : i32, i32, i32
  }
  func.func @transform_29(%arg0: i32) -> (i32, i32) {
    %c0_i32 = arith.constant 0 : i32
    %c0_i32_0 = arith.constant 0 : i32
    %c0_i32_1 = arith.constant 0 : i32
    return %c0_i32, %c0_i32_0 : i32, i32
  }
  func.func @transform_30(%arg0: i32) -> (i32, i32) {
    %c0_i32 = arith.constant 0 : i32
    %c0_i32_0 = arith.constant 0 : i32
    %c0_i32_1 = arith.constant 0 : i32
    return %c0_i32, %c0_i32_0 : i32, i32
  }
  func.func @transform_31(%arg0: i32) -> (i32, i32) {
    %c0_i32 = arith.constant 0 : i32
    %c0_i32_0 = arith.constant 0 : i32
    %c0_i32_1 = arith.constant 0 : i32
    return %c0_i32, %c0_i32_0 : i32, i32
  }
  func.func @transform_32(%arg0: i32) -> (i32, i32) {
    %c0_i32 = arith.constant 0 : i32
    %c0_i32_0 = arith.constant 0 : i32
    %c0_i32_1 = arith.constant 0 : i32
    return %c0_i32, %c0_i32_0 : i32, i32
  }
  func.func @transform_33(%arg0: i32) -> (i32, i32) {
    %c0_i32 = arith.constant 0 : i32
    %c0_i32_0 = arith.constant 0 : i32
    %c0_i32_1 = arith.constant 0 : i32
    return %c0_i32, %c0_i32_0 : i32, i32
  }
  func.func @transform_34(%arg0: i32) -> (i32, i32) {
    %c0_i32 = arith.constant 0 : i32
    %c0_i32_0 = arith.constant 0 : i32
    %c0_i32_1 = arith.constant 0 : i32
    return %c0_i32, %c0_i32_0 : i32, i32
  }
  func.func @transform_35(%arg0: i32) -> (i32, i32) {
    %c0_i32 = arith.constant 0 : i32
    %c0_i32_0 = arith.constant 0 : i32
    %c0_i32_1 = arith.constant 0 : i32
    return %c0_i32, %c0_i32_0 : i32, i32
  }
  func.func @transform_36(%arg0: i32) -> (i32, i32) {
    %c0_i32 = arith.constant 0 : i32
    %c0_i32_0 = arith.constant 0 : i32
    %c0_i32_1 = arith.constant 0 : i32
    return %c0_i32, %c0_i32_0 : i32, i32
  }
  func.func @transform_37(%arg0: i32) -> (i32, i32) {
    %c0_i32 = arith.constant 0 : i32
    %c0_i32_0 = arith.constant 0 : i32
    %c0_i32_1 = arith.constant 0 : i32
    return %c0_i32, %c0_i32_0 : i32, i32
  }
  func.func @transform_38(%arg0: i32) -> (i32, i32, i32) {
    %c0_i32 = arith.constant 0 : i32
    %c0_i32_0 = arith.constant 0 : i32
    %c0_i32_1 = arith.constant 0 : i32
    return %arg0, %c0_i32, %c0_i32_0 : i32, i32, i32
  }
  func.func @transform_39(%arg0: i32) -> (i32, i32, i32) {
    %c0_i32 = arith.constant 0 : i32
    %c0_i32_0 = arith.constant 0 : i32
    %c0_i32_1 = arith.constant 0 : i32
    return %arg0, %c0_i32, %c0_i32_0 : i32, i32, i32
  }
}

</mosaic_0001>

<bundles_post_ra>
// kernel: detr_forward.1
= control target key start
LH: loop header
LB: loop body
LE: loop exit
PB: predicated region body
PF: predicated region fallthrough
CT: control target
= control target key end

     0   :  { %s8267_s6 = smov 1   ;;  %s8268_s10 = smov 2   ;;  %s9511_s0 = inlined_call_operand.smem [shape: u32[40], index: -1, kind: input, shape index: {}] }
   0x1   :  { %s8328_s5 = sld [smem:[%s9511_s0]]   ;;  %s8269_s14 = smov 3  }
   0x2   :  { %s8333_s9 = sld [smem:[%s9511_s0 + %s8267_s6]]   ;;  %s8270_s18 = smov 4  }
   0x3   :  { %s8338_s13 = sld [smem:[%s9511_s0 + %s8268_s10]]   ;;  %s8271_s22 = smov 5  }
   0x4   :  { %s8343_s17 = sld [smem:[%s9511_s0 + %s8269_s14]]   ;;  %s8272_s26 = smov 6  }
   0x5   :  { %s8348_s21 = sld [smem:[%s9511_s0 + %s8270_s18]]   ;;  %s8273_s30 = smov 7  }
   0x6   :  { %s8353_s25 = sld [smem:[%s9511_s0 + %s8271_s22]]   ;;  %s8274_s4 = smov 8  }
   0x7   :  { %9563 = sst [smem:[#allocation2_spill]] %s8328_s5  ;;  %s8275_s10 = smov 9  }
   0x8   :  { %9564 = sst [smem:[#allocation3_spill]] %s8333_s9  ;;  %s8276_s15 = smov 10  }
   0x9   :  { %9565 = sst [smem:[#allocation4_spill]] %s8338_s13  ;;  %s8277_s20 = smov 11  }
   0xa   :  { %9566 = sst [smem:[#allocation5_spill]] %s8343_s17  ;;  %s8279_s1 = smov 13  }
   0xb   :  { %9567 = sst [smem:[#allocation6_spill]] %s8348_s21  ;;  %s8280_s7 = smov 14  }
   0xc   :  { %9568 = sst [smem:[#allocation7_spill]] %s8353_s25  ;;  %s8282_s22 = smov 16  }
   0xd   :  { %s8358_s29 = sld [smem:[%s9511_s0 + %s8272_s26]]   ;;  %s8278_s26 = smov 12  }
   0xe   :  { %s8363_s3 = sld [smem:[%s9511_s0 + %s8273_s30]]   ;;  %s8283_s28 = smov 17  }
   0xf   :  { %s8368_s8 = sld [smem:[%s9511_s0 + %s8274_s4]]  }
  0x10   :  { %s8373_s14 = sld [smem:[%s9511_s0 + %s8275_s10]]  }
  0x11   :  { %s8378_s19 = sld [smem:[%s9511_s0 + %s8276_s15]]   ;;  %s8281_s15 = smov 15  }
  0x12   :  { %s8383_s24 = sld [smem:[%s9511_s0 + %s8277_s20]]  }
  0x13   :  { %s8388_s30 = sld [smem:[%s9511_s0 + %s8278_s26]]  }
  0x14   :  { %9569 = sst [smem:[#allocation8_spill]] %s8363_s3 }
  0x15   :  { %9570 = sst [smem:[#allocation9_spill]] %s8368_s8 }
  0x16   :  { %9571 = sst [smem:[#allocation10_spill]] %s8373_s14 }
  0x17   :  { %9572 = sst [smem:[#allocation11_spill]] %s8378_s19 }
  0x18   :  { %9573 = sst [smem:[#allocation12_spill]] %s8383_s24 }
  0x19   :  { %s8393_s6 = sld [smem:[%s9511_s0 + %s8279_s1]]  }
  0x1a   :  { %s8398_s12 = sld [smem:[%s9511_s0 + %s8280_s7]]   ;;  %s8284_s7 = smov 18  }
  0x1b   :  { %s8403_s20 = sld [smem:[%s9511_s0 + %s8281_s15]]   ;;  %s8285_s15 = smov 19  }
  0x1c   :  { %s8408_s27 = sld [smem:[%s9511_s0 + %s8282_s22]]   ;;  %s8286_s22 = smov 20  }
  0x1d   :  { %s8413_s4 = sld [smem:[%s9511_s0 + %s8283_s28]]   ;;  %s8287_s28 = smov 21  }
  0x1e   :  { %s8418_s13 = sld [smem:[%s9511_s0 + %s8284_s7]]   ;;  %s8288_s7 = smov 22  }
  0x1f   :  { %9574 = sst [smem:[#allocation13_spill]] %s8393_s6 }
  0x20   :  { %9575 = sst [smem:[#allocation14_spill]] %s8398_s12 }
  0x21   :  { %9576 = sst [smem:[#allocation15_spill]] %s8403_s20 }
  0x22   :  { %9577 = sst [smem:[#allocation16_spill]] %s8408_s27 }
  0x23   :  { %9578 = sst [smem:[#allocation17_spill]] %s8413_s4 }
  0x24   :  { %9579 = sst [smem:[#allocation18_spill]] %s8418_s13 }
  0x25   :  { %s8423_s12 = sld [smem:[%s9511_s0 + %s8285_s15]]   ;;  %s8289_s15 = smov 23  }
  0x26   :  { %s8428_s27 = sld [smem:[%s9511_s0 + %s8286_s22]]   ;;  %s8290_s22 = smov 24  }
  0x27   :  { %s8433_s4 = sld [smem:[%s9511_s0 + %s8287_s28]]   ;;  %s8291_s28 = smov 25  }
  0x28   :  { %s8438_s13 = sld [smem:[%s9511_s0 + %s8288_s7]]   ;;  %s8292_s7 = smov 26  }
  0x2b   :  { %9580 = sst [smem:[#allocation19_spill]] %s8423_s12 }
  0x2c   :  { %9581 = sst [smem:[#allocation20_spill]] %s8428_s27 }
  0x2d   :  { %9582 = sst [smem:[#allocation21_spill]] %s8433_s4 }
  0x2e   :  { %9583 = sst [smem:[#allocation22_spill]] %s8438_s13 }
  0x2f   :  { %s8443_s12 = sld [smem:[%s9511_s0 + %s8289_s15]]   ;;  %s8293_s15 = smov 27  }
  0x30   :  { %s8448_s27 = sld [smem:[%s9511_s0 + %s8290_s22]]   ;;  %s8294_s22 = smov 28  }
  0x31   :  { %s8453_s4 = sld [smem:[%s9511_s0 + %s8291_s28]]   ;;  %s8295_s28 = smov 29  }
  0x32   :  { %s8458_s13 = sld [smem:[%s9511_s0 + %s8292_s7]]   ;;  %s8296_s7 = smov 30  }
  0x35   :  { %9584 = sst [smem:[#allocation23_spill]] %s8443_s12 }
  0x36   :  { %9585 = sst [smem:[#allocation24_spill]] %s8448_s27 }
  0x37   :  { %9586 = sst [smem:[#allocation25_spill]] %s8453_s4 }
  0x38   :  { %9587 = sst [smem:[#allocation26_spill]] %s8458_s13 }
  0x39   :  { %s8463_s12 = sld [smem:[%s9511_s0 + %s8293_s15]]   ;;  %s8297_s15 = smov 31  }
  0x3a   :  { %s8468_s27 = sld [smem:[%s9511_s0 + %s8294_s22]]   ;;  %s8298_s22 = smov 32  }
  0x3b   :  { %s8473_s4 = sld [smem:[%s9511_s0 + %s8295_s28]]   ;;  %s8299_s28 = smov 33  }
  0x3c   :  { %s8478_s13 = sld [smem:[%s9511_s0 + %s8296_s7]]   ;;  %s8300_s7 = smov 34  }
  0x3f   :  { %9588 = sst [smem:[#allocation27_spill]] %s8463_s12 }
  0x40   :  { %9589 = sst [smem:[#allocation28_spill]] %s8468_s27 }
  0x41   :  { %9590 = sst [smem:[#allocation29_spill]] %s8473_s4 }
  0x42   :  { %9591 = sst [smem:[#allocation30_spill]] %s8478_s13 }
  0x43   :  { %s8483_s12 = sld [smem:[%s9511_s0 + %s8297_s15]]   ;;  %s8301_s15 = smov 35  }
  0x44   :  { %s8488_s27 = sld [smem:[%s9511_s0 + %s8298_s22]]   ;;  %s8302_s22 = smov 36  }
  0x45   :  { %s8493_s4 = sld [smem:[%s9511_s0 + %s8299_s28]]   ;;  %s8303_s28 = smov 37  }
  0x46   :  { %s8498_s13 = sld [smem:[%s9511_s0 + %s8300_s7]]   ;;  %s8304_s7 = smov 38  }
  0x49   :  { %9592 = sst [smem:[#allocation31_spill]] %s8483_s12 }
  0x4a   :  { %9593 = sst [smem:[#allocation32_spill]] %s8488_s27 }
  0x4b   :  { %9594 = sst [smem:[#allocation33_spill]] %s8493_s4 }
  0x4c   :  { %9595 = sst [smem:[#allocation34_spill]] %s8498_s13 }
  0x4d   :  { %s8503_s12 = sld [smem:[%s9511_s0 + %s8301_s15]]   ;;  %s8305_s15 = smov 39  }
  0x4e   :  { %s8508_s27 = sld [smem:[%s9511_s0 + %s8302_s22]]   ;;  %s8525_s22 = smov 0  }
  0x4f   :  { %s8513_s4 = sld [smem:[%s9511_s0 + %s8303_s28]]  }
  0x50   :  { %s8518_s13 = sld [smem:[%s9511_s0 + %s8304_s7]]  }
  0x53   :  { %9596 = sst [smem:[#allocation35_spill]] %s8503_s12 }
  0x54   :  { %s8523_s12 = sld [smem:[%s9511_s0 + %s8305_s15]]  }
  0x55 LB: > { %s9597_s25 = sld [smem:[#allocation7_spill]]  ;;  %s9598_s24 = sld [smem:[#allocation12_spill]]  ;;  %s8265_s22 = sphi %s8525_s22, %s90_s22  }
  0x56   : > { %s9599_s20 = sld [smem:[#allocation15_spill]]  ;;  %s9600_s19 = sld [smem:[#allocation11_spill]] }
  0x57   : > { %s9601_s17 = sld [smem:[#allocation5_spill]]  ;;  %s9602_s14 = sld [smem:[#allocation10_spill]] }
  0x58   : > { %s9603_s9 = sld [smem:[#allocation3_spill]]  ;;  %s9604_s8 = sld [smem:[#allocation9_spill]] }
  0x59   : > { %s9605_s6 = sld [smem:[#allocation13_spill]]  ;;  %s9606_s3 = sld [smem:[#allocation8_spill]] }
  0x5a   : > { %s6902_s23 = sadd.s32 4294967295, %s8265_s22   ;;  %p6906_p0 = scmp.ge.s32.totalorder %s8265_s22, 1 }
  0x5b   : > { %p1080_p1 = scmp.lt.s32.totalorder %s8265_s22, 3 }
  0x5d   : > { %p1081_p2 = pnand %p6906_p0, %p1080_p1 }
  0x5e   : > { %s9607_s5 = sld [smem:[#allocation2_spill]] (!%p1081_p2)  ;;  %v8022_v0 = vld [vmem:[%s9601_s17] sm:$0xff] (!%p1081_p2)   ;;  %v8306_v1 = vmov (!%p1081_p2), 0   ;;  %p1179_p3 = scmp.lt.s32.totalorder (!%p1081_p2), %s6902_s23, 1  ;;  %v8023_v2 = vld [vmem:[%s9601_s17 + $0x8] sm:$0xff] (!%p1081_p2)   ;;  %v8307_v3 = vmov (!%p1081_p2), 0.0  }
  0x5f   : > { %1084 = sbr.rel (%p1081_p2) target bundleno = 14502 (0x38a6), region = 172  ;;  %1306 = vmatprep.subr.bf16.mxu0 (!%p1081_p2), %v8306_v1  ;;  %7359 = vmatprep.subr.bf16.mxu1 (!%p1081_p2), %v8307_v3  ;;  %v8024_v4 = vld [vmem:[%s9601_s17 + $0x10] sm:$0xff] (!%p1081_p2)   ;;  %v8025_v5 = vld [vmem:[%s9601_s17 + $0x18] sm:$0xff] (!%p1081_p2)   ;;  %vm1302_vm0 = vcmask (!%p1081_p2), 523264   ;;  %v8026_v8 = vld [vmem:[%s9601_s17 + $0x20] sm:$0xff] (!%p1081_p2)   ;;  %s9608_s21 = sld [smem:[#allocation6_spill]] (!%p1081_p2) }
  0x60   : > { %1307 = vmatpush1.bf16.msra.mxu0 (!%p1081_p2), %v8022_v0  ;;  %v8034_v10 = vld [vmem:[%s9597_s25] sm:$0xff] (!%p1081_p2)   ;;  %v8035_v11 = vld [vmem:[%s9597_s25 + $0x8] sm:$0xff] (!%p1081_p2)   ;;  %v8028_v13 = vld [vmem:[%s9601_s17 + $0x30] sm:$0xff] (!%p1081_p2)   ;;  %vm8308_vm1 = vmmov (!%p1081_p2), 0   ;;  %s9532_s28 = smov (!%p1081_p2), 64   ;;  %vm1462_vm2 = vcmask (!%p1081_p2), 261120  }
  0x61   : > { %1308 = vmatprep.subr.bf16.mxu0 (!%p1081_p2), %v8306_v1  ;;  %v8027_v12 = vld [vmem:[%s9601_s17 + $0x28] sm:$0xff] (!%p1081_p2)   ;;  %7360 = vmatpush3.bf16.msra.mxu1 (!%p1081_p2), %v8034_v10  ;;  %v8029_v14 = vld [vmem:[%s9601_s17 + $0x38] sm:$0xff] (!%p1081_p2)   ;;  %v8030_v15 = vld [vmem:[%s9601_s17 + $0x40] sm:$0xff] (!%p1081_p2)   ;;  %s9547_s1 = smov (!%p1081_p2), 120   ;;  %s9550_s2 = smov (!%p1081_p2), 96   ;;  %vm1571_vm3 = vcmask (!%p1081_p2), 64512  }
  0x62   : > { %7361 = vmatprep.subr.bf16.mxu1 (!%p1081_p2), %v8307_v3  ;;  %v8031_v16 = vld [vmem:[%s9601_s17 + $0x48] sm:$0xff] (!%p1081_p2)   ;;  %v8032_v17 = vld [vmem:[%s9601_s17 + $0x50] sm:$0xff] (!%p1081_p2)   ;;  %v8033_v18 = vld [vmem:[%s9601_s17 + $0x58] sm:$0xff] (!%p1081_p2)   ;;  %7367 = vmatprep.mubr.msk.bf16.mxu1 (!%p1081_p2), %vm8308_vm1, %v8307_v3  ;;  %s9545_s7 = smov (!%p1081_p2), 112   ;;  %s9542_s10 = smov (!%p1081_p2), 88   ;;  %vm1621_vm4 = vcmask (!%p1081_p2), 130048  }
  0x63   : > { %v8036_v22 = vld [vmem:[%s9597_s25 + $0x10] sm:$0xff] (!%p1081_p2)   ;;  %v8037_v23 = vld [vmem:[%s9597_s25 + $0x18] sm:$0xff] (!%p1081_p2)   ;;  %v8038_v24 = vld [vmem:[%s9606_s3] sm:$0xff] (!%p1081_p2)   ;;  %s9543_s11 = smov (!%p1081_p2), 104   ;;  %s9541_s15 = smov (!%p1081_p2), 80   ;;  %vm2087_vm5 = vcmask (!%p1081_p2), 195584  }
  0x64   : > { %1309 = vmatpush1.bf16.msra.mxu0 (!%p1081_p2), %v8023_v2  ;;  %1508 = vrot.lane.b32.xlu0 (!%p1081_p2), %v8038_v24, %s9532_s28  ;;  %v8039_v25 = vld [vmem:[%s9606_s3 + $0x8] sm:$0xff] (!%p1081_p2)   ;;  %v6925_v36 = vld [vmem:[%s8358_s29] ss:$0 sm:$0xff] (!%p1081_p2)  ;;  %s9538_s16 = smov (!%p1081_p2), 72   ;;  %s9536_s18 = smov (!%p1081_p2), 8   ;;  %vm3539_vm6 = vcmask (!%p1081_p2), 1043456  }
  0x65   : > { %1310 = vmatprep.subr.bf16.mxu0 (!%p1081_p2), %v8306_v1  ;;  %7362 = vmatpush3.bf16.msra.mxu1 (!%p1081_p2), %v8035_v11  ;;  %v6911_v26 = vld [vmem:[%s9608_s21] ss:$0 sm:$0xff] (!%p1081_p2)  ;;  %v8599_v42 = vld [vmem:[%s9603_s9 + $0x8] sm:$0xff] (!%p1081_p2)  ;;  %s9626_s17 = sld [smem:[#allocation22_spill]] (!%p1081_p2)  ;;  %s9629_s21 = sld [smem:[#allocation26_spill]] (!%p1081_p2) }
  0x66   : > { %s9643_s23 = smov (!%p1179_p3, %s6902_s23), 1  ;;  %7363 = vmatprep.subr.bf16.mxu1 %v8307_v3  ;;  %v8596_v40 = vld [vmem:[%s9603_s9] sm:$0xff]  ;;  %s9631_s25 = sld [smem:[#allocation27_spill]] }
  0x67   : > { %s7153_s0 = sshll.u32 %s9643_s23, 5  ;;  %v8618_v51 = vld [vmem:[%s9604_s8] ss:$0 sm:$0xff] }
  0x68   : > { %s8544_s26 = scalar_lea.vmem %s9607_s5, %s7153_s0  ;;  %1311 = vmatpush1.bf16.msra.mxu0 %v8024_v4  ;;  %1510 = vrot.lane.b32.xlu0 %v8039_v25, %s9532_s28  ;;  %s9534_s0 = smov 16  }
  0x69   : > { %1312 = vmatprep.subr.bf16.mxu0 %v8306_v1  ;;  %v1194_v6 = vld [vmem:[%s8544_s26 + $0x8] sm:$0xff]  ;;  %v1196_v7 = vld [vmem:[%s8544_s26 + $0x18] sm:$0xff]  ;;  %v1193_v19 = vld [vmem:[%s8544_s26] sm:$0xff]  ;;  %7364 = vmatpush3.bf16.msra.mxu1 %v8036_v22  ;;  %s9615_s5 = smov 64  }
  0x6a   : > { %v1222_v9 = vpack.c.bf16 %v1196_v7, %v1194_v6  ;;  %v1195_v20 = vld [vmem:[%s8544_s26 + $0x10] sm:$0xff]  ;;  %7365 = vmatprep.subr.bf16.mxu1 %v8307_v3  ;;  %s9530_s26 = smov 24  }
  0x6b   : > { %v1221_v21 = vpack.c.bf16 %v1195_v20, %v1193_v19 }
  0x6c   : > { %1313 = vmatpush1.bf16.msra.mxu0 %v8025_v5  ;;  %6924 = vmatprep.mubr.msk.bf16.mxu0 %vm1302_vm0, %v1222_v9 }
  0x6d   : > { %1314 = vmatprep.subr.bf16.mxu0 %v8306_v1  ;;  %7366 = vmatpush3.bf16.msra.mxu1 %v8037_v23 }
  0x6e   : > { %7371 = vmatprep.subr.bf16.mxu1 %v8307_v3 }
  0x70   : > { %1315 = vmatpush1.bf16.msra.mxu0 %v8026_v8 }
  0x71   : > { %1316 = vmatprep.subr.bf16.mxu0 %v8306_v1 }
  0x74   : > { %1317 = vmatpush1.bf16.msra.mxu0 %v8027_v12 }
  0x75   : > { %1318 = vmatprep.subr.bf16.mxu0 %v8306_v1 }
  0x78   : > { %1319 = vmatpush1.bf16.msra.mxu0 %v8028_v13 }
  0x79   : > { %1320 = vmatprep.subr.bf16.mxu0 %v8306_v1 }
  0x7c   : > { %1321 = vmatpush1.bf16.msra.mxu0 %v8029_v14 }
  0x7d   : > { %1322 = vmatprep.subr.bf16.mxu0 %v8306_v1 }
  0x80   : > { %1323 = vmatpush1.bf16.msra.mxu0 %v8030_v15 }
  0x81   : > { %1324 = vmatprep.subr.bf16.mxu0 %v8306_v1 }
  0x84   : > { %1325 = vmatpush1.bf16.msra.mxu0 %v8031_v16 }
  0x85   : > { %1326 = vmatprep.subr.bf16.mxu0 %v8306_v1 }
  0x88   : > { %1327 = vmatpush1.bf16.msra.mxu0 %v8032_v17 }
  0x89   : > { %1328 = vmatprep.subr.bf16.mxu0 %v8306_v1 }
  0x8c   : > { %1329 = vmatpush1.bf16.msra.mxu0 %v8033_v18 }
  0x8d   : > { %7399 = vmatprep.subr.bf16.mxu0 %v8307_v3 }
  0x8f   : > { %1339 = vmatmul.mubr.bf16.vlgmr.msra.gmra.mrb[0].mxu0 %v1221_v21 }
  0x90   : > { %7401 = vmatprep.mubr.msk.bf16.mxu0 %vm8308_vm1, %v8307_v3 }
  0xd6   : > { %v1509_v47 = vpop.permute.xlu0 %1508 }
  0xda   : > { %v1511_v49 = vpop.permute.xlu0 %1510 }
 0x162   : > { %v1340_v27 = vpop.f32.mrb[0].mxu0 }
 0x163   : > { %v1341_v28 = vadd.f32 %v6911_v26, %v1340_v27  ;;  %v1342_v29 = vpop.f32.mrb[1].mxu0 }
 0x164   : > { %v1343_v30 = vpop.f32.mrb[2].mxu0 }
 0x165   : > { %v1344_v31 = vadd.f32 %v6911_v26, %v1343_v30  ;;  %v1345_v32 = vpop.f32.mrb[3].mxu0  ;;  %v1347_v33 = vmax.f32 %v1341_v28, 0.0 }
 0x167   : > { %v1348_v34 = vmax.f32 %v1344_v31, 0.0 }
 0x169   : > { %v1357_v35 = vpack.c.bf16 %v1348_v34, %v1347_v33 }
 0x16b   : > { %7368 = vmatmul.mubr.msk.bf16.vlgmr.msra.gmra.mrb[0].mxu1 %vm1302_vm0, %v1357_v35 }
 0x16c   : > { %7372 = vmatpush3.bf16.msra.mxu1 %v8038_v24  ;;  %7375 = vmatprep.mubr.msk.bf16.mxu1 %vm8308_vm1, %v8307_v3 }
 0x16d   : > { %7373 = vmatprep.subr.bf16.mxu1 %v8307_v3 }
 0x170   : > { %7374 = vmatpush3.bf16.msra.mxu1 %v8039_v25 }
 0x171   : > { %7379 = vmatprep.subr.bf16.mxu1 %v8307_v3 }
 0x23e   : > { %v1426_v37 = vpop.f32.mrb[0].mxu1 }
 0x23f   : > { %v8593_v38 = vadd.f32 %v6925_v36, %v1426_v37  ;;  %v7369_v39 = vpop.f32.mrb[1].mxu1 }
 0x240   : > { %v1429_v41 = vpop.f32.mrb[2].mxu1 }
 0x241   : > { %v8601_v43 = vadd.f32 %v6925_v36, %v1429_v41  ;;  %v7370_v44 = vpop.f32.mrb[3].mxu1  ;;  %v1441_v45 = vadd.f32 %v8596_v40, %v8593_v38 }
 0x243   : > { %v1442_v46 = vadd.f32 %v8599_v42, %v8601_v43  ;;  %v1507_v50 = vpack.c.bf16 %v8601_v43, %v8593_v38 }
 0x245   : > { %v1443_v48 = vpack.c.bf16 %v1442_v46, %v1441_v45 }
 0x247   : > { %7376 = vmatmul.mubr.msk.bf16.vlgmr.msra.gmra.mrb[4].mxu1 %vm1462_vm2, %v1443_v48 }
 0x248   : > { %7380 = vmatpush3.bf16.msra.mxu1 %v1509_v47  ;;  %7383 = vmatprep.mubr.msk.bf16.mxu1 %vm8308_vm1, %v8307_v3 }
 0x249   : > { %7381 = vmatprep.subr.bf16.mxu1 %v8307_v3 }
 0x24c   : > { %7382 = vmatpush3.bf16.msra.mxu1 %v1511_v49 }
 0x24d   : > { %7387 = vmatprep.subr.bf16.mxu1 %v8307_v3 }
 0x24f   : > { %7384 = vmatmul.mubr.msk.bf16.vlgmr.msra.gmra.mrb[8].mxu1 %vm1462_vm2, %v1507_v50 }
 0x250   : > { %7389 = vmatprep.mubr.msk.bf16.mxu1 %vm8308_vm1, %v8307_v3 }
 0x31a   : > { %v1500_v52 = vpop.f32.mrb[4].mxu1 }
 0x31b   : > { %v7377_v53 = vpop.f32.mrb[5].mxu1  ;;  %v1501_v55 = vadd.f32 %v8618_v51, %v1500_v52 }
 0x31c   : > { %v1503_v54 = vpop.f32.mrb[6].mxu1 }
 0x31d   : > { %v1504_v56 = vadd.f32 %v8618_v51, %v1503_v54  ;;  %v7378_v57 = vpop.f32.mrb[7].mxu1 }
 0x31f   : > { %v1566_v58 = vpack.c.bf16 %v1504_v56, %v1501_v55 }
 0x321   : > { %1689 = vrot.lane.b32.xlu0 %v1566_v58, %s9547_s1  ;;  %1569 = vrot.lane.b32.xlu1 %v1566_v58, %s9550_s2 }
 0x322   : > { %v8624_v59 = vpop.f32.mrb[8].mxu1 }
 0x323   : > { %v7385_v60 = vpop.f32.mrb[9].mxu1 }
 0x324   : > { %v8626_v61 = vpop.f32.mrb[10].mxu1 }
 0x325   : > { %1813 = vrot.lane.b32.xlu0 %v1566_v58, %s9545_s7  ;;  %1691 = vrot.lane.b32.xlu1 %v1566_v58, %s9542_s10  ;;  %v7386_v62 = vpop.f32.mrb[11].mxu1 }
 0x329   : > { %1936 = vrot.lane.b32.xlu0 %v1566_v58, %s9543_s11  ;;  %1815 = vrot.lane.b32.xlu1 %v1566_v58, %s9541_s15 }
 0x32d   : > { %1938 = vrot.lane.b32.xlu1 %v1566_v58, %s9538_s16 }
 0x393   : > { %v1570_v63 = vpop.permute.xlu1 %1569  ;;  %v1690_v6 = vpop.permute.xlu0 %1689 }
 0x394   : > { %v1576_v0 = vsel %vm1571_vm3, %v1570_v63, 0 }
 0x395   : > { %7388 = vmatpush3.bf16.xpose.msra.mxu1 %v1576_v0 }
 0x396   : > { %7393 = vmatprep.subr.bf16.mxu1 %v8307_v3 }
 0x397   : > { %v1692_v2 = vpop.permute.xlu1 %1691  ;;  %v1814_v9 = vpop.permute.xlu0 %1813 }
 0x398   : > { %v1697_v4 = vsel %vm1571_vm3, %v1692_v2, 0 }
 0x399   : > { %7400 = vmatpush3.bf16.xpose.msra.mxu0 %v1697_v4 }
 0x39a   : > { %7411 = vmatprep.subr.bf16.mxu0 %v8307_v3 }
 0x39b   : > { %v1816_v5 = vpop.permute.xlu1 %1815  ;;  %v1937_v11 = vpop.permute.xlu0 %1936 }
 0x39c   : > { %7390 = vmatmul.mubr.msk.bf16.vlgmr.msra.gmra.mrb[12].mxu1 %vm1571_vm3, %v1566_v58  ;;  %v1821_v7 = vsel %vm1571_vm3, %v1816_v5, 0 }
 0x39d   : > { %7395 = vmatprep.mubr.msk.bf16.mxu1 %vm8308_vm1, %v8307_v3 }
 0x39f   : > { %v1939_v8 = vpop.permute.xlu1 %1938 }
 0x3a0   : > { %7402 = vmatmul.mubr.msk.bf16.vlgmr.msra.gmra.mrb[4].mxu0 %vm1571_vm3, %v1690_v6  ;;  %v1944_v10 = vsel %vm1571_vm3, %v1939_v8, 0 }
 0x3a1   : > { %7412 = vmatpush3.bf16.xpose.msra.mxu0 %v1821_v7  ;;  %7413 = vmatprep.mubr.msk.bf16.mxu0 %vm8308_vm1, %v8307_v3 }
 0x3a2   : > { %7423 = vmatprep.subr.bf16.mxu0 %v8307_v3 }
 0x3a8   : > { %7414 = vmatmul.mubr.msk.bf16.vlgmr.msra.gmra.mrb[8].mxu0 %vm1571_vm3, %v1814_v9 }
 0x3a9   : > { %7424 = vmatpush3.bf16.xpose.msra.mxu0 %v1944_v10  ;;  %7425 = vmatprep.mubr.msk.bf16.mxu0 %vm8308_vm1, %v8307_v3 }
 0x3aa   : > { %7435 = vmatprep.subr.bf16.mxu0 %v8307_v3 }
 0x3b0   : > { %7426 = vmatmul.mubr.msk.bf16.vlgmr.msra.gmra.mrb[12].mxu0 %vm1571_vm3, %v1937_v11 }
 0x3b1   : > { %7439 = vmatprep.mubr.msk.bf16.mxu0 %vm8308_vm1, %v8307_v3 }
 0x46f   : > { %v1612_v12 = vpop.f32.mrb[12].mxu1 }
 0x470   : > { %v1619_v13 = vmul.f32 0.35355338, %v1612_v12  ;;  %v7391_v14 = vpop.f32.mrb[13].mxu1 }
 0x471   : > { %v1615_v15 = vpop.f32.mrb[14].mxu1 }
 0x472   : > { %v1620_v16 = vmul.f32 0.35355338, %v1615_v15  ;;  %v7392_v17 = vpop.f32.mrb[15].mxu1  ;;  %v1622_v18 = vsel %vm1621_vm4, %v1619_v13, -inf }
 0x473   : > { %v1733_v19 = vpop.f32.mrb[4].mxu0  ;;  %1623 = vmax.xlane.f32.xlu1 %v1622_v18 }
 0x474   : > { %v1740_v20 = vmul.f32 0.35355338, %v1733_v19  ;;  %v7403_v21 = vpop.f32.mrb[5].mxu0  ;;  %v1625_v22 = vsel %vm1621_vm4, %v1620_v16, -inf }
 0x475   : > { %v1736_v23 = vpop.f32.mrb[6].mxu0  ;;  %1626 = vmax.xlane.f32.xlu0 %v1625_v22 }
 0x476   : > { %v1741_v24 = vmul.f32 0.35355338, %v1736_v23  ;;  %v7404_v25 = vpop.f32.mrb[7].mxu0  ;;  %v1742_v27 = vsel %vm1621_vm4, %v1740_v20, -inf }
 0x478   : > { %v1745_v26 = vsel %vm1621_vm4, %v1741_v24, -inf }
 0x479   : > { %1746 = vmax.xlane.f32.xlu1 %v1745_v26  ;;  %1743 = vmax.xlane.f32.xlu0 %v1742_v27 }
 0x47b   : > { %v1857_v28 = vpop.f32.mrb[8].mxu0 }
 0x47c   : > { %v1864_v29 = vmul.f32 0.35355338, %v1857_v28  ;;  %v7415_v30 = vpop.f32.mrb[9].mxu0 }
 0x47d   : > { %v1860_v31 = vpop.f32.mrb[10].mxu0 }
 0x47e   : > { %v1865_v32 = vmul.f32 0.35355338, %v1860_v31  ;;  %v7416_v33 = vpop.f32.mrb[11].mxu0  ;;  %v1866_v34 = vsel %vm1621_vm4, %v1864_v29, -inf }
 0x47f   : > { %1867 = vmax.xlane.f32.xlu0 %v1866_v34 }
 0x480   : > { %v1869_v35 = vsel %vm1621_vm4, %v1865_v32, -inf }
 0x481   : > { %1870 = vmax.xlane.f32.xlu1 %v1869_v35 }
 0x483   : > { %v1980_v36 = vpop.f32.mrb[12].mxu0 }
 0x484   : > { %v1987_v37 = vmul.f32 0.35355338, %v1980_v36  ;;  %v7427_v39 = vpop.f32.mrb[13].mxu0 }
 0x485   : > { %v1983_v41 = vpop.f32.mrb[14].mxu0 }
 0x486   : > { %v8659_v44 = vmul.f32 0.35355338, %v1983_v41  ;;  %v7428_v45 = vpop.f32.mrb[15].mxu0  ;;  %v1989_v46 = vsel %vm1621_vm4, %v1987_v37, -inf }
 0x487   : > { %1990 = vmax.xlane.f32.xlu0 %v1989_v46 }
 0x488   : > { %v1992_v47 = vsel %vm1621_vm4, %v8659_v44, -inf }
 0x489   : > { %1993 = vmax.xlane.f32.xlu1 %v1992_v47 }
 0x49d   : > { %1514 = vrot.lane.b32.xlu0 %v8618_v51, %s9532_s28 }
 0x500   : > { %v1624_v48 = vpop.xlane.xlu1 %1623 }
 0x501   : > { %v1628_v49 = vsub.f32 %v1619_v13, %v1624_v48 }
 0x502   : > { %v1627_v50 = vpop.xlane.xlu0 %1626 }
 0x503   : > { %v1630_v52 = vmul.f32 1.442695, %v1628_v49  ;;  %v1629_v53 = vsub.f32 %v1620_v16, %v1627_v50 }
 0x505   : > { %8094 = vpow2.f32 %v1630_v52  ;;  %v1632_v58 = vmul.f32 1.442695, %v1629_v53 }
 0x506   : > { %v1744_v54 = vpop.xlane.xlu0 %1743  ;;  %v1747_v55 = vpop.xlane.xlu1 %1746 }
 0x507   : > { %v1748_v56 = vsub.f32 %v1740_v20, %v1744_v54  ;;  %v1749_v60 = vsub.f32 %v1741_v24, %v1747_v55 }
 0x509   : > { %v1750_v57 = vmul.f32 1.442695, %v1748_v56  ;;  %v1752_v63 = vmul.f32 1.442695, %v1749_v60 }
 0x50b   : > { %8096 = vpow2.f32 %v1750_v57 }
 0x50c   : > { %v1868_v62 = vpop.xlane.xlu0 %1867  ;;  %8098 = vpow2.f32 %v1632_v58 }
 0x50d   : > { %v1872_v0 = vsub.f32 %v1864_v29, %v1868_v62  ;;  %8100 = vpow2.f32 %v1752_v63 }
 0x50e   : > { %v1871_v4 = vpop.xlane.xlu1 %1870 }
 0x50f   : > { %v8095_v2 = vpop.eup %8094  ;;  %v1874_v5 = vmul.f32 1.442695, %v1872_v0  ;;  %v1873_v6 = vsub.f32 %v1865_v32, %v1871_v4 }
 0x510   : > { %v1634_v51 = vsel %vm1621_vm4, %v8095_v2, 0.0 }
 0x511   : > { %1635 = vadd.xlane.f32.xlu1 %v1634_v51  ;;  %8102 = vpow2.f32 %v1874_v5  ;;  %v1876_v10 = vmul.f32 1.442695, %v1873_v6 }
 0x514   : > { %v1991_v7 = vpop.xlane.xlu0 %1990 }
 0x515   : > { %v1995_v8 = vsub.f32 %v1987_v37, %v1991_v7  ;;  %v8667_v9 = vpop.eup %8096 }
 0x516   : > { %v1754_v12 = vsel %vm1621_vm4, %v8667_v9, 0.0  ;;  %v8099_v13 = vpop.eup %8098  ;;  %v1994_v25 = vpop.xlane.xlu1 %1993 }
 0x517   : > { %v1997_v11 = vmul.f32 1.442695, %v1995_v8  ;;  %1755 = vadd.xlane.f32.xlu1 %v1754_v12  ;;  %v1637_v18 = vsel %vm1621_vm4, %v8099_v13, 0.0  ;;  %v8101_v19 = vpop.eup %8100  ;;  %v1996_v26 = vsub.f32 %v8659_v44, %v1994_v25  ;;  %v8040_v12 = vld [vmem:[%s9602_s14] sm:$0xff]  }
 0x518   : > { %v1515_v14 = vpop.permute.xlu0 %1514  ;;  %v1757_v20 = vsel %vm1621_vm4, %v8101_v19, 0.0  ;;  %7436 = vmatpush3.bf16.msra.mxu0 %v8040_v12 }
 0x519   : > { %8104 = vpow2.f32 %v1997_v11  ;;  %v1555_v15 = vadd.f32 %v8624_v59, %v1515_v14  ;;  %v1558_v16 = vadd.f32 %v8626_v61, %v1515_v14  ;;  %v1999_v27 = vmul.f32 1.442695, %v1996_v26  ;;  %7437 = vmatprep.subr.bf16.mxu0 %v8307_v3 }
 0x51a   : > { %8106 = vpow2.f32 %v1876_v10 }
 0x51b   : > { %v1567_v17 = vpack.c.bf16 %v1558_v16, %v1555_v15  ;;  %1638 = vadd.xlane.f32.xlu1 %v1637_v18  ;;  %v8103_v21 = vpop.eup %8102  ;;  %8108 = vpow2.f32 %v1999_v27 }
 0x51c   : > { %v1878_v23 = vsel %vm1621_vm4, %v8103_v21, 0.0 }
 0x51d   : > { %7394 = vmatpush3.bf16.msra.mxu1 %v1567_v17 }
 0x51e   : > { %7405 = vmatprep.subr.bf16.mxu1 %v8307_v3 }
 0x51f   : > { %1758 = vadd.xlane.f32.xlu1 %v1757_v20  ;;  %v8041_v20 = vld [vmem:[%s9602_s14 + $0x8] sm:$0xff]  }
 0x520   : > { %7438 = vmatpush3.bf16.msra.mxu0 %v8041_v20 }
 0x521   : > { %7451 = vmatprep.subr.bf16.mxu0 %v8307_v3 }
 0x523   : > { %v8676_v22 = vpop.eup %8104  ;;  %1879 = vadd.xlane.f32.xlu1 %v1878_v23 }
 0x524   : > { %v8107_v59 = vpop.eup %8106  ;;  %v2001_v61 = vsel %vm1621_vm4, %v8676_v22, 0.0 }
 0x525   : > { %2002 = vadd.xlane.f32.xlu0 %v2001_v61  ;;  %v1881_v24 = vsel %vm1621_vm4, %v8107_v59, 0.0  ;;  %v8109_v28 = vpop.eup %8108 }
 0x526   : > { %v2004_v29 = vsel %vm1621_vm4, %v8109_v28, 0.0 }
 0x527   : > { %1882 = vadd.xlane.f32.xlu1 %v1881_v24 }
 0x538   : > { %1766 = vrot.lane.b32.xlu1 %v1567_v17, %s9547_s1 }
 0x53c   : > { %1889 = vrot.lane.b32.xlu1 %v1567_v17, %s9545_s7 }
 0x560   : > { %2005 = vadd.xlane.f32.xlu1 %v2004_v29 }
 0x571   : > { %2012 = vrot.lane.b32.xlu1 %v1567_v17, %s9543_s11 }
 0x59e   : > { %v1636_v30 = vpop.xlane.xlu1 %1635 }
 0x59f   : > { %8110 = vrcp.f32 %v1636_v30 }
 0x5a4   : > { %v1756_v31 = vpop.xlane.xlu1 %1755 }
 0x5a8   : > { %v1639_v32 = vpop.xlane.xlu1 %1638 }
 0x5a9   : > { %8112 = vrcp.f32 %v1639_v32  ;;  %v8111_v35 = vpop.eup %8110 }
 0x5aa   : > { %v1642_v37 = vmul.f32 %v8111_v35, %v8095_v2 }
 0x5ac   : > { %v1759_v33 = vpop.xlane.xlu1 %1758 }
 0x5ad   : > { %8114 = vrcp.f32 %v1759_v33 }
 0x5ae   : > { %8116 = vrcp.f32 %v1756_v31 }
 0x5b0   : > { %v1880_v34 = vpop.xlane.xlu1 %1879 }
 0x5b2   : > { %v2003_v58 = vpop.xlane.xlu0 %2002 }
 0x5b3   : > { %v8113_v36 = vpop.eup %8112 }
 0x5b4   : > { %v1643_v39 = vmul.f32 %v8113_v36, %v8099_v13  ;;  %v1883_v41 = vpop.xlane.xlu1 %1882 }
 0x5b5   : > { %8118 = vrcp.f32 %v1883_v41 }
 0x5b6   : > { %v1644_v44 = vpack.c.bf16 %v1643_v39, %v1642_v37  ;;  %8120 = vrcp.f32 %v1880_v34 }
 0x5b7   : > { %v8115_v45 = vpop.eup %8114  ;;  %8122 = vrcp.f32 %v2003_v58 }
 0x5b8   : > { %v1767_v46 = vpop.permute.xlu1 %1766  ;;  %7396 = vmatmul.mubr.msk.bf16.vlgmr.msra.gmra.mrb[16].mxu1 %vm1621_vm4, %v1644_v44  ;;  %v8117_v47 = vpop.eup %8116  ;;  %v1763_v48 = vmul.f32 %v8115_v45, %v8101_v19  ;;  %v6944_v44 = vld [vmem:[%s9600_s19] ss:$0 sm:$0xff] }
 0x5b9   : > { %7406 = vmatpush3.bf16.msra.mxu1 %v1767_v46  ;;  %7407 = vmatprep.mubr.msk.bf16.mxu1 %vm8308_vm1, %v8307_v3  ;;  %v1762_v49 = vmul.f32 %v8117_v47, %v8667_v9 }
 0x5ba   : > { %7417 = vmatprep.subr.bf16.mxu1 %v8307_v3 }
 0x5bb   : > { %v1764_v50 = vpack.c.bf16 %v1763_v48, %v1762_v49 }
 0x5bc   : > { %v1890_v53 = vpop.permute.xlu1 %1889 }
 0x5bf   : > { %v8119_v52 = vpop.eup %8118 }
 0x5c0   : > { %7408 = vmatmul.mubr.msk.bf16.vlgmr.msra.gmra.mrb[20].mxu1 %vm1621_vm4, %v1764_v50  ;;  %v8121_v54 = vpop.eup %8120  ;;  %v1887_v55 = vmul.f32 %v8119_v52, %v8107_v59 }
 0x5c1   : > { %7418 = vmatpush3.bf16.msra.mxu1 %v1890_v53  ;;  %7419 = vmatprep.mubr.msk.bf16.mxu1 %vm8308_vm1, %v8307_v3  ;;  %v1886_v56 = vmul.f32 %v8121_v54, %v8103_v21  ;;  %v8123_v63 = vpop.eup %8122 }
 0x5c2   : > { %7429 = vmatprep.subr.bf16.mxu1 %v8307_v3  ;;  %v2009_v2 = vmul.f32 %v8123_v63, %v8676_v22 }
 0x5c3   : > { %v1888_v57 = vpack.c.bf16 %v1887_v55, %v1886_v56 }
 0x5c8   : > { %7420 = vmatmul.mubr.msk.bf16.vlgmr.msra.gmra.mrb[24].mxu1 %vm1621_vm4, %v1888_v57 }
 0x5c9   : > { %7431 = vmatprep.mubr.msk.bf16.mxu1 %vm8308_vm1, %v8307_v3 }
 0x5ed   : > { %v2006_v60 = vpop.xlane.xlu1 %2005 }
 0x5ee   : > { %8124 = vrcp.f32 %v2006_v60 }
 0x5f1   : > { %v2013_v62 = vpop.permute.xlu1 %2012 }
 0x5f2   : > { %7430 = vmatpush3.bf16.msra.mxu1 %v2013_v62 }
 0x5f3   : > { %7443 = vmatprep.subr.bf16.mxu1 %v8307_v3 }
 0x5f8   : > { %v8125_v0 = vpop.eup %8124 }
 0x5f9   : > { %v2010_v4 = vmul.f32 %v8125_v0, %v8109_v28 }
 0x5fb   : > { %v2011_v51 = vpack.c.bf16 %v2010_v4, %v2009_v2  ;;  %v8042_v4 = vld [vmem:[%s9598_s24] sm:$0xff]  }
 0x5fd   : > { %7432 = vmatmul.mubr.msk.bf16.vlgmr.msra.gmra.mrb[28].mxu1 %vm1621_vm4, %v2011_v51  ;;  %v8043_v51 = vld [vmem:[%s9598_s24 + $0x8] sm:$0xff]  }
 0x5fe   : > { %7447 = vmatprep.mubr.msk.bf16.mxu1 %vm8308_vm1, %v8307_v3  ;;  %7444 = vmatpush3.bf16.msra.mxu1 %v8042_v4  ;;  %v8049_v4 = vld [vmem:[%s9606_s3 + $0x18] sm:$0xff]  }
 0x5ff   : > { %7445 = vmatprep.subr.bf16.mxu1 %v8307_v3 }
 0x602   : > { %7446 = vmatpush3.bf16.msra.mxu1 %v8043_v51 }
 0x603   : > { %7463 = vmatprep.subr.bf16.mxu1 %v8307_v3 }
 0x68b   : > { %v1682_v5 = vpop.f32.mrb[16].mxu1 }
 0x68c   : > { %v7397_v6 = vpop.f32.mrb[17].mxu1 }
 0x68d   : > { %v1685_v7 = vpop.f32.mrb[18].mxu1  ;;  %v8045_v6 = vld [vmem:[%s9605_s6 + $0x8] sm:$0xff]  }
 0x68e   : > { %v7398_v8 = vpop.f32.mrb[19].mxu1 }
 0x693   : > { %v1806_v9 = vpop.f32.mrb[20].mxu1 }
 0x694   : > { %v7409_v10 = vpop.f32.mrb[21].mxu1 }
 0x695   : > { %v1809_v11 = vpop.f32.mrb[22].mxu1  ;;  %v2182_v10 = vlaneseq }
 0x696   : > { %v7992_v13 = vpack.i.bf16 %v1809_v11, %v1806_v9  ;;  %v7410_v14 = vpop.f32.mrb[23].mxu1 }
 0x697   : > { %v8735_v14 = vshrl.u32 %v2182_v10, 7 }
 0x698   : > { %7993 = vrot.lane.b32.xlu0 %v7992_v13, %s9536_s18 }
 0x699   : > { %v8746_v20 = vsub.s32 1, %v8735_v14  ;;  %v8771_v10 = vsub.s32 2, %v8735_v14 }
 0x69b   : > { %v1929_v15 = vpop.f32.mrb[24].mxu1 }
 0x69c   : > { %v7421_v16 = vpop.f32.mrb[25].mxu1 }
 0x69d   : > { %v1932_v17 = vpop.f32.mrb[26].mxu1  ;;  %v8741_v16 = vld [vmem:[%s9599_s20] sm:$0xf] }
 0x69e   : > { %v7997_v18 = vpack.i.bf16 %v1932_v17, %v1929_v15  ;;  %v7422_v19 = vpop.f32.mrb[27].mxu1  ;;  %v8738_v15 = vsub.s32 0, %v8735_v14 }
 0x6a0   : > { %7998 = vrot.lane.b32.xlu1 %v7997_v18, %s9534_s0  ;;  %v2185_v18 = vrot.slane %v8741_v16, %v8738_v15 }
 0x6d0   : > { %v2052_v21 = vpop.f32.mrb[28].mxu1 }
 0x6d1   : > { %v7433_v22 = vpop.f32.mrb[29].mxu1 }
 0x6d2   : > { %v2055_v23 = vpop.f32.mrb[30].mxu1 }
 0x6d3   : > { %v8002_v59 = vpack.i.bf16 %v2055_v23, %v2052_v21  ;;  %v7434_v61 = vpop.f32.mrb[31].mxu1 }
 0x6d5   : > { %8003 = vrot.lane.b32.xlu1 %v8002_v59, %s9530_s26  ;;  %v2191_v59 = vrot.slane %v8741_v16, %v8746_v20  ;;  %s9609_s26 = sld [smem:[#allocation14_spill]] }
 0x70a   : > { %v7994_v24 = vpop.permute.xlu0 %7993 }
 0x70b   : > { %v7996_v26 = vunpack.i.h.bf16 %v7994_v24  ;;  %v7995_v27 = vunpack.i.l.bf16 %v7994_v24 }
 0x70d   : > { %v2084_v31 = vsel %vm1571_vm3, %v1685_v7, %v7996_v26  ;;  %v2083_v32 = vsel %vm1571_vm3, %v1682_v5, %v7995_v27  ;;  %v8044_v5 = vld [vmem:[%s9605_s6] sm:$0xff]   ;;  %v8046_v27 = vld [vmem:[%s9605_s6 + $0x10] sm:$0xff]  }
 0x712   : > { %v7999_v25 = vpop.permute.xlu1 %7998 }
 0x713   : > { %v8001_v28 = vunpack.i.h.bf16 %v7999_v25  ;;  %v8000_v29 = vunpack.i.l.bf16 %v7999_v25 }
 0x715   : > { %v2086_v35 = vsel %vm1621_vm4, %v2084_v31, %v8001_v28  ;;  %v2085_v36 = vsel %vm1621_vm4, %v2083_v32, %v8000_v29  ;;  %v8047_v28 = vld [vmem:[%s9605_s6 + $0x18] sm:$0xff]   ;;  %v6948_v29 = vld [vmem:[%s8388_s30] ss:$0 sm:$0xff] }
 0x747   : > { %v8004_v30 = vpop.permute.xlu1 %8003 }
 0x748   : > { %v8006_v33 = vunpack.i.h.bf16 %v8004_v30  ;;  %v8005_v34 = vunpack.i.l.bf16 %v8004_v30 }
 0x74a   : > { %v2089_v37 = vsel %vm2087_vm5, %v2086_v35, %v8006_v33  ;;  %v2088_v39 = vsel %vm2087_vm5, %v2085_v36, %v8005_v34 }
 0x74b   : > { %v2090_v41 = vpack.c.bf16 %v2089_v37, %v2088_v39 }
 0x74d   : > { %7440 = vmatmul.mubr.msk.bf16.vlgmr.msra.gmra.mrb[16].mxu0 %vm1462_vm2, %v2090_v41  ;;  %v6952_v41 = vld [vmem:[%s9609_s26] ss:$0 sm:$0xff] }
 0x74e   : > { %7459 = vmatprep.mubr.msk.bf16.mxu0 %vm8308_vm1, %v8307_v3  ;;  %7452 = vmatpush3.bf16.msra.mxu0 %v8044_v5 }
 0x74f   : > { %7453 = vmatprep.subr.bf16.mxu0 %v8307_v3 }
 0x752   : > { %7454 = vmatpush3.bf16.msra.mxu0 %v8045_v6 }
 0x753   : > { %7455 = vmatprep.subr.bf16.mxu0 %v8307_v3 }
 0x756   : > { %7456 = vmatpush3.bf16.msra.mxu0 %v8046_v27 }
 0x757   : > { %7457 = vmatprep.subr.bf16.mxu0 %v8307_v3 }
 0x75a   : > { %7458 = vmatpush3.bf16.msra.mxu0 %v8047_v28 }
 0x75b   : > { %7479 = vmatprep.subr.bf16.mxu0 %v8307_v3 }
 0x820   : > { %v2146_v45 = vpop.f32.mrb[16].mxu0 }
 0x821   : > { %v2147_v46 = vadd.f32 %v6944_v44, %v2146_v45  ;;  %v7441_v47 = vpop.f32.mrb[17].mxu0 }
 0x822   : > { %v2149_v48 = vpop.f32.mrb[18].mxu0 }
 0x823   : > { %v2150_v49 = vadd.f32 %v6944_v44, %v2149_v48  ;;  %v7442_v50 = vpop.f32.mrb[19].mxu0  ;;  %v2153_v52 = vadd.f32 %v2147_v46, %v8593_v38 }
 0x825   : > { %v2155_v53 = vsel %vm1462_vm2, %v2153_v52, 0.0  ;;  %v2154_v54 = vadd.f32 %v2150_v49, %v8601_v43 }
 0x826   : > { %2156 = vadd.xlane.f32.xlu1 %v2155_v53 }
 0x827   : > { %v2158_v55 = vsel %vm1462_vm2, %v2154_v54, 0.0 }
 0x828   : > { %2159 = vadd.xlane.f32.xlu0 %v2158_v55 }
 0x8b3   : > { %v2157_v56 = vpop.xlane.xlu1 %2156 }
 0x8b4   : > { %v2162_v57 = vmul.f32 0.03125, %v2157_v56 }
 0x8b5   : > { %v2160_v58 = vpop.xlane.xlu0 %2159 }
 0x8b6   : > { %v2164_v60 = vsub.f32 %v2153_v52, %v2162_v57  ;;  %v2163_v62 = vmul.f32 0.03125, %v2160_v58 }
 0x8b8   : > { %v2165_v63 = vsub.f32 %v2154_v54, %v2163_v62  ;;  %v2166_v0 = vmul.f32 %v2164_v60, %v2164_v60 }
 0x8ba   : > { %v2168_v38 = vsel %vm1462_vm2, %v2166_v0, 0.0  ;;  %v2167_v2 = vmul.f32 %v2165_v63, %v2165_v63 }
 0x8bb   : > { %2169 = vadd.xlane.f32.xlu1 %v2168_v38 }
 0x8bc   : > { %v2171_v43 = vsel %vm1462_vm2, %v2167_v2, 0.0 }
 0x8bf   : > { %2172 = vadd.xlane.f32.xlu1 %v2171_v43  ;;  %v8048_v43 = vld [vmem:[%s9606_s3 + $0x10] sm:$0xff]   ;;  %s9614_s3 = smov 72  }
 0x948   : > { %v2170_v7 = vpop.xlane.xlu1 %2169 }
 0x949   : > { %v2174_v8 = vmul.f32 0.03125, %v2170_v7 }
 0x94b   : > { %v2176_v9 = vadd.f32 1e-05, %v2174_v8 }
 0x94c   : > { %v2173_v11 = vpop.xlane.xlu1 %2172 }
 0x94d   : > { %8126 = vrsqrt.f32 %v2176_v9  ;;  %v2175_v12 = vmul.f32 0.03125, %v2173_v11  ;;  %v8774_v11 = vsub.s32 3, %v8735_v14 }
 0x94f   : > { %v2177_v13 = vadd.f32 1e-05, %v2175_v12  ;;  %v2379_v12 = vrot.slane %v8741_v16, %v8771_v10 }
 0x951   : > { %8128 = vrsqrt.f32 %v2177_v13 }
 0x957   : > { %v8127_v17 = vpop.eup %8126 }
 0x958   : > { %v2180_v19 = vmul.f32 %v8127_v17, %v2164_v60  ;;  %v2385_v17 = vrot.slane %v8741_v16, %v8774_v11  ;;  %v8792_v16 = vld [vmem:[%s9604_s8 + $0x1] ss:$0 sm:$0xff]  ;;  %s9623_s8 = smov 120  }
 0x95a   : > { %v2186_v22 = vmul.f32 %v2185_v18, %v2180_v19 }
 0x95b   : > { %v8129_v21 = vpop.eup %8128 }
 0x95c   : > { %v2181_v23 = vmul.f32 %v8129_v21, %v2165_v63  ;;  %v2192_v24 = vadd.f32 %v2191_v59, %v2186_v22 }
 0x95e   : > { %v2187_v61 = vmul.f32 %v2185_v18, %v2181_v23 }
 0x960   : > { %v2193_v25 = vadd.f32 %v2191_v59, %v2187_v61 }
 0x962   : > { %v2198_v26 = vpack.c.bf16 %v2193_v25, %v2192_v24 }
 0x964   : > { %7448 = vmatmul.mubr.msk.bf16.vlgmr.msra.gmra.mrb[32].mxu1 %vm1462_vm2, %v2198_v26 }
 0x965   : > { %7467 = vmatprep.mubr.msk.bf16.mxu1 %vm8308_vm1, %v8307_v3  ;;  %7464 = vmatpush3.bf16.msra.mxu1 %v8048_v43 }
 0x966   : > { %7465 = vmatprep.subr.bf16.mxu1 %v8307_v3 }
 0x969   : > { %7466 = vmatpush3.bf16.msra.mxu1 %v8049_v4 }
 0x96a   : > { %7471 = vmatprep.subr.bf16.mxu1 %v8307_v3 }
 0xa37   : > { %v2255_v30 = vpop.f32.mrb[32].mxu1 }
 0xa38   : > { %v2256_v31 = vadd.f32 %v6948_v29, %v2255_v30  ;;  %v7449_v32 = vpop.f32.mrb[33].mxu1 }
 0xa39   : > { %v2258_v33 = vpop.f32.mrb[34].mxu1 }
 0xa3a   : > { %v2259_v34 = vadd.f32 %v6948_v29, %v2258_v33  ;;  %v7450_v35 = vpop.f32.mrb[35].mxu1  ;;  %v2262_v36 = vmax.f32 %v2256_v31, 0.0 }
 0xa3c   : > { %v2263_v37 = vmax.f32 %v2259_v34, 0.0 }
 0xa3e   : > { %v2272_v39 = vpack.c.bf16 %v2263_v37, %v2262_v36 }
 0xa40   : > { %7460 = vmatmul.mubr.msk.bf16.vlgmr.msra.gmra.mrb[20].mxu0 %vm1302_vm0, %v2272_v39 }
 0xa41   : > { %7481 = vmatprep.mubr.msk.bf16.mxu0 %vm8308_vm1, %v8307_v3 }
 0xb13   : > { %v2341_v44 = vpop.f32.mrb[20].mxu0 }
 0xb14   : > { %v2342_v45 = vadd.f32 %v6952_v41, %v2341_v44  ;;  %v7461_v46 = vpop.f32.mrb[21].mxu0 }
 0xb15   : > { %v2344_v47 = vpop.f32.mrb[22].mxu0 }
 0xb16   : > { %v2345_v48 = vadd.f32 %v6952_v41, %v2344_v47  ;;  %v7462_v49 = vpop.f32.mrb[23].mxu0  ;;  %v2348_v50 = vadd.f32 %v2342_v45, %v2192_v24 }
 0xb18   : > { %v2350_v52 = vsel %vm1462_vm2, %v2348_v50, 0.0  ;;  %v2349_v53 = vadd.f32 %v2345_v48, %v2193_v25 }
 0xb19   : > { %2351 = vadd.xlane.f32.xlu0 %v2350_v52 }
 0xb1a   : > { %v2353_v54 = vsel %vm1462_vm2, %v2349_v53, 0.0 }
 0xb1b   : > { %2354 = vadd.xlane.f32.xlu1 %v2353_v54 }
 0xba6   : > { %v2352_v55 = vpop.xlane.xlu0 %2351 }
 0xba7   : > { %v2356_v56 = vmul.f32 0.03125, %v2352_v55 }
 0xba8   : > { %v2355_v57 = vpop.xlane.xlu1 %2354 }
 0xba9   : > { %v2358_v58 = vsub.f32 %v2348_v50, %v2356_v56  ;;  %v2357_v60 = vmul.f32 0.03125, %v2355_v57 }
 0xbab   : > { %v2359_v62 = vsub.f32 %v2349_v53, %v2357_v60  ;;  %v2360_v63 = vmul.f32 %v2358_v58, %v2358_v58 }
 0xbad   : > { %v2362_v0 = vsel %vm1462_vm2, %v2360_v63, 0.0  ;;  %v2361_v38 = vmul.f32 %v2359_v62, %v2359_v62 }
 0xbae   : > { %2363 = vadd.xlane.f32.xlu0 %v2362_v0 }
 0xbaf   : > { %v2365_v2 = vsel %vm1462_vm2, %v2361_v38, 0.0 }
 0xbb0   : > { %2366 = vadd.xlane.f32.xlu1 %v2365_v2 }
 0xc3b   : > { %v2364_v51 = vpop.xlane.xlu0 %2363 }
 0xc3c   : > { %v2368_v5 = vmul.f32 0.03125, %v2364_v51 }
 0xc3d   : > { %v2367_v6 = vpop.xlane.xlu1 %2366 }
 0xc3e   : > { %v2370_v7 = vadd.f32 1e-05, %v2368_v5  ;;  %v2369_v8 = vmul.f32 0.03125, %v2367_v6 }
 0xc40   : > { %8130 = vrsqrt.f32 %v2370_v7  ;;  %v2371_v9 = vadd.f32 1e-05, %v2369_v8 }
 0xc42   : > { %8132 = vrsqrt.f32 %v2371_v9 }
 0xc4a   : > { %v8131_v13 = vpop.eup %8130 }
 0xc4b   : > { %v2374_v18 = vmul.f32 %v8131_v13, %v2358_v58 }
 0xc4c   : > { %v8133_v19 = vpop.eup %8132 }
 0xc4d   : > { %v2380_v21 = vmul.f32 %v2379_v12, %v2374_v18  ;;  %v2375_v22 = vmul.f32 %v8133_v19, %v2359_v62 }
 0xc4f   : > { %v8780_v23 = vadd.f32 %v2385_v17, %v2380_v21  ;;  %v2381_v59 = vmul.f32 %v2379_v12, %v2375_v22 }
 0xc51   : > { %v8782_v61 = vadd.f32 %v2385_v17, %v2381_v59  ;;  %v2397_v24 = vadd.f32 %v8780_v23, %v8596_v40 }
 0xc53   : > { %v2398_v25 = vadd.f32 %v8782_v61, %v8599_v42  ;;  %v2462_v48 = vpack.c.bf16 %v8782_v61, %v8780_v23 }
 0xc55   : > { %v2399_v26 = vpack.c.bf16 %v2398_v25, %v2397_v24 }
 0xc57   : > { %7468 = vmatmul.mubr.msk.bf16.vlgmr.msra.gmra.mrb[36].mxu1 %vm1462_vm2, %v2399_v26 }
 0xc58   : > { %7475 = vmatprep.mubr.msk.bf16.mxu1 %vm8308_vm1, %v8307_v3 }
 0xd2a   : > { %v2455_v27 = vpop.f32.mrb[36].mxu1 }
 0xd2b   : > { %v7469_v28 = vpop.f32.mrb[37].mxu1  ;;  %v2456_v30 = vadd.f32 %v8792_v16, %v2455_v27 }
 0xd2c   : > { %v2458_v29 = vpop.f32.mrb[38].mxu1 }
 0xd2d   : > { %v2459_v31 = vadd.f32 %v8792_v16, %v2458_v29  ;;  %v7470_v32 = vpop.f32.mrb[39].mxu1 }
 0xd2f   : > { %v2523_v40 = vpack.c.bf16 %v2459_v31, %v2456_v30 }
 0xd31   : > { %2646 = vrot.lane.b32.xlu1 %v2523_v40, %s9542_s10  ;;  %2526 = vrot.lane.b32.xlu0 %v2523_v40, %s9550_s2 }
 0xd35   : > { %2644 = vrot.lane.b32.xlu1 %v2523_v40, %s9547_s1  ;;  %2768 = vrot.lane.b32.xlu0 %v2523_v40, %s9545_s7 }
 0xd39   : > { %2770 = vrot.lane.b32.xlu1 %v2523_v40, %s9541_s15  ;;  %2891 = vrot.lane.b32.xlu0 %v2523_v40, %s9543_s11 }
 0xd3d   : > { %2893 = vrot.lane.b32.xlu1 %v2523_v40, %s9538_s16  ;;  %2465 = vrot.lane.b32.xlu0 %v8049_v4, %s9532_s28  ;;  %s9613_s16 = sld [smem:[#allocation17_spill]] }
 0xd41   : > { %2463 = vrot.lane.b32.xlu1 %v8048_v43, %s9532_s28 }
 0xda3   : > { %v2647_v42 = vpop.permute.xlu1 %2646  ;;  %v2527_v33 = vpop.permute.xlu0 %2526 }
 0xda4   : > { %v2532_v34 = vsel %vm1571_vm3, %v2527_v33, 0  ;;  %v2652_v39 = vsel %vm1571_vm3, %v2647_v42, 0 }
 0xda5   : > { %7480 = vmatpush3.bf16.xpose.msra.mxu0 %v2532_v34 }
 0xda6   : > { %7491 = vmatprep.subr.bf16.mxu0 %v8307_v3 }
 0xda7   : > { %v2645_v35 = vpop.permute.xlu1 %2644  ;;  %v2769_v36 = vpop.permute.xlu0 %2768 }
 0xdab   : > { %v2771_v37 = vpop.permute.xlu1 %2770  ;;  %v2892_v44 = vpop.permute.xlu0 %2891 }
 0xdac   : > { %7482 = vmatmul.mubr.msk.bf16.vlgmr.msra.gmra.mrb[24].mxu0 %vm1571_vm3, %v2523_v40  ;;  %v2776_v46 = vsel %vm1571_vm3, %v2771_v37, 0 }
 0xdad   : > { %7492 = vmatpush3.bf16.xpose.msra.mxu0 %v2652_v39  ;;  %7493 = vmatprep.mubr.msk.bf16.mxu0 %vm8308_vm1, %v8307_v3 }
 0xdae   : > { %7503 = vmatprep.subr.bf16.mxu0 %v8307_v3 }
 0xdaf   : > { %v2894_v41 = vpop.permute.xlu1 %2893  ;;  %v2466_v47 = vpop.permute.xlu0 %2465 }
 0xdb0   : > { %v2899_v49 = vsel %vm1571_vm3, %v2894_v41, 0 }
 0xdb3   : > { %v2464_v45 = vpop.permute.xlu1 %2463 }
 0xdb4   : > { %7472 = vmatpush3.bf16.msra.mxu1 %v2464_v45  ;;  %7494 = vmatmul.mubr.msk.bf16.vlgmr.msra.gmra.mrb[28].mxu0 %vm1571_vm3, %v2645_v35 }
 0xdb5   : > { %7504 = vmatpush3.bf16.xpose.msra.mxu0 %v2776_v46  ;;  %7473 = vmatprep.subr.bf16.mxu1 %v8307_v3 }
 0xdb6   : > { %7505 = vmatprep.mubr.msk.bf16.mxu0 %vm8308_vm1, %v8307_v3  ;;  %7515 = vmatprep.subr.bf16.mxu0 %v8307_v3 }
 0xdb8   : > { %7474 = vmatpush3.bf16.msra.mxu1 %v2466_v47 }
 0xdb9   : > { %7485 = vmatprep.subr.bf16.mxu1 %v8307_v3 }
 0xdbb   : > { %7476 = vmatmul.mubr.msk.bf16.vlgmr.msra.gmra.mrb[40].mxu1 %vm1462_vm2, %v2462_v48 }
 0xdbc   : > { %7506 = vmatmul.mubr.msk.bf16.vlgmr.msra.gmra.mrb[32].mxu0 %vm1571_vm3, %v2769_v36  ;;  %7487 = vmatprep.mubr.msk.bf16.mxu1 %vm8308_vm1, %v8307_v3 }
 0xdbd   : > { %7516 = vmatpush3.bf16.xpose.msra.mxu0 %v2899_v49  ;;  %7517 = vmatprep.mubr.msk.bf16.mxu0 %vm8308_vm1, %v8307_v3 }
 0xdbe   : > { %7527 = vmatprep.subr.bf16.mxu0 %v8307_v3 }
 0xdc4   : > { %7518 = vmatmul.mubr.msk.bf16.vlgmr.msra.gmra.mrb[36].mxu0 %vm1571_vm3, %v2892_v44 }
 0xdc5   : > { %7531 = vmatprep.mubr.msk.bf16.mxu0 %vm8308_vm1, %v8307_v3 }
 0xe7f   : > { %v2568_v50 = vpop.f32.mrb[24].mxu0 }
 0xe80   : > { %v8832_v52 = vmul.f32 0.35355338, %v2568_v50  ;;  %v7483_v53 = vpop.f32.mrb[25].mxu0 }
 0xe81   : > { %v2571_v54 = vpop.f32.mrb[26].mxu0 }
 0xe82   : > { %v8834_v55 = vmul.f32 0.35355338, %v2571_v54  ;;  %v7484_v56 = vpop.f32.mrb[27].mxu0  ;;  %v2577_v57 = vsel %vm1621_vm4, %v8832_v52, -inf }
 0xe83   : > { %2578 = vmax.xlane.f32.xlu1 %v2577_v57 }
 0xe84   : > { %v2580_v58 = vsel %vm1621_vm4, %v8834_v55, -inf }
 0xe85   : > { %2581 = vmax.xlane.f32.xlu0 %v2580_v58 }
 0xe87   : > { %v2688_v60 = vpop.f32.mrb[28].mxu0 }
 0xe88   : > { %v2695_v62 = vmul.f32 0.35355338, %v2688_v60  ;;  %v7495_v63 = vpop.f32.mrb[29].mxu0 }
 0xe89   : > { %v2691_v0 = vpop.f32.mrb[30].mxu0 }
 0xe8a   : > { %v2696_v38 = vmul.f32 0.35355338, %v2691_v0  ;;  %v7496_v2 = vpop.f32.mrb[31].mxu0  ;;  %v2697_v43 = vsel %vm1621_vm4, %v2695_v62, -inf }
 0xe8b   : > { %2698 = vmax.xlane.f32.xlu0 %v2697_v43 }
 0xe8c   : > { %v2700_v51 = vsel %vm1621_vm4, %v2696_v38, -inf }
 0xe8e   : > { %v2509_v4 = vpop.f32.mrb[40].mxu1 }
 0xe8f   : > { %2701 = vmax.xlane.f32.xlu0 %v2700_v51  ;;  %v7477_v5 = vpop.f32.mrb[41].mxu1  ;;  %v2812_v6 = vpop.f32.mrb[32].mxu0 }
 0xe90   : > { %v2819_v7 = vmul.f32 0.35355338, %v2812_v6  ;;  %v2512_v8 = vpop.f32.mrb[42].mxu1  ;;  %v7507_v9 = vpop.f32.mrb[33].mxu0 }
 0xe91   : > { %v7478_v12 = vpop.f32.mrb[43].mxu1  ;;  %v2815_v13 = vpop.f32.mrb[34].mxu0 }
 0xe92   : > { %v2820_v17 = vmul.f32 0.35355338, %v2815_v13  ;;  %v7508_v18 = vpop.f32.mrb[35].mxu0  ;;  %v2821_v19 = vsel %vm1621_vm4, %v2819_v7, -inf }
 0xe93   : > { %2822 = vmax.xlane.f32.xlu1 %v2821_v19 }
 0xe94   : > { %v2824_v21 = vsel %vm1621_vm4, %v2820_v17, -inf }
 0xe95   : > { %2825 = vmax.xlane.f32.xlu0 %v2824_v21 }
 0xe97   : > { %v2935_v22 = vpop.f32.mrb[36].mxu0 }
 0xe98   : > { %v2942_v59 = vmul.f32 0.35355338, %v2935_v22  ;;  %v7519_v24 = vpop.f32.mrb[37].mxu0 }
 0xe99   : > { %v2938_v25 = vpop.f32.mrb[38].mxu0 }
 0xe9a   : > { %v2943_v26 = vmul.f32 0.35355338, %v2938_v25  ;;  %v7520_v27 = vpop.f32.mrb[39].mxu0  ;;  %v2944_v28 = vsel %vm1621_vm4, %v2942_v59, -inf }
 0xe9b   : > { %2945 = vmax.xlane.f32.xlu1 %v2944_v28 }
 0xe9c   : > { %v2947_v29 = vsel %vm1621_vm4, %v2943_v26, -inf }
 0xe9d   : > { %2948 = vmax.xlane.f32.xlu0 %v2947_v29 }
 0xeac   : > { %2469 = vrot.lane.b32.xlu1 %v8792_v16, %s9532_s28  ;;  %s9610_s28 = smov 24  }
 0xf10   : > { %v2579_v30 = vpop.xlane.xlu1 %2578 }
 0xf11   : > { %v2583_v41 = vsub.f32 %v8832_v52, %v2579_v30 }
 0xf12   : > { %v2582_v16 = vpop.xlane.xlu0 %2581 }
 0xf13   : > { %v2585_v45 = vmul.f32 1.442695, %v2583_v41  ;;  %v2584_v46 = vsub.f32 %v8834_v55, %v2582_v16 }
 0xf15   : > { %v2587_v47 = vmul.f32 1.442695, %v2584_v46 }
 0xf18   : > { %v2699_v44 = vpop.xlane.xlu0 %2698 }
 0xf19   : > { %v2703_v48 = vsub.f32 %v2695_v62, %v2699_v44 }
 0xf1b   : > { %v2705_v50 = vmul.f32 1.442695, %v2703_v48 }
 0xf1c   : > { %v2702_v49 = vpop.xlane.xlu0 %2701 }
 0xf1d   : > { %v2704_v53 = vsub.f32 %v2696_v38, %v2702_v49 }
 0xf1f   : > { %v2707_v56 = vmul.f32 1.442695, %v2704_v53 }
 0xf20   : > { %v2823_v31 = vpop.xlane.xlu1 %2822 }
 0xf21   : > { %v2827_v32 = vsub.f32 %v2819_v7, %v2823_v31 }
 0xf22   : > { %v2826_v54 = vpop.xlane.xlu0 %2825 }
 0xf23   : > { %v2829_v40 = vmul.f32 1.442695, %v2827_v32  ;;  %v2828_v57 = vsub.f32 %v2820_v17, %v2826_v54 }
 0xf25   : > { %8134 = vpow2.f32 %v2829_v40  ;;  %v2831_v52 = vmul.f32 1.442695, %v2828_v57 }
 0xf26   : > { %8136 = vpow2.f32 %v2585_v45 }
 0xf27   : > { %8138 = vpow2.f32 %v2587_v47 }
 0xf28   : > { %v2946_v42 = vpop.xlane.xlu1 %2945  ;;  %8140 = vpow2.f32 %v2705_v50 }
 0xf29   : > { %8142 = vpow2.f32 %v2707_v56  ;;  %v2950_v60 = vsub.f32 %v2942_v59, %v2946_v42 }
 0xf2a   : > { %v2949_v63 = vpop.xlane.xlu0 %2948  ;;  %8144 = vpow2.f32 %v2831_v52 }
 0xf2b   : > { %v2952_v62 = vmul.f32 1.442695, %v2950_v60  ;;  %v2951_v2 = vsub.f32 %v2943_v26, %v2949_v63  ;;  %v8050_v63 = vld [vmem:[%s9602_s14 + $0x10] sm:$0xff]  }
 0xf2c   : > { %v2470_v33 = vpop.permute.xlu1 %2469  ;;  %7528 = vmatpush3.bf16.msra.mxu0 %v8050_v63 }
 0xf2d   : > { %v2510_v34 = vadd.f32 %v2509_v4, %v2470_v33  ;;  %v2513_v35 = vadd.f32 %v2512_v8, %v2470_v33  ;;  %8146 = vpow2.f32 %v2952_v62  ;;  %v2954_v38 = vmul.f32 1.442695, %v2951_v2  ;;  %7529 = vmatprep.subr.bf16.mxu0 %v8307_v3 }
 0xf2f   : > { %v8848_v36 = vpop.eup %8134  ;;  %v2524_v37 = vpack.c.bf16 %v2513_v35, %v2510_v34  ;;  %8148 = vpow2.f32 %v2954_v38 }
 0xf30   : > { %v2833_v39 = vsel %vm1621_vm4, %v8848_v36, 0.0  ;;  %v8137_v58 = vpop.eup %8136 }
 0xf31   : > { %2834 = vadd.xlane.f32.xlu1 %v2833_v39  ;;  %2721 = vrot.lane.b32.xlu0 %v2524_v37, %s9547_s1  ;;  %v2589_v55 = vsel %vm1621_vm4, %v8137_v58, 0.0  ;;  %v8139_v0 = vpop.eup %8138 }
 0xf32   : > { %7486 = vmatpush3.bf16.msra.mxu1 %v2524_v37  ;;  %v2592_v43 = vsel %vm1621_vm4, %v8139_v0, 0.0  ;;  %v8141_v4 = vpop.eup %8140 }
 0xf33   : > { %7497 = vmatprep.subr.bf16.mxu1 %v8307_v3  ;;  %v2709_v51 = vsel %vm1621_vm4, %v8141_v4, 0.0  ;;  %v8143_v5 = vpop.eup %8142 }
 0xf34   : > { %v2712_v6 = vsel %vm1621_vm4, %v8143_v5, 0.0  ;;  %v8145_v7 = vpop.eup %8144 }
 0xf35   : > { %v2836_v8 = vsel %vm1621_vm4, %v8145_v7, 0.0 }
 0xf37   : > { %v8147_v9 = vpop.eup %8146 }
 0xf38   : > { %v2956_v12 = vsel %vm1621_vm4, %v8147_v9, 0.0 }
 0xf39   : > { %v8149_v13 = vpop.eup %8148 }
 0xf3a   : > { %v2959_v17 = vsel %vm1621_vm4, %v8149_v13, 0.0 }
 0xf42   : > { %2844 = vrot.lane.b32.xlu1 %v2524_v37, %s9545_s7 }
 0xf50   : > { %2590 = vadd.xlane.f32.xlu0 %v2589_v55 }
 0xf54   : > { %2593 = vadd.xlane.f32.xlu0 %v2592_v43  ;;  %v8051_v43 = vld [vmem:[%s9602_s14 + $0x18] sm:$0xff]   ;;  %s9625_s14 = smov 104  }
 0xf55   : > { %7530 = vmatpush3.bf16.msra.mxu0 %v8051_v43 }
 0xf56   : > { %7543 = vmatprep.subr.bf16.mxu0 %v8307_v3 }
 0xf58   : > { %2710 = vadd.xlane.f32.xlu0 %v2709_v51 }
 0xf5c   : > { %2713 = vadd.xlane.f32.xlu0 %v2712_v6 }
 0xf60   : > { %2837 = vadd.xlane.f32.xlu0 %v2836_v8 }
 0xf64   : > { %2957 = vadd.xlane.f32.xlu0 %v2956_v12 }
 0xf68   : > { %2960 = vadd.xlane.f32.xlu0 %v2959_v17 }
 0xf7e   : > { %2967 = vrot.lane.b32.xlu0 %v2524_v37, %s9543_s11 }
 0xfa3   : > { %v2722_v18 = vpop.permute.xlu0 %2721 }
 0xfbe   : > { %v2835_v26 = vpop.xlane.xlu1 %2834 }
 0xfc2   : > { %v2845_v39 = vpop.permute.xlu1 %2844 }
 0xfdd   : > { %v2591_v19 = vpop.xlane.xlu0 %2590 }
 0xfde   : > { %8150 = vrcp.f32 %v2591_v19 }
 0xfe1   : > { %v2594_v21 = vpop.xlane.xlu0 %2593 }
 0xfe2   : > { %8152 = vrcp.f32 %v2594_v21 }
 0xfe5   : > { %v2711_v22 = vpop.xlane.xlu0 %2710 }
 0xfe6   : > { %8154 = vrcp.f32 %v2711_v22 }
 0xfe8   : > { %v8151_v24 = vpop.eup %8150 }
 0xfe9   : > { %v2714_v59 = vpop.xlane.xlu0 %2713  ;;  %v2597_v27 = vmul.f32 %v8151_v24, %v8137_v58 }
 0xfea   : > { %8156 = vrcp.f32 %v2714_v59 }
 0xfec   : > { %v8153_v25 = vpop.eup %8152 }
 0xfed   : > { %v2598_v28 = vmul.f32 %v8153_v25, %v8139_v0  ;;  %v2838_v29 = vpop.xlane.xlu0 %2837 }
 0xfee   : > { %8158 = vrcp.f32 %v2838_v29 }
 0xfef   : > { %v2599_v30 = vpack.c.bf16 %v2598_v28, %v2597_v27  ;;  %8160 = vrcp.f32 %v2835_v26 }
 0xff0   : > { %v8155_v32 = vpop.eup %8154 }
 0xff1   : > { %v2958_v31 = vpop.xlane.xlu0 %2957  ;;  %7488 = vmatmul.mubr.msk.bf16.vlgmr.msra.gmra.mrb[44].mxu1 %vm1621_vm4, %v2599_v30  ;;  %v2717_v42 = vmul.f32 %v8155_v32, %v8141_v4  ;;  %v6982_v32 = vld [vmem:[%s9600_s19 + $0x1] ss:$0 sm:$0xff]  ;;  %s9627_s19 = sld [smem:[#allocation23_spill]] }
 0xff2   : > { %7498 = vmatpush3.bf16.msra.mxu1 %v2722_v18  ;;  %7499 = vmatprep.mubr.msk.bf16.mxu1 %vm8308_vm1, %v8307_v3 }
 0xff3   : > { %7509 = vmatprep.subr.bf16.mxu1 %v8307_v3 }
 0xff4   : > { %v8157_v40 = vpop.eup %8156 }
 0xff5   : > { %v2718_v33 = vmul.f32 %v8157_v40, %v8143_v5  ;;  %v2961_v34 = vpop.xlane.xlu0 %2960 }
 0xff6   : > { %8162 = vrcp.f32 %v2961_v34 }
 0xff7   : > { %v2719_v35 = vpack.c.bf16 %v2718_v33, %v2717_v42  ;;  %8164 = vrcp.f32 %v2958_v31 }
 0xff8   : > { %v8159_v37 = vpop.eup %8158 }
 0xff9   : > { %7500 = vmatmul.mubr.msk.bf16.vlgmr.msra.gmra.mrb[48].mxu1 %vm1621_vm4, %v2719_v35  ;;  %v8161_v16 = vpop.eup %8160  ;;  %v2842_v41 = vmul.f32 %v8159_v37, %v8145_v7  ;;  %v2968_v47 = vpop.permute.xlu0 %2967 }
 0xffa   : > { %7510 = vmatpush3.bf16.msra.mxu1 %v2845_v39  ;;  %7511 = vmatprep.mubr.msk.bf16.mxu1 %vm8308_vm1, %v8307_v3  ;;  %v2841_v44 = vmul.f32 %v8161_v16, %v8848_v36 }
 0xffb   : > { %7521 = vmatprep.subr.bf16.mxu1 %v8307_v3 }
 0xffc   : > { %v2843_v45 = vpack.c.bf16 %v2842_v41, %v2841_v44 }
0x1000   : > { %v8163_v46 = vpop.eup %8162 }
0x1001   : > { %7512 = vmatmul.mubr.msk.bf16.vlgmr.msra.gmra.mrb[52].mxu1 %vm1621_vm4, %v2843_v45  ;;  %v8165_v48 = vpop.eup %8164  ;;  %v2965_v49 = vmul.f32 %v8163_v46, %v8149_v13 }
0x1002   : > { %7522 = vmatpush3.bf16.msra.mxu1 %v2968_v47  ;;  %7523 = vmatprep.mubr.msk.bf16.mxu1 %vm8308_vm1, %v8307_v3  ;;  %v2964_v50 = vmul.f32 %v8165_v48, %v8147_v9 }
0x1003   : > { %7535 = vmatprep.subr.bf16.mxu1 %v8307_v3 }
0x1004   : > { %v2966_v53 = vpack.c.bf16 %v2965_v49, %v2964_v50 }
0x1009   : > { %7524 = vmatmul.mubr.msk.bf16.vlgmr.msra.gmra.mrb[56].mxu1 %vm1621_vm4, %v2966_v53 }
0x100a   : > { %7539 = vmatprep.mubr.msk.bf16.mxu1 %vm8308_vm1, %v8307_v3 }
0x10c4   : > { %v2637_v36 = vpop.f32.mrb[44].mxu1 }
0x10c5   : > { %v7489_v54 = vpop.f32.mrb[45].mxu1 }
0x10c6   : > { %v2640_v56 = vpop.f32.mrb[46].mxu1  ;;  %v8052_v54 = vld [vmem:[%s9598_s24 + $0x10] sm:$0xff]  }
0x10c7   : > { %v7490_v57 = vpop.f32.mrb[47].mxu1  ;;  %7536 = vmatpush3.bf16.msra.mxu1 %v8052_v54 }
0x10c8   : > { %7537 = vmatprep.subr.bf16.mxu1 %v8307_v3  ;;  %v8056_v57 = vld [vmem:[%s9605_s6 + $0x20] sm:$0xff]  }
0x10cc   : > { %v2761_v58 = vpop.f32.mrb[48].mxu1 }
0x10cd   : > { %v7501_v52 = vpop.f32.mrb[49].mxu1 }
0x10ce   : > { %v2764_v60 = vpop.f32.mrb[50].mxu1 }
0x10cf   : > { %v8007_v55 = vpack.i.bf16 %v2764_v60, %v2761_v58  ;;  %v7502_v0 = vpop.f32.mrb[51].mxu1  ;;  %v8057_v58 = vld [vmem:[%s9605_s6 + $0x28] sm:$0xff]  }
0x10d1   : > { %8008 = vrot.lane.b32.xlu0 %v8007_v55, %s9536_s18  ;;  %s9612_s18 = sld [smem:[#allocation4_spill]] }
0x10d4   : > { %v2884_v62 = vpop.f32.mrb[52].mxu1 }
0x10d5   : > { %v7513_v2 = vpop.f32.mrb[53].mxu1 }
0x10d6   : > { %v2887_v4 = vpop.f32.mrb[54].mxu1  ;;  %v8913_v2 = vld [vmem:[%s9599_s20 + $0x4] sm:$0xf]  ;;  %s9628_s20 = sld [smem:[#allocation24_spill]] }
0x10d7   : > { %v8012_v38 = vpack.i.bf16 %v2887_v4, %v2884_v62  ;;  %v7514_v51 = vpop.f32.mrb[55].mxu1  ;;  %v3138_v4 = vrot.slane %v8913_v2, %v8738_v15 }
0x10d9   : > { %8013 = vrot.lane.b32.xlu0 %v8012_v38, %s9534_s0  ;;  %s9611_s0 = sld [smem:[#allocation16_spill]] }
0x10dc   : > { %v3007_v5 = vpop.f32.mrb[56].mxu1 }
0x10dd   : > { %v7525_v6 = vpop.f32.mrb[57].mxu1 }
0x10de   : > { %v3010_v7 = vpop.f32.mrb[58].mxu1 }
0x10df   : > { %v8017_v8 = vpack.i.bf16 %v3010_v7, %v3007_v5  ;;  %v7526_v9 = vpop.f32.mrb[59].mxu1  ;;  %v3144_v7 = vrot.slane %v8913_v2, %v8746_v20 }
0x10e1   : > { %8018 = vrot.lane.b32.xlu0 %v8017_v8, %s9610_s28 }
0x1143   : > { %v8009_v12 = vpop.permute.xlu0 %8008 }
0x1144   : > { %v8011_v17 = vunpack.i.h.bf16 %v8009_v12  ;;  %v8010_v18 = vunpack.i.l.bf16 %v8009_v12 }
0x1146   : > { %v3039_v59 = vsel %vm1571_vm3, %v2640_v56, %v8011_v17  ;;  %v3038_v24 = vsel %vm1571_vm3, %v2637_v36, %v8010_v18  ;;  %v8053_v56 = vld [vmem:[%s9598_s24 + $0x18] sm:$0xff]   ;;  %v8055_v18 = vld [vmem:[%s9611_s0 + $0x8] sm:$0xff]   ;;  %s9630_s24 = sld [smem:[#allocation25_spill]] }
0x1147   : > { %7538 = vmatpush3.bf16.msra.mxu1 %v8053_v56 }
0x1148   : > { %7555 = vmatprep.subr.bf16.mxu1 %v8307_v3 }
0x114b   : > { %v8014_v13 = vpop.permute.xlu0 %8013 }
0x114c   : > { %v8016_v19 = vunpack.i.h.bf16 %v8014_v13  ;;  %v8015_v21 = vunpack.i.l.bf16 %v8014_v13  ;;  %v8054_v13 = vld [vmem:[%s9611_s0] sm:$0xff]  }
0x114e   : > { %v3041_v27 = vsel %vm1621_vm4, %v3039_v59, %v8016_v19  ;;  %v3040_v28 = vsel %vm1621_vm4, %v3038_v24, %v8015_v21  ;;  %v8931_v19 = vld [vmem:[%s9612_s18] sm:$0xff]  ;;  %v8059_v59 = vld [vmem:[%s9605_s6 + $0x38] sm:$0xff]  }
0x114f   : > { %v3353_v21 = vpack.c.bf16 %v8931_v19, %v8931_v19  ;;  %v6991_v24 = vld [vmem:[%s8388_s30 + $0x1] ss:$0 sm:$0xff] }
0x1153   : > { %v8019_v22 = vpop.permute.xlu0 %8018 }
0x1154   : > { %v8021_v25 = vunpack.i.h.bf16 %v8019_v22  ;;  %v8020_v26 = vunpack.i.l.bf16 %v8019_v22  ;;  %v8058_v22 = vld [vmem:[%s9605_s6 + $0x30] sm:$0xff]   ;;  %s9621_s6 = sld [smem:[#allocation21_spill]] }
0x1156   : > { %v3043_v29 = vsel %vm2087_vm5, %v3041_v27, %v8021_v25  ;;  %v3042_v30 = vsel %vm2087_vm5, %v3040_v28, %v8020_v26 }
0x1157   : > { %v3044_v31 = vpack.c.bf16 %v3043_v29, %v3042_v30 }
0x1159   : > { %7532 = vmatmul.mubr.msk.bf16.vlgmr.msra.gmra.mrb[40].mxu0 %vm1462_vm2, %v3044_v31 }
0x115a   : > { %7551 = vmatprep.mubr.msk.bf16.mxu0 %vm8308_vm1, %v8307_v3  ;;  %7544 = vmatpush3.bf16.msra.mxu0 %v8056_v57 }
0x115b   : > { %7545 = vmatprep.subr.bf16.mxu0 %v8307_v3 }
0x115e   : > { %7546 = vmatpush3.bf16.msra.mxu0 %v8057_v58 }
0x115f   : > { %7547 = vmatprep.subr.bf16.mxu0 %v8307_v3 }
0x1162   : > { %7548 = vmatpush3.bf16.msra.mxu0 %v8058_v22 }
0x1163   : > { %7549 = vmatprep.subr.bf16.mxu0 %v8307_v3 }
0x1166   : > { %7550 = vmatpush3.bf16.msra.mxu0 %v8059_v59 }
0x1167   : > { %7571 = vmatprep.subr.bf16.mxu0 %v8307_v3 }
0x122c   : > { %v3100_v40 = vpop.f32.mrb[40].mxu0 }
0x122d   : > { %v3101_v42 = vadd.f32 %v6982_v32, %v3100_v40  ;;  %v7533_v33 = vpop.f32.mrb[41].mxu0  ;;  %v8946_v40 = vld [vmem:[%s9613_s16] ss:$0 sm:$0xff] }
0x122e   : > { %v3103_v34 = vpop.f32.mrb[42].mxu0 }
0x122f   : > { %v3104_v35 = vadd.f32 %v6982_v32, %v3103_v34  ;;  %v7534_v37 = vpop.f32.mrb[43].mxu0  ;;  %v3107_v39 = vadd.f32 %v3101_v42, %v8780_v23 }
0x1231   : > { %v3109_v16 = vsel %vm1462_vm2, %v3107_v39, 0.0  ;;  %v3108_v41 = vadd.f32 %v3104_v35, %v8782_v61 }
0x1232   : > { %3110 = vadd.xlane.f32.xlu0 %v3109_v16 }
0x1233   : > { %v3112_v44 = vsel %vm1462_vm2, %v3108_v41, 0.0 }
0x1234   : > { %3113 = vadd.xlane.f32.xlu1 %v3112_v44 }
0x12bf   : > { %v3111_v45 = vpop.xlane.xlu0 %3110 }
0x12c0   : > { %v3115_v46 = vmul.f32 0.03125, %v3111_v45 }
0x12c1   : > { %v3114_v47 = vpop.xlane.xlu1 %3113 }
0x12c2   : > { %v3117_v48 = vsub.f32 %v3107_v39, %v3115_v46  ;;  %v3116_v49 = vmul.f32 0.03125, %v3114_v47 }
0x12c4   : > { %v3118_v50 = vsub.f32 %v3108_v41, %v3116_v49  ;;  %v3119_v53 = vmul.f32 %v3117_v48, %v3117_v48 }
0x12c6   : > { %v3121_v23 = vsel %vm1462_vm2, %v3119_v53, 0.0  ;;  %v3120_v36 = vmul.f32 %v3118_v50, %v3118_v50 }
0x12c7   : > { %3122 = vadd.xlane.f32.xlu0 %v3121_v23 }
0x12c8   : > { %v3124_v61 = vsel %vm1462_vm2, %v3120_v36, 0.0 }
0x12cb   : > { %3125 = vadd.xlane.f32.xlu0 %v3124_v61 }
0x1354   : > { %v3123_v52 = vpop.xlane.xlu0 %3122 }
0x1355   : > { %v3127_v60 = vmul.f32 0.03125, %v3123_v52 }
0x1357   : > { %v3129_v63 = vadd.f32 1e-05, %v3127_v60 }
0x1358   : > { %v3126_v55 = vpop.xlane.xlu0 %3125 }
0x1359   : > { %8166 = vrsqrt.f32 %v3129_v63  ;;  %v3128_v0 = vmul.f32 0.03125, %v3126_v55 }
0x135b   : > { %v3130_v62 = vadd.f32 1e-05, %v3128_v0 }
0x135d   : > { %8168 = vrsqrt.f32 %v3130_v62 }
0x1363   : > { %v8167_v43 = vpop.eup %8166 }
0x1364   : > { %v3133_v38 = vmul.f32 %v8167_v43, %v3117_v48 }
0x1366   : > { %v3139_v5 = vmul.f32 %v3138_v4, %v3133_v38 }
0x1367   : > { %v8169_v51 = vpop.eup %8168 }
0x1368   : > { %v3134_v6 = vmul.f32 %v8169_v51, %v3118_v50  ;;  %v8919_v9 = vadd.f32 %v3144_v7, %v3139_v5 }
0x136a   : > { %v3140_v8 = vmul.f32 %v3138_v4, %v3134_v6 }
0x136c   : > { %v8921_v12 = vadd.f32 %v3144_v7, %v3140_v8 }
0x136e   : > { %v3152_v17 = vpack.c.bf16 %v8921_v12, %v8919_v9 }
0x1370   : > { %7540 = vmatmul.mubr.msk.bf16.vlgmr.msra.gmra.mrb[60].mxu1 %vm1462_vm2, %v3152_v17 }
0x1371   : > { %7556 = vmatpush3.bf16.msra.mxu1 %v8054_v13  ;;  %7559 = vmatprep.mubr.msk.bf16.mxu1 %vm8308_vm1, %v8307_v3 }
0x1372   : > { %7557 = vmatprep.subr.bf16.mxu1 %v8307_v3 }
0x1375   : > { %7558 = vmatpush3.bf16.msra.mxu1 %v8055_v18 }
0x1376   : > { %7563 = vmatprep.subr.bf16.mxu1 %v8307_v3 }
0x1378   : > { %7560 = vmatmul.mubr.msk.bf16.vlgmr.msra.gmra.mrb[64].mxu1 %vm1462_vm2, %v3353_v21 }
0x1379   : > { %7567 = vmatprep.mubr.msk.bf16.mxu1 %vm8308_vm1, %v8307_v3 }
0x1443   : > { %v3210_v25 = vpop.f32.mrb[60].mxu1 }
0x1444   : > { %v3211_v26 = vadd.f32 %v6991_v24, %v3210_v25  ;;  %v7541_v27 = vpop.f32.mrb[61].mxu1 }
0x1445   : > { %v3213_v28 = vpop.f32.mrb[62].mxu1 }
0x1446   : > { %v3214_v29 = vadd.f32 %v6991_v24, %v3213_v28  ;;  %v7542_v30 = vpop.f32.mrb[63].mxu1  ;;  %v3217_v31 = vmax.f32 %v3211_v26, 0.0 }
0x1448   : > { %v3218_v32 = vmax.f32 %v3214_v29, 0.0 }
0x144a   : > { %v3228_v42 = vpack.c.bf16 %v3218_v32, %v3217_v31 }
0x144b   : > { %v3409_v33 = vpop.f32.mrb[64].mxu1 }
0x144c   : > { %v3410_v34 = vadd.f32 %v8946_v40, %v3409_v33  ;;  %7552 = vmatmul.mubr.msk.bf16.vlgmr.msra.gmra.mrb[44].mxu0 %vm1302_vm0, %v3228_v42  ;;  %v7561_v35 = vpop.f32.mrb[65].mxu1 }
0x144d   : > { %v3412_v37 = vpop.f32.mrb[66].mxu1  ;;  %7573 = vmatprep.mubr.msk.bf16.mxu0 %vm8308_vm1, %v8307_v3 }
0x144e   : > { %v3472_v39 = vpack.c.bf16 %v3410_v34, %v3410_v34  ;;  %v7562_v16 = vpop.f32.mrb[67].mxu1 }
0x1450   : > { %3585 = vrot.lane.b32.xlu0 %v3472_v39, %s9542_s10  ;;  %3475 = vrot.lane.b32.xlu1 %v3472_v39, %s9550_s2  ;;  %s9617_s10 = smov 8  }
0x1454   : > { %3695 = vrot.lane.b32.xlu0 %v3472_v39, %s9545_s7  ;;  %3583 = vrot.lane.b32.xlu1 %v3472_v39, %s9547_s1 }
0x1458   : > { %3806 = vrot.lane.b32.xlu0 %v3472_v39, %s9543_s11  ;;  %3697 = vrot.lane.b32.xlu1 %v3472_v39, %s9541_s15  ;;  %s9616_s15 = sld [smem:[#allocation18_spill]] }
0x145c   : > { %3808 = vrot.lane.b32.xlu1 %v3472_v39, %s9614_s3  ;;  %3417 = vrot.lane.b32.xlu0 %v8055_v18, %s9615_s5 }
0x1460   : > { %3415 = vrot.lane.b32.xlu1 %v8054_v13, %s9615_s5 }
0x14c2   : > { %v3476_v41 = vpop.permute.xlu1 %3475  ;;  %v3586_v45 = vpop.permute.xlu0 %3585 }
0x14c3   : > { %v3481_v44 = vsel %vm1571_vm3, %v3476_v41, 0  ;;  %v3591_v49 = vsel %vm1571_vm3, %v3586_v45, 0 }
0x14c4   : > { %7572 = vmatpush3.bf16.xpose.msra.mxu0 %v3481_v44 }
0x14c5   : > { %7583 = vmatprep.subr.bf16.mxu0 %v8307_v3 }
0x14c6   : > { %v3584_v46 = vpop.permute.xlu1 %3583  ;;  %v3696_v47 = vpop.permute.xlu0 %3695 }
0x14ca   : > { %v3698_v48 = vpop.permute.xlu1 %3697  ;;  %v3807_v53 = vpop.permute.xlu0 %3806 }
0x14cb   : > { %7574 = vmatmul.mubr.msk.bf16.vlgmr.msra.gmra.mrb[48].mxu0 %vm1571_vm3, %v3472_v39  ;;  %v3703_v36 = vsel %vm1571_vm3, %v3698_v48, 0 }
0x14cc   : > { %7584 = vmatpush3.bf16.xpose.msra.mxu0 %v3591_v49  ;;  %7585 = vmatprep.mubr.msk.bf16.mxu0 %vm8308_vm1, %v8307_v3 }
0x14cd   : > { %7595 = vmatprep.subr.bf16.mxu0 %v8307_v3 }
0x14ce   : > { %v3809_v50 = vpop.permute.xlu1 %3808  ;;  %v3418_v61 = vpop.permute.xlu0 %3417 }
0x14cf   : > { %v3814_v54 = vsel %vm1571_vm3, %v3809_v50, 0 }
0x14d2   : > { %v3416_v23 = vpop.permute.xlu1 %3415 }
0x14d3   : > { %7586 = vmatmul.mubr.msk.bf16.vlgmr.msra.gmra.mrb[52].mxu0 %vm1571_vm3, %v3584_v46  ;;  %7564 = vmatpush3.bf16.msra.mxu1 %v3416_v23 }
0x14d4   : > { %7596 = vmatpush3.bf16.xpose.msra.mxu0 %v3703_v36  ;;  %7597 = vmatprep.mubr.msk.bf16.mxu0 %vm8308_vm1, %v8307_v3 }
0x14d5   : > { %7607 = vmatprep.subr.bf16.mxu0 %v8307_v3  ;;  %7565 = vmatprep.subr.bf16.mxu1 %v8307_v3 }
0x14d7   : > { %7566 = vmatpush3.bf16.msra.mxu1 %v3418_v61 }
0x14d8   : > { %7577 = vmatprep.subr.bf16.mxu1 %v8307_v3 }
0x14da   : > { %7568 = vmatmul.mubr.bf16.vlgmr.msra.gmra.mrb[68].mxu1 %v8306_v1 }
0x14db   : > { %7598 = vmatmul.mubr.msk.bf16.vlgmr.msra.gmra.mrb[56].mxu0 %vm1571_vm3, %v3696_v47  ;;  %7579 = vmatprep.mubr.msk.bf16.mxu1 %vm8308_vm1, %v8307_v3 }
0x14dc   : > { %7608 = vmatpush3.bf16.xpose.msra.mxu0 %v3814_v54  ;;  %7609 = vmatprep.mubr.msk.bf16.mxu0 %vm8308_vm1, %v8307_v3 }
0x14dd   : > { %7619 = vmatprep.subr.bf16.mxu0 %v8307_v3 }
0x14e3   : > { %7610 = vmatmul.mubr.msk.bf16.vlgmr.msra.gmra.mrb[60].mxu0 %vm1571_vm3, %v3807_v53 }
0x14e4   : > { %7623 = vmatprep.mubr.msk.bf16.mxu0 %vm8308_vm1, %v8307_v3 }
0x151f   : > { %v8986_v56 = vpop.f32.mrb[44].mxu0 }
0x1520   : > { %v7553_v1 = vpop.f32.mrb[45].mxu0 }
0x1521   : > { %v8988_v57 = vpop.f32.mrb[46].mxu0 }
0x1522   : > { %v7554_v58 = vpop.f32.mrb[47].mxu0 }
0x159e   : > { %v3517_v52 = vpop.f32.mrb[48].mxu0 }
0x159f   : > { %v3523_v60 = vmul.f32 0.35355338, %v3517_v52  ;;  %v7575_v63 = vpop.f32.mrb[49].mxu0 }
0x15a0   : > { %v3520_v55 = vpop.f32.mrb[50].mxu0 }
0x15a1   : > { %v7576_v0 = vpop.f32.mrb[51].mxu0  ;;  %v3524_v62 = vsel %vm1571_vm3, %v3523_v60, -inf }
0x15a2   : > { %3525 = vmax.xlane.f32.xlu1 %v3524_v62 }
0x15a6   : > { %v3627_v43 = vpop.f32.mrb[52].mxu0 }
0x15a7   : > { %v3633_v4 = vmul.f32 0.35355338, %v3627_v43  ;;  %v7587_v38 = vpop.f32.mrb[53].mxu0 }
0x15a8   : > { %v3630_v51 = vpop.f32.mrb[54].mxu0 }
0x15a9   : > { %v7588_v5 = vpop.f32.mrb[55].mxu0  ;;  %v3634_v6 = vsel %vm1571_vm3, %v3633_v4, -inf }
0x15aa   : > { %3635 = vmax.xlane.f32.xlu0 %v3634_v6 }
0x15ad   : > { %v3461_v28 = vpop.f32.mrb[68].mxu1 }
0x15ae   : > { %v3739_v7 = vpop.f32.mrb[56].mxu0  ;;  %v7569_v29 = vpop.f32.mrb[69].mxu1 }
0x15af   : > { %v3745_v8 = vmul.f32 0.35355338, %v3739_v7  ;;  %v7599_v13 = vpop.f32.mrb[57].mxu0  ;;  %v3464_v30 = vpop.f32.mrb[70].mxu1 }
0x15b0   : > { %v3742_v17 = vpop.f32.mrb[58].mxu0  ;;  %v7570_v31 = vpop.f32.mrb[71].mxu1  ;;  %v8060_v30 = vld [vmem:[%s9616_s15] sm:$0xff]  }
0x15b1   : > { %v7600_v18 = vpop.f32.mrb[59].mxu0  ;;  %v3746_v21 = vsel %vm1571_vm3, %v3745_v8, -inf  ;;  %7620 = vmatpush3.bf16.msra.mxu0 %v8060_v30 }
0x15b2   : > { %3747 = vmax.xlane.f32.xlu0 %v3746_v21  ;;  %7621 = vmatprep.subr.bf16.mxu0 %v8307_v3 }
0x15b6   : > { %v3850_v22 = vpop.f32.mrb[60].mxu0 }
0x15b7   : > { %v3856_v59 = vmul.f32 0.35355338, %v3850_v22  ;;  %v7611_v24 = vpop.f32.mrb[61].mxu0 }
0x15b8   : > { %v3853_v25 = vpop.f32.mrb[62].mxu0 }
0x15b9   : > { %v7612_v26 = vpop.f32.mrb[63].mxu0  ;;  %v3857_v27 = vsel %vm1571_vm3, %v3856_v59, -inf }
0x15ba   : > { %3858 = vmax.xlane.f32.xlu1 %v3857_v27 }
0x15c8   : > { %3421 = vrot.lane.b32.xlu0 %v8946_v40, %s9615_s5 }
0x162f   : > { %v3526_v32 = vpop.xlane.xlu1 %3525 }
0x1630   : > { %v3527_v42 = vsub.f32 %v3523_v60, %v3526_v32 }
0x1632   : > { %v3528_v33 = vmul.f32 1.442695, %v3527_v42 }
0x1634   : > { %8170 = vpow2.f32 %v3528_v33 }
0x1637   : > { %v3636_v34 = vpop.xlane.xlu0 %3635 }
0x1638   : > { %v3637_v35 = vsub.f32 %v3633_v4, %v3636_v34  ;;  %v8061_v34 = vld [vmem:[%s9616_s15 + $0x8] sm:$0xff]  }
0x1639   : > { %7622 = vmatpush3.bf16.msra.mxu0 %v8061_v34 }
0x163a   : > { %v3638_v37 = vmul.f32 1.442695, %v3637_v35  ;;  %7635 = vmatprep.subr.bf16.mxu0 %v8307_v3 }
0x163c   : > { %8172 = vpow2.f32 %v3638_v37 }
0x163e   : > { %v8171_v39 = vpop.eup %8170 }
0x163f   : > { %v3748_v16 = vpop.xlane.xlu0 %3747  ;;  %v3530_v41 = vsel %vm1571_vm3, %v8171_v39, 0.0 }
0x1640   : > { %v3749_v44 = vsub.f32 %v3745_v8, %v3748_v16  ;;  %3531 = vadd.xlane.f32.xlu1 %v3530_v41 }
0x1642   : > { %v3750_v45 = vmul.f32 1.442695, %v3749_v44 }
0x1643   : > { %v3422_v40 = vpop.permute.xlu0 %3421 }
0x1644   : > { %8174 = vpow2.f32 %v3750_v45  ;;  %v3462_v46 = vadd.f32 %v3461_v28, %v3422_v40 }
0x1646   : > { %v8173_v47 = vpop.eup %8172  ;;  %v3473_v48 = vpack.c.bf16 %v3462_v46, %v3462_v46  ;;  %v7004_v46 = vld [vmem:[%s9609_s26 + $0x1] ss:$0 sm:$0xff]  ;;  %s9634_s26 = smov 80  }
0x1647   : > { %v3859_v49 = vpop.xlane.xlu1 %3858  ;;  %v3640_v50 = vsel %vm1571_vm3, %v8173_v47, 0.0 }
0x1648   : > { %v3860_v53 = vsub.f32 %v3856_v59, %v3859_v49  ;;  %3641 = vadd.xlane.f32.xlu1 %v3640_v50  ;;  %3758 = vrot.lane.b32.xlu0 %v3473_v48, %s9545_s7  ;;  %v3541_v23 = vsel %vm3539_vm6, %v3473_v48, 0  ;;  %v3302_v50 = vadd.f32 %v7004_v46, %v8988_v57  ;;  %s9619_s7 = sld [smem:[#allocation19_spill]] }
0x1649   : > { %7578 = vmatpush3.bf16.msra.mxu1 %v3541_v23 }
0x164a   : > { %v3861_v36 = vmul.f32 1.442695, %v3860_v53  ;;  %7589 = vmatprep.subr.bf16.mxu1 %v8307_v3  ;;  %v3306_v53 = vadd.f32 %v3302_v50, %v8921_v12 }
0x164c   : > { %8176 = vpow2.f32 %v3861_v36  ;;  %3869 = vrot.lane.b32.xlu0 %v3473_v48, %s9543_s11  ;;  %s9618_s11 = smov 16   ;;  %v3310_v23 = vsel %vm1462_vm2, %v3306_v53, 0.0 }
0x164e   : > { %v8175_v61 = vpop.eup %8174 }
0x164f   : > { %v3752_v54 = vsel %vm1571_vm3, %v8175_v61, 0.0 }
0x1650   : > { %3753 = vadd.xlane.f32.xlu1 %v3752_v54 }
0x1656   : > { %v8177_v1 = vpop.eup %8176 }
0x1657   : > { %v3863_v58 = vsel %vm1571_vm3, %v8177_v1, 0.0 }
0x1658   : > { %3864 = vadd.xlane.f32.xlu1 %v3863_v58 }
0x1669   : > { %3647 = vrot.lane.b32.xlu1 %v3473_v48, %s9547_s1  ;;  %s9620_s1 = sld [smem:[#allocation20_spill]] }
0x16ba   : > { %v3759_v8 = vpop.permute.xlu0 %3758 }
0x16bb   : > { %v3764_v13 = vsel %vm3539_vm6, %v3759_v8, 0 }
0x16be   : > { %v3870_v18 = vpop.permute.xlu0 %3869 }
0x16bf   : > { %v3875_v59 = vsel %vm3539_vm6, %v3870_v18, 0  ;;  %v9055_v18 = vld [vmem:[%s9620_s1 + $0x8] sm:$0xff]  }
0x16cd   : > { %v3532_v52 = vpop.xlane.xlu1 %3531 }
0x16ce   : > { %8178 = vrcp.f32 %v3532_v52 }
0x16d5   : > { %v3642_v63 = vpop.xlane.xlu1 %3641 }
0x16d6   : > { %8180 = vrcp.f32 %v3642_v63 }
0x16d8   : > { %v8179_v60 = vpop.eup %8178 }
0x16d9   : > { %v3534_v55 = vmul.f32 %v8179_v60, %v8171_v39 }
0x16db   : > { %v3535_v0 = vpack.c.bf16 %v3534_v55, %v3534_v55 }
0x16dd   : > { %7580 = vmatmul.mubr.msk.bf16.vlgmr.msra.gmra.mrb[72].mxu1 %vm1571_vm3, %v3535_v0  ;;  %v3754_v62 = vpop.xlane.xlu1 %3753 }
0x16de   : > { %7591 = vmatprep.mubr.msk.bf16.mxu1 %vm8308_vm1, %v8307_v3  ;;  %8182 = vrcp.f32 %v3754_v62  ;;  %v7022_v62 = vld [vmem:[%s9619_s7] ss:$0 sm:$0xff] }
0x16e0   : > { %v8181_v43 = vpop.eup %8180 }
0x16e1   : > { %v3644_v38 = vmul.f32 %v8181_v43, %v8173_v47  ;;  %v3299_v47 = vadd.f32 %v7004_v46, %v8986_v56 }
0x16e3   : > { %v3645_v6 = vpack.c.bf16 %v3644_v38, %v3644_v38  ;;  %v3305_v48 = vadd.f32 %v3299_v47, %v8919_v9 }
0x16e5   : > { %v3865_v4 = vpop.xlane.xlu1 %3864  ;;  %v3307_v49 = vsel %vm1462_vm2, %v3305_v48, 0.0 }
0x16e6   : > { %8184 = vrcp.f32 %v3865_v4 }
0x16e8   : > { %v8183_v7 = vpop.eup %8182 }
0x16e9   : > { %v3648_v51 = vpop.permute.xlu1 %3647  ;;  %v3756_v17 = vmul.f32 %v8183_v7, %v8175_v61 }
0x16ea   : > { %v3653_v5 = vsel %vm3539_vm6, %v3648_v51, 0 }
0x16eb   : > { %7590 = vmatpush3.bf16.msra.mxu1 %v3653_v5  ;;  %v3757_v21 = vpack.c.bf16 %v3756_v17, %v3756_v17  ;;  %v9048_v17 = vld [vmem:[%s9620_s1] sm:$0xff]  }
0x16ec   : > { %7601 = vmatprep.subr.bf16.mxu1 %v8307_v3 }
0x16ee   : > { %7592 = vmatmul.mubr.msk.bf16.vlgmr.msra.gmra.mrb[76].mxu1 %vm1571_vm3, %v3645_v6 }
0x16ef   : > { %7602 = vmatpush3.bf16.msra.mxu1 %v3764_v13  ;;  %7603 = vmatprep.mubr.msk.bf16.mxu1 %vm8308_vm1, %v8307_v3 }
0x16f0   : > { %7613 = vmatprep.subr.bf16.mxu1 %v8307_v3  ;;  %v8185_v22 = vpop.eup %8184 }
0x16f1   : > { %v3867_v24 = vmul.f32 %v8185_v22, %v8177_v1 }
0x16f3   : > { %v3868_v25 = vpack.c.bf16 %v3867_v24, %v3867_v24 }
0x16f6   : > { %7604 = vmatmul.mubr.msk.bf16.vlgmr.msra.gmra.mrb[80].mxu1 %vm1571_vm3, %v3757_v21 }
0x16f7   : > { %7614 = vmatpush3.bf16.msra.mxu1 %v3875_v59  ;;  %7615 = vmatprep.mubr.msk.bf16.mxu1 %vm8308_vm1, %v8307_v3 }
0x16f8   : > { %7627 = vmatprep.subr.bf16.mxu1 %v8307_v3 }
0x16fe   : > { %7616 = vmatmul.mubr.msk.bf16.vlgmr.msra.gmra.mrb[84].mxu1 %vm1571_vm3, %v3868_v25 }
0x16ff   : > { %7631 = vmatprep.mubr.msk.bf16.mxu1 %vm8308_vm1, %v8307_v3  ;;  %7628 = vmatpush3.bf16.msra.mxu1 %v9048_v17 }
0x1700   : > { %7629 = vmatprep.subr.bf16.mxu1 %v8307_v3 }
0x1703   : > { %7630 = vmatpush3.bf16.msra.mxu1 %v9055_v18 }
0x1704   : > { %7643 = vmatprep.subr.bf16.mxu1 %v8307_v3 }
0x17b0   : > { %v3577_v26 = vpop.f32.mrb[72].mxu1 }
0x17b1   : > { %v7581_v27 = vpop.f32.mrb[73].mxu1 }
0x17b2   : > { %v3580_v28 = vpop.f32.mrb[74].mxu1 }
0x17b3   : > { %v7582_v29 = vpop.f32.mrb[75].mxu1  ;;  %v9064_v28 = vld [vmem:[%s9621_s6] ss:$0 sm:$0xff] }
0x17c1   : > { %v3689_v31 = vpop.f32.mrb[76].mxu1 }
0x17c2   : > { %3918 = vrot.lane.b32.xlu0 %v3689_v31, %s9617_s10  ;;  %v7593_v32 = vpop.f32.mrb[77].mxu1 }
0x17c3   : > { %v3692_v42 = vpop.f32.mrb[78].mxu1 }
0x17c4   : > { %v7594_v33 = vpop.f32.mrb[79].mxu1 }
0x17c9   : > { %v3800_v35 = vpop.f32.mrb[80].mxu1 }
0x17ca   : > { %3922 = vrot.lane.b32.xlu0 %v3800_v35, %s9618_s11  ;;  %v7605_v37 = vpop.f32.mrb[81].mxu1 }
0x17cb   : > { %v3803_v39 = vpop.f32.mrb[82].mxu1  ;;  %v3336_v37 = vrot.slane %v8913_v2, %v8771_v10 }
0x17cc   : > { %v7606_v16 = vpop.f32.mrb[83].mxu1 }
0x17d1   : > { %v3911_v41 = vpop.f32.mrb[84].mxu1 }
0x17d2   : > { %3926 = vrot.lane.b32.xlu1 %v3911_v41, %s9610_s28  ;;  %v7617_v44 = vpop.f32.mrb[85].mxu1 }
0x17d3   : > { %v3914_v45 = vpop.f32.mrb[86].mxu1  ;;  %v3342_v44 = vrot.slane %v8913_v2, %v8774_v11 }
0x17d4   : > { %v7618_v40 = vpop.f32.mrb[87].mxu1 }
0x17e9   : > { %3308 = vadd.xlane.f32.xlu0 %v3307_v49 }
0x17f6   : > { %3311 = vadd.xlane.f32.xlu1 %v3310_v23  ;;  %v8257_v23 = vld [vmem:[%s9603_s9 + $0x8] sm:$0xff] }
0x1834   : > { %v3919_v36 = vpop.permute.xlu0 %3918 }
0x1835   : > { %v3929_v54 = vsel %vm1571_vm3, %v3577_v26, %v3919_v36 }
0x183c   : > { %v3923_v61 = vpop.permute.xlu0 %3922 }
0x183d   : > { %v3930_v1 = vsel %vm1621_vm4, %v3929_v54, %v3923_v61 }
0x1844   : > { %v3927_v56 = vpop.permute.xlu1 %3926 }
0x1845   : > { %v3931_v9 = vsel %vm2087_vm5, %v3930_v1, %v3927_v56 }
0x1846   : > { %v3932_v58 = vpack.c.bf16 %v3931_v9, %v3931_v9 }
0x1848   : > { %7624 = vmatmul.mubr.msk.bf16.vlgmr.msra.gmra.mrb[64].mxu0 %vm1462_vm2, %v3932_v58 }
0x1849   : > { %7639 = vmatprep.mubr.msk.bf16.mxu0 %vm8308_vm1, %v8307_v3 }
0x1876   : > { %v3309_v55 = vpop.xlane.xlu0 %3308 }
0x1877   : > { %v3313_v0 = vmul.f32 0.03125, %v3309_v55 }
0x1879   : > { %v3315_v43 = vsub.f32 %v3305_v48, %v3313_v0  ;;  %v8256_v48 = vld [vmem:[%s9603_s9] sm:$0xff]  ;;  %s9624_s9 = smov 112  }
0x187b   : > { %v3317_v8 = vmul.f32 %v3315_v43, %v3315_v43 }
0x187d   : > { %v3319_v13 = vsel %vm1462_vm2, %v3317_v8, 0.0 }
0x1883   : > { %v3312_v12 = vpop.xlane.xlu1 %3311 }
0x1884   : > { %v3314_v57 = vmul.f32 0.03125, %v3312_v12 }
0x1886   : > { %v3316_v52 = vsub.f32 %v3306_v53, %v3314_v57 }
0x1888   : > { %v3318_v60 = vmul.f32 %v3316_v52, %v3316_v52 }
0x188a   : > { %v3322_v63 = vsel %vm1462_vm2, %v3318_v60, 0.0 }
0x188b   : > { %3323 = vadd.xlane.f32.xlu1 %v3322_v63 }
0x189c   : > { %4089 = vrot.lane.b32.xlu1 %v9048_v17, %s9550_s2 }
0x18a0   : > { %4095 = vrot.lane.b32.xlu1 %v9064_v28, %s9550_s2 }
0x1918   : > { %v3324_v26 = vpop.xlane.xlu1 %3323 }
0x1919   : > { %v3326_v31 = vmul.f32 0.03125, %v3324_v26 }
0x191b   : > { %v3988_v4 = vpop.f32.mrb[64].mxu0  ;;  %v3328_v42 = vadd.f32 1e-05, %v3326_v31 }
0x191c   : > { %v3989_v38 = vadd.f32 %v7022_v62, %v3988_v4  ;;  %v7625_v51 = vpop.f32.mrb[65].mxu0  ;;  %v4090_v27 = vpop.permute.xlu1 %4089 }
0x191d   : > { %v3991_v5 = vpop.f32.mrb[66].mxu0  ;;  %7636 = vmatpush3.bf16.msra.mxu0 %v4090_v27 }
0x191e   : > { %v7626_v6 = vpop.f32.mrb[67].mxu0  ;;  %v3995_v7 = vsel %vm1462_vm2, %v3989_v38, 0.0  ;;  %7637 = vmatprep.subr.bf16.mxu0 %v8307_v3 }
0x191f   : > { %3996 = vadd.xlane.f32.xlu0 %v3995_v7 }
0x1920   : > { %v4096_v63 = vpop.permute.xlu1 %4095 }
0x1923   : > { %3320 = vadd.xlane.f32.xlu0 %v3319_v13 }
0x19ac   : > { %v3997_v21 = vpop.xlane.xlu0 %3996 }
0x19ad   : > { %v3998_v22 = vmul.f32 0.03125, %v3997_v21 }
0x19af   : > { %v3999_v59 = vsub.f32 %v3989_v38, %v3998_v22 }
0x19b0   : > { %v3321_v29 = vpop.xlane.xlu0 %3320 }
0x19b1   : > { %v4000_v24 = vmul.f32 %v3999_v59, %v3999_v59  ;;  %v3325_v30 = vmul.f32 0.03125, %v3321_v29 }
0x19b3   : > { %v4001_v25 = vsel %vm1462_vm2, %v4000_v24, 0.0  ;;  %v3327_v32 = vadd.f32 1e-05, %v3325_v30 }
0x19b4   : > { %4002 = vadd.xlane.f32.xlu0 %v4001_v25 }
0x19b5   : > { %8186 = vrsqrt.f32 %v3327_v32 }
0x19b6   : > { %8188 = vrsqrt.f32 %v3328_v42 }
0x19bf   : > { %v8187_v33 = vpop.eup %8186 }
0x19c0   : > { %v8189_v34 = vpop.eup %8188  ;;  %v3331_v35 = vmul.f32 %v8187_v33, %v3315_v43 }
0x19c1   : > { %v3332_v39 = vmul.f32 %v8189_v34, %v3316_v52 }
0x19c2   : > { %v3337_v16 = vmul.f32 %v3336_v37, %v3331_v35 }
0x19c3   : > { %v3338_v41 = vmul.f32 %v3336_v37, %v3332_v39 }
0x19c4   : > { %v9072_v45 = vadd.f32 %v3342_v44, %v3337_v16 }
0x19c5   : > { %v9074_v46 = vadd.f32 %v3342_v44, %v3338_v41 }
0x19c6   : > { %v4086_v49 = vadd.f32 %v8256_v48, %v9072_v45 }
0x19c7   : > { %v4087_v36 = vadd.f32 %v8257_v23, %v9074_v46  ;;  %v9132_v31 = vpack.c.bf16 %v9074_v46, %v9072_v45 }
0x19c9   : > { %v9080_v61 = vpack.c.bf16 %v4087_v36, %v4086_v49 }
0x19ca   : > { %4091 = vrot.lane.b32.xlu0 %v9055_v18, %s9550_s2  ;;  %s9622_s2 = sld [smem:[#allocation28_spill]] }
0x19d0   : > { %v9088_v2 = vld [vmem:[%s9622_s2] sm:$0x3f] }
0x19d1   : > { %v4011_v54 = vrot.slane %v9088_v2, %v8738_v15  ;;  %v4016_v9 = vrot.slane %v9088_v2, %v8746_v20 }
0x1a41   : > { %v4003_v40 = vpop.xlane.xlu0 %4002 }
0x1a42   : > { %v4004_v47 = vmul.f32 0.03125, %v4003_v40 }
0x1a44   : > { %v4005_v50 = vadd.f32 1e-05, %v4004_v47 }
0x1a45   : > { %v4092_v53 = vpop.permute.xlu0 %4091 }
0x1a46   : > { %8190 = vrsqrt.f32 %v4005_v50  ;;  %7638 = vmatpush3.bf16.msra.mxu0 %v4092_v53 }
0x1a47   : > { %7651 = vmatprep.subr.bf16.mxu0 %v8307_v3 }
0x1a49   : > { %7640 = vmatmul.mubr.msk.bf16.vlgmr.msra.gmra.mrb[68].mxu0 %vm1462_vm2, %v9080_v61 }
0x1a4a   : > { %7653 = vmatprep.mubr.msk.bf16.mxu0 %vm8308_vm1, %v8307_v3 }
0x1a50   : > { %v8191_v1 = vpop.eup %8190 }
0x1a51   : > { %v4007_v56 = vmul.f32 %v8191_v1, %v3999_v59 }
0x1a53   : > { %v4012_v58 = vmul.f32 %v4011_v54, %v4007_v56 }
0x1a55   : > { %v9094_v12 = vadd.f32 %v4016_v9, %v4012_v58 }
0x1a57   : > { %v4023_v57 = vadd.f32 %v9094_v12, %v8931_v19 }
0x1a59   : > { %v4024_v52 = vpack.c.bf16 %v4023_v57, %v4023_v57 }
0x1a5b   : > { %7632 = vmatmul.mubr.msk.bf16.vlgmr.msra.gmra.mrb[88].mxu1 %vm1462_vm2, %v4024_v52 }
0x1a5c   : > { %7647 = vmatprep.mubr.msk.bf16.mxu1 %vm8308_vm1, %v8307_v3 }
0x1b1c   : > { %v4135_v60 = vpop.f32.mrb[68].mxu0 }
0x1b1d   : > { %v7641_v55 = vpop.f32.mrb[69].mxu0  ;;  %v4136_v62 = vadd.f32 %v4135_v60, %v4096_v63 }
0x1b1e   : > { %v4138_v0 = vpop.f32.mrb[70].mxu0 }
0x1b1f   : > { %v4139_v43 = vadd.f32 %v4138_v0, %v4096_v63  ;;  %v7642_v4 = vpop.f32.mrb[71].mxu0 }
0x1b21   : > { %v4202_v38 = vpack.c.bf16 %v4139_v43, %v4136_v62 }
0x1b23   : > { %4310 = vrot.lane.b32.xlu1 %v4202_v38, %s9623_s8  ;;  %v4208_v51 = vsel %vm1571_vm3, %v4202_v38, 0 }
0x1b24   : > { %7652 = vmatpush3.bf16.xpose.msra.mxu0 %v4208_v51 }
0x1b25   : > { %7663 = vmatprep.subr.bf16.mxu0 %v8307_v3 }
0x1b27   : > { %4420 = vrot.lane.b32.xlu1 %v4202_v38, %s9624_s9 }
0x1b2b   : > { %4529 = vrot.lane.b32.xlu1 %v4202_v38, %s9625_s14 }
0x1b2e   : > { %v4080_v19 = vpop.f32.mrb[88].mxu1 }
0x1b2f   : > { %v4081_v5 = vadd.f32 %v9064_v28, %v4080_v19  ;;  %v7633_v6 = vpop.f32.mrb[89].mxu1  ;;  %4143 = vrot.lane.b32.xlu1 %v9048_v17, %s9615_s5 }
0x1b30   : > { %v4083_v7 = vpop.f32.mrb[90].mxu1 }
0x1b31   : > { %v4201_v8 = vpack.c.bf16 %v4081_v5, %v4081_v5  ;;  %v7634_v13 = vpop.f32.mrb[91].mxu1 }
0x1b33   : > { %4307 = vrot.lane.b32.xlu0 %v4201_v8, %s9623_s8  ;;  %7654 = vmatmul.mubr.msk.bf16.vlgmr.msra.gmra.mrb[72].mxu0 %vm1571_vm3, %v4201_v8 }
0x1b34   : > { %7665 = vmatprep.mubr.msk.bf16.mxu0 %vm8308_vm1, %v8307_v3 }
0x1b37   : > { %4418 = vrot.lane.b32.xlu0 %v4201_v8, %s9624_s9 }
0x1b3b   : > { %4527 = vrot.lane.b32.xlu0 %v4201_v8, %s9625_s14 }
0x1b3f   : > { %4145 = vrot.lane.b32.xlu0 %v9055_v18, %s9615_s5 }
0x1b95   : > { %v4311_v21 = vpop.permute.xlu1 %4310 }
0x1b96   : > { %v4316_v17 = vsel %vm1571_vm3, %v4311_v21, 0 }
0x1b97   : > { %7664 = vmatpush3.bf16.xpose.msra.mxu0 %v4316_v17 }
0x1b98   : > { %7675 = vmatprep.subr.bf16.mxu0 %v8307_v3 }
0x1b99   : > { %v4421_v22 = vpop.permute.xlu1 %4420 }
0x1b9a   : > { %v4426_v26 = vsel %vm1571_vm3, %v4421_v22, 0 }
0x1b9d   : > { %v4530_v59 = vpop.permute.xlu1 %4529 }
0x1b9e   : > { %v4535_v29 = vsel %vm1571_vm3, %v4530_v59, 0 }
0x1ba1   : > { %v4144_v24 = vpop.permute.xlu1 %4143 }
0x1ba2   : > { %7644 = vmatpush3.bf16.msra.mxu1 %v4144_v24 }
0x1ba3   : > { %7645 = vmatprep.subr.bf16.mxu1 %v8307_v3 }
0x1ba5   : > { %v4308_v25 = vpop.permute.xlu0 %4307 }
0x1ba6   : > { %7666 = vmatmul.mubr.msk.bf16.vlgmr.msra.gmra.mrb[76].mxu0 %vm1571_vm3, %v4308_v25 }
0x1ba7   : > { %7676 = vmatpush3.bf16.xpose.msra.mxu0 %v4426_v26  ;;  %7677 = vmatprep.mubr.msk.bf16.mxu0 %vm8308_vm1, %v8307_v3 }
0x1ba8   : > { %7687 = vmatprep.subr.bf16.mxu0 %v8307_v3 }
0x1ba9   : > { %v4419_v18 = vpop.permute.xlu0 %4418 }
0x1bad   : > { %v4528_v27 = vpop.permute.xlu0 %4527 }
0x1bae   : > { %7678 = vmatmul.mubr.msk.bf16.vlgmr.msra.gmra.mrb[80].mxu0 %vm1571_vm3, %v4419_v18 }
0x1baf   : > { %7688 = vmatpush3.bf16.xpose.msra.mxu0 %v4535_v29  ;;  %7689 = vmatprep.mubr.msk.bf16.mxu0 %vm8308_vm1, %v8307_v3 }
0x1bb0   : > { %7699 = vmatprep.subr.bf16.mxu0 %v8307_v3 }
0x1bb1   : > { %v4146_v30 = vpop.permute.xlu0 %4145 }
0x1bb2   : > { %7646 = vmatpush3.bf16.msra.mxu1 %v4146_v30 }
0x1bb3   : > { %7657 = vmatprep.subr.bf16.mxu1 %v8307_v3 }
0x1bb5   : > { %7648 = vmatmul.mubr.msk.bf16.vlgmr.msra.gmra.mrb[92].mxu1 %vm1462_vm2, %v9132_v31 }
0x1bb6   : > { %7690 = vmatmul.mubr.msk.bf16.vlgmr.msra.gmra.mrb[84].mxu0 %vm1571_vm3, %v4528_v27  ;;  %7659 = vmatprep.mubr.msk.bf16.mxu1 %vm8308_vm1, %v8307_v3 }
0x1bb7   : > { %7703 = vmatprep.mubr.msk.bf16.mxu0 %vm8308_vm1, %v8307_v3 }
0x1c06   : > { %v4244_v32 = vpop.f32.mrb[72].mxu0 }
0x1c07   : > { %v4250_v42 = vmul.f32 0.35355338, %v4244_v32  ;;  %v7655_v33 = vpop.f32.mrb[73].mxu0 }
0x1c08   : > { %v4247_v34 = vpop.f32.mrb[74].mxu0 }
0x1c09   : > { %v7656_v35 = vpop.f32.mrb[75].mxu0  ;;  %v4251_v37 = vsel %vm1621_vm4, %v4250_v42, -inf }
0x1c0a   : > { %4252 = vmax.xlane.f32.xlu1 %v4251_v37 }
0x1c79   : > { %v4352_v39 = vpop.f32.mrb[76].mxu0 }
0x1c7a   : > { %v4358_v16 = vmul.f32 0.35355338, %v4352_v39  ;;  %v7667_v41 = vpop.f32.mrb[77].mxu0 }
0x1c7b   : > { %v4355_v44 = vpop.f32.mrb[78].mxu0 }
0x1c7c   : > { %v7668_v45 = vpop.f32.mrb[79].mxu0  ;;  %v4359_v40 = vsel %vm1621_vm4, %v4358_v16, -inf }
0x1c7d   : > { %4360 = vmax.xlane.f32.xlu0 %v4359_v40 }
0x1c81   : > { %v4462_v46 = vpop.f32.mrb[80].mxu0 }
0x1c82   : > { %v4468_v47 = vmul.f32 0.35355338, %v4462_v46  ;;  %v7679_v48 = vpop.f32.mrb[81].mxu0 }
0x1c83   : > { %v4465_v49 = vpop.f32.mrb[82].mxu0 }
0x1c84   : > { %v7680_v50 = vpop.f32.mrb[83].mxu0  ;;  %v4469_v53 = vsel %vm1621_vm4, %v4468_v47, -inf }
0x1c85   : > { %4470 = vmax.xlane.f32.xlu0 %v4469_v53 }
0x1c88   : > { %v4189_v23 = vpop.f32.mrb[92].mxu1 }
0x1c89   : > { %v7649_v36 = vpop.f32.mrb[93].mxu1  ;;  %v4571_v54 = vpop.f32.mrb[84].mxu0 }
0x1c8a   : > { %v4577_v1 = vmul.f32 0.35355338, %v4571_v54  ;;  %v4192_v56 = vpop.f32.mrb[94].mxu1  ;;  %v7691_v9 = vpop.f32.mrb[85].mxu0 }
0x1c8b   : > { %v7650_v58 = vpop.f32.mrb[95].mxu1  ;;  %v4574_v57 = vpop.f32.mrb[86].mxu0 }
0x1c8c   : > { %v7692_v52 = vpop.f32.mrb[87].mxu0  ;;  %v4578_v60 = vsel %vm1621_vm4, %v4577_v1, -inf }
0x1c8d   : > { %4579 = vmax.xlane.f32.xlu1 %v4578_v60  ;;  %v8065_v52 = vld [vmem:[%s9626_s17 + $0x8] sm:$0xff]  }
0x1c97   : > { %v4253_v63 = vpop.xlane.xlu1 %4252 }
0x1c98   : > { %v4254_v55 = vsub.f32 %v4250_v42, %v4253_v63 }
0x1c9a   : > { %v4255_v0 = vmul.f32 1.442695, %v4254_v55 }
0x1c9b   : > { %4149 = vrot.lane.b32.xlu0 %v9064_v28, %s9615_s5 }
0x1c9c   : > { %8192 = vpow2.f32 %v4255_v0 }
0x1ca6   : > { %v8193_v62 = vpop.eup %8192 }
0x1ca7   : > { %v4257_v43 = vsel %vm1621_vm4, %v8193_v62, 0.0 }
0x1ca8   : > { %4258 = vadd.xlane.f32.xlu1 %v4257_v43 }
0x1d0a   : > { %v4361_v4 = vpop.xlane.xlu0 %4360 }
0x1d0b   : > { %v4362_v38 = vsub.f32 %v4358_v16, %v4361_v4 }
0x1d0d   : > { %v4363_v51 = vmul.f32 1.442695, %v4362_v38 }
0x1d0f   : > { %8194 = vpow2.f32 %v4363_v51 }
0x1d12   : > { %v4471_v19 = vpop.xlane.xlu0 %4470 }
0x1d13   : > { %v4472_v5 = vsub.f32 %v4468_v47, %v4471_v19 }
0x1d15   : > { %v4473_v6 = vmul.f32 1.442695, %v4472_v5 }
0x1d16   : > { %v4150_v7 = vpop.permute.xlu0 %4149 }
0x1d17   : > { %8196 = vpow2.f32 %v4473_v6  ;;  %v4190_v8 = vadd.f32 %v4189_v23, %v4150_v7  ;;  %v4193_v13 = vadd.f32 %v4192_v56, %v4150_v7 }
0x1d19   : > { %v8195_v21 = vpop.eup %8194  ;;  %v4203_v17 = vpack.c.bf16 %v4193_v13, %v4190_v8 }
0x1d1a   : > { %v4580_v22 = vpop.xlane.xlu1 %4579  ;;  %v4365_v28 = vsel %vm1621_vm4, %v8195_v21, 0.0 }
0x1d1b   : > { %v4581_v59 = vsub.f32 %v4577_v1, %v4580_v22  ;;  %4366 = vadd.xlane.f32.xlu1 %v4365_v28  ;;  %4481 = vrot.lane.b32.xlu0 %v4203_v17, %s9624_s9  ;;  %v8064_v1 = vld [vmem:[%s9626_s17] sm:$0xff]  }
0x1d1c   : > { %7658 = vmatpush3.bf16.msra.mxu1 %v4203_v17  ;;  %7700 = vmatpush3.bf16.msra.mxu0 %v8064_v1 }
0x1d1d   : > { %v4582_v24 = vmul.f32 1.442695, %v4581_v59  ;;  %7669 = vmatprep.subr.bf16.mxu1 %v8307_v3  ;;  %7701 = vmatprep.subr.bf16.mxu0 %v8307_v3 }
0x1d1f   : > { %8198 = vpow2.f32 %v4582_v24  ;;  %4590 = vrot.lane.b32.xlu0 %v4203_v17, %s9625_s14 }
0x1d20   : > { %7702 = vmatpush3.bf16.msra.mxu0 %v8065_v52 }
0x1d21   : > { %v8197_v25 = vpop.eup %8196  ;;  %7715 = vmatprep.subr.bf16.mxu0 %v8307_v3 }
0x1d22   : > { %v4475_v26 = vsel %vm1621_vm4, %v8197_v25, 0.0 }
0x1d23   : > { %4476 = vadd.xlane.f32.xlu1 %v4475_v26 }
0x1d29   : > { %v8199_v18 = vpop.eup %8198 }
0x1d2a   : > { %v4584_v27 = vsel %vm1621_vm4, %v8199_v18, 0.0 }
0x1d2b   : > { %4585 = vadd.xlane.f32.xlu1 %v4584_v27 }
0x1d35   : > { %v4259_v29 = vpop.xlane.xlu1 %4258 }
0x1d36   : > { %8200 = vrcp.f32 %v4259_v29 }
0x1d3c   : > { %4372 = vrot.lane.b32.xlu1 %v4203_v17, %s9623_s8 }
0x1d40   : > { %v8201_v30 = vpop.eup %8200 }
0x1d41   : > { %v4261_v32 = vmul.f32 %v8201_v30, %v8193_v62 }
0x1d43   : > { %v4262_v42 = vpack.c.bf16 %v4261_v32, %v4261_v32 }
0x1d45   : > { %7660 = vmatmul.mubr.msk.bf16.vlgmr.msra.gmra.mrb[96].mxu1 %vm1621_vm4, %v4262_v42  ;;  %v8066_v42 = vld [vmem:[%s9628_s20] sm:$0xff]  }
0x1d46   : > { %7671 = vmatprep.mubr.msk.bf16.mxu1 %vm8308_vm1, %v8307_v3 }
0x1d8d   : > { %v4482_v45 = vpop.permute.xlu0 %4481 }
0x1d91   : > { %v4591_v48 = vpop.permute.xlu0 %4590 }
0x1da8   : > { %v4367_v33 = vpop.xlane.xlu1 %4366 }
0x1da9   : > { %8202 = vrcp.f32 %v4367_v33  ;;  %v8067_v33 = vld [vmem:[%s9628_s20 + $0x8] sm:$0xff]  }
0x1db0   : > { %v4477_v34 = vpop.xlane.xlu1 %4476 }
0x1db1   : > { %8204 = vrcp.f32 %v4477_v34  ;;  %v8069_v34 = vld [vmem:[%s9629_s21 + $0x8] sm:$0xff]  }
0x1db3   : > { %v8203_v35 = vpop.eup %8202 }
0x1db4   : > { %v4369_v39 = vmul.f32 %v8203_v35, %v8195_v21  ;;  %v7040_v21 = vld [vmem:[%s9627_s19] ss:$0 sm:$0xff] }
0x1db6   : > { %v4370_v41 = vpack.c.bf16 %v4369_v39, %v4369_v39 }
0x1db8   : > { %v4586_v37 = vpop.xlane.xlu1 %4585 }
0x1db9   : > { %8206 = vrcp.f32 %v4586_v37 }
0x1dbb   : > { %v8205_v44 = vpop.eup %8204 }
0x1dbc   : > { %v4373_v16 = vpop.permute.xlu1 %4372  ;;  %v4479_v40 = vmul.f32 %v8205_v44, %v8197_v25 }
0x1dbd   : > { %7670 = vmatpush3.bf16.msra.mxu1 %v4373_v16  ;;  %v4730_v16 = vrot.slane %v9088_v2, %v8771_v10 }
0x1dbe   : > { %7681 = vmatprep.subr.bf16.mxu1 %v8307_v3  ;;  %v4480_v46 = vpack.c.bf16 %v4479_v40, %v4479_v40 }
0x1dc0   : > { %7672 = vmatmul.mubr.msk.bf16.vlgmr.msra.gmra.mrb[100].mxu1 %vm1621_vm4, %v4370_v41 }
0x1dc1   : > { %7682 = vmatpush3.bf16.msra.mxu1 %v4482_v45  ;;  %7683 = vmatprep.mubr.msk.bf16.mxu1 %vm8308_vm1, %v8307_v3  ;;  %v4735_v45 = vrot.slane %v9088_v2, %v8774_v11 }
0x1dc2   : > { %7693 = vmatprep.subr.bf16.mxu1 %v8307_v3 }
0x1dc3   : > { %v8207_v47 = vpop.eup %8206 }
0x1dc4   : > { %v4588_v49 = vmul.f32 %v8207_v47, %v8199_v18 }
0x1dc6   : > { %v4589_v50 = vpack.c.bf16 %v4588_v49, %v4588_v49  ;;  %v8071_v49 = vld [vmem:[%s9629_s21 + $0x18] sm:$0xff]  }
0x1dc8   : > { %7684 = vmatmul.mubr.msk.bf16.vlgmr.msra.gmra.mrb[104].mxu1 %vm1621_vm4, %v4480_v46 }
0x1dc9   : > { %7694 = vmatpush3.bf16.msra.mxu1 %v4591_v48  ;;  %7695 = vmatprep.mubr.msk.bf16.mxu1 %vm8308_vm1, %v8307_v3  ;;  %v8070_v48 = vld [vmem:[%s9629_s21 + $0x10] sm:$0xff]  }
0x1dca   : > { %7707 = vmatprep.subr.bf16.mxu1 %v8307_v3 }
0x1dd0   : > { %7696 = vmatmul.mubr.msk.bf16.vlgmr.msra.gmra.mrb[108].mxu1 %vm1621_vm4, %v4589_v50  ;;  %v7044_v50 = vld [vmem:[%s9630_s24] ss:$0 sm:$0xff] }
0x1dd1   : > { %7711 = vmatprep.mubr.msk.bf16.mxu1 %vm8308_vm1, %v8307_v3  ;;  %7708 = vmatpush3.bf16.msra.mxu1 %v8066_v42 }
0x1dd2   : > { %7709 = vmatprep.subr.bf16.mxu1 %v8307_v3 }
0x1dd5   : > { %7710 = vmatpush3.bf16.msra.mxu1 %v8067_v33 }
0x1dd6   : > { %7727 = vmatprep.subr.bf16.mxu1 %v8307_v3 }
0x1e18   : > { %v4300_v53 = vpop.f32.mrb[96].mxu1 }
0x1e19   : > { %v7661_v23 = vpop.f32.mrb[97].mxu1 }
0x1e1a   : > { %v4303_v36 = vpop.f32.mrb[98].mxu1 }
0x1e1b   : > { %v7662_v54 = vpop.f32.mrb[99].mxu1 }
0x1e93   : > { %v4412_v56 = vpop.f32.mrb[100].mxu1 }
0x1e94   : > { %4637 = vrot.lane.b32.xlu0 %v4412_v56, %s9617_s10  ;;  %v7673_v9 = vpop.f32.mrb[101].mxu1 }
0x1e95   : > { %v4415_v58 = vpop.f32.mrb[102].mxu1 }
0x1e96   : > { %v7674_v57 = vpop.f32.mrb[103].mxu1  ;;  %v7048_v58 = vld [vmem:[%s9631_s25] ss:$0 sm:$0xff] }
0x1e9b   : > { %v4521_v60 = vpop.f32.mrb[104].mxu1 }
0x1e9c   : > { %4641 = vrot.lane.b32.xlu0 %v4521_v60, %s9618_s11  ;;  %v7685_v63 = vpop.f32.mrb[105].mxu1 }
0x1e9d   : > { %v4524_v55 = vpop.f32.mrb[106].mxu1 }
0x1e9e   : > { %v7686_v0 = vpop.f32.mrb[107].mxu1 }
0x1ea3   : > { %v4630_v62 = vpop.f32.mrb[108].mxu1 }
0x1ea4   : > { %4645 = vrot.lane.b32.xlu1 %v4630_v62, %s9610_s28  ;;  %v7697_v43 = vpop.f32.mrb[109].mxu1 }
0x1ea5   : > { %v4633_v4 = vpop.f32.mrb[110].mxu1 }
0x1ea6   : > { %v7698_v38 = vpop.f32.mrb[111].mxu1 }
0x1f06   : > { %v4638_v51 = vpop.permute.xlu0 %4637 }
0x1f07   : > { %v4648_v5 = vsel %vm1571_vm3, %v4300_v53, %v4638_v51 }
0x1f0e   : > { %v4642_v19 = vpop.permute.xlu0 %4641 }
0x1f0f   : > { %v4649_v6 = vsel %vm1621_vm4, %v4648_v5, %v4642_v19  ;;  %v8072_v5 = vld [vmem:[%s9611_s0 + $0x10] sm:$0xff]  }
0x1f16   : > { %v4646_v7 = vpop.permute.xlu1 %4645 }
0x1f17   : > { %v4650_v8 = vsel %vm2087_vm5, %v4649_v6, %v4646_v7  ;;  %v8073_v6 = vld [vmem:[%s9611_s0 + $0x18] sm:$0xff]   ;;  %s9632_s0 = smov 88  }
0x1f18   : > { %v4651_v13 = vpack.c.bf16 %v4650_v8, %v4650_v8 }
0x1f1a   : > { %7704 = vmatmul.mubr.msk.bf16.vlgmr.msra.gmra.mrb[88].mxu0 %vm1462_vm2, %v4651_v13 }
0x1f1b   : > { %7723 = vmatprep.mubr.msk.bf16.mxu0 %vm8308_vm1, %v8307_v3 }
0x1fed   : > { %v4707_v17 = vpop.f32.mrb[88].mxu0 }
0x1fee   : > { %v4708_v22 = vadd.f32 %v7040_v21, %v4707_v17  ;;  %v7705_v28 = vpop.f32.mrb[89].mxu0  ;;  %v4904_v21 = vsub.s32 4, %v8735_v14  ;;  %v4909_v17 = vsub.s32 5, %v8735_v14 }
0x1fef   : > { %v4710_v59 = vpop.f32.mrb[90].mxu0 }
0x1ff0   : > { %v4713_v24 = vadd.f32 %v4708_v22, %v9094_v12  ;;  %v7706_v25 = vpop.f32.mrb[91].mxu0  ;;  %v8068_v12 = vld [vmem:[%s9629_s21] sm:$0xff]   ;;  %v4905_v22 = vrot.slane %v9088_v2, %v4904_v21  ;;  %v4910_v59 = vrot.slane %v9088_v2, %v4909_v17 }
0x1ff1   : > { %7716 = vmatpush3.bf16.msra.mxu0 %v8068_v12 }
0x1ff2   : > { %v4714_v26 = vsel %vm1462_vm2, %v4713_v24, 0.0  ;;  %7717 = vmatprep.subr.bf16.mxu0 %v8307_v3 }
0x1ff3   : > { %4715 = vadd.xlane.f32.xlu0 %v4714_v26 }
0x1ff5   : > { %7718 = vmatpush3.bf16.msra.mxu0 %v8069_v34 }
0x1ff6   : > { %7719 = vmatprep.subr.bf16.mxu0 %v8307_v3 }
0x1ff9   : > { %7720 = vmatpush3.bf16.msra.mxu0 %v8070_v48 }
0x1ffa   : > { %7721 = vmatprep.subr.bf16.mxu0 %v8307_v3 }
0x1ffd   : > { %7722 = vmatpush3.bf16.msra.mxu0 %v8071_v49 }
0x1ffe   : > { %7743 = vmatprep.subr.bf16.mxu0 %v8307_v3 }
0x2080   : > { %v4716_v18 = vpop.xlane.xlu0 %4715 }
0x2081   : > { %v4717_v27 = vmul.f32 0.03125, %v4716_v18  ;;  %v9229_v18 = vld [vmem:[%s9612_s18] sm:$0xff]  ;;  %s9633_s18 = smov 96  }
0x2083   : > { %v4718_v29 = vsub.f32 %v4713_v24, %v4717_v27 }
0x2085   : > { %v4719_v30 = vmul.f32 %v4718_v29, %v4718_v29 }
0x2087   : > { %v4720_v32 = vsel %vm1462_vm2, %v4719_v30, 0.0  ;;  %v9237_v30 = vld [vmem:[%s9613_s16 + $0x1] ss:$0 sm:$0xff] }
0x2088   : > { %4721 = vadd.xlane.f32.xlu1 %v4720_v32 }
0x2115   : > { %v4722_v35 = vpop.xlane.xlu1 %4721 }
0x2116   : > { %v4723_v37 = vmul.f32 0.03125, %v4722_v35 }
0x2118   : > { %v4724_v39 = vadd.f32 1e-05, %v4723_v37 }
0x211a   : > { %8208 = vrsqrt.f32 %v4724_v39 }
0x2124   : > { %v8209_v41 = vpop.eup %8208 }
0x2125   : > { %v4726_v44 = vmul.f32 %v8209_v41, %v4718_v29 }
0x2127   : > { %v4731_v40 = vmul.f32 %v4730_v16, %v4726_v44 }
0x2129   : > { %v4736_v46 = vadd.f32 %v4735_v45, %v4731_v40 }
0x212b   : > { %v4741_v47 = vpack.c.bf16 %v4736_v46, %v4736_v46 }
0x212d   : > { %7712 = vmatmul.mubr.msk.bf16.vlgmr.msra.gmra.mrb[112].mxu1 %vm1462_vm2, %v4741_v47 }
0x212e   : > { %7731 = vmatprep.mubr.msk.bf16.mxu1 %vm8308_vm1, %v8307_v3  ;;  %7728 = vmatpush3.bf16.msra.mxu1 %v8072_v5 }
0x212f   : > { %7729 = vmatprep.subr.bf16.mxu1 %v8307_v3 }
0x2132   : > { %7730 = vmatpush3.bf16.msra.mxu1 %v8073_v6 }
0x2133   : > { %7735 = vmatprep.subr.bf16.mxu1 %v8307_v3 }
0x2200   : > { %v4798_v53 = vpop.f32.mrb[112].mxu1 }
0x2201   : > { %v4799_v23 = vadd.f32 %v7044_v50, %v4798_v53  ;;  %v7713_v36 = vpop.f32.mrb[113].mxu1 }
0x2202   : > { %v4801_v54 = vpop.f32.mrb[114].mxu1 }
0x2203   : > { %v4804_v1 = vmax.f32 %v4799_v23, 0.0  ;;  %v7714_v56 = vpop.f32.mrb[115].mxu1 }
0x2205   : > { %v4813_v9 = vpack.c.bf16 %v4804_v1, %v4804_v1 }
0x2207   : > { %7724 = vmatmul.mubr.msk.bf16.vlgmr.msra.gmra.mrb[92].mxu0 %vm1302_vm0, %v4813_v9 }
0x2208   : > { %7745 = vmatprep.mubr.msk.bf16.mxu0 %vm8308_vm1, %v8307_v3 }
0x22da   : > { %v4882_v57 = vpop.f32.mrb[92].mxu0 }
0x22db   : > { %v4883_v52 = vadd.f32 %v7048_v58, %v4882_v57  ;;  %v7725_v60 = vpop.f32.mrb[93].mxu0 }
0x22dc   : > { %v4885_v63 = vpop.f32.mrb[94].mxu0 }
0x22dd   : > { %v4888_v55 = vadd.f32 %v4883_v52, %v4736_v46  ;;  %v7726_v0 = vpop.f32.mrb[95].mxu0 }
0x22df   : > { %v4889_v62 = vsel %vm1462_vm2, %v4888_v55, 0.0 }
0x22e0   : > { %4890 = vadd.xlane.f32.xlu0 %v4889_v62 }
0x236d   : > { %v4891_v43 = vpop.xlane.xlu0 %4890 }
0x236e   : > { %v4892_v4 = vmul.f32 0.03125, %v4891_v43 }
0x2370   : > { %v4893_v38 = vsub.f32 %v4888_v55, %v4892_v4 }
0x2372   : > { %v4894_v51 = vmul.f32 %v4893_v38, %v4893_v38 }
0x2374   : > { %v4895_v19 = vsel %vm1462_vm2, %v4894_v51, 0.0 }
0x2375   : > { %4896 = vadd.xlane.f32.xlu0 %v4895_v19 }
0x2402   : > { %v4897_v7 = vpop.xlane.xlu0 %4896 }
0x2403   : > { %v4898_v8 = vmul.f32 0.03125, %v4897_v7 }
0x2405   : > { %v4899_v13 = vadd.f32 1e-05, %v4898_v8 }
0x2407   : > { %8210 = vrsqrt.f32 %v4899_v13 }
0x2411   : > { %v8211_v28 = vpop.eup %8210 }
0x2412   : > { %v4901_v24 = vmul.f32 %v8211_v28, %v4893_v38 }
0x2414   : > { %v4906_v25 = vmul.f32 %v4905_v22, %v4901_v24 }
0x2416   : > { %v9226_v26 = vadd.f32 %v4910_v59, %v4906_v25 }
0x2418   : > { %v4921_v27 = vadd.f32 %v9229_v18, %v9226_v26  ;;  %v4984_v50 = vpack.c.bf16 %v9226_v26, %v9226_v26 }
0x241a   : > { %v4922_v29 = vpack.c.bf16 %v4921_v27, %v4921_v27 }
0x241c   : > { %7732 = vmatmul.mubr.msk.bf16.vlgmr.msra.gmra.mrb[116].mxu1 %vm1462_vm2, %v4922_v29 }
0x241d   : > { %7739 = vmatprep.mubr.msk.bf16.mxu1 %vm8308_vm1, %v8307_v3 }
0x24ef   : > { %v4978_v32 = vpop.f32.mrb[116].mxu1 }
0x24f0   : > { %v4979_v2 = vadd.f32 %v9237_v30, %v4978_v32  ;;  %v7733_v42 = vpop.f32.mrb[117].mxu1 }
0x24f1   : > { %v4981_v33 = vpop.f32.mrb[118].mxu1 }
0x24f2   : > { %v5044_v12 = vpack.c.bf16 %v4979_v2, %v4979_v2  ;;  %v7734_v34 = vpop.f32.mrb[119].mxu1 }
0x24f4   : > { %5156 = vrot.lane.b32.xlu0 %v5044_v12, %s9632_s0  ;;  %5047 = vrot.lane.b32.xlu1 %v5044_v12, %s9633_s18 }
0x24f8   : > { %5266 = vrot.lane.b32.xlu0 %v5044_v12, %s9624_s9  ;;  %5154 = vrot.lane.b32.xlu1 %v5044_v12, %s9623_s8 }
0x24fc   : > { %5377 = vrot.lane.b32.xlu0 %v5044_v12, %s9625_s14  ;;  %5268 = vrot.lane.b32.xlu1 %v5044_v12, %s9634_s26 }
0x2500   : > { %5379 = vrot.lane.b32.xlu1 %v5044_v12, %s9614_s3  ;;  %4987 = vrot.lane.b32.xlu0 %v8073_v6, %s9615_s5  ;;  %s9637_s3 = sld [smem:[#allocation32_spill]] }
0x2504   : > { %4985 = vrot.lane.b32.xlu1 %v8072_v5, %s9615_s5 }
0x2566   : > { %v5048_v35 = vpop.permute.xlu1 %5047  ;;  %v5157_v39 = vpop.permute.xlu0 %5156 }
0x2567   : > { %v5053_v37 = vsel %vm1571_vm3, %v5048_v35, 0  ;;  %v5162_v45 = vsel %vm1571_vm3, %v5157_v39, 0 }
0x2568   : > { %7744 = vmatpush3.bf16.xpose.msra.mxu0 %v5053_v37 }
0x2569   : > { %7755 = vmatprep.subr.bf16.mxu0 %v8307_v3 }
0x256a   : > { %v5155_v16 = vpop.permute.xlu1 %5154  ;;  %v5267_v41 = vpop.permute.xlu0 %5266 }
0x256e   : > { %v5269_v44 = vpop.permute.xlu1 %5268  ;;  %v5378_v46 = vpop.permute.xlu0 %5377 }
0x256f   : > { %7746 = vmatmul.mubr.msk.bf16.vlgmr.msra.gmra.mrb[96].mxu0 %vm1571_vm3, %v5044_v12  ;;  %v5274_v48 = vsel %vm1571_vm3, %v5269_v44, 0 }
0x2570   : > { %7756 = vmatpush3.bf16.xpose.msra.mxu0 %v5162_v45  ;;  %7757 = vmatprep.mubr.msk.bf16.mxu0 %vm8308_vm1, %v8307_v3 }
0x2571   : > { %7767 = vmatprep.subr.bf16.mxu0 %v8307_v3 }
0x2572   : > { %v5380_v40 = vpop.permute.xlu1 %5379  ;;  %v4988_v49 = vpop.permute.xlu0 %4987 }
0x2573   : > { %v5385_v53 = vsel %vm1571_vm3, %v5380_v40, 0 }
0x2576   : > { %v4986_v47 = vpop.permute.xlu1 %4985 }
0x2577   : > { %7736 = vmatpush3.bf16.msra.mxu1 %v4986_v47  ;;  %7758 = vmatmul.mubr.msk.bf16.vlgmr.msra.gmra.mrb[100].mxu0 %vm1571_vm3, %v5155_v16 }
0x2578   : > { %7768 = vmatpush3.bf16.xpose.msra.mxu0 %v5274_v48  ;;  %7737 = vmatprep.subr.bf16.mxu1 %v8307_v3 }
0x2579   : > { %7769 = vmatprep.mubr.msk.bf16.mxu0 %vm8308_vm1, %v8307_v3  ;;  %7779 = vmatprep.subr.bf16.mxu0 %v8307_v3 }
0x257b   : > { %7738 = vmatpush3.bf16.msra.mxu1 %v4988_v49 }
0x257c   : > { %7749 = vmatprep.subr.bf16.mxu1 %v8307_v3 }
0x257e   : > { %7740 = vmatmul.mubr.msk.bf16.vlgmr.msra.gmra.mrb[120].mxu1 %vm1462_vm2, %v4984_v50 }
0x257f   : > { %7770 = vmatmul.mubr.msk.bf16.vlgmr.msra.gmra.mrb[104].mxu0 %vm1571_vm3, %v5267_v41  ;;  %7751 = vmatprep.mubr.msk.bf16.mxu1 %vm8308_vm1, %v8307_v3 }
0x2580   : > { %7780 = vmatpush3.bf16.xpose.msra.mxu0 %v5385_v53  ;;  %7781 = vmatprep.mubr.msk.bf16.mxu0 %vm8308_vm1, %v8307_v3 }
0x2581   : > { %7791 = vmatprep.subr.bf16.mxu0 %v8307_v3 }
0x2587   : > { %7782 = vmatmul.mubr.msk.bf16.vlgmr.msra.gmra.mrb[108].mxu0 %vm1571_vm3, %v5378_v46 }
0x2588   : > { %7795 = vmatprep.mubr.msk.bf16.mxu0 %vm8308_vm1, %v8307_v3 }
0x2642   : > { %v5089_v23 = vpop.f32.mrb[96].mxu0 }
0x2643   : > { %v5095_v36 = vmul.f32 0.35355338, %v5089_v23  ;;  %v7747_v54 = vpop.f32.mrb[97].mxu0 }
0x2644   : > { %v5092_v1 = vpop.f32.mrb[98].mxu0 }
0x2645   : > { %v7748_v56 = vpop.f32.mrb[99].mxu0  ;;  %v5096_v9 = vsel %vm1571_vm3, %v5095_v36, -inf }
0x2646   : > { %5097 = vmax.xlane.f32.xlu1 %v5096_v9 }
0x264a   : > { %v5198_v58 = vpop.f32.mrb[100].mxu0 }
0x264b   : > { %v5204_v57 = vmul.f32 0.35355338, %v5198_v58  ;;  %v7759_v52 = vpop.f32.mrb[101].mxu0 }
0x264c   : > { %v5201_v60 = vpop.f32.mrb[102].mxu0 }
0x264d   : > { %v7760_v63 = vpop.f32.mrb[103].mxu0  ;;  %v5205_v55 = vsel %vm1571_vm3, %v5204_v57, -inf }
0x264e   : > { %5206 = vmax.xlane.f32.xlu0 %v5205_v55 }
0x2651   : > { %v5031_v0 = vpop.f32.mrb[120].mxu1 }
0x2652   : > { %v7741_v62 = vpop.f32.mrb[121].mxu1  ;;  %v5310_v43 = vpop.f32.mrb[104].mxu0 }
0x2653   : > { %v5316_v4 = vmul.f32 0.35355338, %v5310_v43  ;;  %v5034_v38 = vpop.f32.mrb[122].mxu1  ;;  %v7771_v51 = vpop.f32.mrb[105].mxu0 }
0x2654   : > { %v7742_v19 = vpop.f32.mrb[123].mxu1  ;;  %v5313_v5 = vpop.f32.mrb[106].mxu0 }
0x2655   : > { %v7772_v6 = vpop.f32.mrb[107].mxu0  ;;  %v5317_v7 = vsel %vm1571_vm3, %v5316_v4, -inf }
0x2656   : > { %5318 = vmax.xlane.f32.xlu0 %v5317_v7 }
0x265a   : > { %v5421_v8 = vpop.f32.mrb[108].mxu0 }
0x265b   : > { %v5427_v13 = vmul.f32 0.35355338, %v5421_v8  ;;  %v7783_v22 = vpop.f32.mrb[109].mxu0 }
0x265c   : > { %v5424_v28 = vpop.f32.mrb[110].mxu0 }
0x265d   : > { %v7784_v59 = vpop.f32.mrb[111].mxu0  ;;  %v5428_v24 = vsel %vm1571_vm3, %v5427_v13, -inf }
0x265e   : > { %5429 = vmax.xlane.f32.xlu1 %v5428_v24  ;;  %v8074_v59 = vld [vmem:[%s9616_s15 + $0x10] sm:$0xff]  }
0x265f   : > { %7792 = vmatpush3.bf16.msra.mxu0 %v8074_v59 }
0x2660   : > { %7793 = vmatprep.subr.bf16.mxu0 %v8307_v3 }
0x266c   : > { %4991 = vrot.lane.b32.xlu0 %v9237_v30, %s9615_s5 }
0x26d3   : > { %v5098_v25 = vpop.xlane.xlu1 %5097 }
0x26d4   : > { %v5099_v27 = vsub.f32 %v5095_v36, %v5098_v25 }
0x26d6   : > { %v5100_v29 = vmul.f32 1.442695, %v5099_v27 }
0x26d8   : > { %8212 = vpow2.f32 %v5100_v29 }
0x26db   : > { %v5207_v32 = vpop.xlane.xlu0 %5206 }
0x26dc   : > { %v5208_v2 = vsub.f32 %v5204_v57, %v5207_v32  ;;  %v8075_v32 = vld [vmem:[%s9616_s15 + $0x18] sm:$0xff]  }
0x26dd   : > { %7794 = vmatpush3.bf16.msra.mxu0 %v8075_v32 }
0x26de   : > { %v5209_v42 = vmul.f32 1.442695, %v5208_v2  ;;  %7807 = vmatprep.subr.bf16.mxu0 %v8307_v3 }
0x26e0   : > { %8214 = vpow2.f32 %v5209_v42 }
0x26e2   : > { %v8213_v33 = vpop.eup %8212 }
0x26e3   : > { %v5319_v12 = vpop.xlane.xlu0 %5318  ;;  %v5102_v34 = vsel %vm1571_vm3, %v8213_v33, 0.0 }
0x26e4   : > { %v5320_v35 = vsub.f32 %v5316_v4, %v5319_v12  ;;  %5103 = vadd.xlane.f32.xlu1 %v5102_v34 }
0x26e6   : > { %v5321_v37 = vmul.f32 1.442695, %v5320_v35 }
0x26e7   : > { %v4992_v39 = vpop.permute.xlu0 %4991 }
0x26e8   : > { %8216 = vpow2.f32 %v5321_v37  ;;  %v5032_v16 = vadd.f32 %v5031_v0, %v4992_v39 }
0x26ea   : > { %v8215_v41 = vpop.eup %8214  ;;  %v5045_v30 = vpack.c.bf16 %v5032_v16, %v5032_v16 }
0x26eb   : > { %v5430_v44 = vpop.xlane.xlu1 %5429  ;;  %v5211_v45 = vsel %vm1571_vm3, %v8215_v41, 0.0 }
0x26ec   : > { %v5431_v40 = vsub.f32 %v5427_v13, %v5430_v44  ;;  %5212 = vadd.xlane.f32.xlu1 %v5211_v45  ;;  %5329 = vrot.lane.b32.xlu0 %v5045_v30, %s9624_s9  ;;  %v5112_v46 = vsel %vm3539_vm6, %v5045_v30, 0 }
0x26ed   : > { %7750 = vmatpush3.bf16.msra.mxu1 %v5112_v46 }
0x26ee   : > { %v5432_v47 = vmul.f32 1.442695, %v5431_v40  ;;  %7761 = vmatprep.subr.bf16.mxu1 %v8307_v3 }
0x26f0   : > { %8218 = vpow2.f32 %v5432_v47  ;;  %5440 = vrot.lane.b32.xlu0 %v5045_v30, %s9625_s14  ;;  %v7078_v47 = vld [vmem:[%s9619_s7 + $0x1] ss:$0 sm:$0xff] }
0x26f2   : > { %v8217_v48 = vpop.eup %8216 }
0x26f3   : > { %v5323_v49 = vsel %vm1571_vm3, %v8217_v48, 0.0 }
0x26f4   : > { %5324 = vadd.xlane.f32.xlu1 %v5323_v49 }
0x26fa   : > { %v8219_v50 = vpop.eup %8218 }
0x26fb   : > { %v5434_v53 = vsel %vm1571_vm3, %v8219_v50, 0.0 }
0x26fc   : > { %5435 = vadd.xlane.f32.xlu1 %v5434_v53 }
0x270d   : > { %5218 = vrot.lane.b32.xlu1 %v5045_v30, %s9623_s8 }
0x275e   : > { %v5330_v55 = vpop.permute.xlu0 %5329 }
0x275f   : > { %v5335_v43 = vsel %vm3539_vm6, %v5330_v55, 0 }
0x2762   : > { %v5441_v38 = vpop.permute.xlu0 %5440 }
0x2763   : > { %v5446_v5 = vsel %vm3539_vm6, %v5441_v38, 0 }
0x2771   : > { %v5104_v23 = vpop.xlane.xlu1 %5103 }
0x2772   : > { %8220 = vrcp.f32 %v5104_v23 }
0x2779   : > { %v5213_v54 = vpop.xlane.xlu1 %5212 }
0x277a   : > { %8222 = vrcp.f32 %v5213_v54 }
0x277c   : > { %v8221_v36 = vpop.eup %8220 }
0x277d   : > { %v5106_v1 = vmul.f32 %v8221_v36, %v8213_v33 }
0x277f   : > { %v5107_v56 = vpack.c.bf16 %v5106_v1, %v5106_v1  ;;  %v8076_v1 = vld [vmem:[%s9620_s1 + $0x10] sm:$0xff]  }
0x2781   : > { %7752 = vmatmul.mubr.msk.bf16.vlgmr.msra.gmra.mrb[124].mxu1 %vm1571_vm3, %v5107_v56  ;;  %v5325_v9 = vpop.xlane.xlu1 %5324  ;;  %v8077_v56 = vld [vmem:[%s9620_s1 + $0x18] sm:$0xff]  }
0x2782   : > { %7763 = vmatprep.mubr.msk.bf16.mxu1 %vm8308_vm1, %v8307_v3  ;;  %8224 = vrcp.f32 %v5325_v9 }
0x2784   : > { %v8223_v58 = vpop.eup %8222 }
0x2785   : > { %v5215_v52 = vmul.f32 %v8223_v58, %v8215_v41 }
0x2787   : > { %v5216_v0 = vpack.c.bf16 %v5215_v52, %v5215_v52 }
0x2789   : > { %v5436_v57 = vpop.xlane.xlu1 %5435 }
0x278a   : > { %8226 = vrcp.f32 %v5436_v57 }
0x278c   : > { %v8225_v62 = vpop.eup %8224 }
0x278d   : > { %v5219_v60 = vpop.permute.xlu1 %5218  ;;  %v5327_v4 = vmul.f32 %v8225_v62, %v8217_v48 }
0x278e   : > { %v5224_v63 = vsel %vm3539_vm6, %v5219_v60, 0 }
0x278f   : > { %7762 = vmatpush3.bf16.msra.mxu1 %v5224_v63  ;;  %v5328_v51 = vpack.c.bf16 %v5327_v4, %v5327_v4  ;;  %v9334_v63 = vld [vmem:[%s9621_s6 + $0x1] ss:$0 sm:$0xff]  ;;  %v9344_v4 = vld [vmem:[%s9622_s2 + $0x8] sm:$0x3f] }
0x2790   : > { %7773 = vmatprep.subr.bf16.mxu1 %v8307_v3  ;;  %v5582_v38 = vrot.slane %v9344_v4, %v8738_v15 }
0x2792   : > { %7764 = vmatmul.mubr.msk.bf16.vlgmr.msra.gmra.mrb[128].mxu1 %vm1571_vm3, %v5216_v0 }
0x2793   : > { %7774 = vmatpush3.bf16.msra.mxu1 %v5335_v43  ;;  %7775 = vmatprep.mubr.msk.bf16.mxu1 %vm8308_vm1, %v8307_v3 }
0x2794   : > { %7785 = vmatprep.subr.bf16.mxu1 %v8307_v3  ;;  %v8227_v19 = vpop.eup %8226 }
0x2795   : > { %v5438_v6 = vmul.f32 %v8227_v19, %v8219_v50 }
0x2797   : > { %v5439_v7 = vpack.c.bf16 %v5438_v6, %v5438_v6 }
0x279a   : > { %7776 = vmatmul.mubr.msk.bf16.vlgmr.msra.gmra.mrb[132].mxu1 %vm1571_vm3, %v5328_v51 }
0x279b   : > { %7786 = vmatpush3.bf16.msra.mxu1 %v5446_v5  ;;  %7787 = vmatprep.mubr.msk.bf16.mxu1 %vm8308_vm1, %v8307_v3  ;;  %v5587_v5 = vrot.slane %v9344_v4, %v8746_v20 }
0x279c   : > { %7799 = vmatprep.subr.bf16.mxu1 %v8307_v3 }
0x27a2   : > { %7788 = vmatmul.mubr.msk.bf16.vlgmr.msra.gmra.mrb[136].mxu1 %vm1571_vm3, %v5439_v7 }
0x27a3   : > { %7803 = vmatprep.mubr.msk.bf16.mxu1 %vm8308_vm1, %v8307_v3  ;;  %7800 = vmatpush3.bf16.msra.mxu1 %v8076_v1 }
0x27a4   : > { %7801 = vmatprep.subr.bf16.mxu1 %v8307_v3 }
0x27a7   : > { %7802 = vmatpush3.bf16.msra.mxu1 %v8077_v56 }
0x27a8   : > { %7815 = vmatprep.subr.bf16.mxu1 %v8307_v3 }
0x2854   : > { %v5148_v8 = vpop.f32.mrb[124].mxu1 }
0x2855   : > { %v7753_v13 = vpop.f32.mrb[125].mxu1 }
0x2856   : > { %v5151_v22 = vpop.f32.mrb[126].mxu1 }
0x2857   : > { %v7754_v28 = vpop.f32.mrb[127].mxu1 }
0x2865   : > { %v5260_v24 = vpop.f32.mrb[128].mxu1 }
0x2866   : > { %5489 = vrot.lane.b32.xlu0 %v5260_v24, %s9617_s10  ;;  %v7765_v25 = vpop.f32.mrb[129].mxu1 }
0x2867   : > { %v5263_v27 = vpop.f32.mrb[130].mxu1 }
0x2868   : > { %v7766_v29 = vpop.f32.mrb[131].mxu1 }
0x286d   : > { %v5371_v2 = vpop.f32.mrb[132].mxu1 }
0x286e   : > { %5493 = vrot.lane.b32.xlu0 %v5371_v2, %s9618_s11  ;;  %v7777_v42 = vpop.f32.mrb[133].mxu1 }
0x286f   : > { %v5374_v33 = vpop.f32.mrb[134].mxu1 }
0x2870   : > { %v7778_v12 = vpop.f32.mrb[135].mxu1 }
0x2875   : > { %v5482_v34 = vpop.f32.mrb[136].mxu1 }
0x2876   : > { %5497 = vrot.lane.b32.xlu1 %v5482_v34, %s9610_s28  ;;  %v7789_v35 = vpop.f32.mrb[137].mxu1 }
0x2877   : > { %v5485_v37 = vpop.f32.mrb[138].mxu1 }
0x2878   : > { %v7790_v39 = vpop.f32.mrb[139].mxu1 }
0x28d8   : > { %v5490_v16 = vpop.permute.xlu0 %5489 }
0x28d9   : > { %v5500_v30 = vsel %vm1571_vm3, %v5148_v8, %v5490_v16 }
0x28e0   : > { %v5494_v41 = vpop.permute.xlu0 %5493 }
0x28e1   : > { %v5501_v44 = vsel %vm1621_vm4, %v5500_v30, %v5494_v41 }
0x28e8   : > { %v5498_v45 = vpop.permute.xlu1 %5497 }
0x28e9   : > { %v5502_v40 = vsel %vm2087_vm5, %v5501_v44, %v5498_v45 }
0x28ea   : > { %v5503_v46 = vpack.c.bf16 %v5502_v40, %v5502_v40 }
0x28ec   : > { %7796 = vmatmul.mubr.msk.bf16.vlgmr.msra.gmra.mrb[112].mxu0 %vm1462_vm2, %v5503_v46 }
0x28ed   : > { %7811 = vmatprep.mubr.msk.bf16.mxu0 %vm8308_vm1, %v8307_v3 }
0x29bf   : > { %v5559_v48 = vpop.f32.mrb[112].mxu0 }
0x29c0   : > { %v5560_v49 = vadd.f32 %v7078_v47, %v5559_v48  ;;  %v7797_v50 = vpop.f32.mrb[113].mxu0 }
0x29c1   : > { %v5562_v53 = vpop.f32.mrb[114].mxu0 }
0x29c2   : > { %v5565_v23 = vadd.f32 %v5560_v49, %v9226_v26  ;;  %v7798_v36 = vpop.f32.mrb[115].mxu0 }
0x29c4   : > { %v5566_v54 = vsel %vm1462_vm2, %v5565_v23, 0.0 }
0x29c5   : > { %5567 = vadd.xlane.f32.xlu0 %v5566_v54 }
0x29db   : > { %5659 = vrot.lane.b32.xlu0 %v8076_v1, %s9633_s18 }
0x29df   : > { %5665 = vrot.lane.b32.xlu0 %v9334_v63, %s9633_s18 }
0x2a52   : > { %v5568_v9 = vpop.xlane.xlu0 %5567 }
0x2a53   : > { %v5569_v58 = vmul.f32 0.03125, %v5568_v9 }
0x2a55   : > { %v5570_v57 = vsub.f32 %v5565_v23, %v5569_v58 }
0x2a56   : > { %v5660_v60 = vpop.permute.xlu0 %5659 }
0x2a57   : > { %v5571_v52 = vmul.f32 %v5570_v57, %v5570_v57  ;;  %7808 = vmatpush3.bf16.msra.mxu0 %v5660_v60 }
0x2a58   : > { %7809 = vmatprep.subr.bf16.mxu0 %v8307_v3 }
0x2a59   : > { %v5572_v26 = vsel %vm1462_vm2, %v5571_v52, 0.0 }
0x2a5a   : > { %5573 = vadd.xlane.f32.xlu1 %v5572_v26  ;;  %v5666_v13 = vpop.permute.xlu0 %5665 }
0x2a6b   : > { %5661 = vrot.lane.b32.xlu1 %v8077_v56, %s9633_s18  ;;  %s9641_s18 = sld [smem:[#allocation35_spill]] }
0x2ae7   : > { %v5574_v55 = vpop.xlane.xlu1 %5573 }
0x2ae8   : > { %v5575_v0 = vmul.f32 0.03125, %v5574_v55 }
0x2aea   : > { %v5576_v62 = vadd.f32 1e-05, %v5575_v0 }
0x2aeb   : > { %v5662_v43 = vpop.permute.xlu1 %5661 }
0x2aec   : > { %8228 = vrsqrt.f32 %v5576_v62  ;;  %7810 = vmatpush3.bf16.msra.mxu0 %v5662_v43 }
0x2aed   : > { %7823 = vmatprep.subr.bf16.mxu0 %v8307_v3 }
0x2aef   : > { %7812 = vmatmul.mubr.msk.bf16.vlgmr.msra.gmra.mrb[116].mxu0 %vm1462_vm2, %v9080_v61 }
0x2af0   : > { %7825 = vmatprep.mubr.msk.bf16.mxu0 %vm8308_vm1, %v8307_v3 }
0x2af6   : > { %v8229_v51 = vpop.eup %8228 }
0x2af7   : > { %v5578_v19 = vmul.f32 %v8229_v51, %v5570_v57 }
0x2af9   : > { %v5583_v6 = vmul.f32 %v5582_v38, %v5578_v19 }
0x2afb   : > { %v9350_v7 = vadd.f32 %v5587_v5, %v5583_v6 }
0x2afd   : > { %v5596_v8 = vadd.f32 %v9229_v18, %v9350_v7 }
0x2aff   : > { %v5597_v61 = vpack.c.bf16 %v5596_v8, %v5596_v8 }
0x2b01   : > { %7804 = vmatmul.mubr.msk.bf16.vlgmr.msra.gmra.mrb[140].mxu1 %vm1462_vm2, %v5597_v61 }
0x2b02   : > { %7819 = vmatprep.mubr.msk.bf16.mxu1 %vm8308_vm1, %v8307_v3 }
0x2bc2   : > { %v5702_v22 = vpop.f32.mrb[116].mxu0 }
0x2bc3   : > { %v7813_v28 = vpop.f32.mrb[117].mxu0  ;;  %v5703_v24 = vadd.f32 %v5702_v22, %v5666_v13 }
0x2bc4   : > { %v5705_v59 = vpop.f32.mrb[118].mxu0 }
0x2bc5   : > { %v5706_v25 = vadd.f32 %v5705_v59, %v5666_v13  ;;  %v7814_v27 = vpop.f32.mrb[119].mxu0 }
0x2bc7   : > { %v5767_v29 = vpack.c.bf16 %v5706_v25, %v5703_v24 }
0x2bc9   : > { %5875 = vrot.lane.b32.xlu1 %v5767_v29, %s9623_s8  ;;  %v5773_v32 = vsel %vm1571_vm3, %v5767_v29, 0 }
0x2bca   : > { %7824 = vmatpush3.bf16.xpose.msra.mxu0 %v5773_v32 }
0x2bcb   : > { %7835 = vmatprep.subr.bf16.mxu0 %v8307_v3 }
0x2bcd   : > { %5985 = vrot.lane.b32.xlu1 %v5767_v29, %s9624_s9 }
0x2bd1   : > { %6094 = vrot.lane.b32.xlu1 %v5767_v29, %s9625_s14 }
0x2bd4   : > { %v5653_v18 = vpop.f32.mrb[140].mxu1 }
0x2bd5   : > { %v5654_v2 = vadd.f32 %v9334_v63, %v5653_v18  ;;  %v7805_v42 = vpop.f32.mrb[141].mxu1  ;;  %5709 = vrot.lane.b32.xlu1 %v8076_v1, %s9615_s5 }
0x2bd6   : > { %v5656_v33 = vpop.f32.mrb[142].mxu1 }
0x2bd7   : > { %v5766_v12 = vpack.c.bf16 %v5654_v2, %v5654_v2  ;;  %v7806_v34 = vpop.f32.mrb[143].mxu1 }
0x2bd9   : > { %5872 = vrot.lane.b32.xlu0 %v5766_v12, %s9623_s8  ;;  %7826 = vmatmul.mubr.msk.bf16.vlgmr.msra.gmra.mrb[120].mxu0 %vm1571_vm3, %v5766_v12 }
0x2bda   : > { %7837 = vmatprep.mubr.msk.bf16.mxu0 %vm8308_vm1, %v8307_v3 }
0x2bdd   : > { %5983 = vrot.lane.b32.xlu0 %v5766_v12, %s9624_s9 }
0x2be1   : > { %6092 = vrot.lane.b32.xlu0 %v5766_v12, %s9625_s14 }
0x2be5   : > { %5711 = vrot.lane.b32.xlu0 %v8077_v56, %s9615_s5 }
0x2c3b   : > { %v5876_v35 = vpop.permute.xlu1 %5875 }
0x2c3c   : > { %v5881_v37 = vsel %vm1571_vm3, %v5876_v35, 0 }
0x2c3d   : > { %7836 = vmatpush3.bf16.xpose.msra.mxu0 %v5881_v37 }
0x2c3e   : > { %7847 = vmatprep.subr.bf16.mxu0 %v8307_v3 }
0x2c3f   : > { %v5986_v39 = vpop.permute.xlu1 %5985 }
0x2c40   : > { %v5991_v44 = vsel %vm1571_vm3, %v5986_v39, 0 }
0x2c43   : > { %v6095_v16 = vpop.permute.xlu1 %6094 }
0x2c44   : > { %v6100_v46 = vsel %vm1571_vm3, %v6095_v16, 0 }
0x2c47   : > { %v5710_v41 = vpop.permute.xlu1 %5709 }
0x2c48   : > { %7816 = vmatpush3.bf16.msra.mxu1 %v5710_v41 }
0x2c49   : > { %7817 = vmatprep.subr.bf16.mxu1 %v8307_v3 }
0x2c4b   : > { %v5873_v30 = vpop.permute.xlu0 %5872 }
0x2c4c   : > { %7838 = vmatmul.mubr.msk.bf16.vlgmr.msra.gmra.mrb[124].mxu0 %vm1571_vm3, %v5873_v30 }
0x2c4d   : > { %7848 = vmatpush3.bf16.xpose.msra.mxu0 %v5991_v44  ;;  %7849 = vmatprep.mubr.msk.bf16.mxu0 %vm8308_vm1, %v8307_v3 }
0x2c4e   : > { %7859 = vmatprep.subr.bf16.mxu0 %v8307_v3 }
0x2c4f   : > { %v5984_v45 = vpop.permute.xlu0 %5983 }
0x2c53   : > { %v6093_v40 = vpop.permute.xlu0 %6092 }
0x2c54   : > { %7850 = vmatmul.mubr.msk.bf16.vlgmr.msra.gmra.mrb[128].mxu0 %vm1571_vm3, %v5984_v45 }
0x2c55   : > { %7860 = vmatpush3.bf16.xpose.msra.mxu0 %v6100_v46  ;;  %7861 = vmatprep.mubr.msk.bf16.mxu0 %vm8308_vm1, %v8307_v3 }
0x2c56   : > { %7871 = vmatprep.subr.bf16.mxu0 %v8307_v3 }
0x2c57   : > { %v5712_v47 = vpop.permute.xlu0 %5711 }
0x2c58   : > { %7818 = vmatpush3.bf16.msra.mxu1 %v5712_v47 }
0x2c59   : > { %7829 = vmatprep.subr.bf16.mxu1 %v8307_v3 }
0x2c5b   : > { %7820 = vmatmul.mubr.msk.bf16.vlgmr.msra.gmra.mrb[144].mxu1 %vm1462_vm2, %v9132_v31 }
0x2c5c   : > { %7862 = vmatmul.mubr.msk.bf16.vlgmr.msra.gmra.mrb[132].mxu0 %vm1571_vm3, %v6093_v40  ;;  %7831 = vmatprep.mubr.msk.bf16.mxu1 %vm8308_vm1, %v8307_v3 }
0x2c5d   : > { %7875 = vmatprep.mubr.msk.bf16.mxu0 %vm8308_vm1, %v8307_v3 }
0x2cac   : > { %v5809_v48 = vpop.f32.mrb[120].mxu0 }
0x2cad   : > { %v5815_v49 = vmul.f32 0.35355338, %v5809_v48  ;;  %v7827_v50 = vpop.f32.mrb[121].mxu0 }
0x2cae   : > { %v5812_v53 = vpop.f32.mrb[122].mxu0 }
0x2caf   : > { %v7828_v23 = vpop.f32.mrb[123].mxu0  ;;  %v5816_v36 = vsel %vm1621_vm4, %v5815_v49, -inf }
0x2cb0   : > { %5817 = vmax.xlane.f32.xlu1 %v5816_v36 }
0x2d1f   : > { %v5917_v54 = vpop.f32.mrb[124].mxu0 }
0x2d20   : > { %v5923_v1 = vmul.f32 0.35355338, %v5917_v54  ;;  %v7839_v56 = vpop.f32.mrb[125].mxu0 }
0x2d21   : > { %v5920_v31 = vpop.f32.mrb[126].mxu0 }
0x2d22   : > { %v7840_v9 = vpop.f32.mrb[127].mxu0  ;;  %v5924_v58 = vsel %vm1621_vm4, %v5923_v1, -inf }
0x2d23   : > { %5925 = vmax.xlane.f32.xlu0 %v5924_v58 }
0x2d27   : > { %v6027_v57 = vpop.f32.mrb[128].mxu0 }
0x2d28   : > { %v6033_v52 = vmul.f32 0.35355338, %v6027_v57  ;;  %v7851_v26 = vpop.f32.mrb[129].mxu0 }
0x2d29   : > { %v6030_v60 = vpop.f32.mrb[130].mxu0 }
0x2d2a   : > { %v7852_v55 = vpop.f32.mrb[131].mxu0  ;;  %v6034_v0 = vsel %vm1621_vm4, %v6033_v52, -inf }
0x2d2b   : > { %6035 = vmax.xlane.f32.xlu0 %v6034_v0 }
0x2d2e   : > { %v5752_v62 = vpop.f32.mrb[144].mxu1 }
0x2d2f   : > { %v7821_v43 = vpop.f32.mrb[145].mxu1  ;;  %v6136_v38 = vpop.f32.mrb[132].mxu0 }
0x2d30   : > { %v6142_v51 = vmul.f32 0.35355338, %v6136_v38  ;;  %v5755_v19 = vpop.f32.mrb[146].mxu1  ;;  %v7863_v5 = vpop.f32.mrb[133].mxu0 }
0x2d31   : > { %v7822_v6 = vpop.f32.mrb[147].mxu1  ;;  %v6139_v8 = vpop.f32.mrb[134].mxu0 }
0x2d32   : > { %v7864_v61 = vpop.f32.mrb[135].mxu0  ;;  %v6143_v13 = vsel %vm1621_vm4, %v6142_v51, -inf }
0x2d33   : > { %6144 = vmax.xlane.f32.xlu1 %v6143_v13  ;;  %v8079_v61 = vld [vmem:[%s9626_s17 + $0x18] sm:$0xff]  }
0x2d3d   : > { %v5818_v22 = vpop.xlane.xlu1 %5817 }
0x2d3e   : > { %v5819_v28 = vsub.f32 %v5815_v49, %v5818_v22 }
0x2d40   : > { %v5820_v59 = vmul.f32 1.442695, %v5819_v28 }
0x2d41   : > { %5715 = vrot.lane.b32.xlu0 %v9334_v63, %s9615_s5  ;;  %s9635_s5 = sld [smem:[#allocation30_spill]] }
0x2d42   : > { %8230 = vpow2.f32 %v5820_v59 }
0x2d4c   : > { %v8231_v24 = vpop.eup %8230 }
0x2d4d   : > { %v5822_v25 = vsel %vm1621_vm4, %v8231_v24, 0.0 }
0x2d4e   : > { %5823 = vadd.xlane.f32.xlu1 %v5822_v25 }
0x2db0   : > { %v5926_v27 = vpop.xlane.xlu0 %5925 }
0x2db1   : > { %v5927_v29 = vsub.f32 %v5923_v1, %v5926_v27 }
0x2db3   : > { %v5928_v32 = vmul.f32 1.442695, %v5927_v29 }
0x2db5   : > { %8232 = vpow2.f32 %v5928_v32 }
0x2db8   : > { %v6036_v18 = vpop.xlane.xlu0 %6035 }
0x2db9   : > { %v6037_v2 = vsub.f32 %v6033_v52, %v6036_v18 }
0x2dbb   : > { %v6038_v42 = vmul.f32 1.442695, %v6037_v2 }
0x2dbc   : > { %v5716_v33 = vpop.permute.xlu0 %5715 }
0x2dbd   : > { %8234 = vpow2.f32 %v6038_v42  ;;  %v5753_v12 = vadd.f32 %v5752_v62, %v5716_v33  ;;  %v5756_v34 = vadd.f32 %v5755_v19, %v5716_v33 }
0x2dbf   : > { %v8233_v35 = vpop.eup %8232  ;;  %v5768_v37 = vpack.c.bf16 %v5756_v34, %v5753_v12 }
0x2dc0   : > { %v6145_v39 = vpop.xlane.xlu1 %6144  ;;  %v5930_v63 = vsel %vm1621_vm4, %v8233_v35, 0.0 }
0x2dc1   : > { %v6146_v16 = vsub.f32 %v6142_v51, %v6145_v39  ;;  %5931 = vadd.xlane.f32.xlu1 %v5930_v63  ;;  %6046 = vrot.lane.b32.xlu0 %v5768_v37, %s9624_s9  ;;  %v8078_v51 = vld [vmem:[%s9626_s17 + $0x10] sm:$0xff]   ;;  %s9636_s9 = sld [smem:[#allocation29_spill]] }
0x2dc2   : > { %7830 = vmatpush3.bf16.msra.mxu1 %v5768_v37  ;;  %7872 = vmatpush3.bf16.msra.mxu0 %v8078_v51 }
0x2dc3   : > { %v6147_v41 = vmul.f32 1.442695, %v6146_v16  ;;  %7841 = vmatprep.subr.bf16.mxu1 %v8307_v3  ;;  %7873 = vmatprep.subr.bf16.mxu0 %v8307_v3 }
0x2dc5   : > { %8236 = vpow2.f32 %v6147_v41  ;;  %6155 = vrot.lane.b32.xlu0 %v5768_v37, %s9625_s14  ;;  %s9639_s14 = sld [smem:[#allocation31_spill]] }
0x2dc6   : > { %7874 = vmatpush3.bf16.msra.mxu0 %v8079_v61 }
0x2dc7   : > { %v8235_v30 = vpop.eup %8234  ;;  %7887 = vmatprep.subr.bf16.mxu0 %v8307_v3 }
0x2dc8   : > { %v6040_v44 = vsel %vm1621_vm4, %v8235_v30, 0.0 }
0x2dc9   : > { %6041 = vadd.xlane.f32.xlu1 %v6040_v44 }
0x2dcf   : > { %v8237_v45 = vpop.eup %8236 }
0x2dd0   : > { %v6149_v40 = vsel %vm1621_vm4, %v8237_v45, 0.0 }
0x2dd1   : > { %6150 = vadd.xlane.f32.xlu1 %v6149_v40 }
0x2ddb   : > { %v5824_v46 = vpop.xlane.xlu1 %5823 }
0x2ddc   : > { %8238 = vrcp.f32 %v5824_v46 }
0x2de2   : > { %5937 = vrot.lane.b32.xlu1 %v5768_v37, %s9623_s8  ;;  %s9638_s8 = sld [smem:[#allocation34_spill]] }
0x2de6   : > { %v8239_v47 = vpop.eup %8238 }
0x2de7   : > { %v5826_v48 = vmul.f32 %v8239_v47, %v8231_v24 }
0x2de9   : > { %v5827_v49 = vpack.c.bf16 %v5826_v48, %v5826_v48 }
0x2deb   : > { %7832 = vmatmul.mubr.msk.bf16.vlgmr.msra.gmra.mrb[148].mxu1 %vm1621_vm4, %v5827_v49  ;;  %v8080_v49 = vld [vmem:[%s9628_s20 + $0x10] sm:$0xff]  }
0x2dec   : > { %7843 = vmatprep.mubr.msk.bf16.mxu1 %vm8308_vm1, %v8307_v3 }
0x2e33   : > { %v6047_v9 = vpop.permute.xlu0 %6046 }
0x2e37   : > { %v6156_v26 = vpop.permute.xlu0 %6155 }
0x2e4e   : > { %v5932_v50 = vpop.xlane.xlu1 %5931 }
0x2e4f   : > { %8240 = vrcp.f32 %v5932_v50  ;;  %v8081_v50 = vld [vmem:[%s9628_s20 + $0x18] sm:$0xff]  }
0x2e56   : > { %v6042_v53 = vpop.xlane.xlu1 %6041 }
0x2e57   : > { %8242 = vrcp.f32 %v6042_v53  ;;  %v8083_v53 = vld [vmem:[%s9629_s21 + $0x28] sm:$0xff]  }
0x2e59   : > { %v8241_v23 = vpop.eup %8240 }
0x2e5a   : > { %v5934_v54 = vmul.f32 %v8241_v23, %v8233_v35  ;;  %v7106_v35 = vld [vmem:[%s9627_s19 + $0x1] ss:$0 sm:$0xff] }
0x2e5c   : > { %v5935_v56 = vpack.c.bf16 %v5934_v54, %v5934_v54 }
0x2e5e   : > { %v6151_v36 = vpop.xlane.xlu1 %6150 }
0x2e5f   : > { %8244 = vrcp.f32 %v6151_v36 }
0x2e61   : > { %v8243_v31 = vpop.eup %8242 }
0x2e62   : > { %v5938_v1 = vpop.permute.xlu1 %5937  ;;  %v6044_v58 = vmul.f32 %v8243_v31, %v8235_v30 }
0x2e63   : > { %7842 = vmatpush3.bf16.msra.mxu1 %v5938_v1  ;;  %v6295_v1 = vrot.slane %v9344_v4, %v8771_v10  ;;  %v7115_v10 = vld [vmem:[%s9630_s24 + $0x1] ss:$0 sm:$0xff] }
0x2e64   : > { %7853 = vmatprep.subr.bf16.mxu1 %v8307_v3  ;;  %v6045_v57 = vpack.c.bf16 %v6044_v58, %v6044_v58 }
0x2e66   : > { %7844 = vmatmul.mubr.msk.bf16.vlgmr.msra.gmra.mrb[152].mxu1 %vm1621_vm4, %v5935_v56 }
0x2e67   : > { %7854 = vmatpush3.bf16.msra.mxu1 %v6047_v9  ;;  %7855 = vmatprep.mubr.msk.bf16.mxu1 %vm8308_vm1, %v8307_v3  ;;  %v6300_v9 = vrot.slane %v9344_v4, %v8774_v11 }
0x2e68   : > { %7865 = vmatprep.subr.bf16.mxu1 %v8307_v3 }
0x2e69   : > { %v8245_v52 = vpop.eup %8244 }
0x2e6a   : > { %v6153_v60 = vmul.f32 %v8245_v52, %v8237_v45 }
0x2e6c   : > { %v6154_v55 = vpack.c.bf16 %v6153_v60, %v6153_v60  ;;  %v8085_v60 = vld [vmem:[%s9629_s21 + $0x38] sm:$0xff]  }
0x2e6e   : > { %7856 = vmatmul.mubr.msk.bf16.vlgmr.msra.gmra.mrb[156].mxu1 %vm1621_vm4, %v6045_v57 }
0x2e6f   : > { %7866 = vmatpush3.bf16.msra.mxu1 %v6156_v26  ;;  %7867 = vmatprep.mubr.msk.bf16.mxu1 %vm8308_vm1, %v8307_v3  ;;  %v8084_v26 = vld [vmem:[%s9629_s21 + $0x30] sm:$0xff]  }
0x2e70   : > { %7879 = vmatprep.subr.bf16.mxu1 %v8307_v3 }
0x2e76   : > { %7868 = vmatmul.mubr.msk.bf16.vlgmr.msra.gmra.mrb[160].mxu1 %vm1621_vm4, %v6154_v55 }
0x2e77   : > { %7883 = vmatprep.mubr.msk.bf16.mxu1 %vm8308_vm1, %v8307_v3  ;;  %7880 = vmatpush3.bf16.msra.mxu1 %v8080_v49 }
0x2e78   : > { %7881 = vmatprep.subr.bf16.mxu1 %v8307_v3 }
0x2e7b   : > { %7882 = vmatpush3.bf16.msra.mxu1 %v8081_v50 }
0x2e7c   : > { %7899 = vmatprep.subr.bf16.mxu1 %v8307_v3 }
0x2ebe   : > { %v5865_v0 = vpop.f32.mrb[148].mxu1 }
0x2ebf   : > { %v7833_v62 = vpop.f32.mrb[149].mxu1 }
0x2ec0   : > { %v5868_v43 = vpop.f32.mrb[150].mxu1 }
0x2ec1   : > { %v7834_v38 = vpop.f32.mrb[151].mxu1 }
0x2f39   : > { %v5977_v19 = vpop.f32.mrb[152].mxu1 }
0x2f3a   : > { %6202 = vrot.lane.b32.xlu0 %v5977_v19, %s9617_s10  ;;  %v7845_v5 = vpop.f32.mrb[153].mxu1  ;;  %v7128_v19 = vld [vmem:[%s9631_s25 + $0x1] ss:$0 sm:$0xff]  ;;  %s6909_s10 = sshll.u32 %s9643_s23, 3 }
0x2f3b   : > { %v5980_v6 = vpop.f32.mrb[154].mxu1  ;;  %s1191_s0 = scalar_lea.vmem %s8523_s12, %s6909_s10 }
0x2f3c   : > { %v7846_v8 = vpop.f32.mrb[155].mxu1 }
0x2f41   : > { %v6086_v13 = vpop.f32.mrb[156].mxu1 }
0x2f42   : > { %6206 = vrot.lane.b32.xlu0 %v6086_v13, %s9618_s11  ;;  %v7857_v22 = vpop.f32.mrb[157].mxu1  ;;  %s1187_s11 = scalar_lea.vmem %s8518_s13, %s6909_s10 }
0x2f43   : > { %v6089_v28 = vpop.f32.mrb[158].mxu1 }
0x2f44   : > { %v7858_v59 = vpop.f32.mrb[159].mxu1 }
0x2f49   : > { %v6195_v24 = vpop.f32.mrb[160].mxu1 }
0x2f4a   : > { %6210 = vrot.lane.b32.xlu1 %v6195_v24, %s9610_s28  ;;  %v7869_v25 = vpop.f32.mrb[161].mxu1  ;;  %s9640_s28 = sld [smem:[#allocation33_spill]] }
0x2f4b   : > { %v6198_v27 = vpop.f32.mrb[162].mxu1 }
0x2f4c   : > { %v7870_v29 = vpop.f32.mrb[163].mxu1 }
0x2fac   : > { %v6203_v32 = vpop.permute.xlu0 %6202 }
0x2fad   : > { %v6213_v2 = vsel %vm1571_vm3, %v5865_v0, %v6203_v32 }
0x2fb4   : > { %v6207_v18 = vpop.permute.xlu0 %6206 }
0x2fb5   : > { %v6214_v42 = vsel %vm1621_vm4, %v6213_v2, %v6207_v18 }
0x2fbc   : > { %v6211_v33 = vpop.permute.xlu1 %6210 }
0x2fbd   : > { %v6215_v12 = vsel %vm2087_vm5, %v6214_v42, %v6211_v33  ;;  %v6474_v42 = vrot.slane %v9344_v4, %v4904_v21  ;;  %v8086_v21 = vld [vmem:[%s9635_s5] sm:$0xff]  }
0x2fbe   : > { %v6216_v34 = vpack.c.bf16 %v6215_v12, %v6215_v12 }
0x2fc0   : > { %7876 = vmatmul.mubr.msk.bf16.vlgmr.msra.gmra.mrb[136].mxu0 %vm1462_vm2, %v6216_v34  ;;  %v6479_v34 = vrot.slane %v9344_v4, %v4909_v17 }
0x2fc1   : > { %7895 = vmatprep.mubr.msk.bf16.mxu0 %vm8308_vm1, %v8307_v3 }
0x3093   : > { %v6272_v37 = vpop.f32.mrb[136].mxu0 }
0x3094   : > { %v6273_v39 = vadd.f32 %v7106_v35, %v6272_v37  ;;  %v7877_v63 = vpop.f32.mrb[137].mxu0 }
0x3095   : > { %v6275_v16 = vpop.f32.mrb[138].mxu0 }
0x3096   : > { %v6278_v41 = vadd.f32 %v6273_v39, %v9350_v7  ;;  %v7878_v30 = vpop.f32.mrb[139].mxu0  ;;  %v8082_v7 = vld [vmem:[%s9629_s21 + $0x20] sm:$0xff]  }
0x3097   : > { %7888 = vmatpush3.bf16.msra.mxu0 %v8082_v7 }
0x3098   : > { %v6279_v44 = vsel %vm1462_vm2, %v6278_v41, 0.0  ;;  %7889 = vmatprep.subr.bf16.mxu0 %v8307_v3 }
0x3099   : > { %6280 = vadd.xlane.f32.xlu0 %v6279_v44 }
0x309b   : > { %7890 = vmatpush3.bf16.msra.mxu0 %v8083_v53  ;;  %v8088_v53 = vld [vmem:[%s9637_s3] sm:$0xff]  }
0x309c   : > { %7891 = vmatprep.subr.bf16.mxu0 %v8307_v3 }
0x309f   : > { %7892 = vmatpush3.bf16.msra.mxu0 %v8084_v26 }
0x30a0   : > { %7893 = vmatprep.subr.bf16.mxu0 %v8307_v3 }
0x30a3   : > { %7894 = vmatpush3.bf16.msra.mxu0 %v8085_v60 }
0x30a4   : > { %7915 = vmatprep.subr.bf16.mxu0 %v8307_v3 }
0x3126   : > { %v6281_v45 = vpop.xlane.xlu0 %6280 }
0x3127   : > { %v6282_v40 = vmul.f32 0.03125, %v6281_v45  ;;  %v8087_v45 = vld [vmem:[%s9635_s5 + $0x8] sm:$0xff]  }
0x3129   : > { %v6283_v46 = vsub.f32 %v6278_v41, %v6282_v40  ;;  %v6481_v40 = vld [vmem:[%s9636_s9] sm:$0x3] }
0x312a   : > { %v6503_v49 = vrot.slane %v6481_v40, %v8746_v20  ;;  %v8091_v20 = vld [vmem:[%s9638_s8 + $0x8] sm:$0xff]  }
0x312b   : > { %v6284_v47 = vmul.f32 %v6283_v46, %v6283_v46 }
0x312d   : > { %v6285_v48 = vsel %vm1462_vm2, %v6284_v47, 0.0 }
0x312e   : > { %6286 = vadd.xlane.f32.xlu1 %v6285_v48 }
0x31bb   : > { %v6287_v23 = vpop.xlane.xlu1 %6286 }
0x31bc   : > { %v6288_v36 = vmul.f32 0.03125, %v6287_v23 }
0x31be   : > { %v6289_v54 = vadd.f32 1e-05, %v6288_v36  ;;  %v8089_v36 = vld [vmem:[%s9637_s3 + $0x8] sm:$0xff]  }
0x31c0   : > { %8246 = vrsqrt.f32 %v6289_v54  ;;  %v7134_v54 = vld [vmem:[%s9639_s14] ss:$0 sm:$0xff] }
0x31ca   : > { %v8247_v56 = vpop.eup %8246 }
0x31cb   : > { %v6291_v31 = vmul.f32 %v8247_v56, %v6283_v46  ;;  %v6498_v46 = vrot.slane %v6481_v40, %v8738_v15  ;;  %v8090_v15 = vld [vmem:[%s9638_s8] sm:$0xff]  }
0x31cd   : > { %v6296_v58 = vmul.f32 %v6295_v1, %v6291_v31 }
0x31cf   : > { %v6301_v57 = vadd.f32 %v6300_v9, %v6296_v58 }
0x31d1   : > { %v6307_v52 = vpack.c.bf16 %v6301_v57, %v6301_v57 }
0x31d3   : > { %7884 = vmatmul.mubr.msk.bf16.vlgmr.msra.gmra.mrb[164].mxu1 %vm1462_vm2, %v6307_v52 }
0x31d4   : > { %7903 = vmatprep.mubr.msk.bf16.mxu1 %vm8308_vm1, %v8307_v3  ;;  %7900 = vmatpush3.bf16.msra.mxu1 %v8086_v21 }
0x31d5   : > { %7901 = vmatprep.subr.bf16.mxu1 %v8307_v3 }
0x31d8   : > { %7902 = vmatpush3.bf16.msra.mxu1 %v8087_v45 }
0x31d9   : > { %7907 = vmatprep.subr.bf16.mxu1 %v8307_v3 }
0x32a6   : > { %v6365_v55 = vpop.f32.mrb[164].mxu1 }
0x32a7   : > { %v6366_v11 = vadd.f32 %v7115_v10, %v6365_v55  ;;  %v7885_v0 = vpop.f32.mrb[165].mxu1 }
0x32a8   : > { %v6368_v62 = vpop.f32.mrb[166].mxu1 }
0x32a9   : > { %v6371_v43 = vmax.f32 %v6366_v11, 0.0  ;;  %v7886_v38 = vpop.f32.mrb[167].mxu1  ;;  %v8092_v62 = vld [vmem:[%s8508_s27] sm:$0xff]  }
0x32aa   : > { %v7142_v38 = vld [vmem:[%s9641_s18] ss:$0 sm:$0xff] }
0x32ab   : > { %v6381_v51 = vpack.c.bf16 %v6371_v43, %v6371_v43  ;;  %v8093_v43 = vld [vmem:[%s8508_s27 + $0x8] sm:$0xff]  }
0x32ad   : > { %7896 = vmatmul.mubr.msk.bf16.vlgmr.msra.gmra.mrb[140].mxu0 %vm1302_vm0, %v6381_v51 }
0x32ae   : > { %7919 = vmatprep.mubr.msk.bf16.mxu0 %vm8308_vm1, %v8307_v3  ;;  %7916 = vmatpush3.bf16.msra.mxu0 %v8090_v15 }
0x32af   : > { %7917 = vmatprep.subr.bf16.mxu0 %v8307_v3 }
0x32b2   : > { %7918 = vmatpush3.bf16.msra.mxu0 %v8091_v20 }
0x3380   : > { %v6451_v5 = vpop.f32.mrb[140].mxu0 }
0x3381   : > { %v6452_v6 = vadd.f32 %v7128_v19, %v6451_v5  ;;  %v7897_v8 = vpop.f32.mrb[141].mxu0 }
0x3382   : > { %v6454_v61 = vpop.f32.mrb[142].mxu0 }
0x3383   : > { %v6457_v13 = vadd.f32 %v6452_v6, %v6301_v57  ;;  %v7898_v22 = vpop.f32.mrb[143].mxu0  ;;  %v7138_v57 = vld [vmem:[%s9640_s28] ss:$0 sm:$0xff] }
0x3384   : > { %v7146_v22 = vld [vmem:[%s8513_s4] ss:$0 sm:$0xff] }
0x3385   : > { %v6458_v28 = vsel %vm1462_vm2, %v6457_v13, 0.0 }
0x3386   : > { %6459 = vadd.xlane.f32.xlu0 %v6458_v28 }
0x3413   : > { %v6460_v59 = vpop.xlane.xlu0 %6459 }
0x3414   : > { %v6461_v24 = vmul.f32 0.03125, %v6460_v59 }
0x3416   : > { %v6462_v25 = vsub.f32 %v6457_v13, %v6461_v24 }
0x3418   : > { %v6463_v27 = vmul.f32 %v6462_v25, %v6462_v25 }
0x341a   : > { %v6464_v29 = vsel %vm1462_vm2, %v6463_v27, 0.0 }
0x341b   : > { %6465 = vadd.xlane.f32.xlu0 %v6464_v29 }
0x34a8   : > { %v6466_v32 = vpop.xlane.xlu0 %6465 }
0x34a9   : > { %v6467_v18 = vmul.f32 0.03125, %v6466_v32 }
0x34ab   : > { %v6468_v2 = vadd.f32 1e-05, %v6467_v18 }
0x34ad   : > { %8248 = vrsqrt.f32 %v6468_v2 }
0x34b7   : > { %v8249_v33 = vpop.eup %8248 }
0x34b8   : > { %v6470_v12 = vmul.f32 %v8249_v33, %v6462_v25 }
0x34ba   : > { %v6475_v35 = vmul.f32 %v6474_v42, %v6470_v12 }
0x34bc   : > { %v6480_v37 = vadd.f32 %v6479_v34, %v6475_v35 }
0x34be   : > { %v6482_v39 = vsel %vm1462_vm2, %v6480_v37, 0.0 }
0x34bf   : > { %6483 = vadd.xlane.f32.xlu1 %v6482_v39 }
0x354c   : > { %v6484_v63 = vpop.xlane.xlu1 %6483 }
0x354d   : > { %v6485_v16 = vmul.f32 0.03125, %v6484_v63 }
0x354f   : > { %v6486_v41 = vsub.f32 %v6480_v37, %v6485_v16 }
0x3551   : > { %v6487_v30 = vmul.f32 %v6486_v41, %v6486_v41 }
0x3553   : > { %v6488_v44 = vsel %vm1462_vm2, %v6487_v30, 0.0 }
0x3554   : > { %6489 = vadd.xlane.f32.xlu0 %v6488_v44 }
0x35e1   : > { %v6490_v14 = vpop.xlane.xlu0 %6489 }
0x35e2   : > { %v6491_v17 = vmul.f32 0.03125, %v6490_v14 }
0x35e4   : > { %v6492_v4 = vadd.f32 1e-05, %v6491_v17 }
0x35e6   : > { %8250 = vrsqrt.f32 %v6492_v4 }
0x35f0   : > { %v8251_v47 = vpop.eup %8250 }
0x35f1   : > { %v6494_v48 = vmul.f32 %v8251_v47, %v6486_v41 }
0x35f3   : > { %v6499_v50 = vmul.f32 %v6498_v46, %v6494_v48 }
0x35f5   : > { %v6504_v7 = vadd.f32 %v6503_v49, %v6499_v50 }
0x35f7   : > { %v6509_v23 = vpack.c.bf16 %v6504_v7, %v6504_v7 }
0x35f9   : > { %7904 = vmatmul.mubr.msk.bf16.vlgmr.msra.gmra.mrb[168].mxu1 %vm1462_vm2, %v6509_v23 }
0x35fa   : > { %7908 = vmatpush3.bf16.msra.mxu1 %v8088_v53  ;;  %7911 = vmatprep.mubr.msk.bf16.mxu1 %vm8308_vm1, %v8307_v3 }
0x35fb   : > { %7909 = vmatprep.subr.bf16.mxu1 %v8307_v3 }
0x35fe   : > { %7910 = vmatpush3.bf16.msra.mxu1 %v8089_v36 }
0x35ff   : > { %7923 = vmatprep.subr.bf16.mxu1 %v8307_v3 }
0x3601   : > { %7912 = vmatmul.mubr.msk.bf16.vlgmr.msra.gmra.mrb[172].mxu1 %vm1462_vm2, %v6509_v23 }
0x3602   : > { %7927 = vmatprep.mubr.msk.bf16.mxu1 %vm8308_vm1, %v8307_v3  ;;  %7924 = vmatpush3.bf16.msra.mxu1 %v8092_v62 }
0x3603   : > { %7925 = vmatprep.subr.bf16.mxu1 %v8307_v3 }
0x3606   : > { %7926 = vmatpush3.bf16.msra.mxu1 %v8093_v43 }
0x36cc   : > { %v6566_v1 = vpop.f32.mrb[168].mxu1 }
0x36cd   : > { %v6567_v56 = vadd.f32 %v7134_v54, %v6566_v1  ;;  %v7905_v31 = vpop.f32.mrb[169].mxu1 }
0x36ce   : > { %v6569_v9 = vpop.f32.mrb[170].mxu1 }
0x36cf   : > { %6572 = vst [vmem:[%s1187_s11] sm:$0xff] %v6567_v56  ;;  %v7906_v58 = vpop.f32.mrb[171].mxu1 }
0x36d4   : > { %v6630_v52 = vpop.f32.mrb[172].mxu1 }
0x36d5   : > { %v6631_v26 = vadd.f32 %v7138_v57, %v6630_v52  ;;  %v7913_v60 = vpop.f32.mrb[173].mxu1 }
0x36d6   : > { %v6633_v10 = vpop.f32.mrb[174].mxu1 }
0x36d7   : > { %v6636_v55 = vmax.f32 %v6631_v26, 0.0  ;;  %v7914_v11 = vpop.f32.mrb[175].mxu1 }
0x36d9   : > { %v6641_v0 = vpack.c.bf16 %v6636_v55, %v6636_v55 }
0x36db   : > { %7920 = vmatmul.mubr.msk.bf16.vlgmr.msra.gmra.mrb[144].mxu0 %vm1462_vm2, %v6641_v0 }
0x37ae   : > { %v6698_v51 = vpop.f32.mrb[144].mxu0 }
0x37af   : > { %v6699_v19 = vadd.f32 %v7142_v38, %v6698_v51  ;;  %v7921_v5 = vpop.f32.mrb[145].mxu0 }
0x37b0   : > { %v6701_v6 = vpop.f32.mrb[146].mxu0 }
0x37b1   : > { %v6704_v8 = vmax.f32 %v6699_v19, 0.0  ;;  %v7922_v61 = vpop.f32.mrb[147].mxu0 }
0x37b3   : > { %v6709_v13 = vpack.c.bf16 %v6704_v8, %v6704_v8 }
0x37b5   : > { %7928 = vmatmul.mubr.msk.bf16.vlgmr.msra.gmra.mrb[176].mxu1 %vm1462_vm2, %v6709_v13 }
0x3888   : > { %v6766_v28 = vpop.f32.mrb[176].mxu1 }
0x3889   : > { %v6767_v59 = vadd.f32 %v7146_v22, %v6766_v28  ;;  %v7929_v24 = vpop.f32.mrb[177].mxu1 }
0x388a   : > { %v6769_v25 = vpop.f32.mrb[178].mxu1 }
0x388b   : > { %v7150_v3 = vmul.f32 -1.442695, %v6767_v59  ;;  %v7930_v27 = vpop.f32.mrb[179].mxu1 }
0x388d   : > { %8252 = vpow2.f32 %v7150_v3 }
0x3897   : > { %v8253_v29 = vpop.eup %8252 }
0x3898   : > { %v6775_v32 = vadd.f32 1.0, %v8253_v29 }
0x389a   : > { %8254 = vrcp.f32 %v6775_v32 }
0x38a4   : > { %v8255_v18 = vpop.eup %8254 }
0x38a5   : > { %6778 = vst [vmem:[%s1191_s0] sm:$0xff] %v8255_v18 }
0x38a6 PF: > { %s90_s22 = sadd.s32 1, %s8265_s22  }
0x38a7   : > { %p87_p4 = scmp.ge.s32.totalorder %s90_s22, 4  }
0x38a9   :  { %89 = sbr.rel (!%p87_p4) target bundleno = 85 (0x55), region = 275 }

</bundles_post_ra>
